<compile_context>
chip_gen: v7x
topology: tpu7x:2x2x1
jax: 0.10.0
libtpu: 0.0.40
codegen_flags: <defaults>
</compile_context>

<pallas_src>
import functools
import math

import jax
import jax.numpy as jnp
from jax import lax
from jax.experimental import pallas as pl
from jax.experimental.pallas import tpu as pltpu


def _gqa_flash_kernel(q_ref, k_ref, v_ref, o_ref, m_ref, l_ref, acc_ref, *,
                      group, block_q):
    """One (batch, kv-head, q-tile) tile; grid axis 3 streams KV tiles.

    The `group` query heads sharing this KV head are stacked into the M
    dimension of both matmuls (M = group*block_q), so every K/V tile is DMA'd
    once per q-tile instead of once per q-head per q-tile.
    """
    ki = pl.program_id(3)
    hd = q_ref.shape[-1]
    block_k = k_ref.shape[-2]

    @pl.when(ki == 0)
    def _init():
        m_ref[...] = jnp.full_like(m_ref, -jnp.inf)
        l_ref[...] = jnp.zeros_like(l_ref)
        acc_ref[...] = jnp.zeros_like(acc_ref)

    # (group, block_q, hd) -> (group*block_q, hd): merges two major dims with
    # block_q % 8 == 0 and hd == 128, i.e. a layout-free reshape.
    q = q_ref[0].reshape(group * block_q, hd)          # (M, hd), compute dtype
    k = k_ref[0, 0]                                    # (block_k, hd)
    v = v_ref[0, 0]                                    # (block_k, hd)

    # QK^T on the MXU, contracting the last dims directly (no explicit k.T).
    s = lax.dot_general(q, k, (((1,), (1,)), ((), ())),
                        preferred_element_type=jnp.float32)   # (M, block_k) f32

    # Online (streaming) softmax update; all stats in f32.
    m_prev = m_ref[...]                                       # (M, 1)
    m_new = jnp.maximum(m_prev, jnp.max(s, axis=-1, keepdims=True))
    alpha = jnp.exp(m_prev - m_new)
    p = jnp.exp(s - m_new)                                    # (M, block_k) f32
    p_c = p.astype(v.dtype)                                   # bf16 for the MXU

    # Row-sum of P on the MXU (P @ ones) instead of a cross-lane XLU reduce;
    # only the max reduction above has to stay on the XLU.
    ones_col = jnp.ones((block_k, 1), dtype=p_c.dtype)
    row_sum = lax.dot_general(p_c, ones_col, (((1,), (0,)), ((), ())),
                              preferred_element_type=jnp.float32)   # (M, 1)

    l_ref[...] = alpha * l_ref[...] + row_sum
    acc_ref[...] = alpha * acc_ref[...] + lax.dot_general(
        p_c, v, (((1,), (0,)), ((), ())),
        preferred_element_type=jnp.float32)                   # (M, hd) f32
    m_ref[...] = m_new

    @pl.when(ki == pl.num_programs(3) - 1)
    def _finalize():
        # Exact reciprocal: runs once per q-tile, so approx buys nothing and
        # only loosens numerics.
        inv_l = pl.reciprocal(l_ref[...], approx=False)
        out = (acc_ref[...] * inv_l).astype(o_ref.dtype)
        o_ref[0] = out.reshape(group, block_q, hd)


def gqa_attention(q, k, v, *, block_q=256, block_k=256,
                  compute_dtype=jnp.bfloat16):
    """q: (B, Hq, S, hd); k, v: (B, Hkv, S, hd) -> (B, Hq, S, hd) in q.dtype."""
    B, Hq, S, hd = q.shape
    Hkv = k.shape[1]
    assert Hq % Hkv == 0, "query heads must be a multiple of kv heads"
    group = Hq // Hkv

    block_q = min(block_q, S)
    block_k = min(block_k, S)
    assert S % block_q == 0 and S % block_k == 0, "S must divide the tile sizes"
    # TODO(synk): no padding/masking path for S not divisible by the tiles.
    nq, nk = S // block_q, S // block_k

    out_dtype = q.dtype
    scale = 1.0 / math.sqrt(hd)
    # Pre-scale Q in f32 BEFORE the bf16 cast (O(S*hd) work, avoids an extra
    # rounding step and O(S*S) score scaling on the VALU).
    q = q * jnp.asarray(scale, dtype=q.dtype)
    if compute_dtype is not None:
        q = q.astype(compute_dtype)
        k = k.astype(compute_dtype)
        v = v.astype(compute_dtype)

    kernel = functools.partial(_gqa_flash_kernel, group=group, block_q=block_q)

    # Advisory cost: Q read once, O written once, K/V each re-streamed once
    # per q-tile (shared across the grouped q-heads).
    bytes_accessed = (
        q.size * jnp.dtype(q.dtype).itemsize
        + (k.size + v.size) * jnp.dtype(k.dtype).itemsize * nq
        + B * Hq * S * hd * jnp.dtype(out_dtype).itemsize)
    cost = pl.CostEstimate(
        flops=4 * B * Hq * S * S * hd,            # QK^T + PV
        transcendentals=B * Hq * S * S,           # exp
        bytes_accessed=int(bytes_accessed))

    grid_spec = pltpu.PrefetchScalarGridSpec(
        num_scalar_prefetch=0,
        grid=(B, Hkv, nq, nk),
        in_specs=[
            # Q: all `group` q-heads of this KV head, one q-tile; resident
            # across the KV axis (block index independent of ki).
            pl.BlockSpec((1, group, block_q, hd),
                         lambda b, hk, qi, ki: (b, hk, qi, 0)),
            pl.BlockSpec((1, 1, block_k, hd),
                         lambda b, hk, qi, ki: (b, hk, ki, 0)),
            pl.BlockSpec((1, 1, block_k, hd),
                         lambda b, hk, qi, ki: (b, hk, ki, 0)),
        ],
        out_specs=pl.BlockSpec((1, group, block_q, hd),
                               lambda b, hk, qi, ki: (b, hk, qi, 0)),
        scratch_shapes=[
            pltpu.VMEM((group * block_q, 1), jnp.float32),    # running max m
            pltpu.VMEM((group * block_q, 1), jnp.float32),    # running denom l
            pltpu.VMEM((group * block_q, hd), jnp.float32),   # out accumulator
        ],
    )

    return pl.pallas_call(
        kernel,
        out_shape=jax.ShapeDtypeStruct((B, Hq, S, hd), out_dtype),
        grid_spec=grid_spec,
        compiler_params=pltpu.CompilerParams(
            # B / kv-head / q-tile axes parallel (megacore sharding on v7x),
            # KV reduction axis last and arbitrary (scratch carries across it).
            dimension_semantics=("parallel", "parallel", "parallel",
                                 "arbitrary"),
            # Comfortably within v7x's 64 MiB VMEM per TensorCore.
            vmem_limit_bytes=32 * 1024 * 1024,
        ),
        cost_estimate=cost,
    )(q, k, v)


def init_params(key, d_model, num_q_heads, num_kv_heads, head_dim):
    """Deterministic synthetic parameter init (no checkpoint load)."""
    ks = jax.random.split(key, 4)
    s = 1.0 / math.sqrt(d_model)
    return {
        "wq": jax.random.normal(ks[0], (d_model, num_q_heads * head_dim), jnp.float32) * s,
        "wk": jax.random.normal(ks[1], (d_model, num_kv_heads * head_dim), jnp.float32) * s,
        "wv": jax.random.normal(ks[2], (d_model, num_kv_heads * head_dim), jnp.float32) * s,
        "wo": jax.random.normal(ks[3], (num_q_heads * head_dim, d_model), jnp.float32) * s,
        "num_q_heads": num_q_heads,
        "num_kv_heads": num_kv_heads,
        "head_dim": head_dim,
    }


def grouped_query_attention_block_forward(x, params, *, block_q=256,
                                          block_k=256,
                                          compute_dtype=jnp.bfloat16):
    """x: (B, S, D) -> (B, S, D).

    Projections are plain-JAX glue; they emit Q/K/V directly in head-major
    (B, H, S, hd) layout and consume the attention output head-major, so no
    explicit HBM transposes surround the Pallas kernel.
    """
    B, S, D = x.shape
    hq, hkv, hd = params["num_q_heads"], params["num_kv_heads"], params["head_dim"]

    wq = params["wq"].reshape(D, hq, hd)
    wk = params["wk"].reshape(D, hkv, hd)
    wv = params["wv"].reshape(D, hkv, hd)
    wo = params["wo"].reshape(hq, hd, D)

    q = jnp.einsum("bsd,dhk->bhsk", x, wq)    # (B, Hq, S, hd)
    k = jnp.einsum("bsd,dhk->bhsk", x, wk)    # (B, Hkv, S, hd)
    v = jnp.einsum("bsd,dhk->bhsk", x, wv)    # (B, Hkv, S, hd)

    attn = gqa_attention(q, k, v, block_q=block_q, block_k=block_k,
                         compute_dtype=compute_dtype)   # (B, Hq, S, hd)

    return jnp.einsum("bhsk,hkd->bsd", attn, wo)


def _reference_forward(x, params):
    """Pure-jnp f32 reference for correctness checking."""
    B, S, D = x.shape
    hq, hkv, hd = params["num_q_heads"], params["num_kv_heads"], params["head_dim"]
    group = hq // hkv
    q = (x @ params["wq"]).reshape(B, S, hq, hd).transpose(0, 2, 1, 3)
    k = (x @ params["wk"]).reshape(B, S, hkv, hd).transpose(0, 2, 1, 3)
    v = (x @ params["wv"]).reshape(B, S, hkv, hd).transpose(0, 2, 1, 3)
    k = jnp.repeat(k, group, axis=1)
    v = jnp.repeat(v, group, axis=1)
    s = jnp.einsum("bhqd,bhkd->bhqk", q, k) / math.sqrt(hd)
    p = jax.nn.softmax(s, axis=-1)
    o = jnp.einsum("bhqk,bhkd->bhqd", p, v)
    o = o.transpose(0, 2, 1, 3).reshape(B, S, hq * hd)
    return o @ params["wo"]


if __name__ == "__main__":
    # Small but layout-realistic shapes: hd=128 (lane-dense), group=2 q-heads
    # per kv-head (exercises the group-folded M dimension), two q-tiles and
    # two kv-tiles per (batch, kv-head) so the online-softmax accumulation
    # path is actually exercised.
    B, S, D = 2, 512, 128
    num_q_heads, num_kv_heads, head_dim = 4, 2, 128

    key = jax.random.PRNGKey(0)
    kx, kp = jax.random.split(key)
    x = jax.random.normal(kx, (B, S, D), jnp.float32)
    params = init_params(kp, D, num_q_heads, num_kv_heads, head_dim)

    out = grouped_query_attention_block_forward(x, params, block_q=256,
                                                block_k=256)
    out = jax.block_until_ready(out)

    ref = _reference_forward(x, params)
    assert out.shape == (B, S, D)
    # Tolerance covers the bf16 MXU operands (Q/K/V/P) vs the f32 reference.
    assert jnp.allclose(out, ref, atol=2e-2, rtol=2e-2), float(
        jnp.max(jnp.abs(out - ref)))

    print("KERNEL_OK")
</pallas_src>

<mosaic_0001>
module attributes {stable_mosaic.version = 11 : i64} {
  func.func @_gqa_flash_kernel(%arg0: i32, %arg1: i32, %arg2: i32, %arg3: i32, %arg4: memref<1x2x256x128xbf16, #tpu.memory_space<vmem>>, %arg5: memref<1x1x256x128xbf16, #tpu.memory_space<vmem>>, %arg6: memref<1x1x256x128xbf16, #tpu.memory_space<vmem>>, %arg7: memref<1x2x256x128xf32, #tpu.memory_space<vmem>>, %arg8: memref<512x1xf32, #tpu.memory_space<vmem>>, %arg9: memref<512x1xf32, #tpu.memory_space<vmem>>, %arg10: memref<512x128xf32, #tpu.memory_space<vmem>>) attributes {dimension_semantics = [#tpu.dimension_semantics<parallel>, #tpu.dimension_semantics<parallel>, #tpu.dimension_semantics<parallel>, #tpu.dimension_semantics<arbitrary>], iteration_bounds = array<i64: 2, 2, 2, 2>, scalar_prefetch = 0 : i64, scratch_operands = 3 : i64, tpu.core_type = #tpu.core_type<tc>, window_params = [{transform_indices = @transform_0, window_bounds = array<i64: 1, 2, 256, 128>}, {transform_indices = @transform_1, window_bounds = array<i64: 1, 1, 256, 128>}, {transform_indices = @transform_2, window_bounds = array<i64: 1, 1, 256, 128>}, {transform_indices = @transform_3, window_bounds = array<i64: 1, 2, 256, 128>}]} {
    %c0_i32 = arith.constant 0 : i32
    %0 = arith.cmpi eq, %arg3, %c0_i32 : i32
    %1 = arith.extui %0 : i1 to i32
    %c0_i32_0 = arith.constant 0 : i32
    %2 = arith.cmpi ne, %1, %c0_i32_0 : i32
    scf.if %2 {
      %cst_29 = arith.constant 0xFF800000 : f32
      %37 = vector.broadcast %cst_29 : f32 to vector<512x1xf32>
      %c0_30 = arith.constant 0 : index
      %c0_31 = arith.constant 0 : index
      %38 = vector.load %arg8[%c0_30, %c0_31] : memref<512x1xf32, #tpu.memory_space<vmem>>, vector<512x1xf32>
      tpu.vector_store %arg8[%c0_30, %c0_31], %37 {strides = array<i32>} : memref<512x1xf32, #tpu.memory_space<vmem>>, vector<512x1xf32>,
      %cst_32 = arith.constant 0.000000e+00 : f32
      %39 = vector.broadcast %cst_32 : f32 to vector<512x1xf32>
      %c0_33 = arith.constant 0 : index
      %c0_34 = arith.constant 0 : index
      %40 = vector.load %arg9[%c0_33, %c0_34] : memref<512x1xf32, #tpu.memory_space<vmem>>, vector<512x1xf32>
      tpu.vector_store %arg9[%c0_33, %c0_34], %39 {strides = array<i32>} : memref<512x1xf32, #tpu.memory_space<vmem>>, vector<512x1xf32>,
      %cst_35 = arith.constant 0.000000e+00 : f32
      %41 = vector.broadcast %cst_35 : f32 to vector<512x128xf32>
      %c0_36 = arith.constant 0 : index
      %c0_37 = arith.constant 0 : index
      %42 = vector.load %arg10[%c0_36, %c0_37] : memref<512x128xf32, #tpu.memory_space<vmem>>, vector<512x128xf32>
      tpu.vector_store %arg10[%c0_36, %c0_37], %41 {strides = array<i32>} : memref<512x128xf32, #tpu.memory_space<vmem>>, vector<512x128xf32>,
    } else {
    }
    %c0 = arith.constant 0 : index
    %c0_1 = arith.constant 0 : index
    %c0_2 = arith.constant 0 : index
    %c0_3 = arith.constant 0 : index
    %3 = vector.load %arg4[%c0, %c0_1, %c0_2, %c0_3] : memref<1x2x256x128xbf16, #tpu.memory_space<vmem>>, vector<1x2x256x128xbf16>
    %4 = vector.shape_cast %3 : vector<1x2x256x128xbf16> to vector<2x256x128xbf16>
    %5 = vector.shape_cast %4 : vector<2x256x128xbf16> to vector<512x128xbf16>
    %c0_4 = arith.constant 0 : index
    %c0_5 = arith.constant 0 : index
    %c0_6 = arith.constant 0 : index
    %c0_7 = arith.constant 0 : index
    %6 = vector.load %arg5[%c0_4, %c0_5, %c0_6, %c0_7] : memref<1x1x256x128xbf16, #tpu.memory_space<vmem>>, vector<1x1x256x128xbf16>
    %7 = vector.shape_cast %6 : vector<1x1x256x128xbf16> to vector<256x128xbf16>
    %c0_8 = arith.constant 0 : index
    %c0_9 = arith.constant 0 : index
    %c0_10 = arith.constant 0 : index
    %c0_11 = arith.constant 0 : index
    %8 = vector.load %arg6[%c0_8, %c0_9, %c0_10, %c0_11] : memref<1x1x256x128xbf16, #tpu.memory_space<vmem>>, vector<1x1x256x128xbf16>
    %9 = vector.shape_cast %8 : vector<1x1x256x128xbf16> to vector<256x128xbf16>
    %cst = arith.constant dense<0.000000e+00> : vector<512x256xf32>
    %10 = tpu.matmul %5, %7, %cst {dimension_numbers = #tpu.dot_dimension_numbers<[1], [1], [0], [0], [0, 0, 1, 0], [], []>} : vector<512x128xbf16>, vector<256x128xbf16>, vector<512x256xf32> -> vector<512x256xf32>
    %c0_12 = arith.constant 0 : index
    %c0_13 = arith.constant 0 : index
    %11 = vector.load %arg8[%c0_12, %c0_13] : memref<512x1xf32, #tpu.memory_space<vmem>>, vector<512x1xf32>
    %cst_14 = arith.constant dense<0xFF800000> : vector<512xf32>
    %12 = vector.multi_reduction <maximumf>, %10, %cst_14 [1] : vector<512x256xf32> to vector<512xf32>
    %13 = vector.shape_cast %12 : vector<512xf32> to vector<512x1xf32>
    %14 = arith.maximumf %11, %13 : vector<512x1xf32>
    %15 = arith.subf %11, %14 : vector<512x1xf32>
    %16 = math.exp %15 : vector<512x1xf32>
    %17 = vector.broadcast %14 : vector<512x1xf32> to vector<512x256xf32>
    %18 = arith.subf %10, %17 : vector<512x256xf32>
    %19 = math.exp %18 : vector<512x256xf32>
    %20 = arith.truncf %19 : vector<512x256xf32> to vector<512x256xbf16>
    %cst_15 = arith.constant 1.000000e+00 : bf16
    %21 = vector.broadcast %cst_15 : bf16 to vector<256x1xbf16>
    %cst_16 = arith.constant dense<0.000000e+00> : vector<512x1xf32>
    %22 = tpu.matmul %20, %21, %cst_16 {dimension_numbers = #tpu.dot_dimension_numbers<[1], [0], [0], [1], [0, 0, 1, 1], [], []>} : vector<512x256xbf16>, vector<256x1xbf16>, vector<512x1xf32> -> vector<512x1xf32>
    %c0_17 = arith.constant 0 : index
    %c0_18 = arith.constant 0 : index
    %23 = vector.load %arg9[%c0_17, %c0_18] : memref<512x1xf32, #tpu.memory_space<vmem>>, vector<512x1xf32>
    %24 = arith.mulf %16, %23 : vector<512x1xf32>
    %25 = arith.addf %24, %22 : vector<512x1xf32>
    %c0_19 = arith.constant 0 : index
    %c0_20 = arith.constant 0 : index
    %26 = vector.load %arg9[%c0_19, %c0_20] : memref<512x1xf32, #tpu.memory_space<vmem>>, vector<512x1xf32>
    tpu.vector_store %arg9[%c0_19, %c0_20], %25 {strides = array<i32>} : memref<512x1xf32, #tpu.memory_space<vmem>>, vector<512x1xf32>,
    %c0_21 = arith.constant 0 : index
    %c0_22 = arith.constant 0 : index
    %27 = vector.load %arg10[%c0_21, %c0_22] : memref<512x128xf32, #tpu.memory_space<vmem>>, vector<512x128xf32>
    %28 = vector.broadcast %16 : vector<512x1xf32> to vector<512x128xf32>
    %29 = arith.mulf %28, %27 : vector<512x128xf32>
    %cst_23 = arith.constant dense<0.000000e+00> : vector<512x128xf32>
    %30 = tpu.matmul %20, %9, %cst_23 {dimension_numbers = #tpu.dot_dimension_numbers<[1], [0], [0], [1], [0, 0, 1, 1], [], []>} : vector<512x256xbf16>, vector<256x128xbf16>, vector<512x128xf32> -> vector<512x128xf32>
    %31 = arith.addf %29, %30 : vector<512x128xf32>
    %c0_24 = arith.constant 0 : index
    %c0_25 = arith.constant 0 : index
    %32 = vector.load %arg10[%c0_24, %c0_25] : memref<512x128xf32, #tpu.memory_space<vmem>>, vector<512x128xf32>
    tpu.vector_store %arg10[%c0_24, %c0_25], %31 {strides = array<i32>} : memref<512x128xf32, #tpu.memory_space<vmem>>, vector<512x128xf32>,
    %c0_26 = arith.constant 0 : index
    %c0_27 = arith.constant 0 : index
    %33 = vector.load %arg8[%c0_26, %c0_27] : memref<512x1xf32, #tpu.memory_space<vmem>>, vector<512x1xf32>
    tpu.vector_store %arg8[%c0_26, %c0_27], %14 {strides = array<i32>} : memref<512x1xf32, #tpu.memory_space<vmem>>, vector<512x1xf32>,
    %c1_i32 = arith.constant 1 : i32
    %34 = arith.cmpi eq, %arg3, %c1_i32 : i32
    %35 = arith.extui %34 : i1 to i32
    %c0_i32_28 = arith.constant 0 : i32
    %36 = arith.cmpi ne, %35, %c0_i32_28 : i32
    scf.if %36 {
      %c0_29 = arith.constant 0 : index
      %c0_30 = arith.constant 0 : index
      %37 = vector.load %arg9[%c0_29, %c0_30] : memref<512x1xf32, #tpu.memory_space<vmem>>, vector<512x1xf32>
      %38 = tpu.reciprocal %37 : vector<512x1xf32> -> vector<512x1xf32>
      %c0_31 = arith.constant 0 : index
      %c0_32 = arith.constant 0 : index
      %39 = vector.load %arg10[%c0_31, %c0_32] : memref<512x128xf32, #tpu.memory_space<vmem>>, vector<512x128xf32>
      %40 = vector.broadcast %38 : vector<512x1xf32> to vector<512x128xf32>
      %41 = arith.mulf %39, %40 : vector<512x128xf32>
      %42 = vector.shape_cast %41 : vector<512x128xf32> to vector<2x256x128xf32>
      %c0_33 = arith.constant 0 : index
      %c0_34 = arith.constant 0 : index
      %c0_35 = arith.constant 0 : index
      %c0_36 = arith.constant 0 : index
      %43 = vector.load %arg7[%c0_33, %c0_34, %c0_35, %c0_36] : memref<1x2x256x128xf32, #tpu.memory_space<vmem>>, vector<1x2x256x128xf32>
      %44 = vector.shape_cast %43 : vector<1x2x256x128xf32> to vector<2x256x128xf32>
      %45 = vector.shape_cast %42 : vector<2x256x128xf32> to vector<1x2x256x128xf32>
      tpu.vector_store %arg7[%c0_33, %c0_34, %c0_35, %c0_36], %45 {strides = array<i32>} : memref<1x2x256x128xf32, #tpu.memory_space<vmem>>, vector<1x2x256x128xf32>,
    } else {
    }
    return
  }
  func.func @transform_0(%arg0: i32, %arg1: i32, %arg2: i32, %arg3: i32) -> (i32, i32, i32, i32) {
    %c0_i32 = arith.constant 0 : i32
    %c0_i32_0 = arith.constant 0 : i32
    return %arg0, %arg1, %arg2, %c0_i32 : i32, i32, i32, i32
  }
  func.func @transform_1(%arg0: i32, %arg1: i32, %arg2: i32, %arg3: i32) -> (i32, i32, i32, i32) {
    %c0_i32 = arith.constant 0 : i32
    %c0_i32_0 = arith.constant 0 : i32
    return %arg0, %arg1, %arg3, %c0_i32 : i32, i32, i32, i32
  }
  func.func @transform_2(%arg0: i32, %arg1: i32, %arg2: i32, %arg3: i32) -> (i32, i32, i32, i32) {
    %c0_i32 = arith.constant 0 : i32
    %c0_i32_0 = arith.constant 0 : i32
    return %arg0, %arg1, %arg3, %c0_i32 : i32, i32, i32, i32
  }
  func.func @transform_3(%arg0: i32, %arg1: i32, %arg2: i32, %arg3: i32) -> (i32, i32, i32, i32) {
    %c0_i32 = arith.constant 0 : i32
    %c0_i32_0 = arith.constant 0 : i32
    return %arg0, %arg1, %arg2, %c0_i32 : i32, i32, i32, i32
  }
}

</mosaic_0001>

<bundles_post_ra>
// kernel: tpu_custom_call.1
= control target key start
LH: loop header
LB: loop body
LE: loop exit
PB: predicated region body
PF: predicated region fallthrough
CT: control target
= control target key end

     0   :  { %s8904_s0 = inlined_call_operand.hbm [shape: bf16[2,4,512,128], index: 0, kind: input, shape index: {}]   ;;  %s8905_s1 = inlined_call_operand.hbm [shape: bf16[2,2,512,128], index: 1, kind: input, shape index: {}]   ;;  %s8906_s2 = inlined_call_operand.hbm [shape: bf16[2,2,512,128], index: 2, kind: input, shape index: {}]   ;;  %s8907_s3 = inlined_call_operand.hbm [shape: f32[2,4,512,128], index: 3, kind: output, shape index: {}]  }
   0x1   :  { %9167 = sst [smem:[#allocation232_spill]] %s8907_s3 }
   0x2   :  { %8 = vsyncpa [#allocation6], 0 }
   0x3   :  { %10 = vsyncpa [#allocation6 + $0x1], 0 }
   0x4   :  { %11 = vsyncpa [#allocation9], 0 }
   0x5   :  { %13 = vsyncpa [#allocation9 + $0x1], 0 }
   0x6   :  { %14 = vsyncpa [#allocation7], 0 }
   0x7   :  { %16 = vsyncpa [#allocation7 + $0x1], 0  ;;  %s6197_s12 = smov 0   ;;  %s6199_s13 = smov 0  }
   0x8   :  { %s6201_s14 = smov 0   ;;  %s6203_s15 = smov 0  }
   0x9   :  { %s6205_s16 = smov 0   ;;  %s6207_s17 = smov 0  }
   0xa   :  { %s6209_s18 = smov 0   ;;  %s6211_s19 = smov 0  }
   0xb   :  { %s6213_s20 = smov 0   ;;  %s6215_s21 = smov 0  }
   0xc   :  { %s6217_s22 = smov 0   ;;  %s6219_s23 = smov 0  }
   0xd   :  { %s6221_s24 = smov 0   ;;  %s6223_s25 = smov 0  }
   0xe   :  { %s6225_s26 = smov 0  }
   0xf LB: > { %9168 = sst [smem:[#allocation20_spill]] %s6117_s17  ;;  %s6273_s27 = sadd.s32 4294967295, %s6153_s26   ;;  %s6153_s26 = sphi %s6225_s26, %s22_s26   ;;  %s6149_s25 = sphi %s6223_s25, %s9737_s25   ;;  %s6145_s24 = sphi %s6221_s24, %s9736_s24   ;;  %s6141_s23 = sphi %s6219_s23, %s9735_s23   ;;  %s6137_s22 = sphi %s6217_s22, %s9734_s22   ;;  %s6133_s21 = sphi %s6215_s21, %s9733_s21   ;;  %s6129_s20 = sphi %s6213_s20, %s9732_s20   ;;  %s6125_s19 = sphi %s6211_s19, %s9721_s19   ;;  %s6121_s18 = sphi %s6209_s18, %s9731_s18   ;;  %s6117_s17 = sphi %s6207_s17, %s9720_s17   ;;  %s6113_s16 = sphi %s6205_s16, %s9730_s16   ;;  %s6109_s15 = sphi %s6203_s15, %s9729_s15   ;;  %s6105_s14 = sphi %s6201_s14, %s9728_s14   ;;  %s6101_s13 = sphi %s6199_s13, %s9727_s13   ;;  %s6097_s12 = sphi %s6197_s12, %s9726_s12  }
  0x10   : > { %9169 = sst [smem:[#allocation21_spill]] %s6121_s18  ;;  %s5023_s28 = sadd.s32 4294967294, %s6153_s26  }
  0x11   : > { %9170 = sst [smem:[#allocation22_spill]] %s6125_s19  ;;  %s37_s29 = sadd.s32 1, %s6137_s22 }
  0x12   : > { %9171 = sst [smem:[#allocation23_spill]] %s6129_s20  ;;  %p38_p0 = scmp.ge.s32.totalorder %s37_s29, 2 }
  0x13   : > { %9172 = sst [smem:[#allocation24_spill]] %s6133_s21  ;;  %s40_s30 = sadd.s32 1, %s6141_s23 }
  0x14   : > { %9173 = sst [smem:[#allocation25_spill]] %s6141_s23  ;;  %s44_s4 = sadd.s32 1, %s6145_s24 }
  0x15   : > { %s48_s5 = sadd.s32 1, %s6149_s25  ;;  %s9739_s29 = smov (%p38_p0, %s37_s29), 0 }
  0x16   : > { %9174 = sst [smem:[#allocation26_spill]] %s9739_s29  ;;  %s9741_s30 = smov (!%p38_p0, %s40_s30), %s6141_s23 }
  0x17   : > { %p66_p1 = scmp.ne.s32.totalorder %s6117_s17, %s6113_s16  ;;  %p67_p2 = scmp.eq.s32.totalorder %s6153_s26, 0 }
  0x18   : > { %p42_p3 = scmp.ge.s32.totalorder %s9741_s30, 2  ;;  %p72_p4 = scmp.ne.s32.totalorder %s6113_s16, %s6109_s15 }
  0x19   : > { %p6293_p5 = por %p67_p2, %p66_p1  ;;  %p73_p6 = scmp.eq.s32.totalorder %s6273_s27, 0 }
  0x1a   : > { %s9743_s30 = smov (%p42_p3, %s9741_s30), 0  ;;  %s9745_s4 = smov (!%p42_p3, %s44_s4), %s6145_s24 }
  0x1b   : > { %9176 = sst [smem:[#allocation27_spill]] %s9743_s30  ;;  %s59_s7 = sadd.s32 1, %s6117_s17 }
  0x1c   : > { %p6307_p7 = por %p73_p6, %p72_p4  ;;  %p46_p8 = scmp.ge.s32.totalorder %s9745_s4, 2 }
  0x1d   : > { %s55_s9 = ssub.s32 %s6141_s23, %s9743_s30  ;;  %s85_s10 = ssub.s32 %s6137_s22, %s9739_s29 }
  0x1e   : > { %p96_p9 = scmp.ne.s32.totalorder %s6105_s14, %s6101_s13  ;;  %s9747_s4 = smov (%p46_p8, %s9745_s4), 0 }
  0x1f   : > { %9178 = sst [smem:[#allocation28_spill]] %s9747_s4  ;;  %s9749_s5 = smov (!%p46_p8, %s48_s5), %s6149_s25 }
  0x20   : > { %s53_s11 = ssub.s32 %s6145_s24, %s9747_s4  ;;  %p6324_p10 = por %p96_p9, %p67_p2 }
  0x21   : > { %p50_p11 = scmp.ge.s32.totalorder %s9749_s5, 2  ;;  %p102_p12 = scmp.ne.s32.totalorder %s6101_s13, %s6097_s12 }
  0x22   : > { %p160_p13 = scmp.eq.s32.totalorder %s6273_s27, 15  ;;  %p166_p0 = scmp.eq.s32.totalorder %s5023_s28, 15 }
  0x23   : > { %s9751_s5 = smov (%p50_p11, %s9749_s5), 0  ;;  %p6335_p3 = por %p102_p12, %p73_p6 }
  0x24   : > { %9180 = sst [smem:[#allocation29_spill]] %s9751_s5  ;;  %p6342_p8 = por %p160_p13, %p66_p1 }
  0x25   : > { %s9181_s30 = scalar_select %p6335_p3, 1, 0 }
  0x26   : > { %s9183_s4 = scalar_select %p6342_p8, 1, 0 }
  0x27   : > { %9182 = sst [smem:[#allocation30_spill]] %s9181_s30  ;;  %s52_s29 = ssub.s32 %s6149_s25, %s9751_s5 }
  0x28   : > { %p6351_p2 = por %p166_p0, %p72_p4  ;;  %s54_s12 = sor.u32 %s53_s11, %s52_s29 }
  0x29   : > { %s89_s28 = sadd.s32 1, %s6105_s14  ;;  %s56_s20 = sor.u32 %s55_s9, %s54_s12 }
  0x2a   : > { %s9184_s21 = scalar_select %p6351_p2, 1, 0 }
  0x2b   : > { %s86_s19 = sor.u32 %s85_s10, %s54_s12  ;;  %p57_p9 = scmp.eq.s32.totalorder %s56_s20, 0 }
  0x2c   : > { %9185 = sst [smem:[#allocation31_spill]] %s9184_s21  ;;  %p87_p6 = scmp.eq.s32.totalorder %s86_s19, 0 }
  0x2d   : > { %s6357_s18 = scalar_select %p57_p9, %s6117_s17, %s59_s7  }
  0x2e   : > { %s6360_s30 = scalar_select %p87_p6, %s6105_s14, %s89_s28  }
  0x2f   : > { %9186 = sst [smem:[#allocation32_spill]] %s6357_s18  ;;  %p5025_p1 = scmp.ge.s32.totalorder %s6153_s26, 16 }
  0x30   : > { %9187 = sst [smem:[#allocation33_spill]] %s6360_s30 }
  0x31   : > { %182 = sbr.rel (%p5025_p1) target bundleno = 124 (0x7c), region = 16 }
  0x38   : > { %s186_s29 = sand.u32 1, %s6117_s17   ;;  %s5028_s11 = sshll.u32 %s6141_s23, 5 }
  0x39   : > { %s5026_s9 = sshll.u32 %s186_s29, 8  ;;  %s5123_s20 = sshll.u32 %s6145_s24, 7 }
  0x3a   : > { %s197_s19 = sadd.s32 %s5123_s20, %s5028_s11  ;;  %s5030_s7 = sshll.u32 %s6149_s25, 8 }
  0x3b   : > { %s199_s10 = sadd.s32 %s5030_s7, %s197_s19  ;;  %s190_s12 = scalar_lea.vmem [#allocation5], %s5026_s9 }
  0x3c   : > { %s214_s28 = sshll.u32 %s190_s12, 4  ;;  %s5031_s5 = sshll.u32 %s199_s10, 6  ;;  %s215_s28 = int_to_ptr.vmem [resolvable:$true] %s214_s28 }
  0x3d   : > { %s5221_s18 = scalar_select %p6293_p5, [#allocation0], [#allocation16] }
  0x3e   : > { %s6155_s30 = smov 4096   ;;  %s6156_s23 = smov 2048  }
  0x3f   : > { %5222 = sst [smem:[#allocation13]] (%p6293_p5), %s6155_s30  ;;  %s6157_s17 = smov 32  }
  0x40   : > { %s206_s21 = sld [smem:[%s5221_s18]]   ;;  %s6158_s11 = smov 64  }
  0x41   : > { %5223 = sst [smem:[#allocation13 + $0x1]] (%p6293_p5), %s6156_s23  ;;  %s201_s19 = scalar_lea.hbm %s8904_s0, %s5031_s5 }
  0x42   : > { %5224 = sst [smem:[#allocation13 + $0x2]] (%p6293_p5), %s6157_s17  ;;  %s6159_s7 = smov 4  }
  0x43   : > { %5225 = sst [smem:[#allocation13 + $0x3]] (%p6293_p5), %s6158_s11  ;;  %s187_s10 = scalar_lea.sflag [#allocation6], %s186_s29 }
  0x44   : > { %5226 = sst [smem:[#allocation13 + $0x4]] (%p6293_p5), %s6158_s11  ;;  %s6160_s23 = smov [#allocation12]  }
  0x45   : > { %5227 = sst [smem:[#allocation13 + $0x5]] (%p6293_p5), %s6159_s7  ;;  %s237_s17 = sand.u32 1, %s6153_s26  }
  0x46   : > { %s5032_s18 = sshll.u32 %s206_s21, 26  ;;  %s239_s12 = sand.u32 1, %s6105_s14  }
  0x47   : > { %s5033_s30 = sadd.s32 134217728, %s5032_s18  ;;  %s6388_s5 = sshll.u32 %s239_s12, 7 }
  0x48   : > { %5228 = dma.general (%p6293_p5), %s201_s19, 4096, %s215_s28, %s187_s10, %s6160_s23, [#allocation13], %s5033_s30, 0  }
  0x49   : > { %s5035_s11 = sshll.u32 %s6137_s22, 5  ;;  %s5036_s9 = sshll.u32 %s6145_s24, 6 }
  0x4a   : > { %s5037_s20 = sshll.u32 %s6149_s25, 7  ;;  %s247_s21 = sadd.s32 %s5036_s9, %s5035_s11 }
  0x4b   : > { %s241_s7 = scalar_lea.vmem [#allocation8], %s6388_s5  ;;  %s6394_s18 = sadd.s32 %s5037_s20, %s247_s21 }
  0x4c   : > { %s252_s29 = sshll.u32 %s241_s7, 4  ;;  %s5038_s6 = sshll.u32 %s6394_s18, 6  ;;  %s6396_s29 = int_to_ptr.vmem [resolvable:$true] %s252_s29 }
  0x4d   : > { %s6404_s30 = scalar_lea.hbm %s8905_s1, %s5038_s6  ;;  %s6406_s10 = scalar_lea.sflag [#allocation9], %s237_s17 }
  0x4e   : > { %s5967_s23 = scalar_lea.hbm %s6404_s30, 2048  ;;  %s5971_s9 = scalar_lea.hbm %s8905_s1, 16384 }
  0x4f   : > { %p5968_p4 = scmp.ne.s32.totalorder %s6404_s30, %s5967_s23  ;;  %p5972_p12 = scmp.lt.u32.totalorder %s6404_s30, %s8905_s1 }
  0x50   : > { %p5973_p13 = scmp.lt.u32.totalorder %s5971_s9, %s5967_s23  ;;  %p5975_p9 = scmp.lt.u32.totalorder %s5967_s23, %s6404_s30 }
  0x51   : > { %p5969_p5 = pnand %p5968_p4, %p6324_p10 }
  0x52   : > { %p5974_p0 = por %p5973_p13, %p5972_p12 }
  0x53   : > { %p5970_p11 = pneg %p5969_p5 }
  0x54   : > { %p5976_p6 = por %p5975_p9, %p5974_p0 }
  0x56   : > { %p5977_p1 = pnand %p5976_p6, %p5970_p11 }
  0x58   : > { %5980 = shalt.err (!%p5977_p1)
}
  0x59   : > { %s5981_s17 = scalar_lea.vmem %s6396_s29, 2048  ;;  %s6161_s7 = smov [#allocation8]  }
  0x5a   : > { %p5982_p4 = scmp.ne.s32.totalorder %s6396_s29, %s5981_s17  ;;  %s5985_s28 = sshll.u32 %s6161_s7, 4  ;;  %s5986_s28 = int_to_ptr.vmem [resolvable:$false] %s5985_s28 }
  0x5b   : > { %s5987_s19 = scalar_lea.vmem %s5986_s28, 4096  ;;  %p5988_p8 = scmp.lt.s32.totalorder %s6396_s29, %s5986_s28 }
  0x5c   : > { %p5983_p5 = pnand %p5982_p4, %p6324_p10  ;;  %p5989_p3 = scmp.lt.s32.totalorder %s5987_s19, %s5981_s17 }
  0x5e   : > { %p5984_p2 = pneg %p5983_p5  ;;  %p5990_p12 = por %p5989_p3, %p5988_p8 }
  0x60   : > { %p5991_p13 = pnand %p5990_p12, %p5984_p2 }
  0x62   : > { %5994 = shalt.err (!%p5991_p13)
}
  0x63   : > { %s6162_s23 = smov 64   ;;  %s6163_s12 = smov 4  }
  0x64   : > { %5229 = dma.hbm_to_vmem [thread:$0]  (%p6324_p10), %s6404_s30, 2048, %s6396_s29, %s6406_s10, %s6162_s23, %s6162_s23, %s6163_s12  }
  0x65   : > { %s6438_s20 = scalar_lea.hbm %s8906_s2, %s5038_s6  ;;  %s266_s21 = scalar_lea.vmem [#allocation10], %s6388_s5 }
  0x66   : > { %s277_s17 = sshll.u32 %s266_s21, 4  ;;  %s5995_s7 = scalar_lea.hbm %s6438_s20, 2048  ;;  %s6441_s17 = int_to_ptr.vmem [resolvable:$true] %s277_s17 }
  0x67   : > { %p5996_p3 = scmp.ne.s32.totalorder %s6438_s20, %s5995_s7  ;;  %s5999_s30 = scalar_lea.hbm %s8906_s2, 16384 }
  0x68   : > { %p6000_p11 = scmp.lt.u32.totalorder %s6438_s20, %s8906_s2  ;;  %p6001_p0 = scmp.lt.u32.totalorder %s5999_s30, %s5995_s7 }
  0x69   : > { %p5997_p8 = pnand %p5996_p3, %p6324_p10  ;;  %p6003_p6 = scmp.lt.u32.totalorder %s5995_s7, %s6438_s20 }
  0x6a   : > { %p6002_p9 = por %p6001_p0, %p6000_p11 }
  0x6b   : > { %p5998_p2 = pneg %p5997_p8 }
  0x6c   : > { %p6004_p1 = por %p6003_p6, %p6002_p9 }
  0x6e   : > { %p6005_p4 = pnand %p6004_p1, %p5998_p2 }
  0x70   : > { %6008 = shalt.err (!%p6005_p4)
}
  0x71   : > { %s6009_s5 = scalar_lea.vmem %s6441_s17, 2048  ;;  %s6164_s19 = smov [#allocation10]  }
  0x72   : > { %p6010_p5 = scmp.ne.s32.totalorder %s6441_s17, %s6009_s5  ;;  %s6013_s11 = sshll.u32 %s6164_s19, 4  ;;  %s6014_s11 = int_to_ptr.vmem [resolvable:$false] %s6013_s11 }
  0x73   : > { %s6015_s9 = scalar_lea.vmem %s6014_s11, 4096  ;;  %p6016_p3 = scmp.lt.s32.totalorder %s6441_s17, %s6014_s11 }
  0x74   : > { %p6011_p12 = pnand %p6010_p5, %p6324_p10  ;;  %p6017_p8 = scmp.lt.s32.totalorder %s6015_s9, %s6009_s5 }
  0x76   : > { %p6012_p13 = pneg %p6011_p12  ;;  %p6018_p11 = por %p6017_p8, %p6016_p3 }
  0x78   : > { %p6019_p0 = pnand %p6018_p11, %p6012_p13 }
  0x7a   : > { %6022 = shalt.err (!%p6019_p0)
}
  0x7b   : > { %5230 = dma.hbm_to_vmem [thread:$0]  (%p6324_p10), %s6438_s20, 2048, %s6441_s17, %s6406_s10, %s6162_s23, %s6162_s23, %s6163_s12  }
  0x7c PF: > { %p5044_p2 = scmp.ge.s32.totalorder %s6153_s26, 1  ;;  %p285_p9 = scmp.lt.s32.totalorder %s6153_s26, 17 }
  0x7e   : > { %p286_p6 = pnand %p5044_p2, %p285_p9 }
  0x80   : > { %289 = sbr.rel (%p286_p6) target bundleno = 1627 (0x65b), region = 32 }
  0x87   : > { %s6471_s21 = sand.u32 1, %s6113_s16  }
  0x88   : > { %s5045_s3 = sshll.u32 %s6471_s21, 8  ;;  %s292_s7 = scalar_lea.sflag [#allocation6], %s6471_s21 }
  0x89   : > { %s6475_s29 = scalar_lea.vmem [#allocation5], %s5045_s3 }
  0x8a   : > { %6084 = dma.done.wait (%p6307_p7), %s292_s7, 4096  }
  0x8b   : > { %6086 = vsyncadd (%p6307_p7), %s292_s7, 4294963200  ;;  %s9188_s10 = sld [smem:[#allocation30_spill]]  ;;  %s300_s23 = sand.u32 1, %s6273_s27  }
  0x8c   : > { %s302_s12 = sand.u32 1, %s6101_s13   ;;  %s301_s17 = scalar_lea.sflag [#allocation9], %s300_s23 }
  0x8d   : > { %s5046_s20 = sshll.u32 %s302_s12, 7 }
  0x8e   : > { %s6483_s18 = scalar_lea.vmem [#allocation8], %s5046_s20 }
  0x91   : > { %p9189_p10 = scmp.ne.s32.totalorder %s9188_s10, 0 }
  0x93   : > { %6088 = dma.done.wait (%p9189_p10), %s301_s17, 4096  }
  0x94   : > { %6090 = vsyncadd (%p9189_p10), %s301_s17, 4294963200  ;;  %s5048_s30 = sshll.u32 %s6471_s21, 9  ;;  %s6490_s28 = scalar_lea.vmem [#allocation10], %s5046_s20 }
  0x95   : > { %s6492_s8 = scalar_lea.vmem [#allocation11], %s5048_s30  ;;  %s9190_s6 = sld [smem:[#allocation21_spill]] }
  0x9b   : > { %p5049_p7 = scmp.ne.s32.totalorder %s9190_s6, 0 }
  0x9c   : > { %vm358_vm0 = vcmask (!%p5049_p7), 7168   ;;  %v6165_v0 = vmov (!%p5049_p7), -inf   ;;  %v6166_v1 = vmov (!%p5049_p7), 0.0  }
  0x9d   : > { %357 = sbr.rel (%p5049_p7) target bundleno = 253 (0xfd), region = 48  ;;  %359 = vst.msk [vmem:[#allocation2] sm:$0xff] (!%p5049_p7), %vm358_vm0, %v6165_v0  ;;  %360 = vst.msk [vmem:[#allocation2 + $0x8] sm:$0xff] (!%p5049_p7), %vm358_vm0, %v6165_v0 }
  0x9e   : > { %361 = vst.msk [vmem:[#allocation2 + $0x10] sm:$0xff] (!%p5049_p7), %vm358_vm0, %v6165_v0  ;;  %362 = vst.msk [vmem:[#allocation2 + $0x18] sm:$0xff] (!%p5049_p7), %vm358_vm0, %v6165_v0 }
  0x9f   : > { %363 = vst.msk [vmem:[#allocation2 + $0x20] sm:$0xff] (!%p5049_p7), %vm358_vm0, %v6165_v0  ;;  %364 = vst.msk [vmem:[#allocation2 + $0x28] sm:$0xff] (!%p5049_p7), %vm358_vm0, %v6165_v0 }
  0xa0   : > { %365 = vst.msk [vmem:[#allocation2 + $0x30] sm:$0xff] (!%p5049_p7), %vm358_vm0, %v6165_v0  ;;  %366 = vst.msk [vmem:[#allocation2 + $0x38] sm:$0xff] (!%p5049_p7), %vm358_vm0, %v6165_v0 }
  0xa1   : > { %367 = vst.msk [vmem:[#allocation2 + $0x40] sm:$0xff] (!%p5049_p7), %vm358_vm0, %v6165_v0  ;;  %368 = vst.msk [vmem:[#allocation2 + $0x48] sm:$0xff] (!%p5049_p7), %vm358_vm0, %v6165_v0 }
  0xa2   : > { %369 = vst.msk [vmem:[#allocation2 + $0x50] sm:$0xff] (!%p5049_p7), %vm358_vm0, %v6165_v0  ;;  %370 = vst.msk [vmem:[#allocation2 + $0x58] sm:$0xff] (!%p5049_p7), %vm358_vm0, %v6165_v0 }
  0xa3   : > { %371 = vst.msk [vmem:[#allocation2 + $0x60] sm:$0xff] (!%p5049_p7), %vm358_vm0, %v6165_v0  ;;  %372 = vst.msk [vmem:[#allocation2 + $0x68] sm:$0xff] (!%p5049_p7), %vm358_vm0, %v6165_v0 }
  0xa4   : > { %373 = vst.msk [vmem:[#allocation2 + $0x70] sm:$0xff] %vm358_vm0, %v6165_v0  ;;  %374 = vst.msk [vmem:[#allocation2 + $0x78] sm:$0xff] %vm358_vm0, %v6165_v0 }
  0xa5   : > { %375 = vst.msk [vmem:[#allocation2 + $0x80] sm:$0xff] %vm358_vm0, %v6165_v0  ;;  %376 = vst.msk [vmem:[#allocation2 + $0x88] sm:$0xff] %vm358_vm0, %v6165_v0 }
  0xa6   : > { %377 = vst.msk [vmem:[#allocation2 + $0x90] sm:$0xff] %vm358_vm0, %v6165_v0  ;;  %378 = vst.msk [vmem:[#allocation2 + $0x98] sm:$0xff] %vm358_vm0, %v6165_v0 }
  0xa7   : > { %379 = vst.msk [vmem:[#allocation2 + $0xa0] sm:$0xff] %vm358_vm0, %v6165_v0  ;;  %380 = vst.msk [vmem:[#allocation2 + $0xa8] sm:$0xff] %vm358_vm0, %v6165_v0 }
  0xa8   : > { %381 = vst.msk [vmem:[#allocation2 + $0xb0] sm:$0xff] %vm358_vm0, %v6165_v0  ;;  %382 = vst.msk [vmem:[#allocation2 + $0xb8] sm:$0xff] %vm358_vm0, %v6165_v0 }
  0xa9   : > { %383 = vst.msk [vmem:[#allocation2 + $0xc0] sm:$0xff] %vm358_vm0, %v6165_v0  ;;  %384 = vst.msk [vmem:[#allocation2 + $0xc8] sm:$0xff] %vm358_vm0, %v6165_v0 }
  0xaa   : > { %385 = vst.msk [vmem:[#allocation2 + $0xd0] sm:$0xff] %vm358_vm0, %v6165_v0  ;;  %386 = vst.msk [vmem:[#allocation2 + $0xd8] sm:$0xff] %vm358_vm0, %v6165_v0 }
  0xab   : > { %387 = vst.msk [vmem:[#allocation2 + $0xe0] sm:$0xff] %vm358_vm0, %v6165_v0  ;;  %388 = vst.msk [vmem:[#allocation2 + $0xe8] sm:$0xff] %vm358_vm0, %v6165_v0 }
  0xac   : > { %389 = vst.msk [vmem:[#allocation2 + $0xf0] sm:$0xff] %vm358_vm0, %v6165_v0  ;;  %390 = vst.msk [vmem:[#allocation2 + $0xf8] sm:$0xff] %vm358_vm0, %v6165_v0 }
  0xad   : > { %391 = vst.msk [vmem:[#allocation2 + $0x100] sm:$0xff] %vm358_vm0, %v6165_v0  ;;  %392 = vst.msk [vmem:[#allocation2 + $0x108] sm:$0xff] %vm358_vm0, %v6165_v0 }
  0xae   : > { %393 = vst.msk [vmem:[#allocation2 + $0x110] sm:$0xff] %vm358_vm0, %v6165_v0  ;;  %394 = vst.msk [vmem:[#allocation2 + $0x118] sm:$0xff] %vm358_vm0, %v6165_v0 }
  0xaf   : > { %395 = vst.msk [vmem:[#allocation2 + $0x120] sm:$0xff] %vm358_vm0, %v6165_v0  ;;  %396 = vst.msk [vmem:[#allocation2 + $0x128] sm:$0xff] %vm358_vm0, %v6165_v0 }
  0xb0   : > { %397 = vst.msk [vmem:[#allocation2 + $0x130] sm:$0xff] %vm358_vm0, %v6165_v0  ;;  %398 = vst.msk [vmem:[#allocation2 + $0x138] sm:$0xff] %vm358_vm0, %v6165_v0 }
  0xb1   : > { %399 = vst.msk [vmem:[#allocation2 + $0x140] sm:$0xff] %vm358_vm0, %v6165_v0  ;;  %400 = vst.msk [vmem:[#allocation2 + $0x148] sm:$0xff] %vm358_vm0, %v6165_v0 }
  0xb2   : > { %401 = vst.msk [vmem:[#allocation2 + $0x150] sm:$0xff] %vm358_vm0, %v6165_v0  ;;  %402 = vst.msk [vmem:[#allocation2 + $0x158] sm:$0xff] %vm358_vm0, %v6165_v0 }
  0xb3   : > { %403 = vst.msk [vmem:[#allocation2 + $0x160] sm:$0xff] %vm358_vm0, %v6165_v0  ;;  %404 = vst.msk [vmem:[#allocation2 + $0x168] sm:$0xff] %vm358_vm0, %v6165_v0 }
  0xb4   : > { %405 = vst.msk [vmem:[#allocation2 + $0x170] sm:$0xff] %vm358_vm0, %v6165_v0  ;;  %406 = vst.msk [vmem:[#allocation2 + $0x178] sm:$0xff] %vm358_vm0, %v6165_v0 }
  0xb5   : > { %407 = vst.msk [vmem:[#allocation2 + $0x180] sm:$0xff] %vm358_vm0, %v6165_v0  ;;  %408 = vst.msk [vmem:[#allocation2 + $0x188] sm:$0xff] %vm358_vm0, %v6165_v0 }
  0xb6   : > { %409 = vst.msk [vmem:[#allocation2 + $0x190] sm:$0xff] %vm358_vm0, %v6165_v0  ;;  %410 = vst.msk [vmem:[#allocation2 + $0x198] sm:$0xff] %vm358_vm0, %v6165_v0 }
  0xb7   : > { %411 = vst.msk [vmem:[#allocation2 + $0x1a0] sm:$0xff] %vm358_vm0, %v6165_v0  ;;  %412 = vst.msk [vmem:[#allocation2 + $0x1a8] sm:$0xff] %vm358_vm0, %v6165_v0 }
  0xb8   : > { %413 = vst.msk [vmem:[#allocation2 + $0x1b0] sm:$0xff] %vm358_vm0, %v6165_v0  ;;  %414 = vst.msk [vmem:[#allocation2 + $0x1b8] sm:$0xff] %vm358_vm0, %v6165_v0 }
  0xb9   : > { %415 = vst.msk [vmem:[#allocation2 + $0x1c0] sm:$0xff] %vm358_vm0, %v6165_v0  ;;  %416 = vst.msk [vmem:[#allocation2 + $0x1c8] sm:$0xff] %vm358_vm0, %v6165_v0 }
  0xba   : > { %417 = vst.msk [vmem:[#allocation2 + $0x1d0] sm:$0xff] %vm358_vm0, %v6165_v0  ;;  %418 = vst.msk [vmem:[#allocation2 + $0x1d8] sm:$0xff] %vm358_vm0, %v6165_v0 }
  0xbb   : > { %419 = vst.msk [vmem:[#allocation2 + $0x1e0] sm:$0xff] %vm358_vm0, %v6165_v0  ;;  %420 = vst.msk [vmem:[#allocation2 + $0x1e8] sm:$0xff] %vm358_vm0, %v6165_v0 }
  0xbc   : > { %421 = vst.msk [vmem:[#allocation2 + $0x1f0] sm:$0xff] %vm358_vm0, %v6165_v0  ;;  %422 = vst.msk [vmem:[#allocation2 + $0x1f8] sm:$0xff] %vm358_vm0, %v6165_v0 }
  0xbd   : > { %423 = vst.msk [vmem:[#allocation3] sm:$0xff] %vm358_vm0, %v6166_v1  ;;  %424 = vst.msk [vmem:[#allocation3 + $0x8] sm:$0xff] %vm358_vm0, %v6166_v1 }
  0xbe   : > { %425 = vst.msk [vmem:[#allocation3 + $0x10] sm:$0xff] %vm358_vm0, %v6166_v1  ;;  %426 = vst.msk [vmem:[#allocation3 + $0x18] sm:$0xff] %vm358_vm0, %v6166_v1 }
  0xbf   : > { %427 = vst.msk [vmem:[#allocation3 + $0x20] sm:$0xff] %vm358_vm0, %v6166_v1  ;;  %428 = vst.msk [vmem:[#allocation3 + $0x28] sm:$0xff] %vm358_vm0, %v6166_v1 }
  0xc0   : > { %429 = vst.msk [vmem:[#allocation3 + $0x30] sm:$0xff] %vm358_vm0, %v6166_v1  ;;  %430 = vst.msk [vmem:[#allocation3 + $0x38] sm:$0xff] %vm358_vm0, %v6166_v1 }
  0xc1   : > { %431 = vst.msk [vmem:[#allocation3 + $0x40] sm:$0xff] %vm358_vm0, %v6166_v1  ;;  %432 = vst.msk [vmem:[#allocation3 + $0x48] sm:$0xff] %vm358_vm0, %v6166_v1 }
  0xc2   : > { %433 = vst.msk [vmem:[#allocation3 + $0x50] sm:$0xff] %vm358_vm0, %v6166_v1  ;;  %434 = vst.msk [vmem:[#allocation3 + $0x58] sm:$0xff] %vm358_vm0, %v6166_v1 }
  0xc3   : > { %435 = vst.msk [vmem:[#allocation3 + $0x60] sm:$0xff] %vm358_vm0, %v6166_v1  ;;  %436 = vst.msk [vmem:[#allocation3 + $0x68] sm:$0xff] %vm358_vm0, %v6166_v1 }
  0xc4   : > { %437 = vst.msk [vmem:[#allocation3 + $0x70] sm:$0xff] %vm358_vm0, %v6166_v1  ;;  %438 = vst.msk [vmem:[#allocation3 + $0x78] sm:$0xff] %vm358_vm0, %v6166_v1 }
  0xc5   : > { %439 = vst.msk [vmem:[#allocation3 + $0x80] sm:$0xff] %vm358_vm0, %v6166_v1  ;;  %440 = vst.msk [vmem:[#allocation3 + $0x88] sm:$0xff] %vm358_vm0, %v6166_v1 }
  0xc6   : > { %441 = vst.msk [vmem:[#allocation3 + $0x90] sm:$0xff] %vm358_vm0, %v6166_v1  ;;  %442 = vst.msk [vmem:[#allocation3 + $0x98] sm:$0xff] %vm358_vm0, %v6166_v1 }
  0xc7   : > { %443 = vst.msk [vmem:[#allocation3 + $0xa0] sm:$0xff] %vm358_vm0, %v6166_v1  ;;  %444 = vst.msk [vmem:[#allocation3 + $0xa8] sm:$0xff] %vm358_vm0, %v6166_v1 }
  0xc8   : > { %445 = vst.msk [vmem:[#allocation3 + $0xb0] sm:$0xff] %vm358_vm0, %v6166_v1  ;;  %446 = vst.msk [vmem:[#allocation3 + $0xb8] sm:$0xff] %vm358_vm0, %v6166_v1 }
  0xc9   : > { %447 = vst.msk [vmem:[#allocation3 + $0xc0] sm:$0xff] %vm358_vm0, %v6166_v1  ;;  %448 = vst.msk [vmem:[#allocation3 + $0xc8] sm:$0xff] %vm358_vm0, %v6166_v1 }
  0xca   : > { %449 = vst.msk [vmem:[#allocation3 + $0xd0] sm:$0xff] %vm358_vm0, %v6166_v1  ;;  %450 = vst.msk [vmem:[#allocation3 + $0xd8] sm:$0xff] %vm358_vm0, %v6166_v1 }
  0xcb   : > { %451 = vst.msk [vmem:[#allocation3 + $0xe0] sm:$0xff] %vm358_vm0, %v6166_v1  ;;  %452 = vst.msk [vmem:[#allocation3 + $0xe8] sm:$0xff] %vm358_vm0, %v6166_v1 }
  0xcc   : > { %453 = vst.msk [vmem:[#allocation3 + $0xf0] sm:$0xff] %vm358_vm0, %v6166_v1  ;;  %454 = vst.msk [vmem:[#allocation3 + $0xf8] sm:$0xff] %vm358_vm0, %v6166_v1 }
  0xcd   : > { %455 = vst.msk [vmem:[#allocation3 + $0x100] sm:$0xff] %vm358_vm0, %v6166_v1  ;;  %456 = vst.msk [vmem:[#allocation3 + $0x108] sm:$0xff] %vm358_vm0, %v6166_v1 }
  0xce   : > { %457 = vst.msk [vmem:[#allocation3 + $0x110] sm:$0xff] %vm358_vm0, %v6166_v1  ;;  %458 = vst.msk [vmem:[#allocation3 + $0x118] sm:$0xff] %vm358_vm0, %v6166_v1 }
  0xcf   : > { %459 = vst.msk [vmem:[#allocation3 + $0x120] sm:$0xff] %vm358_vm0, %v6166_v1  ;;  %460 = vst.msk [vmem:[#allocation3 + $0x128] sm:$0xff] %vm358_vm0, %v6166_v1 }
  0xd0   : > { %461 = vst.msk [vmem:[#allocation3 + $0x130] sm:$0xff] %vm358_vm0, %v6166_v1  ;;  %462 = vst.msk [vmem:[#allocation3 + $0x138] sm:$0xff] %vm358_vm0, %v6166_v1 }
  0xd1   : > { %463 = vst.msk [vmem:[#allocation3 + $0x140] sm:$0xff] %vm358_vm0, %v6166_v1  ;;  %464 = vst.msk [vmem:[#allocation3 + $0x148] sm:$0xff] %vm358_vm0, %v6166_v1 }
  0xd2   : > { %465 = vst.msk [vmem:[#allocation3 + $0x150] sm:$0xff] %vm358_vm0, %v6166_v1  ;;  %466 = vst.msk [vmem:[#allocation3 + $0x158] sm:$0xff] %vm358_vm0, %v6166_v1 }
  0xd3   : > { %467 = vst.msk [vmem:[#allocation3 + $0x160] sm:$0xff] %vm358_vm0, %v6166_v1  ;;  %468 = vst.msk [vmem:[#allocation3 + $0x168] sm:$0xff] %vm358_vm0, %v6166_v1 }
  0xd4   : > { %469 = vst.msk [vmem:[#allocation3 + $0x170] sm:$0xff] %vm358_vm0, %v6166_v1  ;;  %470 = vst.msk [vmem:[#allocation3 + $0x178] sm:$0xff] %vm358_vm0, %v6166_v1 }
  0xd5   : > { %471 = vst.msk [vmem:[#allocation3 + $0x180] sm:$0xff] %vm358_vm0, %v6166_v1  ;;  %472 = vst.msk [vmem:[#allocation3 + $0x188] sm:$0xff] %vm358_vm0, %v6166_v1 }
  0xd6   : > { %473 = vst.msk [vmem:[#allocation3 + $0x190] sm:$0xff] %vm358_vm0, %v6166_v1  ;;  %474 = vst.msk [vmem:[#allocation3 + $0x198] sm:$0xff] %vm358_vm0, %v6166_v1 }
  0xd7   : > { %475 = vst.msk [vmem:[#allocation3 + $0x1a0] sm:$0xff] %vm358_vm0, %v6166_v1  ;;  %476 = vst.msk [vmem:[#allocation3 + $0x1a8] sm:$0xff] %vm358_vm0, %v6166_v1 }
  0xd8   : > { %477 = vst.msk [vmem:[#allocation3 + $0x1b0] sm:$0xff] %vm358_vm0, %v6166_v1  ;;  %478 = vst.msk [vmem:[#allocation3 + $0x1b8] sm:$0xff] %vm358_vm0, %v6166_v1 }
  0xd9   : > { %479 = vst.msk [vmem:[#allocation3 + $0x1c0] sm:$0xff] %vm358_vm0, %v6166_v1  ;;  %480 = vst.msk [vmem:[#allocation3 + $0x1c8] sm:$0xff] %vm358_vm0, %v6166_v1 }
  0xda   : > { %481 = vst.msk [vmem:[#allocation3 + $0x1d0] sm:$0xff] %vm358_vm0, %v6166_v1  ;;  %482 = vst.msk [vmem:[#allocation3 + $0x1d8] sm:$0xff] %vm358_vm0, %v6166_v1 }
  0xdb   : > { %483 = vst.msk [vmem:[#allocation3 + $0x1e0] sm:$0xff] %vm358_vm0, %v6166_v1  ;;  %484 = vst.msk [vmem:[#allocation3 + $0x1e8] sm:$0xff] %vm358_vm0, %v6166_v1 }
  0xdc   : > { %485 = vst.msk [vmem:[#allocation3 + $0x1f0] sm:$0xff] %vm358_vm0, %v6166_v1  ;;  %486 = vst.msk [vmem:[#allocation3 + $0x1f8] sm:$0xff] %vm358_vm0, %v6166_v1 }
  0xdd   : > { %487 = vst [vmem:[#allocation4] sm:$0xff] %v6166_v1  ;;  %488 = vst [vmem:[#allocation4 + $0x8] sm:$0xff] %v6166_v1 }
  0xde   : > { %489 = vst [vmem:[#allocation4 + $0x10] sm:$0xff] %v6166_v1  ;;  %490 = vst [vmem:[#allocation4 + $0x18] sm:$0xff] %v6166_v1 }
  0xdf   : > { %491 = vst [vmem:[#allocation4 + $0x20] sm:$0xff] %v6166_v1  ;;  %492 = vst [vmem:[#allocation4 + $0x28] sm:$0xff] %v6166_v1 }
  0xe0   : > { %493 = vst [vmem:[#allocation4 + $0x30] sm:$0xff] %v6166_v1  ;;  %494 = vst [vmem:[#allocation4 + $0x38] sm:$0xff] %v6166_v1 }
  0xe1   : > { %495 = vst [vmem:[#allocation4 + $0x40] sm:$0xff] %v6166_v1  ;;  %496 = vst [vmem:[#allocation4 + $0x48] sm:$0xff] %v6166_v1 }
  0xe2   : > { %497 = vst [vmem:[#allocation4 + $0x50] sm:$0xff] %v6166_v1  ;;  %498 = vst [vmem:[#allocation4 + $0x58] sm:$0xff] %v6166_v1 }
  0xe3   : > { %499 = vst [vmem:[#allocation4 + $0x60] sm:$0xff] %v6166_v1  ;;  %500 = vst [vmem:[#allocation4 + $0x68] sm:$0xff] %v6166_v1 }
  0xe4   : > { %501 = vst [vmem:[#allocation4 + $0x70] sm:$0xff] %v6166_v1  ;;  %502 = vst [vmem:[#allocation4 + $0x78] sm:$0xff] %v6166_v1 }
  0xe5   : > { %503 = vst [vmem:[#allocation4 + $0x80] sm:$0xff] %v6166_v1  ;;  %504 = vst [vmem:[#allocation4 + $0x88] sm:$0xff] %v6166_v1 }
  0xe6   : > { %505 = vst [vmem:[#allocation4 + $0x90] sm:$0xff] %v6166_v1  ;;  %506 = vst [vmem:[#allocation4 + $0x98] sm:$0xff] %v6166_v1 }
  0xe7   : > { %507 = vst [vmem:[#allocation4 + $0xa0] sm:$0xff] %v6166_v1  ;;  %508 = vst [vmem:[#allocation4 + $0xa8] sm:$0xff] %v6166_v1 }
  0xe8   : > { %509 = vst [vmem:[#allocation4 + $0xb0] sm:$0xff] %v6166_v1  ;;  %510 = vst [vmem:[#allocation4 + $0xb8] sm:$0xff] %v6166_v1 }
  0xe9   : > { %511 = vst [vmem:[#allocation4 + $0xc0] sm:$0xff] %v6166_v1  ;;  %512 = vst [vmem:[#allocation4 + $0xc8] sm:$0xff] %v6166_v1 }
  0xea   : > { %513 = vst [vmem:[#allocation4 + $0xd0] sm:$0xff] %v6166_v1  ;;  %514 = vst [vmem:[#allocation4 + $0xd8] sm:$0xff] %v6166_v1 }
  0xeb   : > { %515 = vst [vmem:[#allocation4 + $0xe0] sm:$0xff] %v6166_v1  ;;  %516 = vst [vmem:[#allocation4 + $0xe8] sm:$0xff] %v6166_v1 }
  0xec   : > { %517 = vst [vmem:[#allocation4 + $0xf0] sm:$0xff] %v6166_v1  ;;  %518 = vst [vmem:[#allocation4 + $0xf8] sm:$0xff] %v6166_v1 }
  0xed   : > { %519 = vst [vmem:[#allocation4 + $0x100] sm:$0xff] %v6166_v1  ;;  %520 = vst [vmem:[#allocation4 + $0x108] sm:$0xff] %v6166_v1 }
  0xee   : > { %521 = vst [vmem:[#allocation4 + $0x110] sm:$0xff] %v6166_v1  ;;  %522 = vst [vmem:[#allocation4 + $0x118] sm:$0xff] %v6166_v1 }
  0xef   : > { %523 = vst [vmem:[#allocation4 + $0x120] sm:$0xff] %v6166_v1  ;;  %524 = vst [vmem:[#allocation4 + $0x128] sm:$0xff] %v6166_v1 }
  0xf0   : > { %525 = vst [vmem:[#allocation4 + $0x130] sm:$0xff] %v6166_v1  ;;  %526 = vst [vmem:[#allocation4 + $0x138] sm:$0xff] %v6166_v1 }
  0xf1   : > { %527 = vst [vmem:[#allocation4 + $0x140] sm:$0xff] %v6166_v1  ;;  %528 = vst [vmem:[#allocation4 + $0x148] sm:$0xff] %v6166_v1 }
  0xf2   : > { %529 = vst [vmem:[#allocation4 + $0x150] sm:$0xff] %v6166_v1  ;;  %530 = vst [vmem:[#allocation4 + $0x158] sm:$0xff] %v6166_v1 }
  0xf3   : > { %531 = vst [vmem:[#allocation4 + $0x160] sm:$0xff] %v6166_v1  ;;  %532 = vst [vmem:[#allocation4 + $0x168] sm:$0xff] %v6166_v1 }
  0xf4   : > { %533 = vst [vmem:[#allocation4 + $0x170] sm:$0xff] %v6166_v1  ;;  %534 = vst [vmem:[#allocation4 + $0x178] sm:$0xff] %v6166_v1 }
  0xf5   : > { %535 = vst [vmem:[#allocation4 + $0x180] sm:$0xff] %v6166_v1  ;;  %536 = vst [vmem:[#allocation4 + $0x188] sm:$0xff] %v6166_v1 }
  0xf6   : > { %537 = vst [vmem:[#allocation4 + $0x190] sm:$0xff] %v6166_v1  ;;  %538 = vst [vmem:[#allocation4 + $0x198] sm:$0xff] %v6166_v1 }
  0xf7   : > { %539 = vst [vmem:[#allocation4 + $0x1a0] sm:$0xff] %v6166_v1  ;;  %540 = vst [vmem:[#allocation4 + $0x1a8] sm:$0xff] %v6166_v1 }
  0xf8   : > { %541 = vst [vmem:[#allocation4 + $0x1b0] sm:$0xff] %v6166_v1  ;;  %542 = vst [vmem:[#allocation4 + $0x1b8] sm:$0xff] %v6166_v1 }
  0xf9   : > { %543 = vst [vmem:[#allocation4 + $0x1c0] sm:$0xff] %v6166_v1  ;;  %544 = vst [vmem:[#allocation4 + $0x1c8] sm:$0xff] %v6166_v1 }
  0xfa   : > { %545 = vst [vmem:[#allocation4 + $0x1d0] sm:$0xff] %v6166_v1  ;;  %546 = vst [vmem:[#allocation4 + $0x1d8] sm:$0xff] %v6166_v1 }
  0xfb   : > { %547 = vst [vmem:[#allocation4 + $0x1e0] sm:$0xff] %v6166_v1  ;;  %548 = vst [vmem:[#allocation4 + $0x1e8] sm:$0xff] %v6166_v1 }
  0xfc   : > { %549 = vst [vmem:[#allocation4 + $0x1f0] sm:$0xff] %v6166_v1  ;;  %550 = vst [vmem:[#allocation4 + $0x1f8] sm:$0xff] %v6166_v1 }
  0xfd PF: > { %v5389_v2 = vld [vmem:[%s6483_s18 + $0x40] sm:$0xff]   ;;  %v5391_v4 = vld [vmem:[%s6483_s18 + $0x48] sm:$0xff]   ;;  %v5393_v6 = vld [vmem:[%s6483_s18 + $0x50] sm:$0xff]   ;;  %vm3081_vm1 = vcmask 7168   ;;  %s9709_s27 = sld [smem:[#allocation21_spill]] }
  0xfe   : > { %v5390_v3 = vld [vmem:[%s6483_s18] sm:$0xff]   ;;  %5125 = vmatprep.subr.bf16.mxu0 %v5389_v2  ;;  %5205 = vmatprep.subr.bf16.mxu1 %v5389_v2  ;;  %v5392_v5 = vld [vmem:[%s6483_s18 + $0x8] sm:$0xff]   ;;  %v5394_v7 = vld [vmem:[%s6483_s18 + $0x10] sm:$0xff]  }
  0xff   : > { %5126 = vmatpush3.bf16.xpose.msra.mxu0 %v5390_v3  ;;  %5213 = vmatpush3.bf16.xpose.msra.mxu1 %v5390_v3  ;;  %v5395_v8 = vld [vmem:[%s6483_s18 + $0x58] sm:$0xff]   ;;  %v5405_v9 = vld [vmem:[%s6475_s29] sm:$0xff]   ;;  %v5399_v14 = vld [vmem:[%s6483_s18 + $0x68] sm:$0xff]  }
 0x100   : > { %5127 = vmatprep.subr.bf16.mxu0 %v5391_v4  ;;  %5206 = vmatprep.subr.bf16.mxu1 %v5391_v4  ;;  %v5406_v10 = vld [vmem:[%s6475_s29 + $0x80] sm:$0xff]   ;;  %v5396_v11 = vld [vmem:[%s6483_s18 + $0x18] sm:$0xff]   ;;  %v5400_v15 = vld [vmem:[%s6483_s18 + $0x28] sm:$0xff]  }
 0x101   : > { %5141 = vmatprep.mubr.bf16.mxu0 %v5405_v9  ;;  %5173 = vmatprep.mubr.bf16.mxu1 %v5406_v10  ;;  %v5397_v12 = vld [vmem:[%s6483_s18 + $0x60] sm:$0xff]   ;;  %v5401_v16 = vld [vmem:[%s6483_s18 + $0x70] sm:$0xff]   ;;  %v5403_v18 = vld [vmem:[%s6483_s18 + $0x78] sm:$0xff]  }
 0x102   : > { %v5398_v13 = vld [vmem:[%s6483_s18 + $0x20] sm:$0xff]   ;;  %v5402_v17 = vld [vmem:[%s6483_s18 + $0x30] sm:$0xff]   ;;  %v5404_v19 = vld [vmem:[%s6483_s18 + $0x38] sm:$0xff]  }
 0x103   : > { %v5407_v20 = vld [vmem:[%s6475_s29 + $0x8] sm:$0xff]   ;;  %v5409_v22 = vld [vmem:[%s6475_s29 + $0x10] sm:$0xff]   ;;  %v5411_v24 = vld [vmem:[%s6475_s29 + $0x18] sm:$0xff]   ;;  %p5114_p1 = scmp.ne.s32.totalorder %s9709_s27, 1 }
 0x104   : > { %v5408_v21 = vld [vmem:[%s6475_s29 + $0x88] sm:$0xff]   ;;  %v5410_v23 = vld [vmem:[%s6475_s29 + $0x90] sm:$0xff]   ;;  %v5412_v25 = vld [vmem:[%s6475_s29 + $0x98] sm:$0xff]  }
 0x105   : > { %v5413_v26 = vld [vmem:[%s6475_s29 + $0x20] sm:$0xff]   ;;  %v5415_v28 = vld [vmem:[%s6475_s29 + $0x28] sm:$0xff]   ;;  %v5417_v30 = vld [vmem:[%s6475_s29 + $0x30] sm:$0xff]  }
 0x106   : > { %v5414_v27 = vld [vmem:[%s6475_s29 + $0xa0] sm:$0xff]   ;;  %v5416_v29 = vld [vmem:[%s6475_s29 + $0xa8] sm:$0xff]   ;;  %v5418_v31 = vld [vmem:[%s6475_s29 + $0xb0] sm:$0xff]  }
 0x107   : > { %5128 = vmatpush3.bf16.xpose.msra.mxu0 %v5392_v5  ;;  %5214 = vmatpush3.bf16.xpose.msra.mxu1 %v5392_v5  ;;  %v5419_v32 = vld [vmem:[%s6475_s29 + $0x38] sm:$0xff]   ;;  %v5421_v34 = vld [vmem:[%s6475_s29 + $0x40] sm:$0xff]   ;;  %v5423_v36 = vld [vmem:[%s6475_s29 + $0x48] sm:$0xff]  }
 0x108   : > { %5129 = vmatprep.subr.bf16.mxu0 %v5393_v6  ;;  %5207 = vmatprep.subr.bf16.mxu1 %v5393_v6  ;;  %v5420_v33 = vld [vmem:[%s6475_s29 + $0xb8] sm:$0xff]   ;;  %v5422_v35 = vld [vmem:[%s6475_s29 + $0xc0] sm:$0xff]   ;;  %v5424_v37 = vld [vmem:[%s6475_s29 + $0xc8] sm:$0xff]  }
 0x109   : > { %v5425_v38 = vld [vmem:[%s6475_s29 + $0x50] sm:$0xff]   ;;  %v5427_v40 = vld [vmem:[%s6475_s29 + $0x58] sm:$0xff]   ;;  %v5429_v42 = vld [vmem:[%s6475_s29 + $0x60] sm:$0xff]  }
 0x10a   : > { %v5426_v39 = vld [vmem:[%s6475_s29 + $0xd0] sm:$0xff]   ;;  %v5428_v41 = vld [vmem:[%s6475_s29 + $0xd8] sm:$0xff]   ;;  %v5430_v43 = vld [vmem:[%s6475_s29 + $0xe0] sm:$0xff]  }
 0x10b   : > { %v5431_v44 = vld [vmem:[%s6475_s29 + $0x68] sm:$0xff]   ;;  %v5433_v46 = vld [vmem:[%s6475_s29 + $0x70] sm:$0xff]   ;;  %v5434_v47 = vld [vmem:[%s6475_s29 + $0x78] sm:$0xff]  }
 0x10c   : > { %v5432_v45 = vld [vmem:[%s6475_s29 + $0xe8] sm:$0xff]   ;;  %v5435_v48 = vld [vmem:[%s6475_s29 + $0xf0] sm:$0xff]   ;;  %v5436_v49 = vld [vmem:[%s6475_s29 + $0xf8] sm:$0xff]  }
 0x10f   : > { %5130 = vmatpush3.bf16.xpose.msra.mxu0 %v5394_v7  ;;  %5215 = vmatpush3.bf16.xpose.msra.mxu1 %v5394_v7 }
 0x110   : > { %5131 = vmatprep.subr.bf16.mxu0 %v5395_v8  ;;  %5208 = vmatprep.subr.bf16.mxu1 %v5395_v8 }
 0x117   : > { %5132 = vmatpush3.bf16.xpose.msra.mxu0 %v5396_v11  ;;  %5216 = vmatpush3.bf16.xpose.msra.mxu1 %v5396_v11 }
 0x118   : > { %5133 = vmatprep.subr.bf16.mxu0 %v5397_v12  ;;  %5209 = vmatprep.subr.bf16.mxu1 %v5397_v12 }
 0x11f   : > { %5134 = vmatpush3.bf16.xpose.msra.mxu0 %v5398_v13  ;;  %5217 = vmatpush3.bf16.xpose.msra.mxu1 %v5398_v13 }
 0x120   : > { %5135 = vmatprep.subr.bf16.mxu0 %v5399_v14  ;;  %5210 = vmatprep.subr.bf16.mxu1 %v5399_v14 }
 0x127   : > { %5136 = vmatpush3.bf16.xpose.msra.mxu0 %v5400_v15  ;;  %5218 = vmatpush3.bf16.xpose.msra.mxu1 %v5400_v15 }
 0x128   : > { %5137 = vmatprep.subr.bf16.mxu0 %v5401_v16  ;;  %5211 = vmatprep.subr.bf16.mxu1 %v5401_v16 }
 0x12f   : > { %5138 = vmatpush3.bf16.xpose.msra.mxu0 %v5402_v17  ;;  %5219 = vmatpush3.bf16.xpose.msra.mxu1 %v5402_v17 }
 0x130   : > { %5139 = vmatprep.subr.bf16.mxu0 %v5403_v18  ;;  %5212 = vmatprep.subr.bf16.mxu1 %v5403_v18 }
 0x137   : > { %5140 = vmatpush3.bf16.xpose.msra.mxu0 %v5404_v19  ;;  %5220 = vmatpush3.bf16.xpose.msra.mxu1 %v5404_v19 }
 0x13e   : > { %5142 = vmatmul.mubr.bf16.vlgmr.msra.gmra.mrb[0].mxu0 %v5405_v9  ;;  %5174 = vmatmul.mubr.bf16.vlgmr.msra.gmra.mrb[0].mxu1 %v5406_v10 }
 0x13f   : > { %5143 = vmatprep.mubr.bf16.mxu0 %v5407_v20  ;;  %5175 = vmatprep.mubr.bf16.mxu1 %v5408_v21 }
 0x146   : > { %5144 = vmatmul.mubr.bf16.gmra.mrb[4].mxu0 %v5407_v20  ;;  %5176 = vmatmul.mubr.bf16.gmra.mrb[4].mxu1 %v5408_v21  ;;  %v8919_v20 = vmov 0  }
 0x147   : > { %5145 = vmatprep.mubr.bf16.mxu0 %v5409_v22  ;;  %5177 = vmatprep.mubr.bf16.mxu1 %v5410_v23 }
 0x148   : > { %5387 = vset.pattern.permute.xlu0 %v8919_v20  ;;  %5388 = vset.pattern.permute.xlu1 %v8919_v20 }
 0x149   : > { %2600 = vmatprep.subr.bf16.mxu1 %v8919_v20  ;;  %3690 = vmatprep.subr.bf16.mxu0 %v8919_v20 }
 0x14e   : > { %5146 = vmatmul.mubr.bf16.gmra.mrb[8].mxu0 %v5409_v22  ;;  %5178 = vmatmul.mubr.bf16.gmra.mrb[8].mxu1 %v5410_v23 }
 0x14f   : > { %5147 = vmatprep.mubr.bf16.mxu0 %v5411_v24  ;;  %5179 = vmatprep.mubr.bf16.mxu1 %v5412_v25 }
 0x156   : > { %5148 = vmatmul.mubr.bf16.gmra.mrb[12].mxu0 %v5411_v24  ;;  %5180 = vmatmul.mubr.bf16.gmra.mrb[12].mxu1 %v5412_v25 }
 0x157   : > { %5149 = vmatprep.mubr.bf16.mxu0 %v5413_v26  ;;  %5181 = vmatprep.mubr.bf16.mxu1 %v5414_v27 }
 0x15e   : > { %5150 = vmatmul.mubr.bf16.gmra.mrb[16].mxu0 %v5413_v26  ;;  %5182 = vmatmul.mubr.bf16.gmra.mrb[16].mxu1 %v5414_v27 }
 0x15f   : > { %5151 = vmatprep.mubr.bf16.mxu0 %v5415_v28  ;;  %5183 = vmatprep.mubr.bf16.mxu1 %v5416_v29 }
 0x166   : > { %5152 = vmatmul.mubr.bf16.gmra.mrb[20].mxu0 %v5415_v28  ;;  %5184 = vmatmul.mubr.bf16.gmra.mrb[20].mxu1 %v5416_v29 }
 0x167   : > { %5153 = vmatprep.mubr.bf16.mxu0 %v5417_v30  ;;  %5185 = vmatprep.mubr.bf16.mxu1 %v5418_v31 }
 0x16e   : > { %5154 = vmatmul.mubr.bf16.gmra.mrb[24].mxu0 %v5417_v30  ;;  %5186 = vmatmul.mubr.bf16.gmra.mrb[24].mxu1 %v5418_v31 }
 0x16f   : > { %5155 = vmatprep.mubr.bf16.mxu0 %v5419_v32  ;;  %5187 = vmatprep.mubr.bf16.mxu1 %v5420_v33 }
 0x176   : > { %5156 = vmatmul.mubr.bf16.gmra.mrb[28].mxu0 %v5419_v32  ;;  %5188 = vmatmul.mubr.bf16.gmra.mrb[28].mxu1 %v5420_v33 }
 0x177   : > { %5157 = vmatprep.mubr.bf16.mxu0 %v5421_v34  ;;  %5189 = vmatprep.mubr.bf16.mxu1 %v5422_v35 }
 0x17e   : > { %5158 = vmatmul.mubr.bf16.gmra.mrb[32].mxu0 %v5421_v34  ;;  %5190 = vmatmul.mubr.bf16.gmra.mrb[32].mxu1 %v5422_v35 }
 0x17f   : > { %5159 = vmatprep.mubr.bf16.mxu0 %v5423_v36  ;;  %5191 = vmatprep.mubr.bf16.mxu1 %v5424_v37 }
 0x186   : > { %5160 = vmatmul.mubr.bf16.gmra.mrb[36].mxu0 %v5423_v36  ;;  %5192 = vmatmul.mubr.bf16.gmra.mrb[36].mxu1 %v5424_v37 }
 0x187   : > { %5161 = vmatprep.mubr.bf16.mxu0 %v5425_v38  ;;  %5193 = vmatprep.mubr.bf16.mxu1 %v5426_v39 }
 0x18e   : > { %5162 = vmatmul.mubr.bf16.gmra.mrb[40].mxu0 %v5425_v38  ;;  %5194 = vmatmul.mubr.bf16.gmra.mrb[40].mxu1 %v5426_v39 }
 0x18f   : > { %5163 = vmatprep.mubr.bf16.mxu0 %v5427_v40  ;;  %5195 = vmatprep.mubr.bf16.mxu1 %v5428_v41 }
 0x196   : > { %5164 = vmatmul.mubr.bf16.gmra.mrb[44].mxu0 %v5427_v40  ;;  %5196 = vmatmul.mubr.bf16.gmra.mrb[44].mxu1 %v5428_v41 }
 0x197   : > { %5165 = vmatprep.mubr.bf16.mxu0 %v5429_v42  ;;  %5197 = vmatprep.mubr.bf16.mxu1 %v5430_v43 }
 0x19e   : > { %5166 = vmatmul.mubr.bf16.gmra.mrb[48].mxu0 %v5429_v42  ;;  %5198 = vmatmul.mubr.bf16.gmra.mrb[48].mxu1 %v5430_v43 }
 0x19f   : > { %5167 = vmatprep.mubr.bf16.mxu0 %v5431_v44  ;;  %5199 = vmatprep.mubr.bf16.mxu1 %v5432_v45 }
 0x1a6   : > { %5168 = vmatmul.mubr.bf16.gmra.mrb[52].mxu0 %v5431_v44  ;;  %5200 = vmatmul.mubr.bf16.gmra.mrb[52].mxu1 %v5432_v45 }
 0x1a7   : > { %5169 = vmatprep.mubr.bf16.mxu0 %v5433_v46  ;;  %5201 = vmatprep.mubr.bf16.mxu1 %v5435_v48 }
 0x1ae   : > { %5170 = vmatmul.mubr.bf16.gmra.mrb[56].mxu0 %v5433_v46  ;;  %5202 = vmatmul.mubr.bf16.gmra.mrb[56].mxu1 %v5435_v48 }
 0x1af   : > { %5171 = vmatprep.mubr.bf16.mxu0 %v5434_v47  ;;  %5203 = vmatprep.mubr.bf16.mxu1 %v5436_v49 }
 0x1b6   : > { %5172 = vmatmul.mubr.bf16.gmra.mrb[60].mxu0 %v5434_v47  ;;  %5204 = vmatmul.mubr.bf16.gmra.mrb[60].mxu1 %v5436_v49 }
 0x211   : > { %v6863_v50 = vpop.f32.mrb[0].mxu0  ;;  %v6865_v51 = vpop.f32.mrb[0].mxu1 }
 0x212   : > { %9191 = vst [vmem:[#allocation34_spill] sm:$0xff] %v6865_v51  ;;  %v6867_v52 = vpop.f32.mrb[1].mxu0  ;;  %v6869_v53 = vpop.f32.mrb[1].mxu1 }
 0x213   : > { %9192 = vst [vmem:[#allocation35_spill] sm:$0xff] %v6869_v53  ;;  %v6871_v54 = vpop.f32.mrb[2].mxu0  ;;  %v6873_v55 = vpop.f32.mrb[2].mxu1  ;;  %v1384_v56 = vmax.f32 %v6863_v50, %v6867_v52  ;;  %v1480_v57 = vmax.f32 %v6865_v51, %v6869_v53  ;;  %v7318_v53 = vld [vmem:[#allocation2 + $0x110] sm:$0xff]  ;;  %v7320_v51 = vld [vmem:[#allocation2 + $0x18] sm:$0xff] }
 0x214   : > { %9193 = vst [vmem:[#allocation36_spill] sm:$0xff] %v6873_v55  ;;  %v6879_v58 = vpop.f32.mrb[3].mxu0  ;;  %v6881_v59 = vpop.f32.mrb[3].mxu1  ;;  %9294 = vst [vmem:[#allocation135_spill] sm:$0xff] %v7318_v53 }
 0x215   : > { %9194 = vst [vmem:[#allocation37_spill] sm:$0xff] %v6881_v59  ;;  %1385 = vmax.xlane.f32.xlu0 %v1384_v56  ;;  %v1483_v60 = vmax.f32 %v6873_v55, %v6881_v59  ;;  %v1387_v61 = vmax.f32 %v6871_v54, %v6879_v58  ;;  %9295 = vst [vmem:[#allocation136_spill] sm:$0xff] %v7320_v51 }
 0x217   : > { %1484 = vmax.xlane.f32.xlu1 %v1483_v60 }
 0x219   : > { %1481 = vmax.xlane.f32.xlu0 %v1480_v57  ;;  %v6887_v62 = vpop.f32.mrb[4].mxu0  ;;  %v6889_v63 = vpop.f32.mrb[4].mxu1 }
 0x21a   : > { %9195 = vst [vmem:[#allocation38_spill] sm:$0xff] %v6889_v63  ;;  %v6891_v0 = vpop.f32.mrb[5].mxu0  ;;  %v6893_v1 = vpop.f32.mrb[5].mxu1 }
 0x21b   : > { %9196 = vst [vmem:[#allocation39_spill] sm:$0xff] %v6893_v1  ;;  %v6895_v2 = vpop.f32.mrb[6].mxu0  ;;  %v6897_v3 = vpop.f32.mrb[6].mxu1  ;;  %v1390_v4 = vmax.f32 %v6887_v62, %v6891_v0  ;;  %v1486_v5 = vmax.f32 %v6889_v63, %v6893_v1 }
 0x21c   : > { %9197 = vst [vmem:[#allocation40_spill] sm:$0xff] %v6897_v3  ;;  %v6903_v6 = vpop.f32.mrb[7].mxu0  ;;  %v6905_v7 = vpop.f32.mrb[7].mxu1 }
 0x21d   : > { %9198 = vst [vmem:[#allocation41_spill] sm:$0xff] %v6905_v7  ;;  %1388 = vmax.xlane.f32.xlu0 %v1387_v61  ;;  %1391 = vmax.xlane.f32.xlu1 %v1390_v4  ;;  %v1393_v8 = vmax.f32 %v6895_v2, %v6903_v6  ;;  %v1489_v9 = vmax.f32 %v6897_v3, %v6905_v7 }
 0x221   : > { %1487 = vmax.xlane.f32.xlu0 %v1486_v5  ;;  %1394 = vmax.xlane.f32.xlu1 %v1393_v8  ;;  %v6911_v10 = vpop.f32.mrb[8].mxu0  ;;  %v6913_v11 = vpop.f32.mrb[8].mxu1 }
 0x222   : > { %9199 = vst [vmem:[#allocation42_spill] sm:$0xff] %v6913_v11  ;;  %v6915_v12 = vpop.f32.mrb[9].mxu0  ;;  %v6917_v13 = vpop.f32.mrb[9].mxu1 }
 0x223   : > { %9200 = vst [vmem:[#allocation43_spill] sm:$0xff] %v6917_v13  ;;  %v6919_v14 = vpop.f32.mrb[10].mxu0  ;;  %v6921_v15 = vpop.f32.mrb[10].mxu1  ;;  %v1396_v16 = vmax.f32 %v6911_v10, %v6915_v12  ;;  %v1492_v17 = vmax.f32 %v6913_v11, %v6917_v13 }
 0x224   : > { %9201 = vst [vmem:[#allocation44_spill] sm:$0xff] %v6921_v15  ;;  %v6927_v18 = vpop.f32.mrb[11].mxu0  ;;  %v6929_v19 = vpop.f32.mrb[11].mxu1 }
 0x225   : > { %9202 = vst [vmem:[#allocation45_spill] sm:$0xff] %v6929_v19  ;;  %1490 = vmax.xlane.f32.xlu1 %v1489_v9  ;;  %1397 = vmax.xlane.f32.xlu0 %v1396_v16  ;;  %v1399_v21 = vmax.f32 %v6919_v14, %v6927_v18  ;;  %v1495_v22 = vmax.f32 %v6921_v15, %v6929_v19 }
 0x229   : > { %1493 = vmax.xlane.f32.xlu0 %v1492_v17  ;;  %1400 = vmax.xlane.f32.xlu1 %v1399_v21  ;;  %v6939_v23 = vpop.f32.mrb[12].mxu0  ;;  %v6941_v24 = vpop.f32.mrb[12].mxu1 }
 0x22a   : > { %9203 = vst [vmem:[#allocation46_spill] sm:$0xff] %v6941_v24  ;;  %v6943_v25 = vpop.f32.mrb[13].mxu0  ;;  %v6945_v26 = vpop.f32.mrb[13].mxu1 }
 0x22b   : > { %9204 = vst [vmem:[#allocation47_spill] sm:$0xff] %v6945_v26  ;;  %v6947_v27 = vpop.f32.mrb[14].mxu0  ;;  %v6949_v28 = vpop.f32.mrb[14].mxu1  ;;  %v1402_v29 = vmax.f32 %v6939_v23, %v6943_v25  ;;  %v1498_v30 = vmax.f32 %v6941_v24, %v6945_v26 }
 0x22c   : > { %9205 = vst [vmem:[#allocation48_spill] sm:$0xff] %v6949_v28  ;;  %v6955_v31 = vpop.f32.mrb[15].mxu0  ;;  %v6957_v32 = vpop.f32.mrb[15].mxu1 }
 0x22d   : > { %9206 = vst [vmem:[#allocation49_spill] sm:$0xff] %v6957_v32  ;;  %1496 = vmax.xlane.f32.xlu1 %v1495_v22  ;;  %1403 = vmax.xlane.f32.xlu0 %v1402_v29  ;;  %v1405_v33 = vmax.f32 %v6947_v27, %v6955_v31  ;;  %v1501_v34 = vmax.f32 %v6949_v28, %v6957_v32 }
 0x231   : > { %1499 = vmax.xlane.f32.xlu0 %v1498_v30  ;;  %1406 = vmax.xlane.f32.xlu1 %v1405_v33  ;;  %v6963_v35 = vpop.f32.mrb[16].mxu0  ;;  %v6965_v36 = vpop.f32.mrb[16].mxu1 }
 0x232   : > { %9207 = vst [vmem:[#allocation50_spill] sm:$0xff] %v6965_v36  ;;  %v6967_v37 = vpop.f32.mrb[17].mxu0  ;;  %v6969_v38 = vpop.f32.mrb[17].mxu1 }
 0x233   : > { %9208 = vst [vmem:[#allocation51_spill] sm:$0xff] %v6969_v38  ;;  %v6971_v39 = vpop.f32.mrb[18].mxu0  ;;  %v6973_v40 = vpop.f32.mrb[18].mxu1  ;;  %v1408_v41 = vmax.f32 %v6963_v35, %v6967_v37  ;;  %v1504_v42 = vmax.f32 %v6965_v36, %v6969_v38 }
 0x234   : > { %9209 = vst [vmem:[#allocation52_spill] sm:$0xff] %v6973_v40  ;;  %v6979_v43 = vpop.f32.mrb[19].mxu0  ;;  %v6981_v44 = vpop.f32.mrb[19].mxu1 }
 0x235   : > { %9210 = vst [vmem:[#allocation53_spill] sm:$0xff] %v6981_v44  ;;  %1502 = vmax.xlane.f32.xlu1 %v1501_v34  ;;  %1409 = vmax.xlane.f32.xlu0 %v1408_v41  ;;  %v1411_v45 = vmax.f32 %v6971_v39, %v6979_v43  ;;  %v1507_v46 = vmax.f32 %v6973_v40, %v6981_v44 }
 0x239   : > { %1505 = vmax.xlane.f32.xlu0 %v1504_v42  ;;  %1412 = vmax.xlane.f32.xlu1 %v1411_v45  ;;  %v6987_v47 = vpop.f32.mrb[20].mxu0  ;;  %v6989_v48 = vpop.f32.mrb[20].mxu1 }
 0x23a   : > { %9211 = vst [vmem:[#allocation54_spill] sm:$0xff] %v6989_v48  ;;  %v6991_v49 = vpop.f32.mrb[21].mxu0  ;;  %v6993_v56 = vpop.f32.mrb[21].mxu1 }
 0x23b   : > { %9212 = vst [vmem:[#allocation55_spill] sm:$0xff] %v6993_v56  ;;  %v6995_v57 = vpop.f32.mrb[22].mxu0  ;;  %v6997_v60 = vpop.f32.mrb[22].mxu1  ;;  %v1414_v61 = vmax.f32 %v6987_v47, %v6991_v49  ;;  %v1510_v4 = vmax.f32 %v6989_v48, %v6993_v56 }
 0x23c   : > { %9213 = vst [vmem:[#allocation56_spill] sm:$0xff] %v6997_v60  ;;  %v7003_v5 = vpop.f32.mrb[23].mxu0  ;;  %v7005_v8 = vpop.f32.mrb[23].mxu1 }
 0x23d   : > { %9214 = vst [vmem:[#allocation57_spill] sm:$0xff] %v7005_v8  ;;  %1508 = vmax.xlane.f32.xlu1 %v1507_v46  ;;  %1415 = vmax.xlane.f32.xlu0 %v1414_v61  ;;  %v1417_v9 = vmax.f32 %v6995_v57, %v7003_v5  ;;  %v1513_v16 = vmax.f32 %v6997_v60, %v7005_v8 }
 0x241   : > { %1511 = vmax.xlane.f32.xlu0 %v1510_v4  ;;  %1418 = vmax.xlane.f32.xlu1 %v1417_v9  ;;  %v7011_v17 = vpop.f32.mrb[24].mxu0  ;;  %v7013_v21 = vpop.f32.mrb[24].mxu1 }
 0x242   : > { %9215 = vst [vmem:[#allocation58_spill] sm:$0xff] %v7013_v21  ;;  %v7015_v22 = vpop.f32.mrb[25].mxu0  ;;  %v7017_v29 = vpop.f32.mrb[25].mxu1 }
 0x243   : > { %9216 = vst [vmem:[#allocation59_spill] sm:$0xff] %v7017_v29  ;;  %v7019_v30 = vpop.f32.mrb[26].mxu0  ;;  %v7021_v33 = vpop.f32.mrb[26].mxu1  ;;  %v1420_v34 = vmax.f32 %v7011_v17, %v7015_v22  ;;  %v1516_v41 = vmax.f32 %v7013_v21, %v7017_v29 }
 0x244   : > { %9217 = vst [vmem:[#allocation60_spill] sm:$0xff] %v7021_v33  ;;  %v7027_v42 = vpop.f32.mrb[27].mxu0  ;;  %v7029_v45 = vpop.f32.mrb[27].mxu1 }
 0x245   : > { %9218 = vst [vmem:[#allocation61_spill] sm:$0xff] %v7029_v45  ;;  %1514 = vmax.xlane.f32.xlu1 %v1513_v16  ;;  %1421 = vmax.xlane.f32.xlu0 %v1420_v34  ;;  %v1423_v46 = vmax.f32 %v7019_v30, %v7027_v42  ;;  %v1519_v61 = vmax.f32 %v7021_v33, %v7029_v45 }
 0x249   : > { %1517 = vmax.xlane.f32.xlu0 %v1516_v41  ;;  %1424 = vmax.xlane.f32.xlu1 %v1423_v46  ;;  %v7035_v4 = vpop.f32.mrb[28].mxu0  ;;  %v7037_v9 = vpop.f32.mrb[28].mxu1 }
 0x24a   : > { %9219 = vst [vmem:[#allocation62_spill] sm:$0xff] %v7037_v9  ;;  %v7039_v20 = vpop.f32.mrb[29].mxu0  ;;  %v7041_v29 = vpop.f32.mrb[29].mxu1 }
 0x24b   : > { %9220 = vst [vmem:[#allocation63_spill] sm:$0xff] %v7041_v29  ;;  %v7043_v21 = vpop.f32.mrb[30].mxu0  ;;  %v7045_v16 = vpop.f32.mrb[30].mxu1  ;;  %v1426_v34 = vmax.f32 %v7035_v4, %v7039_v20  ;;  %v1522_v45 = vmax.f32 %v7037_v9, %v7041_v29 }
 0x24c   : > { %9221 = vst [vmem:[#allocation64_spill] sm:$0xff] %v7043_v21  ;;  %9222 = vst [vmem:[#allocation65_spill] sm:$0xff] %v7045_v16  ;;  %v7051_v41 = vpop.f32.mrb[31].mxu0  ;;  %v7053_v46 = vpop.f32.mrb[31].mxu1 }
 0x24d   : > { %9223 = vst [vmem:[#allocation66_spill] sm:$0xff] %v7051_v41  ;;  %9224 = vst [vmem:[#allocation67_spill] sm:$0xff] %v7053_v46  ;;  %1520 = vmax.xlane.f32.xlu1 %v1519_v61  ;;  %1427 = vmax.xlane.f32.xlu0 %v1426_v34  ;;  %v1429_v33 = vmax.f32 %v7043_v21, %v7051_v41  ;;  %v1525_v56 = vmax.f32 %v7045_v16, %v7053_v46  ;;  %v7741_v21 = vld [vmem:[#allocation2 + $0xd0] sm:$0xff] }
 0x24e   : > { %9378 = vst [vmem:[#allocation218_spill] sm:$0xff] %v7741_v21 }
 0x251   : > { %1523 = vmax.xlane.f32.xlu0 %v1522_v45  ;;  %1430 = vmax.xlane.f32.xlu1 %v1429_v33  ;;  %v7059_v48 = vpop.f32.mrb[32].mxu0  ;;  %v7061_v8 = vpop.f32.mrb[32].mxu1 }
 0x252   : > { %9225 = vst [vmem:[#allocation68_spill] sm:$0xff] %v7061_v8  ;;  %v7063_v60 = vpop.f32.mrb[33].mxu0  ;;  %v7065_v29 = vpop.f32.mrb[33].mxu1 }
 0x253   : > { %9226 = vst [vmem:[#allocation69_spill] sm:$0xff] %v7065_v29  ;;  %v7067_v9 = vpop.f32.mrb[34].mxu0  ;;  %v7069_v61 = vpop.f32.mrb[34].mxu1  ;;  %v1432_v34 = vmax.f32 %v7059_v48, %v7063_v60  ;;  %v1528_v46 = vmax.f32 %v7061_v8, %v7065_v29 }
 0x254   : > { %9227 = vst [vmem:[#allocation70_spill] sm:$0xff] %v7067_v9  ;;  %9228 = vst [vmem:[#allocation71_spill] sm:$0xff] %v7069_v61  ;;  %v7075_v45 = vpop.f32.mrb[35].mxu0  ;;  %v7077_v33 = vpop.f32.mrb[35].mxu1 }
 0x255   : > { %9229 = vst [vmem:[#allocation72_spill] sm:$0xff] %v7075_v45  ;;  %9230 = vst [vmem:[#allocation73_spill] sm:$0xff] %v7077_v33  ;;  %1526 = vmax.xlane.f32.xlu1 %v1525_v56  ;;  %1433 = vmax.xlane.f32.xlu0 %v1432_v34  ;;  %v1435_v16 = vmax.f32 %v7067_v9, %v7075_v45  ;;  %v1531_v38 = vmax.f32 %v7069_v61, %v7077_v33  ;;  %v7528_v45 = vld [vmem:[#allocation2 + $0x70] sm:$0xff]  ;;  %v7545_v9 = vld [vmem:[#allocation2 + $0x78] sm:$0xff] }
 0x256   : > { %9330 = vst [vmem:[#allocation170_spill] sm:$0xff] %v7528_v45  ;;  %9334 = vst [vmem:[#allocation174_spill] sm:$0xff] %v7545_v9 }
 0x259   : > { %1529 = vmax.xlane.f32.xlu0 %v1528_v46  ;;  %1436 = vmax.xlane.f32.xlu1 %v1435_v16  ;;  %v7083_v36 = vpop.f32.mrb[36].mxu0  ;;  %v7085_v44 = vpop.f32.mrb[36].mxu1 }
 0x25a   : > { %9231 = vst [vmem:[#allocation74_spill] sm:$0xff] %v7083_v36  ;;  %9232 = vst [vmem:[#allocation75_spill] sm:$0xff] %v7085_v44  ;;  %v7087_v40 = vpop.f32.mrb[37].mxu0  ;;  %v7089_v29 = vpop.f32.mrb[37].mxu1 }
 0x25b   : > { %9233 = vst [vmem:[#allocation76_spill] sm:$0xff] %v7087_v40  ;;  %9234 = vst [vmem:[#allocation77_spill] sm:$0xff] %v7089_v29  ;;  %v7091_v8 = vpop.f32.mrb[38].mxu0  ;;  %v1438_v56 = vmax.f32 %v7083_v36, %v7087_v40  ;;  %v7095_v34 = vpop.f32.mrb[38].mxu1  ;;  %v1534_v33 = vmax.f32 %v7085_v44, %v7089_v29  ;;  %v7511_v40 = vld [vmem:[#allocation2 + $0x68] sm:$0xff] }
 0x25c   : > { %9235 = vst [vmem:[#allocation78_spill] sm:$0xff] %v7091_v8  ;;  %9236 = vst [vmem:[#allocation79_spill] sm:$0xff] %v7095_v34  ;;  %v7099_v46 = vpop.f32.mrb[39].mxu0  ;;  %v7101_v16 = vpop.f32.mrb[39].mxu1  ;;  %v7526_v36 = vld [vmem:[#allocation2 + $0x168] sm:$0xff] }
 0x25d   : > { %9237 = vst [vmem:[#allocation80_spill] sm:$0xff] %v7099_v46  ;;  %9238 = vst [vmem:[#allocation81_spill] sm:$0xff] %v7101_v16  ;;  %1532 = vmax.xlane.f32.xlu1 %v1531_v38  ;;  %1439 = vmax.xlane.f32.xlu0 %v1438_v56  ;;  %v1441_v61 = vmax.f32 %v7091_v8, %v7099_v46  ;;  %v1537_v26 = vmax.f32 %v7095_v34, %v7101_v16  ;;  %v7406_v46 = vld [vmem:[#allocation2 + $0x38] sm:$0xff]  ;;  %v7424_v8 = vld [vmem:[#allocation2 + $0x40] sm:$0xff] }
 0x25e   : > { %9307 = vst [vmem:[#allocation148_spill] sm:$0xff] %v7406_v46  ;;  %9310 = vst [vmem:[#allocation151_spill] sm:$0xff] %v7424_v8 }
 0x25f   : > { %9326 = vst [vmem:[#allocation166_spill] sm:$0xff] %v7511_v40  ;;  %9329 = vst [vmem:[#allocation169_spill] sm:$0xff] %v7526_v36 }
 0x261   : > { %1442 = vmax.xlane.f32.xlu1 %v1441_v61  ;;  %v7107_v24 = vpop.f32.mrb[40].mxu0  ;;  %1535 = vmax.xlane.f32.xlu0 %v1534_v33  ;;  %v7109_v32 = vpop.f32.mrb[40].mxu1 }
 0x262   : > { %9239 = vst [vmem:[#allocation82_spill] sm:$0xff] %v7107_v24  ;;  %9240 = vst [vmem:[#allocation83_spill] sm:$0xff] %v7109_v32  ;;  %v7111_v28 = vpop.f32.mrb[41].mxu0  ;;  %v7113_v29 = vpop.f32.mrb[41].mxu1 }
 0x263   : > { %9241 = vst [vmem:[#allocation84_spill] sm:$0xff] %v7111_v28  ;;  %9242 = vst [vmem:[#allocation85_spill] sm:$0xff] %v7113_v29  ;;  %v7115_v44 = vpop.f32.mrb[42].mxu0  ;;  %v7117_v38 = vpop.f32.mrb[42].mxu1  ;;  %v1444_v56 = vmax.f32 %v7107_v24, %v7111_v28  ;;  %v1540_v16 = vmax.f32 %v7109_v32, %v7113_v29 }
 0x264   : > { %9243 = vst [vmem:[#allocation86_spill] sm:$0xff] %v7115_v44  ;;  %9244 = vst [vmem:[#allocation87_spill] sm:$0xff] %v7117_v38  ;;  %v7123_v61 = vpop.f32.mrb[43].mxu0  ;;  %v7125_v34 = vpop.f32.mrb[43].mxu1 }
 0x265   : > { %9245 = vst [vmem:[#allocation88_spill] sm:$0xff] %v7123_v61  ;;  %9246 = vst [vmem:[#allocation89_spill] sm:$0xff] %v7125_v34  ;;  %1538 = vmax.xlane.f32.xlu1 %v1537_v26  ;;  %v1447_v33 = vmax.f32 %v7115_v44, %v7123_v61  ;;  %1445 = vmax.xlane.f32.xlu0 %v1444_v56  ;;  %v1543_v19 = vmax.f32 %v7117_v38, %v7125_v34 }
 0x269   : > { %1448 = vmax.xlane.f32.xlu1 %v1447_v33  ;;  %v7131_v15 = vpop.f32.mrb[44].mxu0  ;;  %1541 = vmax.xlane.f32.xlu0 %v1540_v16  ;;  %v7133_v7 = vpop.f32.mrb[44].mxu1 }
 0x26a   : > { %9247 = vst [vmem:[#allocation90_spill] sm:$0xff] %v7131_v15  ;;  %9248 = vst [vmem:[#allocation91_spill] sm:$0xff] %v7133_v7  ;;  %v7135_v3 = vpop.f32.mrb[45].mxu0  ;;  %v7137_v29 = vpop.f32.mrb[45].mxu1 }
 0x26b   : > { %9249 = vst [vmem:[#allocation92_spill] sm:$0xff] %v7135_v3  ;;  %9250 = vst [vmem:[#allocation93_spill] sm:$0xff] %v7137_v29  ;;  %v7139_v32 = vpop.f32.mrb[46].mxu0  ;;  %v7141_v26 = vpop.f32.mrb[46].mxu1  ;;  %v1450_v56 = vmax.f32 %v7131_v15, %v7135_v3  ;;  %v1546_v34 = vmax.f32 %v7133_v7, %v7137_v29  ;;  %v7274_v15 = vld [vmem:[#allocation2 + $0x108] sm:$0xff] }
 0x26c   : > { %9251 = vst [vmem:[#allocation94_spill] sm:$0xff] %v7139_v32  ;;  %9252 = vst [vmem:[#allocation95_spill] sm:$0xff] %v7141_v26  ;;  %v7147_v33 = vpop.f32.mrb[47].mxu0  ;;  %v7149_v38 = vpop.f32.mrb[47].mxu1 }
 0x26d   : > { %9253 = vst [vmem:[#allocation96_spill] sm:$0xff] %v7147_v33  ;;  %9254 = vst [vmem:[#allocation97_spill] sm:$0xff] %v7149_v38  ;;  %1544 = vmax.xlane.f32.xlu1 %v1543_v19  ;;  %v1453_v16 = vmax.f32 %v7139_v32, %v7147_v33  ;;  %1451 = vmax.xlane.f32.xlu0 %v1450_v56  ;;  %v1549_v13 = vmax.f32 %v7141_v26, %v7149_v38  ;;  %v5447_v33 = vld [vmem:[%s6490_s28 + $0x50] sm:$0xff]  }
 0x26e   : > { %9286 = vst [vmem:[#allocation127_spill] sm:$0xff] %v7274_v15 }
 0x271   : > { %1454 = vmax.xlane.f32.xlu1 %v1453_v16  ;;  %v7155_v11 = vpop.f32.mrb[48].mxu0  ;;  %v7157_v59 = vpop.f32.mrb[48].mxu1  ;;  %1547 = vmax.xlane.f32.xlu0 %v1546_v34 }
 0x272   : > { %9255 = vst [vmem:[#allocation98_spill] sm:$0xff] %v7155_v11  ;;  %9256 = vst [vmem:[#allocation99_spill] sm:$0xff] %v7157_v59  ;;  %v7159_v55 = vpop.f32.mrb[49].mxu0  ;;  %v7161_v29 = vpop.f32.mrb[49].mxu1 }
 0x273   : > { %9257 = vst [vmem:[#allocation100_spill] sm:$0xff] %v7159_v55  ;;  %9258 = vst [vmem:[#allocation101_spill] sm:$0xff] %v7161_v29  ;;  %v7163_v7 = vpop.f32.mrb[50].mxu0  ;;  %v1552_v19 = vmax.f32 %v7157_v59, %v7161_v29  ;;  %v7167_v1 = vpop.f32.mrb[50].mxu1  ;;  %v1456_v56 = vmax.f32 %v7155_v11, %v7159_v55 }
 0x274   : > { %9259 = vst [vmem:[#allocation102_spill] sm:$0xff] %v7163_v7  ;;  %9260 = vst [vmem:[#allocation103_spill] sm:$0xff] %v7167_v1  ;;  %v7171_v16 = vpop.f32.mrb[51].mxu0  ;;  %v7173_v38 = vpop.f32.mrb[51].mxu1 }
 0x275   : > { %9261 = vst [vmem:[#allocation104_spill] sm:$0xff] %v7171_v16  ;;  %9262 = vst [vmem:[#allocation105_spill] sm:$0xff] %v7173_v38  ;;  %1550 = vmax.xlane.f32.xlu1 %v1549_v13  ;;  %1457 = vmax.xlane.f32.xlu0 %v1456_v56  ;;  %v1459_v34 = vmax.f32 %v7163_v7, %v7171_v16  ;;  %v1555_v26 = vmax.f32 %v7167_v1, %v7173_v38  ;;  %v5437_v7 = vld [vmem:[%s6490_s28] sm:$0xff]   ;;  %v5438_v16 = vld [vmem:[%s6490_s28 + $0x8] sm:$0xff]  }
 0x276   : > { %3691 = vmatpush1.bf16.msra.mxu0 %v5437_v7  ;;  %v5439_v7 = vld [vmem:[%s6490_s28 + $0x10] sm:$0xff]  }
 0x279   : > { %1553 = vmax.xlane.f32.xlu1 %v1552_v19  ;;  %v7179_v29 = vpop.f32.mrb[52].mxu0  ;;  %v7181_v59 = vpop.f32.mrb[52].mxu1  ;;  %1556 = vmax.xlane.f32.xlu0 %v1555_v26 }
 0x27a   : > { %9263 = vst [vmem:[#allocation106_spill] sm:$0xff] %v7179_v29  ;;  %9264 = vst [vmem:[#allocation107_spill] sm:$0xff] %v7181_v59  ;;  %v7183_v55 = vpop.f32.mrb[53].mxu0  ;;  %v7185_v11 = vpop.f32.mrb[53].mxu1 }
 0x27b   : > { %9265 = vst [vmem:[#allocation108_spill] sm:$0xff] %v7183_v55  ;;  %9266 = vst [vmem:[#allocation109_spill] sm:$0xff] %v7185_v11  ;;  %v7187_v63 = vpop.f32.mrb[54].mxu0  ;;  %v1558_v13 = vmax.f32 %v7181_v59, %v7185_v11  ;;  %v1462_v56 = vmax.f32 %v7179_v29, %v7183_v55  ;;  %v7193_v38 = vpop.f32.mrb[54].mxu1  ;;  %v8979_v59 = vmov 1065369472  }
 0x27c   : > { %9267 = vst [vmem:[#allocation110_spill] sm:$0xff] %v7187_v63  ;;  %9268 = vst [vmem:[#allocation111_spill] sm:$0xff] %v7193_v38  ;;  %v7195_v19 = vpop.f32.mrb[55].mxu0  ;;  %v7197_v1 = vpop.f32.mrb[55].mxu1  ;;  %2601 = vmatpush1.bf16.msra.mxu1 %v8979_v59  ;;  %v9273_v29 = vmov 0  }
 0x27d   : > { %9269 = vst [vmem:[#allocation112_spill] sm:$0xff] %v7195_v19  ;;  %9270 = vst [vmem:[#allocation113_spill] sm:$0xff] %v7197_v1  ;;  %1460 = vmax.xlane.f32.xlu1 %v1459_v34  ;;  %1463 = vmax.xlane.f32.xlu0 %v1462_v56  ;;  %v1465_v26 = vmax.f32 %v7187_v63, %v7195_v19  ;;  %v9276_v19 = vmov 1065369472  }
 0x27e   : > { %2602 = vmatprep.subr.bf16.mxu1 %v9273_v29  ;;  %3692 = vmatprep.subr.bf16.mxu0 %v9273_v29 }
 0x27f   : > { %3693 = vmatpush1.bf16.msra.mxu0 %v5438_v16 }
 0x280   : > { %2603 = vmatpush1.bf16.msra.mxu1 %v9276_v19  ;;  %3694 = vmatprep.subr.bf16.mxu0 %v9273_v29 }
 0x281   : > { %1559 = vmax.xlane.f32.xlu1 %v1558_v13  ;;  %v7204_v11 = vpop.f32.mrb[56].mxu0  ;;  %2604 = vmatprep.subr.bf16.mxu1 %v9273_v29 }
 0x282   : > { %9271 = vst [vmem:[#allocation114_spill] sm:$0xff] %v7204_v11  ;;  %v7207_v55 = vpop.f32.mrb[57].mxu0 }
 0x283   : > { %9272 = vst [vmem:[#allocation115_spill] sm:$0xff] %v7207_v55  ;;  %v7210_v34 = vpop.f32.mrb[58].mxu0  ;;  %v1468_v56 = vmax.f32 %v7204_v11, %v7207_v55  ;;  %v7226_v11 = vpop.f32.mrb[56].mxu1  ;;  %3695 = vmatpush1.bf16.msra.mxu0 %v5439_v7 }
 0x284   : > { %9274 = vst [vmem:[#allocation116_spill] sm:$0xff] %v7210_v34  ;;  %v7216_v13 = vpop.f32.mrb[59].mxu0  ;;  %9278 = vst [vmem:[#allocation119_spill] sm:$0xff] %v7226_v11  ;;  %2605 = vmatpush1.bf16.msra.mxu1 %v9276_v19  ;;  %3696 = vmatprep.subr.bf16.mxu0 %v9273_v29 }
 0x285   : > { %9275 = vst [vmem:[#allocation117_spill] sm:$0xff] %v7216_v13  ;;  %1466 = vmax.xlane.f32.xlu1 %v1465_v26  ;;  %1469 = vmax.xlane.f32.xlu0 %v1468_v56  ;;  %v1471_v59 = vmax.f32 %v7210_v34, %v7216_v13  ;;  %v7231_v26 = vpop.f32.mrb[57].mxu1 }
 0x286   : > { %9280 = vst [vmem:[#allocation121_spill] sm:$0xff] %v7231_v26  ;;  %v7237_v13 = vpop.f32.mrb[58].mxu1  ;;  %2606 = vmatprep.subr.bf16.mxu1 %v9273_v29 }
 0x287   : > { %9282 = vst [vmem:[#allocation123_spill] sm:$0xff] %v7237_v13  ;;  %v7244_v3 = vpop.f32.mrb[59].mxu1 }
 0x288   : > { %9284 = vst [vmem:[#allocation125_spill] sm:$0xff] %v7244_v3  ;;  %2607 = vmatpush1.bf16.msra.mxu1 %v9276_v19 }
 0x289   : > { %1472 = vmax.xlane.f32.xlu1 %v1471_v59  ;;  %v7224_v55 = vpop.f32.mrb[60].mxu0  ;;  %v5440_v59 = vld [vmem:[%s6490_s28 + $0x18] sm:$0xff]   ;;  %2608 = vmatprep.subr.bf16.mxu1 %v9273_v29 }
 0x28a   : > { %9277 = vst [vmem:[#allocation118_spill] sm:$0xff] %v7224_v55  ;;  %v7228_v63 = vpop.f32.mrb[61].mxu0  ;;  %3697 = vmatpush1.bf16.msra.mxu0 %v5440_v59  ;;  %v5443_v59 = vld [vmem:[%s6490_s28 + $0x30] sm:$0xff]  }
 0x28b   : > { %9279 = vst [vmem:[#allocation120_spill] sm:$0xff] %v7228_v63  ;;  %v7233_v56 = vpop.f32.mrb[62].mxu0  ;;  %v1474_v16 = vmax.f32 %v7224_v55, %v7228_v63  ;;  %v5441_v55 = vld [vmem:[%s6490_s28 + $0x20] sm:$0xff]   ;;  %3698 = vmatprep.subr.bf16.mxu0 %v9273_v29 }
 0x28c   : > { %9281 = vst [vmem:[#allocation122_spill] sm:$0xff] %v7233_v56  ;;  %v7242_v34 = vpop.f32.mrb[63].mxu0  ;;  %2609 = vmatpush1.bf16.msra.mxu1 %v9276_v19 }
 0x28d   : > { %9283 = vst [vmem:[#allocation124_spill] sm:$0xff] %v7242_v34  ;;  %1475 = vmax.xlane.f32.xlu0 %v1474_v16  ;;  %v1477_v7 = vmax.f32 %v7233_v56, %v7242_v34  ;;  %2610 = vmatprep.subr.bf16.mxu1 %v9273_v29  ;;  %v5442_v16 = vld [vmem:[%s6490_s28 + $0x28] sm:$0xff]   ;;  %v7283_v56 = vld [vmem:[#allocation2 + $0x100] sm:$0xff] }
 0x28e   : > { %3699 = vmatpush1.bf16.msra.mxu0 %v5441_v55  ;;  %v5444_v55 = vld [vmem:[%s6490_s28 + $0x38] sm:$0xff]   ;;  %9288 = vst [vmem:[#allocation129_spill] sm:$0xff] %v7283_v56 }
 0x28f   : > { %1478 = vmax.xlane.f32.xlu1 %v1477_v7  ;;  %3700 = vmatprep.subr.bf16.mxu0 %v9273_v29  ;;  %v5445_v7 = vld [vmem:[%s6490_s28 + $0x40] sm:$0xff]  }
 0x290   : > { %2611 = vmatpush1.bf16.msra.mxu1 %v9276_v19 }
 0x291   : > { %2612 = vmatprep.subr.bf16.mxu1 %v9273_v29 }
 0x292   : > { %3701 = vmatpush1.bf16.msra.mxu0 %v5442_v16  ;;  %v7272_v16 = vld [vmem:[#allocation2] sm:$0xff] }
 0x293   : > { %3702 = vmatprep.subr.bf16.mxu0 %v9273_v29  ;;  %9285 = vst [vmem:[#allocation126_spill] sm:$0xff] %v7272_v16 }
 0x294   : > { %2613 = vmatpush1.bf16.msra.mxu1 %v9276_v19 }
 0x295   : > { %2614 = vmatprep.subr.bf16.mxu1 %v9273_v29 }
 0x296   : > { %3703 = vmatpush1.bf16.msra.mxu0 %v5443_v59 }
 0x297   : > { %3704 = vmatprep.subr.bf16.mxu0 %v9273_v29 }
 0x298   : > { %2615 = vmatpush1.bf16.msra.mxu1 %v9276_v19 }
 0x299   : > { %2616 = vmatprep.subr.bf16.mxu1 %v9273_v29 }
 0x29a   : > { %3705 = vmatpush1.bf16.msra.mxu0 %v5444_v55  ;;  %v5446_v55 = vld [vmem:[%s6490_s28 + $0x48] sm:$0xff]  }
 0x29b   : > { %3706 = vmatprep.subr.bf16.mxu0 %v9273_v29 }
 0x29c   : > { %2617 = vmatpush1.bf16.msra.mxu1 %v9276_v19 }
 0x29d   : > { %2618 = vmatprep.subr.bf16.mxu1 %v9273_v29 }
 0x29e   : > { %3707 = vmatpush1.bf16.msra.mxu0 %v5445_v7 }
 0x29f   : > { %3708 = vmatprep.subr.bf16.mxu0 %v9273_v29 }
 0x2a0   : > { %2619 = vmatpush1.bf16.msra.mxu1 %v9276_v19 }
 0x2a1   : > { %2620 = vmatprep.subr.bf16.mxu1 %v9273_v29 }
 0x2a2   : > { %v1386_v63 = vpop.xlane.xlu0 %1385  ;;  %3709 = vmatpush1.bf16.msra.mxu0 %v5446_v55 }
 0x2a3   : > { %v7278_v59 = vmax.f32 %v7272_v16, %v1386_v63  ;;  %3710 = vmatprep.subr.bf16.mxu0 %v9273_v29  ;;  %v5448_v16 = vld [vmem:[%s6490_s28 + $0x58] sm:$0xff]  }
 0x2a4   : > { %v1485_v34 = vpop.xlane.xlu1 %1484  ;;  %2621 = vmatpush1.bf16.msra.mxu1 %v9276_v19 }
 0x2a5   : > { %9287 = vst [vmem:[#allocation128_spill] sm:$0xff] %v7278_v59  ;;  %4107 = vst.msk [vmem:[#allocation2] sm:$0xff] %vm3081_vm1, %v7278_v59  ;;  %v7290_v7 = vmax.f32 %v7274_v15, %v1485_v34  ;;  %1834 = vperm.xlu0 %5387, %v7278_v59   ;;  %v7302_v34 = vld [vmem:[#allocation2 + $0x8] sm:$0xff]  ;;  %v7304_v15 = vld [vmem:[#allocation2 + $0x10] sm:$0xff]  ;;  %2622 = vmatprep.subr.bf16.mxu1 %v9273_v29 }
 0x2a6   : > { %v1482_v63 = vpop.xlane.xlu0 %1481  ;;  %9290 = vst [vmem:[#allocation131_spill] sm:$0xff] %v7302_v34  ;;  %9291 = vst [vmem:[#allocation132_spill] sm:$0xff] %v7304_v15  ;;  %3711 = vmatpush1.bf16.msra.mxu0 %v5447_v33  ;;  %v5449_v33 = vld [vmem:[%s6490_s28 + $0x60] sm:$0xff]  }
 0x2a7   : > { %4140 = vst.msk [vmem:[#allocation2 + $0x108] sm:$0xff] %vm3081_vm1, %v7290_v7  ;;  %v7297_v32 = vmax.f32 %v7283_v56, %v1482_v63  ;;  %3712 = vmatprep.subr.bf16.mxu0 %v9273_v29 }
 0x2a8   : > { %2623 = vmatpush1.bf16.msra.mxu1 %v9276_v19 }
 0x2a9   : > { %9289 = vst [vmem:[#allocation130_spill] sm:$0xff] %v7297_v32  ;;  %4139 = vst.msk [vmem:[#allocation2 + $0x100] sm:$0xff] %vm3081_vm1, %v7297_v32  ;;  %2624 = vmatprep.subr.bf16.mxu1 %v9273_v29 }
 0x2aa   : > { %v1389_v59 = vpop.xlane.xlu0 %1388  ;;  %v1392_v55 = vpop.xlane.xlu1 %1391  ;;  %3713 = vmatpush1.bf16.msra.mxu0 %v5448_v16  ;;  %v5450_v16 = vld [vmem:[%s6490_s28 + $0x68] sm:$0xff]  }
 0x2ab   : > { %v7311_v63 = vmax.f32 %v7302_v34, %v1389_v59  ;;  %v7314_v56 = vmax.f32 %v7304_v15, %v1392_v55  ;;  %3714 = vmatprep.subr.bf16.mxu0 %v9273_v29  ;;  %v7341_v15 = vld [vmem:[#allocation2 + $0x118] sm:$0xff] }
 0x2ac   : > { %9297 = vst [vmem:[#allocation138_spill] sm:$0xff] %v7341_v15  ;;  %2625 = vmatpush1.bf16.msra.mxu1 %v9276_v19 }
 0x2ad   : > { %9292 = vst [vmem:[#allocation133_spill] sm:$0xff] %v7311_v63  ;;  %9293 = vst [vmem:[#allocation134_spill] sm:$0xff] %v7314_v56  ;;  %1839 = vperm.xlu1 %5388, %v7311_v63   ;;  %2626 = vmatprep.subr.bf16.mxu1 %v9273_v29 }
 0x2ae   : > { %4108 = vst.msk [vmem:[#allocation2 + $0x8] sm:$0xff] %vm3081_vm1, %v7311_v63  ;;  %4109 = vst.msk [vmem:[#allocation2 + $0x10] sm:$0xff] %vm3081_vm1, %v7314_v56  ;;  %v1488_v59 = vpop.xlane.xlu0 %1487  ;;  %v1395_v55 = vpop.xlane.xlu1 %1394  ;;  %v7343_v63 = vld [vmem:[#allocation2 + $0x20] sm:$0xff]  ;;  %3715 = vmatpush1.bf16.msra.mxu0 %v5449_v33  ;;  %v5451_v33 = vld [vmem:[%s6490_s28 + $0x70] sm:$0xff]  }
 0x2af   : > { %v7333_v44 = vmax.f32 %v7318_v53, %v1488_v59  ;;  %v7336_v61 = vmax.f32 %v7320_v51, %v1395_v55  ;;  %9298 = vst [vmem:[#allocation139_spill] sm:$0xff] %v7343_v63  ;;  %3716 = vmatprep.subr.bf16.mxu0 %v9273_v29  ;;  %v7362_v51 = vld [vmem:[#allocation2 + $0x120] sm:$0xff] }
 0x2b0   : > { %9300 = vst [vmem:[#allocation141_spill] sm:$0xff] %v7362_v51  ;;  %2627 = vmatpush1.bf16.msra.mxu1 %v9276_v19 }
 0x2b1   : > { %9296 = vst [vmem:[#allocation137_spill] sm:$0xff] %v7336_v61  ;;  %4141 = vst.msk [vmem:[#allocation2 + $0x110] sm:$0xff] %vm3081_vm1, %v7333_v44  ;;  %1844 = vperm.xlu1 %5388, %v7314_v56   ;;  %v7364_v56 = vld [vmem:[#allocation2 + $0x28] sm:$0xff]  ;;  %2628 = vmatprep.subr.bf16.mxu1 %v9273_v29 }
 0x2b2   : > { %4110 = vst.msk [vmem:[#allocation2 + $0x18] sm:$0xff] %vm3081_vm1, %v7336_v61  ;;  %v1491_v59 = vpop.xlane.xlu1 %1490  ;;  %v1398_v55 = vpop.xlane.xlu0 %1397  ;;  %9301 = vst [vmem:[#allocation142_spill] sm:$0xff] %v7364_v56  ;;  %3717 = vmatpush1.bf16.msra.mxu0 %v5450_v16  ;;  %v5452_v16 = vld [vmem:[%s6490_s28 + $0x78] sm:$0xff]  }
 0x2b3   : > { %v7354_v53 = vmax.f32 %v7341_v15, %v1491_v59  ;;  %v7357_v34 = vmax.f32 %v7343_v63, %v1398_v55  ;;  %3718 = vmatprep.subr.bf16.mxu0 %v9273_v29  ;;  %v7383_v63 = vld [vmem:[#allocation2 + $0x128] sm:$0xff] }
 0x2b4   : > { %9303 = vst [vmem:[#allocation144_spill] sm:$0xff] %v7383_v63  ;;  %2629 = vmatpush1.bf16.msra.mxu1 %v9276_v19 }
 0x2b5   : > { %9299 = vst [vmem:[#allocation140_spill] sm:$0xff] %v7357_v34  ;;  %4142 = vst.msk [vmem:[#allocation2 + $0x118] sm:$0xff] %vm3081_vm1, %v7354_v53  ;;  %1849 = vperm.xlu1 %5388, %v7336_v61   ;;  %v7385_v61 = vld [vmem:[#allocation2 + $0x30] sm:$0xff]  ;;  %2630 = vmatprep.subr.bf16.mxu1 %v9273_v29 }
 0x2b6   : > { %4111 = vst.msk [vmem:[#allocation2 + $0x20] sm:$0xff] %vm3081_vm1, %v7357_v34  ;;  %v1494_v59 = vpop.xlane.xlu0 %1493  ;;  %v1401_v55 = vpop.xlane.xlu1 %1400  ;;  %9304 = vst [vmem:[#allocation145_spill] sm:$0xff] %v7385_v61  ;;  %3719 = vmatpush1.bf16.msra.mxu0 %v5451_v33  ;;  %v7444_v33 = vld [vmem:[#allocation2 + $0x48] sm:$0xff] }
 0x2b7   : > { %v7375_v15 = vmax.f32 %v7362_v51, %v1494_v59  ;;  %v7378_v28 = vmax.f32 %v7364_v56, %v1401_v55  ;;  %3720 = vmatprep.subr.bf16.mxu0 %v9273_v29  ;;  %v7404_v56 = vld [vmem:[#allocation2 + $0x130] sm:$0xff]  ;;  %9314 = vst [vmem:[#allocation154_spill] sm:$0xff] %v7444_v33 }
 0x2b8   : > { %9306 = vst [vmem:[#allocation147_spill] sm:$0xff] %v7404_v56  ;;  %2631 = vmatpush1.bf16.msra.mxu1 %v9276_v19 }
 0x2b9   : > { %9302 = vst [vmem:[#allocation143_spill] sm:$0xff] %v7378_v28  ;;  %4143 = vst.msk [vmem:[#allocation2 + $0x120] sm:$0xff] %vm3081_vm1, %v7375_v15  ;;  %1854 = vperm.xlu1 %5388, %v7357_v34   ;;  %v7422_v34 = vld [vmem:[#allocation2 + $0x138] sm:$0xff] }
 0x2ba   : > { %4112 = vst.msk [vmem:[#allocation2 + $0x28] sm:$0xff] %vm3081_vm1, %v7378_v28  ;;  %v1497_v59 = vpop.xlane.xlu1 %1496  ;;  %v1404_v55 = vpop.xlane.xlu0 %1403  ;;  %3721 = vmatpush1.bf16.msra.mxu0 %v5452_v16  ;;  %9309 = vst [vmem:[#allocation150_spill] sm:$0xff] %v7422_v34 }
 0x2bb   : > { %v7396_v51 = vmax.f32 %v7383_v63, %v1497_v59  ;;  %v7399_v24 = vmax.f32 %v7385_v61, %v1404_v55  ;;  %v7442_v61 = vld [vmem:[#allocation2 + $0x140] sm:$0xff] }
 0x2bc   : > { %9313 = vst [vmem:[#allocation153_spill] sm:$0xff] %v7442_v61 }
 0x2bd   : > { %9305 = vst [vmem:[#allocation146_spill] sm:$0xff] %v7399_v24  ;;  %4144 = vst.msk [vmem:[#allocation2 + $0x128] sm:$0xff] %vm3081_vm1, %v7396_v51  ;;  %1859 = vperm.xlu1 %5388, %v7378_v28   ;;  %v7495_v28 = vld [vmem:[#allocation2 + $0x60] sm:$0xff] }
 0x2be   : > { %4113 = vst.msk [vmem:[#allocation2 + $0x30] sm:$0xff] %vm3081_vm1, %v7399_v24  ;;  %v1500_v59 = vpop.xlane.xlu0 %1499  ;;  %v1407_v55 = vpop.xlane.xlu1 %1406  ;;  %9323 = vst [vmem:[#allocation163_spill] sm:$0xff] %v7495_v28 }
 0x2bf   : > { %v7417_v29 = vmax.f32 %v7404_v56, %v1500_v59  ;;  %v7420_v63 = vmax.f32 %v7406_v46, %v1407_v55  ;;  %v9312_v56 = vmax.f32 %v7193_v38, %v7197_v1  ;;  %v7459_v1 = vld [vmem:[#allocation2 + $0x148] sm:$0xff]  ;;  %v7461_v38 = vld [vmem:[#allocation2 + $0x50] sm:$0xff] }
 0x2c0   : > { %9316 = vst [vmem:[#allocation156_spill] sm:$0xff] %v7459_v1  ;;  %9317 = vst [vmem:[#allocation157_spill] sm:$0xff] %v7461_v38 }
 0x2c1   : > { %9308 = vst [vmem:[#allocation149_spill] sm:$0xff] %v7420_v63  ;;  %4145 = vst.msk [vmem:[#allocation2 + $0x130] sm:$0xff] %vm3081_vm1, %v7417_v29  ;;  %1864 = vperm.xlu1 %5388, %v7399_v24   ;;  %v7478_v24 = vld [vmem:[#allocation2 + $0x58] sm:$0xff] }
 0x2c2   : > { %4114 = vst.msk [vmem:[#allocation2 + $0x38] sm:$0xff] %vm3081_vm1, %v7420_v63  ;;  %v1503_v19 = vpop.xlane.xlu1 %1502  ;;  %v1410_v16 = vpop.xlane.xlu0 %1409  ;;  %9320 = vst [vmem:[#allocation160_spill] sm:$0xff] %v7478_v24 }
 0x2c3   : > { %v7434_v59 = vmax.f32 %v7422_v34, %v1503_v19  ;;  %v7437_v55 = vmax.f32 %v7424_v8, %v1410_v16 }
 0x2c4   : > { %1562 = vmax.xlane.f32.xlu0 %v9312_v56 }
 0x2c5   : > { %9311 = vst [vmem:[#allocation152_spill] sm:$0xff] %v7437_v55  ;;  %4146 = vst.msk [vmem:[#allocation2 + $0x138] sm:$0xff] %vm3081_vm1, %v7434_v59  ;;  %1869 = vperm.xlu1 %5388, %v7420_v63   ;;  %v7476_v63 = vld [vmem:[#allocation2 + $0x150] sm:$0xff] }
 0x2c6   : > { %4115 = vst.msk [vmem:[#allocation2 + $0x40] sm:$0xff] %vm3081_vm1, %v7437_v55  ;;  %v1506_v19 = vpop.xlane.xlu0 %1505  ;;  %v1413_v16 = vpop.xlane.xlu1 %1412  ;;  %9319 = vst [vmem:[#allocation159_spill] sm:$0xff] %v7476_v63 }
 0x2c7   : > { %v7454_v34 = vmax.f32 %v7442_v61, %v1506_v19  ;;  %v7457_v56 = vmax.f32 %v7444_v33, %v1413_v16 }
 0x2c9   : > { %9315 = vst [vmem:[#allocation155_spill] sm:$0xff] %v7457_v56  ;;  %4147 = vst.msk [vmem:[#allocation2 + $0x140] sm:$0xff] %vm3081_vm1, %v7454_v34  ;;  %1874 = vperm.xlu1 %5388, %v7437_v55   ;;  %v7493_v55 = vld [vmem:[#allocation2 + $0x158] sm:$0xff] }
 0x2ca   : > { %4116 = vst.msk [vmem:[#allocation2 + $0x48] sm:$0xff] %vm3081_vm1, %v7457_v56  ;;  %v1509_v19 = vpop.xlane.xlu1 %1508  ;;  %v1416_v61 = vpop.xlane.xlu0 %1415  ;;  %9322 = vst [vmem:[#allocation162_spill] sm:$0xff] %v7493_v55 }
 0x2cb   : > { %v7471_v16 = vmax.f32 %v7459_v1, %v1509_v19  ;;  %v7474_v8 = vmax.f32 %v7461_v38, %v1416_v61 }
 0x2cd   : > { %9318 = vst [vmem:[#allocation158_spill] sm:$0xff] %v7474_v8  ;;  %4148 = vst.msk [vmem:[#allocation2 + $0x148] sm:$0xff] %vm3081_vm1, %v7471_v16  ;;  %1884 = vperm.xlu1 %5388, %v7474_v8  }
 0x2ce   : > { %4117 = vst.msk [vmem:[#allocation2 + $0x50] sm:$0xff] %vm3081_vm1, %v7474_v8  ;;  %v1512_v19 = vpop.xlane.xlu0 %1511  ;;  %v1419_v1 = vpop.xlane.xlu1 %1418 }
 0x2cf   : > { %v7488_v61 = vmax.f32 %v7476_v63, %v1512_v19  ;;  %v7491_v33 = vmax.f32 %v7478_v24, %v1419_v1  ;;  %v7509_v63 = vld [vmem:[#allocation2 + $0x160] sm:$0xff] }
 0x2d0   : > { %9325 = vst [vmem:[#allocation165_spill] sm:$0xff] %v7509_v63 }
 0x2d1   : > { %9321 = vst [vmem:[#allocation161_spill] sm:$0xff] %v7491_v33  ;;  %4149 = vst.msk [vmem:[#allocation2 + $0x150] sm:$0xff] %vm3081_vm1, %v7488_v61 }
 0x2d2   : > { %4118 = vst.msk [vmem:[#allocation2 + $0x58] sm:$0xff] %vm3081_vm1, %v7491_v33  ;;  %v1515_v8 = vpop.xlane.xlu1 %1514  ;;  %v1422_v38 = vpop.xlane.xlu0 %1421 }
 0x2d3   : > { %v7504_v19 = vmax.f32 %v7493_v55, %v1515_v8  ;;  %v7507_v1 = vmax.f32 %v7495_v28, %v1422_v38 }
 0x2d5   : > { %9324 = vst [vmem:[#allocation164_spill] sm:$0xff] %v7507_v1  ;;  %4150 = vst.msk [vmem:[#allocation2 + $0x158] sm:$0xff] %vm3081_vm1, %v7504_v19  ;;  %1894 = vperm.xlu1 %5388, %v7507_v1  }
 0x2d6   : > { %4119 = vst.msk [vmem:[#allocation2 + $0x60] sm:$0xff] %vm3081_vm1, %v7507_v1  ;;  %v1518_v8 = vpop.xlane.xlu0 %1517  ;;  %v1425_v55 = vpop.xlane.xlu1 %1424 }
 0x2d7   : > { %v7521_v38 = vmax.f32 %v7509_v63, %v1518_v8  ;;  %v7524_v24 = vmax.f32 %v7511_v40, %v1425_v55  ;;  %v7543_v63 = vld [vmem:[#allocation2 + $0x170] sm:$0xff] }
 0x2d8   : > { %9333 = vst [vmem:[#allocation173_spill] sm:$0xff] %v7543_v63 }
 0x2d9   : > { %9327 = vst [vmem:[#allocation167_spill] sm:$0xff] %v7521_v38  ;;  %9328 = vst [vmem:[#allocation168_spill] sm:$0xff] %v7524_v24 }
 0x2da   : > { %4151 = vst.msk [vmem:[#allocation2 + $0x160] sm:$0xff] %vm3081_vm1, %v7521_v38  ;;  %4120 = vst.msk [vmem:[#allocation2 + $0x68] sm:$0xff] %vm3081_vm1, %v7524_v24  ;;  %v1521_v1 = vpop.xlane.xlu1 %1520  ;;  %v1428_v28 = vpop.xlane.xlu0 %1427  ;;  %1879 = vperm.xlu0 %5387, %v7457_v56   ;;  %v7561_v56 = vld [vmem:[#allocation2 + $0x178] sm:$0xff]  ;;  %v7563_v38 = vld [vmem:[#allocation2 + $0x80] sm:$0xff] }
 0x2db   : > { %v7538_v55 = vmax.f32 %v7526_v36, %v1521_v1  ;;  %v7541_v8 = vmax.f32 %v7528_v45, %v1428_v28  ;;  %9337 = vst [vmem:[#allocation177_spill] sm:$0xff] %v7561_v56  ;;  %9338 = vst [vmem:[#allocation178_spill] sm:$0xff] %v7563_v38 }
 0x2dd   : > { %9331 = vst [vmem:[#allocation171_spill] sm:$0xff] %v7538_v55  ;;  %9332 = vst [vmem:[#allocation172_spill] sm:$0xff] %v7541_v8  ;;  %1904 = vperm.xlu1 %5388, %v7541_v8  }
 0x2de   : > { %4152 = vst.msk [vmem:[#allocation2 + $0x168] sm:$0xff] %vm3081_vm1, %v7538_v55  ;;  %4121 = vst.msk [vmem:[#allocation2 + $0x70] sm:$0xff] %vm3081_vm1, %v7541_v8  ;;  %v1524_v1 = vpop.xlane.xlu0 %1523  ;;  %v1431_v36 = vpop.xlane.xlu1 %1430  ;;  %1889 = vperm.xlu0 %5387, %v7491_v33   ;;  %v7580_v33 = vld [vmem:[#allocation2 + $0x88] sm:$0xff] }
 0x2df   : > { %v7556_v28 = vmax.f32 %v7543_v63, %v1524_v1  ;;  %v7559_v40 = vmax.f32 %v7545_v9, %v1431_v36  ;;  %v7578_v63 = vld [vmem:[#allocation2 + $0x180] sm:$0xff]  ;;  %9342 = vst [vmem:[#allocation182_spill] sm:$0xff] %v7580_v33 }
 0x2e0   : > { %9341 = vst [vmem:[#allocation181_spill] sm:$0xff] %v7578_v63 }
 0x2e1   : > { %9335 = vst [vmem:[#allocation175_spill] sm:$0xff] %v7556_v28  ;;  %9336 = vst [vmem:[#allocation176_spill] sm:$0xff] %v7559_v40 }
 0x2e2   : > { %4153 = vst.msk [vmem:[#allocation2 + $0x170] sm:$0xff] %vm3081_vm1, %v7556_v28  ;;  %4122 = vst.msk [vmem:[#allocation2 + $0x78] sm:$0xff] %vm3081_vm1, %v7559_v40  ;;  %v1527_v8 = vpop.xlane.xlu1 %1526  ;;  %v1434_v45 = vpop.xlane.xlu0 %1433  ;;  %1899 = vperm.xlu0 %5387, %v7524_v24   ;;  %v7596_v24 = vld [vmem:[#allocation2 + $0x188] sm:$0xff] }
 0x2e3   : > { %v7573_v36 = vmax.f32 %v7561_v56, %v1527_v8  ;;  %v7576_v1 = vmax.f32 %v7563_v38, %v1434_v45  ;;  %9345 = vst [vmem:[#allocation185_spill] sm:$0xff] %v7596_v24 }
 0x2e5   : > { %9339 = vst [vmem:[#allocation179_spill] sm:$0xff] %v7573_v36  ;;  %9340 = vst [vmem:[#allocation180_spill] sm:$0xff] %v7576_v1  ;;  %1914 = vperm.xlu1 %5388, %v7576_v1  }
 0x2e6   : > { %4154 = vst.msk [vmem:[#allocation2 + $0x178] sm:$0xff] %vm3081_vm1, %v7573_v36  ;;  %4123 = vst.msk [vmem:[#allocation2 + $0x80] sm:$0xff] %vm3081_vm1, %v7576_v1  ;;  %v1530_v8 = vpop.xlane.xlu0 %1529  ;;  %v1437_v56 = vpop.xlane.xlu1 %1436  ;;  %1909 = vperm.xlu0 %5387, %v7559_v40   ;;  %v7598_v36 = vld [vmem:[#allocation2 + $0x90] sm:$0xff]  ;;  %v7615_v40 = vld [vmem:[#allocation2 + $0x98] sm:$0xff] }
 0x2e7   : > { %v7591_v45 = vmax.f32 %v7578_v63, %v1530_v8  ;;  %v7594_v9 = vmax.f32 %v7580_v33, %v1437_v56  ;;  %9346 = vst [vmem:[#allocation186_spill] sm:$0xff] %v7598_v36  ;;  %v7613_v63 = vpop.f32.mrb[60].mxu1  ;;  %9350 = vst [vmem:[#allocation190_spill] sm:$0xff] %v7615_v40 }
 0x2e8   : > { %9349 = vst [vmem:[#allocation189_spill] sm:$0xff] %v7613_v63  ;;  %v7619_v46 = vpop.f32.mrb[61].mxu1  ;;  %v7693_v63 = vld [vmem:[#allocation2 + $0x1b0] sm:$0xff] }
 0x2e9   : > { %9343 = vst [vmem:[#allocation183_spill] sm:$0xff] %v7591_v45  ;;  %9344 = vst [vmem:[#allocation184_spill] sm:$0xff] %v7594_v9 }
 0x2ea   : > { %4155 = vst.msk [vmem:[#allocation2 + $0x180] sm:$0xff] %vm3081_vm1, %v7591_v45  ;;  %4124 = vst.msk [vmem:[#allocation2 + $0x88] sm:$0xff] %vm3081_vm1, %v7594_v9  ;;  %v1533_v1 = vpop.xlane.xlu1 %1532  ;;  %v1440_v38 = vpop.xlane.xlu0 %1439  ;;  %1919 = vperm.xlu0 %5387, %v7594_v9   ;;  %v7617_v45 = vld [vmem:[#allocation2 + $0x190] sm:$0xff]  ;;  %v7640_v9 = vld [vmem:[#allocation2 + $0xa0] sm:$0xff] }
 0x2eb   : > { %v7608_v56 = vmax.f32 %v7596_v24, %v1533_v1  ;;  %v7611_v8 = vmax.f32 %v7598_v36, %v1440_v38  ;;  %9351 = vst [vmem:[#allocation191_spill] sm:$0xff] %v7617_v45  ;;  %9352 = vst [vmem:[#allocation192_spill] sm:$0xff] %v7619_v46  ;;  %v7628_v38 = vpop.f32.mrb[62].mxu1  ;;  %v7661_v46 = vld [vmem:[#allocation2 + $0x1a0] sm:$0xff] }
 0x2ec   : > { %9353 = vst [vmem:[#allocation193_spill] sm:$0xff] %v7628_v38  ;;  %v7636_v55 = vpop.f32.mrb[63].mxu1  ;;  %9358 = vst [vmem:[#allocation198_spill] sm:$0xff] %v7640_v9  ;;  %v7725_v38 = vld [vmem:[#allocation2 + $0x1c8] sm:$0xff] }
 0x2ed   : > { %9347 = vst [vmem:[#allocation187_spill] sm:$0xff] %v7608_v56  ;;  %9348 = vst [vmem:[#allocation188_spill] sm:$0xff] %v7611_v8  ;;  %1924 = vperm.xlu1 %5388, %v7611_v8  }
 0x2ee   : > { %4156 = vst.msk [vmem:[#allocation2 + $0x188] sm:$0xff] %vm3081_vm1, %v7608_v56  ;;  %4125 = vst.msk [vmem:[#allocation2 + $0x90] sm:$0xff] %vm3081_vm1, %v7611_v8  ;;  %v1443_v1 = vpop.xlane.xlu1 %1442  ;;  %v1536_v24 = vpop.xlane.xlu0 %1535  ;;  %v7638_v56 = vld [vmem:[#allocation2 + $0x198] sm:$0xff]  ;;  %v7659_v8 = vld [vmem:[#allocation2 + $0xa8] sm:$0xff] }
 0x2ef   : > { %v7631_v33 = vmax.f32 %v7615_v40, %v1443_v1  ;;  %v7634_v28 = vmax.f32 %v7617_v45, %v1536_v24  ;;  %9356 = vst [vmem:[#allocation196_spill] sm:$0xff] %v7636_v55  ;;  %9357 = vst [vmem:[#allocation197_spill] sm:$0xff] %v7638_v56  ;;  %v7709_v55 = vld [vmem:[#allocation2 + $0xc0] sm:$0xff] }
 0x2f0   : > { %9361 = vst [vmem:[#allocation201_spill] sm:$0xff] %v7659_v8  ;;  %9362 = vst [vmem:[#allocation202_spill] sm:$0xff] %v7661_v46 }
 0x2f1   : > { %9354 = vst [vmem:[#allocation194_spill] sm:$0xff] %v7631_v33  ;;  %9355 = vst [vmem:[#allocation195_spill] sm:$0xff] %v7634_v28  ;;  %1929 = vperm.xlu0 %5387, %v7631_v33  }
 0x2f2   : > { %4126 = vst.msk [vmem:[#allocation2 + $0x98] sm:$0xff] %vm3081_vm1, %v7631_v33  ;;  %4157 = vst.msk [vmem:[#allocation2 + $0x190] sm:$0xff] %vm3081_vm1, %v7634_v28  ;;  %v1539_v24 = vpop.xlane.xlu1 %1538  ;;  %v1446_v1 = vpop.xlane.xlu0 %1445  ;;  %v7677_v28 = vld [vmem:[#allocation2 + $0xb0] sm:$0xff] }
 0x2f3   : > { %v7654_v45 = vmax.f32 %v7638_v56, %v1539_v24  ;;  %v7657_v36 = vmax.f32 %v7640_v9, %v1446_v1  ;;  %v7675_v56 = vld [vmem:[#allocation2 + $0x1a8] sm:$0xff]  ;;  %9365 = vst [vmem:[#allocation205_spill] sm:$0xff] %v7677_v28  ;;  %9368 = vst [vmem:[#allocation208_spill] sm:$0xff] %v7693_v63 }
 0x2f4   : > { %9364 = vst [vmem:[#allocation204_spill] sm:$0xff] %v7675_v56  ;;  %9371 = vst [vmem:[#allocation211_spill] sm:$0xff] %v7709_v55 }
 0x2f5   : > { %9359 = vst [vmem:[#allocation199_spill] sm:$0xff] %v7654_v45  ;;  %9360 = vst [vmem:[#allocation200_spill] sm:$0xff] %v7657_v36 }
 0x2f6   : > { %4158 = vst.msk [vmem:[#allocation2 + $0x198] sm:$0xff] %vm3081_vm1, %v7654_v45  ;;  %4127 = vst.msk [vmem:[#allocation2 + $0xa0] sm:$0xff] %vm3081_vm1, %v7657_v36  ;;  %v1449_v33 = vpop.xlane.xlu1 %1448  ;;  %v1542_v40 = vpop.xlane.xlu0 %1541 }
 0x2f7   : > { %v7670_v24 = vmax.f32 %v7659_v8, %v1449_v33  ;;  %v7673_v1 = vmax.f32 %v7661_v46, %v1542_v40  ;;  %v7691_v46 = vld [vmem:[#allocation2 + $0xb8] sm:$0xff]  ;;  %9374 = vst [vmem:[#allocation214_spill] sm:$0xff] %v7725_v38 }
 0x2f8   : > { %9367 = vst [vmem:[#allocation207_spill] sm:$0xff] %v7691_v46 }
 0x2f9   : > { %9363 = vst [vmem:[#allocation203_spill] sm:$0xff] %v7673_v1  ;;  %4128 = vst.msk [vmem:[#allocation2 + $0xa8] sm:$0xff] %vm3081_vm1, %v7670_v24 }
 0x2fa   : > { %4159 = vst.msk [vmem:[#allocation2 + $0x1a0] sm:$0xff] %vm3081_vm1, %v7673_v1  ;;  %v1545_v41 = vpop.xlane.xlu1 %1544  ;;  %v1452_v9 = vpop.xlane.xlu0 %1451 }
 0x2fb   : > { %v7686_v33 = vmax.f32 %v7675_v56, %v1545_v41  ;;  %v7689_v40 = vmax.f32 %v7677_v28, %v1452_v9  ;;  %v7707_v56 = vld [vmem:[#allocation2 + $0x1b8] sm:$0xff] }
 0x2fc   : > { %9370 = vst [vmem:[#allocation210_spill] sm:$0xff] %v7707_v56 }
 0x2fd   : > { %9366 = vst [vmem:[#allocation206_spill] sm:$0xff] %v7686_v33  ;;  %4160 = vst.msk [vmem:[#allocation2 + $0x1a8] sm:$0xff] %vm3081_vm1, %v7686_v33 }
 0x2fe   : > { %4129 = vst.msk [vmem:[#allocation2 + $0xb0] sm:$0xff] %vm3081_vm1, %v7689_v40  ;;  %v1455_v8 = vpop.xlane.xlu1 %1454  ;;  %v1548_v1 = vpop.xlane.xlu0 %1547 }
 0x2ff   : > { %v7702_v41 = vmax.f32 %v7691_v46, %v1455_v8  ;;  %v7705_v9 = vmax.f32 %v7693_v63, %v1548_v1  ;;  %v7723_v63 = vld [vmem:[#allocation2 + $0x1c0] sm:$0xff] }
 0x300   : > { %9373 = vst [vmem:[#allocation213_spill] sm:$0xff] %v7723_v63 }
 0x301   : > { %9369 = vst [vmem:[#allocation209_spill] sm:$0xff] %v7705_v9  ;;  %4130 = vst.msk [vmem:[#allocation2 + $0xb8] sm:$0xff] %vm3081_vm1, %v7702_v41 }
 0x302   : > { %4161 = vst.msk [vmem:[#allocation2 + $0x1b0] sm:$0xff] %vm3081_vm1, %v7705_v9  ;;  %v1551_v45 = vpop.xlane.xlu1 %1550  ;;  %v1458_v28 = vpop.xlane.xlu0 %1457 }
 0x303   : > { %v7718_v8 = vmax.f32 %v7707_v56, %v1551_v45  ;;  %v7721_v1 = vmax.f32 %v7709_v55, %v1458_v28  ;;  %v7739_v56 = vld [vmem:[#allocation2 + $0xc8] sm:$0xff] }
 0x304   : > { %9377 = vst [vmem:[#allocation217_spill] sm:$0xff] %v7739_v56 }
 0x305   : > { %9372 = vst [vmem:[#allocation212_spill] sm:$0xff] %v7718_v8  ;;  %4162 = vst.msk [vmem:[#allocation2 + $0x1b8] sm:$0xff] %vm3081_vm1, %v7718_v8 }
 0x306   : > { %4131 = vst.msk [vmem:[#allocation2 + $0xc0] sm:$0xff] %vm3081_vm1, %v7721_v1  ;;  %v1554_v46 = vpop.xlane.xlu1 %1553  ;;  %v1557_v9 = vpop.xlane.xlu0 %1556 }
 0x307   : > { %v7734_v45 = vmax.f32 %v7723_v63, %v1554_v46  ;;  %v7737_v28 = vmax.f32 %v7725_v38, %v1557_v9  ;;  %v7753_v9 = vld [vmem:[#allocation2 + $0x1d0] sm:$0xff]  ;;  %v7771_v63 = vld [vmem:[#allocation2 + $0xe0] sm:$0xff]  ;;  %v9384_v38 = vmax.f32 %v7226_v11, %v7231_v26 }
 0x308   : > { %9379 = vst [vmem:[#allocation219_spill] sm:$0xff] %v7753_v9  ;;  %9383 = vst [vmem:[#allocation222_spill] sm:$0xff] %v7771_v63 }
 0x309   : > { %9375 = vst [vmem:[#allocation215_spill] sm:$0xff] %v7734_v45  ;;  %9376 = vst [vmem:[#allocation216_spill] sm:$0xff] %v7737_v28 }
 0x30a   : > { %4163 = vst.msk [vmem:[#allocation2 + $0x1c0] sm:$0xff] %vm3081_vm1, %v7734_v45  ;;  %4164 = vst.msk [vmem:[#allocation2 + $0x1c8] sm:$0xff] %vm3081_vm1, %v7737_v28  ;;  %v1461_v33 = vpop.xlane.xlu1 %1460  ;;  %v1464_v55 = vpop.xlane.xlu0 %1463  ;;  %v7769_v45 = vld [vmem:[#allocation2 + $0xd8] sm:$0xff] }
 0x30b   : > { %v7748_v8 = vmax.f32 %v7739_v56, %v1461_v33  ;;  %v7751_v46 = vmax.f32 %v7741_v21, %v1464_v55  ;;  %v9381_v55 = vmax.f32 %v7237_v13, %v7244_v3  ;;  %9382 = vst [vmem:[#allocation221_spill] sm:$0xff] %v7769_v45 }
 0x30d   : > { %4132 = vst.msk [vmem:[#allocation2 + $0xc8] sm:$0xff] %vm3081_vm1, %v7748_v8  ;;  %4133 = vst.msk [vmem:[#allocation2 + $0xd0] sm:$0xff] %vm3081_vm1, %v7751_v46 }
 0x30e   : > { %v1560_v28 = vpop.xlane.xlu1 %1559 }
 0x30f   : > { %v7764_v33 = vmax.f32 %v7753_v9, %v1560_v28 }
 0x310   : > { %1568 = vmax.xlane.f32.xlu0 %v9381_v55  ;;  %v7784_v55 = vld [vmem:[#allocation2 + $0xe8] sm:$0xff] }
 0x311   : > { %9380 = vst [vmem:[#allocation220_spill] sm:$0xff] %v7764_v33  ;;  %4165 = vst.msk [vmem:[#allocation2 + $0x1d0] sm:$0xff] %vm3081_vm1, %v7764_v33  ;;  %1565 = vmax.xlane.f32.xlu1 %v9384_v38 }
 0x312   : > { %v1467_v21 = vpop.xlane.xlu1 %1466  ;;  %v1470_v56 = vpop.xlane.xlu0 %1469  ;;  %9386 = vst [vmem:[#allocation224_spill] sm:$0xff] %v7784_v55 }
 0x313   : > { %v7779_v28 = vmax.f32 %v7769_v45, %v1467_v21  ;;  %v7782_v9 = vmax.f32 %v7771_v63, %v1470_v56  ;;  %v7797_v56 = vld [vmem:[#allocation2 + $0xf0] sm:$0xff]  ;;  %v7803_v45 = vld [vmem:[#allocation2 + $0xf8] sm:$0xff] }
 0x314   : > { %9388 = vst [vmem:[#allocation226_spill] sm:$0xff] %v7797_v56  ;;  %9389 = vst [vmem:[#allocation227_spill] sm:$0xff] %v7803_v45 }
 0x315   : > { %9385 = vst [vmem:[#allocation223_spill] sm:$0xff] %v7782_v9  ;;  %4134 = vst.msk [vmem:[#allocation2 + $0xd8] sm:$0xff] %vm3081_vm1, %v7779_v28 }
 0x316   : > { %4135 = vst.msk [vmem:[#allocation2 + $0xe0] sm:$0xff] %vm3081_vm1, %v7782_v9  ;;  %v1473_v38 = vpop.xlane.xlu1 %1472 }
 0x317   : > { %v7795_v21 = vmax.f32 %v7784_v55, %v1473_v38 }
 0x319   : > { %9387 = vst [vmem:[#allocation225_spill] sm:$0xff] %v7795_v21  ;;  %4136 = vst.msk [vmem:[#allocation2 + $0xe8] sm:$0xff] %vm3081_vm1, %v7795_v21 }
 0x31a   : > { %v1476_v3 = vpop.xlane.xlu0 %1475 }
 0x31b   : > { %v7806_v13 = vmax.f32 %v7797_v56, %v1476_v3 }
 0x31c   : > { %v1479_v63 = vpop.xlane.xlu1 %1478 }
 0x31d   : > { %9390 = vst [vmem:[#allocation228_spill] sm:$0xff] %v7806_v13  ;;  %4137 = vst.msk [vmem:[#allocation2 + $0xf0] sm:$0xff] %vm3081_vm1, %v7806_v13  ;;  %v7813_v38 = vmax.f32 %v7803_v45, %v1479_v63 }
 0x31f   : > { %9391 = vst [vmem:[#allocation229_spill] sm:$0xff] %v7813_v38  ;;  %4138 = vst.msk [vmem:[#allocation2 + $0xf8] sm:$0xff] %vm3081_vm1, %v7813_v38 }
 0x322   : > { %1934 = vperm.xlu1 %5388, %v7657_v36  }
 0x324   : > { %v1835_v3 = vpop.permute.xlu0 %1834 }
 0x325   : > { %v2152_v11 = vsub.f32 %v6863_v50, %v1835_v3  ;;  %v2153_v56 = vsub.f32 %v6867_v52, %v1835_v3 }
 0x326   : > { %1939 = vperm.xlu0 %5387, %v7670_v24   ;;  %1994 = vperm.xlu1 %5388, %v7297_v32  }
 0x327   : > { %v2280_v63 = vmul.f32 1.442695, %v2152_v11  ;;  %v2282_v26 = vmul.f32 1.442695, %v2153_v56 }
 0x329   : > { %5453 = vpow2.f32 %v2280_v63 }
 0x32a   : > { %1949 = vperm.xlu0 %5387, %v7702_v41   ;;  %1944 = vperm.xlu1 %5388, %v7689_v40   ;;  %5455 = vpow2.f32 %v2282_v26 }
 0x32c   : > { %v1840_v45 = vpop.permute.xlu1 %1839 }
 0x32d   : > { %v2154_v55 = vsub.f32 %v6871_v54, %v1840_v45  ;;  %v2155_v36 = vsub.f32 %v6879_v58, %v1840_v45 }
 0x32e   : > { %1959 = vperm.xlu0 %5387, %v7748_v8   ;;  %2004 = vperm.xlu1 %5388, %v7333_v44  }
 0x32f   : > { %v2284_v32 = vmul.f32 1.442695, %v2154_v55  ;;  %v2286_v50 = vmul.f32 1.442695, %v2155_v36 }
 0x330   : > { %v1845_v52 = vpop.permute.xlu1 %1844 }
 0x331   : > { %5457 = vpow2.f32 %v2284_v32  ;;  %v2156_v3 = vsub.f32 %v6887_v62, %v1845_v52  ;;  %v2157_v11 = vsub.f32 %v6891_v0, %v1845_v52 }
 0x332   : > { %5459 = vpow2.f32 %v2286_v50  ;;  %1969 = vperm.xlu0 %5387, %v7779_v28   ;;  %1954 = vperm.xlu1 %5388, %v7721_v1  }
 0x333   : > { %v2288_v54 = vmul.f32 1.442695, %v2156_v3  ;;  %v2290_v58 = vmul.f32 1.442695, %v2157_v11  ;;  %v5454_v26 = vpop.eup %5453 }
 0x334   : > { %v1850_v45 = vpop.permute.xlu1 %1849  ;;  %v5456_v50 = vpop.eup %5455 }
 0x335   : > { %v2158_v56 = vsub.f32 %v6895_v2, %v1850_v45  ;;  %v2159_v55 = vsub.f32 %v6903_v6, %v1850_v45  ;;  %5461 = vpow2.f32 %v2288_v54 }
 0x336   : > { %1999 = vperm.xlu0 %5387, %v7290_v7   ;;  %2014 = vperm.xlu1 %5388, %v7375_v15   ;;  %5463 = vpow2.f32 %v2290_v58 }
 0x337   : > { %v2292_v62 = vmul.f32 1.442695, %v2158_v56  ;;  %v2294_v32 = vmul.f32 1.442695, %v2159_v55 }
 0x338   : > { %v1855_v0 = vpop.permute.xlu1 %1854 }
 0x339   : > { %5465 = vpow2.f32 %v2292_v62  ;;  %v2160_v36 = vsub.f32 %v6911_v10, %v1855_v0  ;;  %v2161_v63 = vsub.f32 %v6915_v12, %v1855_v0 }
 0x33a   : > { %5467 = vpow2.f32 %v2294_v32  ;;  %2009 = vperm.xlu0 %5387, %v7354_v53   ;;  %1964 = vperm.xlu1 %5388, %v7751_v46  }
 0x33b   : > { %v5458_v2 = vpop.eup %5457  ;;  %v2296_v6 = vmul.f32 1.442695, %v2160_v36  ;;  %v2298_v3 = vmul.f32 1.442695, %v2161_v63 }
 0x33c   : > { %v5460_v52 = vpop.eup %5459  ;;  %v1860_v11 = vpop.permute.xlu1 %1859  ;;  %v2536_v54 = vpack.c.bf16 %v5458_v2, %v5454_v26 }
 0x33d   : > { %v2162_v58 = vsub.f32 %v6919_v14, %v1860_v11  ;;  %v2163_v45 = vsub.f32 %v6927_v18, %v1860_v11  ;;  %v2537_v56 = vpack.c.bf16 %v5460_v52, %v5456_v50  ;;  %5469 = vpow2.f32 %v2296_v6 }
 0x33e   : > { %2019 = vperm.xlu0 %5387, %v7396_v51   ;;  %2029 = vperm.xlu1 %5388, %v7434_v59   ;;  %5471 = vpow2.f32 %v2298_v3 }
 0x33f   : > { %v2300_v10 = vmul.f32 1.442695, %v2162_v58  ;;  %v2302_v12 = vmul.f32 1.442695, %v2163_v45  ;;  %2632 = vmatprep.mubr.bf16.mxu1 %v2537_v56  ;;  %3722 = vmatprep.mubr.bf16.mxu0 %v2537_v56  ;;  %v5462_v62 = vpop.eup %5461 }
 0x340   : > { %2633 = vmatmul.mubr.bf16.vlgmr.msra.gmra.mrb[64].mxu1 %v2536_v54  ;;  %3723 = vmatmul.mubr.bf16.vlgmr.msra.gmra.mrb[64].mxu0 %v2536_v54  ;;  %v1865_v55 = vpop.permute.xlu1 %1864  ;;  %v5464_v32 = vpop.eup %5463 }
 0x341   : > { %5473 = vpow2.f32 %v2300_v10  ;;  %v2164_v14 = vsub.f32 %v6939_v23, %v1865_v55  ;;  %v2165_v18 = vsub.f32 %v6943_v25, %v1865_v55  ;;  %v7858_v10 = vld [vmem:[#allocation2 + $0x1d8] sm:$0xff] }
 0x342   : > { %5475 = vpow2.f32 %v2302_v12  ;;  %2024 = vperm.xlu0 %5387, %v7417_v29   ;;  %1974 = vperm.xlu1 %5388, %v7782_v9   ;;  %9392 = vst [vmem:[#allocation230_spill] sm:$0xff] %v7858_v10 }
 0x343   : > { %v5466_v0 = vpop.eup %5465  ;;  %v2304_v26 = vmul.f32 1.442695, %v2164_v14  ;;  %v2306_v63 = vmul.f32 1.442695, %v2165_v18 }
 0x344   : > { %v5468_v36 = vpop.eup %5467  ;;  %v1870_v50 = vpop.permute.xlu1 %1869  ;;  %v2538_v2 = vpack.c.bf16 %v5466_v0, %v5462_v62 }
 0x345   : > { %v2166_v6 = vsub.f32 %v6947_v27, %v1870_v50  ;;  %v2167_v52 = vsub.f32 %v6955_v31, %v1870_v50  ;;  %v2539_v3 = vpack.c.bf16 %v5468_v36, %v5464_v32  ;;  %5477 = vpow2.f32 %v2304_v26 }
 0x346   : > { %1979 = vperm.xlu0 %5387, %v7795_v21   ;;  %2039 = vperm.xlu1 %5388, %v7471_v16   ;;  %5479 = vpow2.f32 %v2306_v63 }
 0x347   : > { %v2308_v23 = vmul.f32 1.442695, %v2166_v6  ;;  %v2310_v25 = vmul.f32 1.442695, %v2167_v52  ;;  %2640 = vmatprep.mubr.bf16.mxu1 %v2539_v3  ;;  %3730 = vmatprep.mubr.bf16.mxu0 %v2539_v3  ;;  %v5470_v11 = vpop.eup %5469 }
 0x348   : > { %2641 = vmatmul.mubr.bf16.gmra.mrb[68].mxu1 %v2538_v2  ;;  %3731 = vmatmul.mubr.bf16.gmra.mrb[68].mxu0 %v2538_v2  ;;  %v5472_v54 = vpop.eup %5471  ;;  %v1875_v45 = vpop.permute.xlu1 %1874 }
 0x349   : > { %5481 = vpow2.f32 %v2308_v23  ;;  %v2168_v26 = vsub.f32 %v6963_v35, %v1875_v45  ;;  %v2169_v63 = vsub.f32 %v6967_v37, %v1875_v45 }
 0x34a   : > { %5483 = vpow2.f32 %v2310_v25  ;;  %2034 = vperm.xlu0 %5387, %v7454_v34   ;;  %1984 = vperm.xlu1 %5388, %v7806_v13  }
 0x34b   : > { %v5474_v27 = vpop.eup %5473  ;;  %v2312_v6 = vmul.f32 1.442695, %v2168_v26  ;;  %v2314_v3 = vmul.f32 1.442695, %v2169_v63 }
 0x34c   : > { %v5476_v31 = vpop.eup %5475  ;;  %v2540_v58 = vpack.c.bf16 %v5474_v27, %v5470_v11  ;;  %v1885_v32 = vpop.permute.xlu1 %1884 }
 0x34d   : > { %v2541_v56 = vpack.c.bf16 %v5476_v31, %v5472_v54  ;;  %v2172_v52 = vsub.f32 %v6987_v47, %v1885_v32  ;;  %v2173_v23 = vsub.f32 %v6991_v49, %v1885_v32  ;;  %5485 = vpow2.f32 %v2312_v6  ;;  %v9394_v6 = vld [vmem:[#allocation64_spill] sm:$0xff] }
 0x34e   : > { %2049 = vperm.xlu1 %5388, %v7504_v19   ;;  %1989 = vperm.xlu0 %5387, %v7813_v38   ;;  %5487 = vpow2.f32 %v2314_v3  ;;  %v9565_v38 = vld [vmem:[#allocation77_spill] sm:$0xff] }
 0x34f   : > { %2648 = vmatprep.mubr.bf16.mxu1 %v2541_v56  ;;  %3738 = vmatprep.mubr.bf16.mxu0 %v2541_v56  ;;  %v5478_v12 = vpop.eup %5477  ;;  %v2320_v37 = vmul.f32 1.442695, %v2172_v52 }
 0x350   : > { %2649 = vmatmul.mubr.bf16.gmra.mrb[72].mxu1 %v2540_v58  ;;  %3739 = vmatmul.mubr.bf16.gmra.mrb[72].mxu0 %v2540_v58  ;;  %v5480_v62 = vpop.eup %5479  ;;  %v2322_v58 = vmul.f32 1.442695, %v2173_v23 }
 0x351   : > { %v1563_v55 = vpop.xlane.xlu0 %1562 }
 0x352   : > { %v7861_v14 = vmax.f32 %v7858_v10, %v1563_v55  ;;  %2044 = vperm.xlu0 %5387, %v7488_v61  }
 0x353   : > { %v5482_v18 = vpop.eup %5481 }
 0x354   : > { %9393 = vst [vmem:[#allocation231_spill] sm:$0xff] %v7861_v14  ;;  %v5484_v0 = vpop.eup %5483  ;;  %4166 = vst.msk [vmem:[#allocation2 + $0x1d8] sm:$0xff] %vm3081_vm1, %v7861_v14  ;;  %v2542_v36 = vpack.c.bf16 %v5482_v18, %v5478_v12  ;;  %v1895_v2 = vpop.permute.xlu1 %1894 }
 0x355   : > { %v2543_v50 = vpack.c.bf16 %v5484_v0, %v5480_v62  ;;  %v2176_v35 = vsub.f32 %v7011_v17, %v1895_v2  ;;  %v2177_v47 = vsub.f32 %v7015_v22, %v1895_v2 }
 0x357   : > { %2656 = vmatprep.mubr.bf16.mxu1 %v2543_v50  ;;  %3746 = vmatprep.mubr.bf16.mxu0 %v2543_v50  ;;  %v2328_v12 = vmul.f32 1.442695, %v2176_v35  ;;  %v2330_v62 = vmul.f32 1.442695, %v2177_v47  ;;  %v9397_v47 = vld [vmem:[#allocation72_spill] sm:$0xff] }
 0x358   : > { %2657 = vmatmul.mubr.bf16.gmra.mrb[76].mxu1 %v2542_v36  ;;  %3747 = vmatmul.mubr.bf16.gmra.mrb[76].mxu0 %v2542_v36 }
 0x359   : > { %v1880_v25 = vpop.permute.xlu0 %1879 }
 0x35a   : > { %v2170_v11 = vsub.f32 %v6971_v39, %v1880_v25  ;;  %v2171_v54 = vsub.f32 %v6979_v43, %v1880_v25 }
 0x35c   : > { %v2316_v27 = vmul.f32 1.442695, %v2170_v11  ;;  %v2318_v31 = vmul.f32 1.442695, %v2171_v54  ;;  %v1905_v45 = vpop.permute.xlu1 %1904 }
 0x35d   : > { %v1890_v56 = vpop.permute.xlu0 %1889  ;;  %v2180_v39 = vsub.f32 %v7035_v4, %v1905_v45  ;;  %v2181_v18 = vsub.f32 %v7039_v20, %v1905_v45  ;;  %v5486_v20 = vpop.eup %5485 }
 0x35e   : > { %5489 = vpow2.f32 %v2316_v27  ;;  %v2174_v49 = vsub.f32 %v6995_v57, %v1890_v56  ;;  %v2175_v17 = vsub.f32 %v7003_v5, %v1890_v56 }
 0x35f   : > { %5491 = vpow2.f32 %v2318_v31  ;;  %v2336_v57 = vmul.f32 1.442695, %v2180_v39  ;;  %v2338_v4 = vmul.f32 1.442695, %v2181_v18  ;;  %v9396_v31 = vld [vmem:[#allocation70_spill] sm:$0xff] }
 0x360   : > { %5493 = vpow2.f32 %v2320_v37  ;;  %v2324_v43 = vmul.f32 1.442695, %v2174_v49  ;;  %v2326_v55 = vmul.f32 1.442695, %v2175_v17 }
 0x361   : > { %5495 = vpow2.f32 %v2322_v58  ;;  %v1900_v32 = vpop.permute.xlu0 %1899 }
 0x362   : > { %5497 = vpow2.f32 %v2328_v12  ;;  %v2178_v22 = vsub.f32 %v7019_v30, %v1900_v32  ;;  %v2179_v0 = vsub.f32 %v7027_v42, %v1900_v32  ;;  %v9395_v30 = vld [vmem:[#allocation66_spill] sm:$0xff]  ;;  %v5488_v42 = vpop.eup %5487  ;;  %v9399_v32 = vld [vmem:[#allocation76_spill] sm:$0xff] }
 0x363   : > { %5499 = vpow2.f32 %v2324_v43 }
 0x364   : > { %5501 = vpow2.f32 %v2326_v55  ;;  %v2332_v5 = vmul.f32 1.442695, %v2178_v22  ;;  %v2334_v26 = vmul.f32 1.442695, %v2179_v0  ;;  %v1915_v36 = vpop.permute.xlu1 %1914 }
 0x365   : > { %5503 = vpow2.f32 %v2330_v62  ;;  %v2184_v63 = vsub.f32 %v7059_v48, %v1915_v36  ;;  %v2185_v50 = vsub.f32 %v7063_v60, %v1915_v36  ;;  %v1910_v2 = vpop.permute.xlu0 %1909  ;;  %v9398_v62 = vld [vmem:[#allocation74_spill] sm:$0xff] }
 0x366   : > { %5505 = vpow2.f32 %v2332_v5  ;;  %v2182_v52 = vsub.f32 %v9394_v6, %v1910_v2  ;;  %v2183_v3 = vsub.f32 %v9395_v30, %v1910_v2 }
 0x367   : > { %5507 = vpow2.f32 %v2334_v26  ;;  %v2344_v23 = vmul.f32 1.442695, %v2184_v63  ;;  %v2346_v37 = vmul.f32 1.442695, %v2185_v50 }
 0x368   : > { %v5490_v25 = vpop.eup %5489  ;;  %5509 = vpow2.f32 %v2336_v57  ;;  %v2340_v35 = vmul.f32 1.442695, %v2182_v52  ;;  %v2342_v11 = vmul.f32 1.442695, %v2183_v3  ;;  %v9401_v52 = vld [vmem:[#allocation80_spill] sm:$0xff] }
 0x369   : > { %v5492_v54 = vpop.eup %5491  ;;  %5511 = vpow2.f32 %v2338_v4  ;;  %v1920_v48 = vpop.permute.xlu0 %1919  ;;  %v2544_v27 = vpack.c.bf16 %v5490_v25, %v5486_v20  ;;  %v9400_v20 = vld [vmem:[#allocation78_spill] sm:$0xff]  ;;  %v9403_v25 = vld [vmem:[#allocation196_spill] sm:$0xff] }
 0x36a   : > { %v5494_v60 = vpop.eup %5493  ;;  %5513 = vpow2.f32 %v2344_v23  ;;  %v2186_v58 = vsub.f32 %v9396_v31, %v1920_v48  ;;  %v2187_v45 = vsub.f32 %v9397_v47, %v1920_v48  ;;  %v2545_v56 = vpack.c.bf16 %v5492_v54, %v5488_v42  ;;  %v9402_v23 = vld [vmem:[#allocation193_spill] sm:$0xff]  ;;  %v9406_v54 = vld [vmem:[#allocation192_spill] sm:$0xff] }
 0x36b   : > { %v5496_v12 = vpop.eup %5495  ;;  %5515 = vpow2.f32 %v2340_v35  ;;  %v9404_v35 = vmax.f32 %v9402_v23, %v9403_v25  ;;  %v9435_v23 = vld [vmem:[#allocation92_spill] sm:$0xff] }
 0x36c   : > { %v5498_v49 = vpop.eup %5497  ;;  %5517 = vpow2.f32 %v2342_v11  ;;  %v2348_v17 = vmul.f32 1.442695, %v2186_v58  ;;  %v2350_v39 = vmul.f32 1.442695, %v2187_v45  ;;  %2664 = vmatprep.mubr.bf16.mxu1 %v2545_v56  ;;  %3754 = vmatprep.mubr.bf16.mxu0 %v2545_v56  ;;  %v1925_v43 = vpop.permute.xlu1 %1924  ;;  %v9405_v11 = vld [vmem:[#allocation189_spill] sm:$0xff] }
 0x36d   : > { %v5500_v55 = vpop.eup %5499  ;;  %5519 = vpow2.f32 %v2346_v37  ;;  %2665 = vmatmul.mubr.bf16.gmra.mrb[80].mxu1 %v2544_v27  ;;  %3755 = vmatmul.mubr.bf16.gmra.mrb[80].mxu0 %v2544_v27  ;;  %v2188_v18 = vsub.f32 %v9398_v62, %v1925_v43  ;;  %v2189_v22 = vsub.f32 %v9399_v32, %v1925_v43  ;;  %v9407_v37 = vmax.f32 %v9405_v11, %v9406_v54 }
 0x36e   : > { %v5502_v0 = vpop.eup %5501  ;;  %5521 = vpow2.f32 %v2348_v17  ;;  %v2546_v57 = vpack.c.bf16 %v5500_v55, %v5494_v60 }
 0x36f   : > { %v5504_v5 = vpop.eup %5503  ;;  %5523 = vpow2.f32 %v2350_v39  ;;  %v2352_v26 = vmul.f32 1.442695, %v2188_v18  ;;  %v2547_v36 = vpack.c.bf16 %v5502_v0, %v5496_v12  ;;  %v2354_v63 = vmul.f32 1.442695, %v2189_v22 }
 0x370   : > { %v5506_v4 = vpop.eup %5505  ;;  %v1930_v50 = vpop.permute.xlu0 %1929 }
 0x371   : > { %v5508_v2 = vpop.eup %5507  ;;  %2672 = vmatprep.mubr.bf16.mxu1 %v2547_v36  ;;  %3762 = vmatprep.mubr.bf16.mxu0 %v2547_v36  ;;  %v2190_v6 = vsub.f32 %v9400_v20, %v1930_v50  ;;  %v2191_v30 = vsub.f32 %v9401_v52, %v1930_v50  ;;  %v2548_v3 = vpack.c.bf16 %v5506_v4, %v5498_v49  ;;  %5525 = vpow2.f32 %v2352_v26  ;;  %v9409_v26 = vld [vmem:[#allocation175_spill] sm:$0xff]  ;;  %v9417_v52 = vld [vmem:[#allocation209_spill] sm:$0xff] }
 0x372   : > { %v5510_v42 = vpop.eup %5509  ;;  %1574 = vmax.xlane.f32.xlu0 %v9404_v35  ;;  %1571 = vmax.xlane.f32.xlu1 %v9407_v37  ;;  %v2549_v48 = vpack.c.bf16 %v5508_v2, %v5504_v5  ;;  %5527 = vpow2.f32 %v2354_v63  ;;  %v9408_v5 = vld [vmem:[#allocation171_spill] sm:$0xff]  ;;  %v9421_v35 = vld [vmem:[#allocation212_spill] sm:$0xff]  ;;  %v7911_v37 = vld [vmem:[#allocation2 + $0x1e0] sm:$0xff] }
 0x373   : > { %v5512_v27 = vpop.eup %5511  ;;  %v2356_v60 = vmul.f32 1.442695, %v2190_v6  ;;  %v2358_v31 = vmul.f32 1.442695, %v2191_v30  ;;  %v9410_v36 = vld [vmem:[#allocation167_spill] sm:$0xff]  ;;  %v9418_v30 = vld [vmem:[#allocation206_spill] sm:$0xff] }
 0x374   : > { %v5514_v58 = vpop.eup %5513  ;;  %v9411_v4 = vld [vmem:[#allocation183_spill] sm:$0xff]  ;;  %9422 = vst [vmem:[#allocation66_spill] sm:$0xff] %v7911_v37 }
 0x375   : > { %v5516_v47 = vpop.eup %5515  ;;  %5529 = vpow2.f32 %v2356_v60  ;;  %2673 = vmatmul.mubr.bf16.gmra.mrb[84].mxu1 %v2546_v57  ;;  %3763 = vmatmul.mubr.bf16.gmra.mrb[84].mxu0 %v2546_v57  ;;  %v9412_v63 = vld [vmem:[#allocation179_spill] sm:$0xff] }
 0x376   : > { %v5518_v45 = vpop.eup %5517  ;;  %5531 = vpow2.f32 %v2358_v31  ;;  %2680 = vmatprep.mubr.bf16.mxu1 %v2549_v48  ;;  %3770 = vmatprep.mubr.bf16.mxu0 %v2549_v48  ;;  %v2550_v56 = vpack.c.bf16 %v5516_v47, %v5510_v42  ;;  %v9413_v50 = vld [vmem:[#allocation195_spill] sm:$0xff]  ;;  %v9425_v47 = vld [vmem:[#allocation216_spill] sm:$0xff] }
 0x377   : > { %v5520_v12 = vpop.eup %5519  ;;  %v2551_v49 = vpack.c.bf16 %v5518_v45, %v5512_v27  ;;  %v9414_v2 = vld [vmem:[#allocation187_spill] sm:$0xff] }
 0x378   : > { %v5522_v17 = vpop.eup %5521  ;;  %v9415_v20 = vld [vmem:[#allocation203_spill] sm:$0xff] }
 0x379   : > { %v5524_v39 = vpop.eup %5523  ;;  %v2552_v43 = vpack.c.bf16 %v5522_v17, %v5514_v58  ;;  %v9416_v6 = vld [vmem:[#allocation199_spill] sm:$0xff]  ;;  %v9427_v17 = vld [vmem:[#allocation84_spill] sm:$0xff] }
 0x37a   : > { %v2553_v55 = vpack.c.bf16 %v5524_v39, %v5520_v12  ;;  %v7908_v42 = vld [vmem:[#allocation2 + $0x1e8] sm:$0xff]  ;;  %v9426_v12 = vld [vmem:[#allocation82_spill] sm:$0xff] }
 0x37b   : > { %v5526_v62 = vpop.eup %5525  ;;  %9420 = vst [vmem:[#allocation64_spill] sm:$0xff] %v7908_v42  ;;  %v9431_v45 = vld [vmem:[#allocation35_spill] sm:$0xff] }
 0x37c   : > { %v5528_v18 = vpop.eup %5527 }
 0x37d   : > { %2681 = vmatmul.mubr.bf16.gmra.mrb[88].mxu1 %v2548_v3  ;;  %3771 = vmatmul.mubr.bf16.gmra.mrb[88].mxu0 %v2548_v3  ;;  %v9419_v3 = vld [vmem:[#allocation215_spill] sm:$0xff] }
 0x37e   : > { %2688 = vmatprep.mubr.bf16.mxu1 %v2551_v49  ;;  %3778 = vmatprep.mubr.bf16.mxu0 %v2551_v49 }
 0x37f   : > { %v5530_v32 = vpop.eup %5529 }
 0x380   : > { %v5532_v22 = vpop.eup %5531  ;;  %v2554_v0 = vpack.c.bf16 %v5530_v32, %v5526_v62 }
 0x381   : > { %v2555_v57 = vpack.c.bf16 %v5532_v22, %v5528_v18  ;;  %v9428_v18 = vld [vmem:[#allocation86_spill] sm:$0xff]  ;;  %v9429_v22 = vld [vmem:[#allocation88_spill] sm:$0xff] }
 0x383   : > { %2059 = vperm.xlu1 %5388, %v9408_v5  }
 0x385   : > { %2689 = vmatmul.mubr.bf16.gmra.mrb[92].mxu1 %v2550_v56  ;;  %3779 = vmatmul.mubr.bf16.gmra.mrb[92].mxu0 %v2550_v56 }
 0x386   : > { %2696 = vmatprep.mubr.bf16.mxu1 %v2553_v55  ;;  %3786 = vmatprep.mubr.bf16.mxu0 %v2553_v55 }
 0x387   : > { %2064 = vperm.xlu1 %5388, %v9409_v26  }
 0x388   : > { %2054 = vperm.xlu0 %5387, %v9410_v36  }
 0x38b   : > { %2074 = vperm.xlu1 %5388, %v9411_v4  }
 0x38c   : > { %2069 = vperm.xlu0 %5387, %v9412_v63  }
 0x38d   : > { %2697 = vmatmul.mubr.bf16.gmra.mrb[96].mxu1 %v2552_v43  ;;  %3787 = vmatmul.mubr.bf16.gmra.mrb[96].mxu0 %v2552_v43 }
 0x38e   : > { %2704 = vmatprep.mubr.bf16.mxu1 %v2555_v57  ;;  %3794 = vmatprep.mubr.bf16.mxu0 %v2555_v57 }
 0x38f   : > { %2084 = vperm.xlu1 %5388, %v9413_v50  }
 0x390   : > { %2079 = vperm.xlu0 %5387, %v9414_v2  }
 0x393   : > { %2094 = vperm.xlu1 %5388, %v9415_v20  }
 0x394   : > { %2089 = vperm.xlu0 %5387, %v9416_v6  }
 0x395   : > { %2705 = vmatmul.mubr.bf16.gmra.mrb[100].mxu1 %v2554_v0  ;;  %3795 = vmatmul.mubr.bf16.gmra.mrb[100].mxu0 %v2554_v0 }
 0x397   : > { %2104 = vperm.xlu1 %5388, %v9417_v52  }
 0x398   : > { %2099 = vperm.xlu0 %5387, %v9418_v30  }
 0x39b   : > { %2114 = vperm.xlu1 %5388, %v9419_v3  }
 0x39c   : > { %2109 = vperm.xlu0 %5387, %v9421_v35  }
 0x39d   : > { %v1569_v48 = vpop.xlane.xlu0 %1568 }
 0x39e   : > { %v7914_v27 = vmax.f32 %v7908_v42, %v1569_v48  ;;  %v1566_v60 = vpop.xlane.xlu1 %1565  ;;  %v9430_v48 = vld [vmem:[#allocation34_spill] sm:$0xff] }
 0x39f   : > { %v7917_v31 = vmax.f32 %v7911_v37, %v1566_v60  ;;  %2124 = vperm.xlu1 %5388, %v7764_v33   ;;  %v9443_v37 = vld [vmem:[#allocation100_spill] sm:$0xff] }
 0x3a0   : > { %9423 = vst [vmem:[#allocation70_spill] sm:$0xff] %v7914_v27  ;;  %4168 = vst.msk [vmem:[#allocation2 + $0x1e8] sm:$0xff] %vm3081_vm1, %v7914_v27  ;;  %2119 = vperm.xlu0 %5387, %v9425_v47  }
 0x3a1   : > { %9424 = vst [vmem:[#allocation72_spill] sm:$0xff] %v7917_v31  ;;  %4167 = vst.msk [vmem:[#allocation2 + $0x1e0] sm:$0xff] %vm3081_vm1, %v7917_v31 }
 0x3a2   : > { %v1935_v56 = vpop.permute.xlu1 %1934 }
 0x3a3   : > { %v2192_v49 = vsub.f32 %v9426_v12, %v1935_v56  ;;  %v2193_v39 = vsub.f32 %v9427_v17, %v1935_v56  ;;  %2134 = vperm.xlu1 %5388, %v7917_v31  }
 0x3a4   : > { %2129 = vperm.xlu0 %5387, %v7861_v14  }
 0x3a5   : > { %v2360_v43 = vmul.f32 1.442695, %v2192_v49  ;;  %v2362_v55 = vmul.f32 1.442695, %v2193_v39  ;;  %v1940_v62 = vpop.permute.xlu0 %1939  ;;  %v9432_v39 = vld [vmem:[#allocation94_spill] sm:$0xff] }
 0x3a6   : > { %v2194_v32 = vsub.f32 %v9428_v18, %v1940_v62  ;;  %v2195_v0 = vsub.f32 %v9429_v22, %v1940_v62  ;;  %v1995_v57 = vpop.permute.xlu1 %1994  ;;  %v9433_v18 = vld [vmem:[#allocation96_spill] sm:$0xff]  ;;  %v9434_v22 = vld [vmem:[#allocation90_spill] sm:$0xff] }
 0x3a7   : > { %v2216_v60 = vsub.f32 %v9430_v48, %v1995_v57  ;;  %v2217_v58 = vsub.f32 %v9431_v45, %v1995_v57  ;;  %5533 = vpow2.f32 %v2360_v43 }
 0x3a8   : > { %v2364_v12 = vmul.f32 1.442695, %v2194_v32  ;;  %v2366_v54 = vmul.f32 1.442695, %v2195_v0  ;;  %2139 = vperm.xlu0 %5387, %v7914_v27   ;;  %5535 = vpow2.f32 %v2362_v55 }
 0x3a9   : > { %v2408_v56 = vmul.f32 1.442695, %v2216_v60  ;;  %v2410_v17 = vmul.f32 1.442695, %v2217_v58  ;;  %v1950_v49 = vpop.permute.xlu0 %1949  ;;  %v9436_v58 = vld [vmem:[#allocation102_spill] sm:$0xff] }
 0x3aa   : > { %5537 = vpow2.f32 %v2364_v12  ;;  %v2198_v11 = vsub.f32 %v9432_v39, %v1950_v49  ;;  %v2199_v25 = vsub.f32 %v9433_v18, %v1950_v49  ;;  %v1945_v62 = vpop.permute.xlu1 %1944  ;;  %v9437_v12 = vld [vmem:[#allocation104_spill] sm:$0xff]  ;;  %v9438_v49 = vld [vmem:[#allocation38_spill] sm:$0xff]  ;;  %v9439_v18 = vld [vmem:[#allocation39_spill] sm:$0xff] }
 0x3ab   : > { %5539 = vpow2.f32 %v2366_v54  ;;  %v2196_v48 = vsub.f32 %v9434_v22, %v1945_v62  ;;  %v2197_v45 = vsub.f32 %v9435_v23, %v1945_v62 }
 0x3ac   : > { %5541 = vpow2.f32 %v2408_v56  ;;  %v2372_v43 = vmul.f32 1.442695, %v2198_v11  ;;  %v2374_v32 = vmul.f32 1.442695, %v2199_v25 }
 0x3ad   : > { %5543 = vpow2.f32 %v2410_v17  ;;  %v2368_v0 = vmul.f32 1.442695, %v2196_v48  ;;  %v2370_v55 = vmul.f32 1.442695, %v2197_v45  ;;  %v1960_v57 = vpop.permute.xlu0 %1959  ;;  %v9440_v48 = vld [vmem:[#allocation110_spill] sm:$0xff] }
 0x3ae   : > { %5545 = vpow2.f32 %v2372_v43  ;;  %v2202_v60 = vsub.f32 %v9436_v58, %v1960_v57  ;;  %v2203_v39 = vsub.f32 %v9437_v12, %v1960_v57  ;;  %v2005_v31 = vpop.permute.xlu1 %2004  ;;  %v9441_v43 = vld [vmem:[#allocation112_spill] sm:$0xff] }
 0x3af   : > { %5547 = vpow2.f32 %v2374_v32  ;;  %v2220_v54 = vsub.f32 %v9438_v49, %v2005_v31  ;;  %v2221_v22 = vsub.f32 %v9439_v18, %v2005_v31  ;;  %v9442_v32 = vld [vmem:[#allocation98_spill] sm:$0xff] }
 0x3b0   : > { %5549 = vpow2.f32 %v2368_v0  ;;  %v2380_v23 = vmul.f32 1.442695, %v2202_v60  ;;  %v2382_v56 = vmul.f32 1.442695, %v2203_v39 }
 0x3b1   : > { %5551 = vpow2.f32 %v2370_v55  ;;  %v2416_v25 = vmul.f32 1.442695, %v2220_v54  ;;  %v2418_v11 = vmul.f32 1.442695, %v2221_v22  ;;  %v1970_v17 = vpop.permute.xlu0 %1969  ;;  %v5534_v62 = vpop.eup %5533 }
 0x3b2   : > { %5553 = vpow2.f32 %v2380_v23  ;;  %v2206_v45 = vsub.f32 %v9440_v48, %v1970_v17  ;;  %v2207_v58 = vsub.f32 %v9441_v43, %v1970_v17  ;;  %v1955_v57 = vpop.permute.xlu1 %1954  ;;  %v5536_v12 = vpop.eup %5535  ;;  %v9444_v17 = vld [vmem:[#allocation36_spill] sm:$0xff] }
 0x3b3   : > { %5555 = vpow2.f32 %v2382_v56  ;;  %v2200_v49 = vsub.f32 %v9442_v32, %v1955_v57  ;;  %v2201_v31 = vsub.f32 %v9443_v37, %v1955_v57  ;;  %v9445_v56 = vld [vmem:[#allocation37_spill] sm:$0xff] }
 0x3b4   : > { %v5538_v0 = vpop.eup %5537  ;;  %5557 = vpow2.f32 %v2416_v25  ;;  %v2388_v60 = vmul.f32 1.442695, %v2206_v45  ;;  %v2390_v55 = vmul.f32 1.442695, %v2207_v58  ;;  %v9446_v25 = vld [vmem:[#allocation42_spill] sm:$0xff]  ;;  %v9447_v58 = vld [vmem:[#allocation43_spill] sm:$0xff] }
 0x3b5   : > { %v5540_v39 = vpop.eup %5539  ;;  %5559 = vpow2.f32 %v2418_v11  ;;  %v2376_v54 = vmul.f32 1.442695, %v2200_v49  ;;  %v2378_v18 = vmul.f32 1.442695, %v2201_v31  ;;  %v2000_v22 = vpop.permute.xlu0 %1999  ;;  %v2556_v23 = vpack.c.bf16 %v5538_v0, %v5534_v62 }
 0x3b6   : > { %v7950_v48 = vpop.eup %5541  ;;  %5561 = vpow2.f32 %v2388_v60  ;;  %v2218_v43 = vsub.f32 %v9444_v17, %v2000_v22  ;;  %v2219_v27 = vsub.f32 %v9445_v56, %v2000_v22  ;;  %v2015_v32 = vpop.permute.xlu1 %2014  ;;  %v2557_v42 = vpack.c.bf16 %v5540_v39, %v5536_v12  ;;  %v9449_v17 = vld [vmem:[#allocation41_spill] sm:$0xff] }
 0x3b7   : > { %v7954_v37 = vpop.eup %5543  ;;  %5563 = vpow2.f32 %v2390_v55  ;;  %v2224_v45 = vsub.f32 %v9446_v25, %v2015_v32  ;;  %v2225_v11 = vsub.f32 %v9447_v58, %v2015_v32  ;;  %v9448_v55 = vld [vmem:[#allocation40_spill] sm:$0xff] }
 0x3b8   : > { %v5546_v57 = vpop.eup %5545  ;;  %5565 = vpow2.f32 %v2376_v54  ;;  %v2412_v49 = vmul.f32 1.442695, %v2218_v43  ;;  %v2414_v62 = vmul.f32 1.442695, %v2219_v27  ;;  %2712 = vmatprep.mubr.bf16.mxu1 %v2557_v42  ;;  %3802 = vmatprep.mubr.bf16.mxu0 %v2557_v42  ;;  %v9450_v54 = vld [vmem:[#allocation106_spill] sm:$0xff]  ;;  %v9451_v43 = vld [vmem:[#allocation108_spill] sm:$0xff] }
 0x3b9   : > { %v5548_v31 = vpop.eup %5547  ;;  %5567 = vpow2.f32 %v2378_v18  ;;  %v2424_v0 = vmul.f32 1.442695, %v2224_v45  ;;  %v2426_v60 = vmul.f32 1.442695, %v2225_v11  ;;  %2713 = vmatmul.mubr.bf16.gmra.mrb[104].mxu1 %v2556_v23  ;;  %3803 = vmatmul.mubr.bf16.gmra.mrb[104].mxu0 %v2556_v23  ;;  %v2010_v12 = vpop.permute.xlu0 %2009 }
 0x3ba   : > { %v5550_v39 = vpop.eup %5549  ;;  %5569 = vpow2.f32 %v2412_v49  ;;  %v2222_v22 = vsub.f32 %v9448_v55, %v2010_v12  ;;  %v2223_v56 = vsub.f32 %v9449_v17, %v2010_v12  ;;  %v1965_v32 = vpop.permute.xlu1 %1964  ;;  %v9453_v17 = vld [vmem:[#allocation45_spill] sm:$0xff] }
 0x3bb   : > { %v5552_v25 = vpop.eup %5551  ;;  %5571 = vpow2.f32 %v2414_v62  ;;  %v2204_v27 = vsub.f32 %v9450_v54, %v1965_v32  ;;  %v2205_v42 = vsub.f32 %v9451_v43, %v1965_v32  ;;  %v2558_v58 = vpack.c.bf16 %v5546_v57, %v5550_v39  ;;  %v9452_v62 = vld [vmem:[#allocation44_spill] sm:$0xff] }
 0x3bc   : > { %v5554_v18 = vpop.eup %5553  ;;  %5573 = vpow2.f32 %v2424_v0  ;;  %v2420_v45 = vmul.f32 1.442695, %v2222_v22  ;;  %v2422_v11 = vmul.f32 1.442695, %v2223_v56  ;;  %v2559_v23 = vpack.c.bf16 %v5548_v31, %v5552_v25  ;;  %v9454_v0 = vld [vmem:[#allocation48_spill] sm:$0xff]  ;;  %v9455_v22 = vld [vmem:[#allocation49_spill] sm:$0xff] }
 0x3bd   : > { %v5556_v33 = vpop.eup %5555  ;;  %5575 = vpow2.f32 %v2426_v60  ;;  %v2384_v49 = vmul.f32 1.442695, %v2204_v27  ;;  %v2386_v10 = vmul.f32 1.442695, %v2205_v42  ;;  %v2020_v55 = vpop.permute.xlu0 %2019 }
 0x3be   : > { %v7962_v14 = vpop.eup %5557  ;;  %5577 = vpow2.f32 %v2420_v45  ;;  %2720 = vmatprep.mubr.bf16.mxu1 %v2559_v23  ;;  %3810 = vmatprep.mubr.bf16.mxu0 %v2559_v23  ;;  %v2226_v12 = vsub.f32 %v9452_v62, %v2020_v55  ;;  %v2227_v32 = vsub.f32 %v9453_v17, %v2020_v55  ;;  %v2030_v57 = vpop.permute.xlu1 %2029  ;;  %v9457_v62 = vld [vmem:[#allocation47_spill] sm:$0xff] }
 0x3bf   : > { %v7966_v39 = vpop.eup %5559  ;;  %5579 = vpow2.f32 %v2422_v11  ;;  %v2230_v31 = vsub.f32 %v9454_v0, %v2030_v57  ;;  %v2231_v60 = vsub.f32 %v9455_v22, %v2030_v57  ;;  %v9456_v11 = vld [vmem:[#allocation46_spill] sm:$0xff] }
 0x3c0   : > { %v7970_v56 = vpop.eup %5561  ;;  %5581 = vpow2.f32 %v2384_v49  ;;  %v2428_v25 = vmul.f32 1.442695, %v2226_v12  ;;  %v2430_v54 = vmul.f32 1.442695, %v2227_v32  ;;  %v9458_v49 = vld [vmem:[#allocation114_spill] sm:$0xff]  ;;  %v9459_v32 = vld [vmem:[#allocation115_spill] sm:$0xff] }
 0x3c1   : > { %v7972_v27 = vpop.eup %5563  ;;  %5583 = vpow2.f32 %v2386_v10  ;;  %v2436_v43 = vmul.f32 1.442695, %v2230_v31  ;;  %v2438_v42 = vmul.f32 1.442695, %v2231_v60  ;;  %2721 = vmatmul.mubr.bf16.gmra.mrb[108].mxu1 %v2558_v58  ;;  %3811 = vmatmul.mubr.bf16.gmra.mrb[108].mxu0 %v2558_v58  ;;  %v2025_v45 = vpop.permute.xlu0 %2024 }
 0x3c2   : > { %v5566_v23 = vpop.eup %5565  ;;  %5585 = vpow2.f32 %v2428_v25  ;;  %v2228_v55 = vsub.f32 %v9456_v11, %v2025_v45  ;;  %v2229_v17 = vsub.f32 %v9457_v62, %v2025_v45  ;;  %v1975_v57 = vpop.permute.xlu1 %1974 }
 0x3c3   : > { %v5568_v0 = vpop.eup %5567  ;;  %5587 = vpow2.f32 %v2430_v54  ;;  %v2208_v12 = vsub.f32 %v9458_v49, %v1975_v57  ;;  %v2209_v22 = vsub.f32 %v9459_v32, %v1975_v57  ;;  %v2560_v3 = vpack.c.bf16 %v5554_v18, %v5566_v23  ;;  %v9460_v54 = vld [vmem:[#allocation116_spill] sm:$0xff]  ;;  %v9461_v18 = vld [vmem:[#allocation117_spill] sm:$0xff] }
 0x3c4   : > { %v5570_v10 = vpop.eup %5569  ;;  %5589 = vpow2.f32 %v2436_v43  ;;  %v2432_v31 = vmul.f32 1.442695, %v2228_v55  ;;  %v2434_v60 = vmul.f32 1.442695, %v2229_v17  ;;  %v2561_v58 = vpack.c.bf16 %v5556_v33, %v5568_v0  ;;  %v9463_v0 = vld [vmem:[#allocation53_spill] sm:$0xff] }
 0x3c5   : > { %v5572_v47 = vpop.eup %5571  ;;  %5591 = vpow2.f32 %v2438_v42  ;;  %v2392_v25 = vmul.f32 1.442695, %v2208_v12  ;;  %v2394_v52 = vmul.f32 1.442695, %v2209_v22  ;;  %v1980_v11 = vpop.permute.xlu0 %1979  ;;  %v7979_v45 = vpack.c.bf16 %v5570_v10, %v7950_v48  ;;  %v9462_v42 = vld [vmem:[#allocation52_spill] sm:$0xff] }
 0x3c6   : > { %v5574_v62 = vpop.eup %5573  ;;  %5593 = vpow2.f32 %v2432_v31  ;;  %2728 = vmatprep.mubr.bf16.mxu1 %v2561_v58  ;;  %3818 = vmatprep.mubr.bf16.mxu0 %v2561_v58  ;;  %v2210_v57 = vsub.f32 %v9460_v54, %v1980_v11  ;;  %v2211_v23 = vsub.f32 %v9461_v18, %v1980_v11  ;;  %v2040_v43 = vpop.permute.xlu1 %2039  ;;  %v7984_v55 = vpack.c.bf16 %v5572_v47, %v7954_v37  ;;  %v9465_v54 = vld [vmem:[#allocation51_spill] sm:$0xff] }
 0x3c7   : > { %v5576_v33 = vpop.eup %5575  ;;  %5595 = vpow2.f32 %v2434_v60  ;;  %v2234_v17 = vsub.f32 %v9462_v42, %v2040_v43  ;;  %v2235_v49 = vsub.f32 %v9463_v0, %v2040_v43  ;;  %v9464_v60 = vld [vmem:[#allocation50_spill] sm:$0xff]  ;;  %v9467_v42 = vld [vmem:[#allocation120_spill] sm:$0xff] }
 0x3c8   : > { %v5578_v48 = vpop.eup %5577  ;;  %5597 = vpow2.f32 %v2392_v25  ;;  %v2396_v12 = vmul.f32 1.442695, %v2210_v57  ;;  %v2398_v32 = vmul.f32 1.442695, %v2211_v23 }
 0x3c9   : > { %v5580_v22 = vpop.eup %5579  ;;  %5599 = vpow2.f32 %v2394_v52  ;;  %v2444_v10 = vmul.f32 1.442695, %v2234_v17  ;;  %v2446_v31 = vmul.f32 1.442695, %v2235_v49  ;;  %2729 = vmatmul.mubr.bf16.gmra.mrb[112].mxu1 %v2560_v3  ;;  %3819 = vmatmul.mubr.bf16.gmra.mrb[112].mxu0 %v2560_v3  ;;  %v2035_v58 = vpop.permute.xlu0 %2034  ;;  %v7989_v47 = vpack.c.bf16 %v5578_v48, %v7962_v14  ;;  %v9466_v52 = vld [vmem:[#allocation118_spill] sm:$0xff] }
 0x3ca   : > { %v5582_v37 = vpop.eup %5581  ;;  %5601 = vpow2.f32 %v2396_v12  ;;  %v2232_v11 = vsub.f32 %v9464_v60, %v2035_v58  ;;  %v2233_v18 = vsub.f32 %v9465_v54, %v2035_v58  ;;  %v1985_v43 = vpop.permute.xlu1 %1984  ;;  %v7994_v25 = vpack.c.bf16 %v5580_v22, %v7966_v39  ;;  %v9468_v54 = vld [vmem:[#allocation122_spill] sm:$0xff] }
 0x3cb   : > { %v5584_v57 = vpop.eup %5583  ;;  %5603 = vpow2.f32 %v2398_v32  ;;  %v2212_v23 = vsub.f32 %v9466_v52, %v1985_v43  ;;  %v2213_v3 = vsub.f32 %v9467_v42, %v1985_v43  ;;  %v2562_v17 = vpack.c.bf16 %v7970_v56, %v5582_v37  ;;  %v9469_v56 = vld [vmem:[#allocation124_spill] sm:$0xff] }
 0x3cc   : > { %v5586_v14 = vpop.eup %5585  ;;  %5605 = vpow2.f32 %v2444_v10  ;;  %v2440_v0 = vmul.f32 1.442695, %v2232_v11  ;;  %v2442_v49 = vmul.f32 1.442695, %v2233_v18  ;;  %v2563_v48 = vpack.c.bf16 %v7972_v27, %v5584_v57  ;;  %v9470_v27 = vld [vmem:[#allocation56_spill] sm:$0xff]  ;;  %v9471_v57 = vld [vmem:[#allocation57_spill] sm:$0xff] }
 0x3cd   : > { %v5588_v12 = vpop.eup %5587  ;;  %5607 = vpow2.f32 %v2446_v31  ;;  %v2400_v58 = vmul.f32 1.442695, %v2212_v23  ;;  %v2402_v60 = vmul.f32 1.442695, %v2213_v3  ;;  %v1990_v39 = vpop.permute.xlu0 %1989  ;;  %v8000_v22 = vpack.c.bf16 %v5586_v14, %v5574_v62 }
 0x3ce   : > { %v5590_v32 = vpop.eup %5589  ;;  %5609 = vpow2.f32 %v2440_v0  ;;  %2736 = vmatprep.mubr.bf16.mxu1 %v2563_v48  ;;  %3826 = vmatprep.mubr.bf16.mxu0 %v2563_v48  ;;  %v2214_v43 = vsub.f32 %v9468_v54, %v1990_v39  ;;  %v2215_v37 = vsub.f32 %v9469_v56, %v1990_v39  ;;  %v2050_v10 = vpop.permute.xlu1 %2049  ;;  %v8004_v11 = vpack.c.bf16 %v5588_v12, %v5576_v33  ;;  %v9473_v54 = vld [vmem:[#allocation55_spill] sm:$0xff] }
 0x3cf   : > { %v5592_v18 = vpop.eup %5591  ;;  %5611 = vpow2.f32 %v2442_v49  ;;  %v2238_v31 = vsub.f32 %v9470_v27, %v2050_v10  ;;  %v2239_v52 = vsub.f32 %v9471_v57, %v2050_v10  ;;  %v9472_v49 = vld [vmem:[#allocation54_spill] sm:$0xff] }
 0x3d0   : > { %v5594_v23 = vpop.eup %5593  ;;  %5613 = vpow2.f32 %v2400_v58  ;;  %v2404_v62 = vmul.f32 1.442695, %v2214_v43  ;;  %v2406_v42 = vmul.f32 1.442695, %v2215_v37 }
 0x3d1   : > { %v5596_v3 = vpop.eup %5595  ;;  %5615 = vpow2.f32 %v2402_v60  ;;  %v2452_v14 = vmul.f32 1.442695, %v2238_v31  ;;  %v2454_v0 = vmul.f32 1.442695, %v2239_v52  ;;  %2737 = vmatmul.mubr.bf16.gmra.mrb[116].mxu1 %v2562_v17  ;;  %3827 = vmatmul.mubr.bf16.gmra.mrb[116].mxu0 %v2562_v17  ;;  %v2045_v48 = vpop.permute.xlu0 %2044  ;;  %v8008_v39 = vpack.c.bf16 %v5590_v32, %v5594_v23 }
 0x3d2   : > { %v5598_v33 = vpop.eup %5597  ;;  %5617 = vpow2.f32 %v2404_v62  ;;  %v2236_v12 = vsub.f32 %v9472_v49, %v2045_v48  ;;  %v2237_v56 = vsub.f32 %v9473_v54, %v2045_v48  ;;  %v8012_v10 = vpack.c.bf16 %v5592_v18, %v5596_v3 }
 0x3d3   : > { %v5600_v58 = vpop.eup %5599  ;;  %5619 = vpow2.f32 %v2406_v42 }
 0x3d4   : > { %v5602_v43 = vpop.eup %5601  ;;  %5621 = vpow2.f32 %v2452_v14  ;;  %v2448_v60 = vmul.f32 1.442695, %v2236_v12  ;;  %v2450_v37 = vmul.f32 1.442695, %v2237_v56 }
 0x3d5   : > { %v5604_v27 = vpop.eup %5603  ;;  %5623 = vpow2.f32 %v2454_v0  ;;  %v2564_v17 = vpack.c.bf16 %v5602_v43, %v5598_v33 }
 0x3d6   : > { %v5606_v31 = vpop.eup %5605  ;;  %5625 = vpow2.f32 %v2448_v60  ;;  %v2565_v32 = vpack.c.bf16 %v5604_v27, %v5600_v58  ;;  %v9474_v60 = vld [vmem:[#allocation126_spill] sm:$0xff] }
 0x3d7   : > { %v5608_v57 = vpop.eup %5607  ;;  %5627 = vpow2.f32 %v2450_v37  ;;  %v9475_v37 = vld [vmem:[#allocation128_spill] sm:$0xff] }
 0x3d8   : > { %v5610_v52 = vpop.eup %5609  ;;  %2744 = vmatprep.mubr.bf16.mxu1 %v2565_v32  ;;  %3834 = vmatprep.mubr.bf16.mxu0 %v2565_v32  ;;  %v9476_v27 = vsub.f32 %v9474_v60, %v9475_v37  ;;  %v9478_v32 = vld [vmem:[#allocation133_spill] sm:$0xff] }
 0x3d9   : > { %v5612_v23 = vpop.eup %5611  ;;  %2745 = vmatmul.mubr.bf16.gmra.mrb[120].mxu1 %v2564_v17  ;;  %3835 = vmatmul.mubr.bf16.gmra.mrb[120].mxu0 %v2564_v17  ;;  %v8014_v18 = vpack.c.bf16 %v5606_v31, %v5610_v52  ;;  %v9477_v31 = vld [vmem:[#allocation131_spill] sm:$0xff] }
 0x3da   : > { %v5614_v62 = vpop.eup %5613  ;;  %v8016_v42 = vpack.c.bf16 %v5608_v57, %v5612_v23  ;;  %v1704_v17 = vmul.f32 1.442695, %v9476_v27  ;;  %v9479_v57 = vsub.f32 %v9477_v31, %v9478_v32  ;;  %v9480_v23 = vld [vmem:[#allocation132_spill] sm:$0xff]  ;;  %v9492_v27 = vld [vmem:[#allocation145_spill] sm:$0xff]  ;;  %v9493_v31 = vld [vmem:[#allocation146_spill] sm:$0xff] }
 0x3db   : > { %v5616_v3 = vpop.eup %5615  ;;  %v9494_v32 = vsub.f32 %v9492_v27, %v9493_v31 }
 0x3dc   : > { %v5618_v14 = vpop.eup %5617  ;;  %v1706_v52 = vmul.f32 1.442695, %v9479_v57  ;;  %5629 = vpow2.f32 %v1704_v17  ;;  %v9495_v17 = vld [vmem:[#allocation148_spill] sm:$0xff] }
 0x3dd   : > { %v5620_v0 = vpop.eup %5619  ;;  %v2566_v48 = vpack.c.bf16 %v5618_v14, %v5614_v62  ;;  %v9483_v14 = vld [vmem:[#allocation136_spill] sm:$0xff]  ;;  %v1716_v57 = vmul.f32 1.442695, %v9494_v32 }
 0x3de   : > { %v5622_v33 = vpop.eup %5621  ;;  %v2567_v49 = vpack.c.bf16 %v5620_v0, %v5616_v3  ;;  %v9484_v0 = vld [vmem:[#allocation137_spill] sm:$0xff]  ;;  %5631 = vpow2.f32 %v1706_v52  ;;  %v9511_v32 = vld [vmem:[#allocation164_spill] sm:$0xff] }
 0x3df   : > { %v5624_v12 = vpop.eup %5623  ;;  %v9496_v52 = vld [vmem:[#allocation149_spill] sm:$0xff] }
 0x3e0   : > { %v5626_v54 = vpop.eup %5625  ;;  %2752 = vmatprep.mubr.bf16.mxu1 %v2567_v49  ;;  %3842 = vmatprep.mubr.bf16.mxu0 %v2567_v49  ;;  %v9487_v49 = vld [vmem:[#allocation140_spill] sm:$0xff] }
 0x3e1   : > { %v5628_v56 = vpop.eup %5627  ;;  %2753 = vmatmul.mubr.bf16.gmra.mrb[124].mxu1 %v2566_v48  ;;  %3843 = vmatmul.mubr.bf16.gmra.mrb[124].mxu0 %v2566_v48  ;;  %v8018_v58 = vpack.c.bf16 %v5622_v33, %v5626_v54  ;;  %v9485_v48 = vsub.f32 %v9483_v14, %v9484_v0  ;;  %v9486_v33 = vld [vmem:[#allocation139_spill] sm:$0xff]  ;;  %v9489_v54 = vld [vmem:[#allocation142_spill] sm:$0xff]  ;;  %v9499_v14 = vld [vmem:[#allocation152_spill] sm:$0xff] }
 0x3e2   : > { %2760 = vmatprep.mubr.bf16.mxu1 %v7984_v55  ;;  %3850 = vmatprep.mubr.bf16.mxu0 %v7984_v55  ;;  %v8022_v43 = vpack.c.bf16 %v5624_v12, %v5628_v56  ;;  %v9481_v55 = vld [vmem:[#allocation134_spill] sm:$0xff]  ;;  %v9490_v56 = vld [vmem:[#allocation143_spill] sm:$0xff] }
 0x3e3   : > { %v9482_v62 = vsub.f32 %v9480_v23, %v9481_v55  ;;  %v9491_v60 = vsub.f32 %v9489_v54, %v9490_v56  ;;  %v9497_v23 = vsub.f32 %v9495_v17, %v9496_v52  ;;  %v9505_v54 = vld [vmem:[#allocation158_spill] sm:$0xff] }
 0x3e5   : > { %v1708_v3 = vmul.f32 1.442695, %v9482_v62  ;;  %v1714_v37 = vmul.f32 1.442695, %v9491_v60  ;;  %v1718_v55 = vmul.f32 1.442695, %v9497_v23 }
 0x3e6   : > { %v9498_v62 = vld [vmem:[#allocation151_spill] sm:$0xff]  ;;  %v9508_v60 = vld [vmem:[#allocation161_spill] sm:$0xff]  ;;  %v9514_v23 = vld [vmem:[#allocation168_spill] sm:$0xff] }
 0x3e7   : > { %5633 = vpow2.f32 %v1708_v3  ;;  %v9500_v0 = vsub.f32 %v9498_v62, %v9499_v14  ;;  %v9502_v3 = vld [vmem:[#allocation155_spill] sm:$0xff] }
 0x3e9   : > { %2761 = vmatmul.mubr.bf16.gmra.mrb[128].mxu1 %v7979_v45  ;;  %3851 = vmatmul.mubr.bf16.gmra.mrb[128].mxu0 %v7979_v45  ;;  %v1710_v45 = vmul.f32 1.442695, %v9485_v48  ;;  %v1720_v48 = vmul.f32 1.442695, %v9500_v0  ;;  %v9517_v0 = vld [vmem:[#allocation172_spill] sm:$0xff] }
 0x3ea   : > { %2768 = vmatprep.mubr.bf16.mxu1 %v7994_v25  ;;  %3858 = vmatprep.mubr.bf16.mxu0 %v7994_v25  ;;  %v9488_v25 = vsub.f32 %v9486_v33, %v9487_v49 }
 0x3eb   : > { %5635 = vpow2.f32 %v1710_v45  ;;  %v9507_v45 = vld [vmem:[#allocation160_spill] sm:$0xff] }
 0x3ec   : > { %v1712_v12 = vmul.f32 1.442695, %v9488_v25  ;;  %v9504_v25 = vld [vmem:[#allocation157_spill] sm:$0xff]  ;;  %v9509_v27 = vsub.f32 %v9507_v45, %v9508_v60 }
 0x3ed   : > { %v9506_v56 = vsub.f32 %v9504_v25, %v9505_v54 }
 0x3ee   : > { %5637 = vpow2.f32 %v1712_v12  ;;  %v1726_v31 = vmul.f32 1.442695, %v9509_v27  ;;  %v9510_v12 = vld [vmem:[#allocation163_spill] sm:$0xff] }
 0x3ef   : > { %5639 = vpow2.f32 %v1714_v37  ;;  %v9512_v17 = vsub.f32 %v9510_v12, %v9511_v32  ;;  %v9513_v37 = vld [vmem:[#allocation166_spill] sm:$0xff]  ;;  %v9526_v32 = vld [vmem:[#allocation184_spill] sm:$0xff] }
 0x3f0   : > { %5641 = vpow2.f32 %v1716_v57  ;;  %v9515_v62 = vsub.f32 %v9513_v37, %v9514_v23  ;;  %v8076_v57 = vpop.eup %5629  ;;  %v9525_v12 = vld [vmem:[#allocation182_spill] sm:$0xff]  ;;  %v8098_v37 = vld [vmem:[#allocation2 + $0x1f8] sm:$0xff] }
 0x3f1   : > { %2769 = vmatmul.mubr.bf16.gmra.mrb[132].mxu1 %v7989_v47  ;;  %3859 = vmatmul.mubr.bf16.gmra.mrb[132].mxu0 %v7989_v47  ;;  %v9501_v47 = vld [vmem:[#allocation154_spill] sm:$0xff]  ;;  %5643 = vpow2.f32 %v1718_v55  ;;  %v1728_v52 = vmul.f32 1.442695, %v9512_v17  ;;  %9528 = vst [vmem:[#allocation74_spill] sm:$0xff] %v8098_v37 }
 0x3f2   : > { %2776 = vmatprep.mubr.bf16.mxu1 %v8004_v11  ;;  %3866 = vmatprep.mubr.bf16.mxu0 %v8004_v11  ;;  %v9503_v33 = vsub.f32 %v9501_v47, %v9502_v3  ;;  %v1724_v11 = vmul.f32 1.442695, %v9506_v56  ;;  %5645 = vpow2.f32 %v1720_v48  ;;  %v1730_v14 = vmul.f32 1.442695, %v9515_v62  ;;  %v9516_v55 = vld [vmem:[#allocation170_spill] sm:$0xff]  ;;  %v8083_v3 = vpop.eup %5631 }
 0x3f3   : > { %v9518_v47 = vsub.f32 %v9516_v55, %v9517_v0  ;;  %v8088_v56 = vpop.eup %5633  ;;  %v9530_v62 = vld [vmem:[#allocation186_spill] sm:$0xff] }
 0x3f4   : > { %v1722_v49 = vmul.f32 1.442695, %v9503_v33  ;;  %v9519_v33 = vld [vmem:[#allocation174_spill] sm:$0xff] }
 0x3f5   : > { %v1732_v48 = vmul.f32 1.442695, %v9518_v47  ;;  %v8093_v27 = vpop.eup %5635 }
 0x3f6   : > { %5647 = vpow2.f32 %v1722_v49  ;;  %v9520_v49 = vld [vmem:[#allocation176_spill] sm:$0xff] }
 0x3f7   : > { %5649 = vpow2.f32 %v1724_v11  ;;  %v9521_v25 = vsub.f32 %v9519_v33, %v9520_v49  ;;  %v9523_v11 = vld [vmem:[#allocation180_spill] sm:$0xff]  ;;  %v9533_v33 = vld [vmem:[#allocation190_spill] sm:$0xff] }
 0x3f8   : > { %5651 = vpow2.f32 %v1726_v31  ;;  %v8100_v31 = vld [vmem:[#allocation2 + $0x1f0] sm:$0xff]  ;;  %v8102_v23 = vpop.eup %5637 }
 0x3f9   : > { %2777 = vmatmul.mubr.bf16.gmra.mrb[136].mxu1 %v8000_v22  ;;  %3867 = vmatmul.mubr.bf16.gmra.mrb[136].mxu0 %v8000_v22  ;;  %v1734_v54 = vmul.f32 1.442695, %v9521_v25  ;;  %5653 = vpow2.f32 %v1728_v52  ;;  %v9522_v22 = vld [vmem:[#allocation178_spill] sm:$0xff]  ;;  %9529 = vst [vmem:[#allocation76_spill] sm:$0xff] %v8100_v31  ;;  %v9531_v52 = vld [vmem:[#allocation188_spill] sm:$0xff]  ;;  %v8107_v47 = vpop.eup %5639 }
 0x3fa   : > { %2784 = vmatprep.mubr.bf16.mxu1 %v8012_v10  ;;  %3874 = vmatprep.mubr.bf16.mxu0 %v8012_v10  ;;  %v9524_v45 = vsub.f32 %v9522_v22, %v9523_v11  ;;  %5655 = vpow2.f32 %v1730_v14  ;;  %v9527_v10 = vsub.f32 %v9525_v12, %v9526_v32  ;;  %v9532_v55 = vsub.f32 %v9530_v62, %v9531_v52  ;;  %v9534_v14 = vld [vmem:[#allocation194_spill] sm:$0xff]  ;;  %v9537_v32 = vld [vmem:[#allocation200_spill] sm:$0xff]  ;;  %v9541_v52 = vld [vmem:[#allocation201_spill] sm:$0xff] }
 0x3fb   : > { %5657 = vpow2.f32 %v1732_v48  ;;  %v9535_v49 = vsub.f32 %v9533_v33, %v9534_v14  ;;  %v9536_v12 = vld [vmem:[#allocation198_spill] sm:$0xff]  ;;  %v9543_v14 = vld [vmem:[#allocation205_spill] sm:$0xff] }
 0x3fc   : > { %v1736_v60 = vmul.f32 1.442695, %v9524_v45  ;;  %v1738_v17 = vmul.f32 1.442695, %v9527_v10  ;;  %v1740_v0 = vmul.f32 1.442695, %v9532_v55  ;;  %5659 = vpow2.f32 %v1734_v54  ;;  %v8112_v45 = vpop.eup %5641 }
 0x3fd   : > { %v1742_v25 = vmul.f32 1.442695, %v9535_v49  ;;  %v9538_v10 = vsub.f32 %v9536_v12, %v9537_v32  ;;  %v8123_v54 = vpop.eup %5643  ;;  %v9542_v55 = vsub.f32 %v9541_v52, %v7670_v24  ;;  %v9544_v49 = vsub.f32 %v9543_v14, %v7689_v40  ;;  %v9545_v40 = vld [vmem:[#allocation207_spill] sm:$0xff]  ;;  %v9549_v14 = vld [vmem:[#allocation60_spill] sm:$0xff]  ;;  %v9550_v24 = vld [vmem:[#allocation61_spill] sm:$0xff] }
 0x3fe   : > { %5661 = vpow2.f32 %v1736_v60  ;;  %v8130_v60 = vpop.eup %5645 }
 0x3ff   : > { %v1575_v22 = vpop.xlane.xlu0 %1574  ;;  %v1572_v11 = vpop.xlane.xlu1 %1571  ;;  %v1744_v48 = vmul.f32 1.442695, %v9538_v10  ;;  %5663 = vpow2.f32 %v1738_v17  ;;  %v1746_v33 = vmul.f32 1.442695, %v9542_v55  ;;  %v9546_v17 = vsub.f32 %v9545_v40, %v7702_v41  ;;  %v9547_v10 = vld [vmem:[#allocation211_spill] sm:$0xff]  ;;  %v9552_v41 = vld [vmem:[#allocation217_spill] sm:$0xff] }
 0x400   : > { %v8118_v35 = vmax.f32 %v8098_v37, %v1575_v22  ;;  %v8121_v62 = vmax.f32 %v8100_v31, %v1572_v11  ;;  %5665 = vpow2.f32 %v1740_v0  ;;  %v1748_v22 = vmul.f32 1.442695, %v9544_v49  ;;  %v2889_v37 = vld [vmem:[#allocation3] sm:$0xff] }
 0x401   : > { %2785 = vmatmul.mubr.bf16.gmra.mrb[140].mxu1 %v8008_v39  ;;  %3875 = vmatmul.mubr.bf16.gmra.mrb[140].mxu0 %v8008_v39  ;;  %v8145_v39 = vpop.eup %5647  ;;  %5667 = vpow2.f32 %v1742_v25  ;;  %v1750_v0 = vmul.f32 1.442695, %v9546_v17  ;;  %v9548_v52 = vsub.f32 %v9547_v10, %v7721_v1 }
 0x402   : > { %9539 = vst [vmem:[#allocation78_spill] sm:$0xff] %v8118_v35  ;;  %9540 = vst [vmem:[#allocation80_spill] sm:$0xff] %v8121_v62  ;;  %2149 = vperm.xlu0 %5387, %v8118_v35   ;;  %2792 = vmatprep.mubr.bf16.mxu1 %v8016_v42  ;;  %v8152_v32 = vpop.eup %5649  ;;  %5669 = vpow2.f32 %v1744_v48 }
 0x403   : > { %4170 = vst.msk [vmem:[#allocation2 + $0x1f8] sm:$0xff] %vm3081_vm1, %v8118_v35  ;;  %4169 = vst.msk [vmem:[#allocation2 + $0x1f0] sm:$0xff] %vm3081_vm1, %v8121_v62  ;;  %3882 = vmatprep.mubr.bf16.mxu0 %v8016_v42  ;;  %2144 = vperm.xlu1 %5388, %v8121_v62   ;;  %v2060_v12 = vpop.permute.xlu1 %2059  ;;  %v1752_v55 = vmul.f32 1.442695, %v9548_v52  ;;  %v8159_v11 = vpop.eup %5651  ;;  %5671 = vpow2.f32 %v1746_v33  ;;  %v9553_v42 = vsub.f32 %v9552_v41, %v7748_v8  ;;  %v9554_v33 = vld [vmem:[#allocation58_spill] sm:$0xff]  ;;  %v9555_v52 = vld [vmem:[#allocation59_spill] sm:$0xff] }
 0x404   : > { %v2242_v49 = vsub.f32 %v9549_v14, %v2060_v12  ;;  %v2243_v25 = vsub.f32 %v9550_v24, %v2060_v12  ;;  %9551 = vst [vmem:[#allocation171_spill] sm:$0xff] %v8159_v11  ;;  %v8164_v17 = vpop.eup %5653  ;;  %5673 = vpow2.f32 %v1748_v22  ;;  %v9556_v41 = vld [vmem:[#allocation62_spill] sm:$0xff] }
 0x405   : > { %v1754_v40 = vmul.f32 1.442695, %v9553_v42  ;;  %v8167_v48 = vpop.eup %5655  ;;  %5675 = vpow2.f32 %v1750_v0  ;;  %v9557_v42 = vld [vmem:[#allocation63_spill] sm:$0xff] }
 0x406   : > { %v2460_v62 = vmul.f32 1.442695, %v2242_v49  ;;  %3217 = vperm.xlu0 %5387, %v8083_v3   ;;  %v2462_v1 = vmul.f32 1.442695, %v2243_v25  ;;  %v8170_v12 = vpop.eup %5657  ;;  %5677 = vpow2.f32 %v1752_v55 }
 0x407   : > { %v2055_v10 = vpop.permute.xlu0 %2054  ;;  %3212 = vperm.xlu1 %5388, %v8076_v57   ;;  %v2065_v24 = vpop.permute.xlu1 %2064  ;;  %5679 = vpow2.f32 %v1754_v40 }
 0x408   : > { %v2240_v8 = vsub.f32 %v9554_v33, %v2055_v10  ;;  %v2241_v14 = vsub.f32 %v9555_v52, %v2055_v10  ;;  %v2244_v22 = vsub.f32 %v9556_v41, %v2065_v24  ;;  %v8175_v49 = vpop.eup %5659  ;;  %v2245_v31 = vsub.f32 %v9557_v42, %v2065_v24  ;;  %v9559_v52 = vld [vmem:[#allocation67_spill] sm:$0xff]  ;;  %v9560_v41 = vld [vmem:[#allocation68_spill] sm:$0xff] }
 0x409   : > { %2793 = vmatmul.mubr.bf16.gmra.mrb[144].mxu1 %v8014_v18  ;;  %3883 = vmatmul.mubr.bf16.gmra.mrb[144].mxu0 %v8014_v18  ;;  %v8180_v0 = vpop.eup %5661  ;;  %5681 = vpow2.f32 %v2460_v62  ;;  %v9558_v62 = vld [vmem:[#allocation65_spill] sm:$0xff] }
 0x40a   : > { %v2456_v25 = vmul.f32 1.442695, %v2240_v8  ;;  %v2458_v55 = vmul.f32 1.442695, %v2241_v14  ;;  %v2464_v35 = vmul.f32 1.442695, %v2244_v22  ;;  %3227 = vperm.xlu0 %5387, %v8093_v27   ;;  %2800 = vmatprep.mubr.bf16.mxu1 %v8022_v43  ;;  %v8184_v10 = vpop.eup %5663  ;;  %5683 = vpow2.f32 %v2462_v1 }
 0x40b   : > { %v2466_v40 = vmul.f32 1.442695, %v2245_v31  ;;  %3890 = vmatprep.mubr.bf16.mxu0 %v8022_v43  ;;  %v2070_v24 = vpop.permute.xlu0 %2069  ;;  %3222 = vperm.xlu1 %5388, %v8088_v56   ;;  %v2075_v18 = vpop.permute.xlu1 %2074  ;;  %v9561_v1 = vld [vmem:[#allocation69_spill] sm:$0xff] }
 0x40c   : > { %v8188_v33 = vpop.eup %5665  ;;  %5685 = vpow2.f32 %v2456_v25  ;;  %v2246_v8 = vsub.f32 %v9558_v62, %v2070_v24  ;;  %v2247_v14 = vsub.f32 %v9559_v52, %v2070_v24  ;;  %v2248_v22 = vsub.f32 %v9560_v41, %v2075_v18 }
 0x40d   : > { %v8193_v42 = vpop.eup %5667  ;;  %5687 = vpow2.f32 %v2458_v55  ;;  %v2249_v31 = vsub.f32 %v9561_v1, %v2075_v18  ;;  %v9562_v18 = vld [vmem:[#allocation71_spill] sm:$0xff]  ;;  %v9563_v1 = vld [vmem:[#allocation73_spill] sm:$0xff] }
 0x40e   : > { %v8196_v43 = vpop.eup %5669  ;;  %5689 = vpow2.f32 %v2464_v35  ;;  %v2468_v13 = vmul.f32 1.442695, %v2246_v8  ;;  %v2470_v20 = vmul.f32 1.442695, %v2247_v14  ;;  %v2472_v30 = vmul.f32 1.442695, %v2248_v22  ;;  %3237 = vperm.xlu0 %5387, %v8107_v47  }
 0x40f   : > { %v8199_v25 = vpop.eup %5671  ;;  %5691 = vpow2.f32 %v2466_v40  ;;  %v2474_v24 = vmul.f32 1.442695, %v2249_v31  ;;  %v2080_v62 = vpop.permute.xlu0 %2079  ;;  %3232 = vperm.xlu1 %5388, %v8102_v23   ;;  %v9564_v8 = vld [vmem:[#allocation75_spill] sm:$0xff]  ;;  %v2953_v40 = vmul.f32 %v8076_v57, %v2889_v37 }
 0x410   : > { %v2085_v52 = vpop.permute.xlu1 %2084  ;;  %v8202_v55 = vpop.eup %5673  ;;  %5693 = vpow2.f32 %v2468_v13  ;;  %v2250_v41 = vsub.f32 %v9562_v18, %v2080_v62  ;;  %v2251_v35 = vsub.f32 %v9563_v1, %v2080_v62  ;;  %v2890_v31 = vld [vmem:[#allocation3 + $0x8] sm:$0xff] }
 0x411   : > { %v2252_v14 = vsub.f32 %v9564_v8, %v2085_v52  ;;  %v8207_v22 = vpop.eup %5675  ;;  %5695 = vpow2.f32 %v2470_v20  ;;  %v2253_v6 = vsub.f32 %v9565_v38, %v2085_v52  ;;  %2801 = vmatmul.mubr.bf16.gmra.mrb[148].mxu1 %v8018_v58  ;;  %3891 = vmatmul.mubr.bf16.gmra.mrb[148].mxu0 %v8018_v58  ;;  %v9566_v57 = vld [vmem:[#allocation79_spill] sm:$0xff]  ;;  %v9567_v8 = vld [vmem:[#allocation81_spill] sm:$0xff] }
 0x412   : > { %v8213_v9 = vpop.eup %5677  ;;  %5697 = vpow2.f32 %v2472_v30  ;;  %v2476_v13 = vmul.f32 1.442695, %v2250_v41  ;;  %v2478_v18 = vmul.f32 1.442695, %v2251_v35  ;;  %3247 = vperm.xlu0 %5387, %v8123_v54  }
 0x413   : > { %v2480_v62 = vmul.f32 1.442695, %v2252_v14  ;;  %v8216_v1 = vpop.eup %5679  ;;  %5699 = vpow2.f32 %v2474_v24  ;;  %v2482_v20 = vmul.f32 1.442695, %v2253_v6  ;;  %v2090_v38 = vpop.permute.xlu0 %2089  ;;  %3242 = vperm.xlu1 %5388, %v8112_v45   ;;  %v2954_v6 = vmul.f32 %v8083_v3, %v2890_v31 }
 0x414   : > { %v2634_v52 = vpop.f32.mrb[64].mxu1  ;;  %v5682_v58 = vpop.eup %5681  ;;  %5701 = vpow2.f32 %v2476_v13  ;;  %v2254_v37 = vsub.f32 %v9566_v57, %v2090_v38  ;;  %v2255_v50 = vsub.f32 %v9567_v8, %v2090_v38  ;;  %v9569_v13 = vld [vmem:[#allocation83_spill] sm:$0xff] }
 0x415   : > { %v3017_v30 = vadd.f32 %v2953_v40, %v2634_v52  ;;  %v8221_v41 = vpop.f32.mrb[64].mxu0  ;;  %v2636_v35 = vpop.f32.mrb[65].mxu1  ;;  %5703 = vpow2.f32 %v2478_v18  ;;  %v9571_v18 = vld [vmem:[#allocation85_spill] sm:$0xff] }
 0x416   : > { %9568 = vst [vmem:[#allocation82_spill] sm:$0xff] %v8221_v41  ;;  %v5684_v14 = vpop.eup %5683  ;;  %v3726_v21 = vpop.f32.mrb[65].mxu0  ;;  %5705 = vpow2.f32 %v2480_v62  ;;  %v2484_v4 = vmul.f32 1.442695, %v2254_v37  ;;  %v2486_v26 = vmul.f32 1.442695, %v2255_v50  ;;  %3257 = vperm.xlu0 %5387, %v8145_v39  }
 0x417   : > { %v2095_v2 = vpop.permute.xlu1 %2094  ;;  %v5686_v24 = vpop.eup %5685  ;;  %3082 = vst.msk [vmem:[#allocation3] sm:$0xff] %vm3081_vm1, %v3017_v30  ;;  %5707 = vpow2.f32 %v2482_v20  ;;  %3252 = vperm.xlu1 %5388, %v8130_v60   ;;  %v2891_v50 = vld [vmem:[#allocation3 + $0x10] sm:$0xff]  ;;  %v9572_v20 = vld [vmem:[#allocation87_spill] sm:$0xff] }
 0x418   : > { %v2256_v57 = vsub.f32 %v9569_v13, %v2095_v2  ;;  %v2637_v63 = vpop.f32.mrb[66].mxu1  ;;  %v8226_v38 = vpop.f32.mrb[66].mxu0  ;;  %v2257_v21 = vsub.f32 %v9571_v18, %v2095_v2  ;;  %v2580_v31 = vpack.c.bf16 %v5682_v58, %v5686_v24  ;;  %5709 = vpow2.f32 %v2484_v4  ;;  %v9573_v2 = vld [vmem:[#allocation89_spill] sm:$0xff] }
 0x419   : > { %9570 = vst [vmem:[#allocation84_spill] sm:$0xff] %v8226_v38  ;;  %v5688_v40 = vpop.eup %5687  ;;  %v3018_v52 = vadd.f32 %v2954_v6, %v2637_v63  ;;  %v2639_v8 = vpop.f32.mrb[67].mxu1  ;;  %5711 = vpow2.f32 %v2486_v26  ;;  %v9575_v24 = vld [vmem:[#allocation93_spill] sm:$0xff]  ;;  %v2955_v4 = vmul.f32 %v8088_v56, %v2891_v50  ;;  %v2893_v26 = vld [vmem:[#allocation3 + $0x20] sm:$0xff] }
 0x41a   : > { %v3729_v3 = vpop.f32.mrb[67].mxu0  ;;  %v5690_v62 = vpop.eup %5689  ;;  %v2488_v37 = vmul.f32 1.442695, %v2256_v57  ;;  %v2581_v35 = vpack.c.bf16 %v5684_v14, %v5688_v40  ;;  %v2490_v41 = vmul.f32 1.442695, %v2257_v21  ;;  %v9574_v8 = vld [vmem:[#allocation91_spill] sm:$0xff]  ;;  %3267 = vperm.xlu0 %5387, %v8159_v11  }
 0x41b   : > { %v2100_v30 = vpop.permute.xlu0 %2099  ;;  %v5692_v13 = vpop.eup %5691  ;;  %3083 = vst.msk [vmem:[#allocation3 + $0x8] sm:$0xff] %vm3081_vm1, %v3018_v52  ;;  %v2892_v14 = vld [vmem:[#allocation3 + $0x18] sm:$0xff]  ;;  %3262 = vperm.xlu1 %5388, %v8152_v32  }
 0x41c   : > { %v2258_v38 = vsub.f32 %v9572_v20, %v2100_v30  ;;  %v2259_v63 = vsub.f32 %v9573_v2, %v2100_v30  ;;  %v2105_v6 = vpop.permute.xlu1 %2104  ;;  %v5694_v18 = vpop.eup %5693  ;;  %5713 = vpow2.f32 %v2488_v37  ;;  %2808 = vmatprep.mubr.bf16.mxu1 %v2581_v35  ;;  %3898 = vmatprep.mubr.bf16.mxu0 %v2581_v35 }
 0x41d   : > { %v2260_v58 = vsub.f32 %v9574_v8, %v2105_v6  ;;  %v2261_v3 = vsub.f32 %v9575_v24, %v2105_v6  ;;  %v5696_v57 = vpop.eup %5695  ;;  %5715 = vpow2.f32 %v2490_v41  ;;  %2809 = vmatmul.mubr.bf16.gmra.mrb[152].mxu1 %v2580_v31  ;;  %v2642_v52 = vpop.f32.mrb[68].mxu1  ;;  %v8240_v37 = vpack.c.bf16 %v5694_v18, %v5690_v62  ;;  %3899 = vmatmul.mubr.bf16.gmra.mrb[152].mxu0 %v2580_v31  ;;  %v9578_v24 = vld [vmem:[#allocation97_spill] sm:$0xff]  ;;  %v9579_v31 = vld [vmem:[#allocation99_spill] sm:$0xff] }
 0x41e   : > { %v2492_v40 = vmul.f32 1.442695, %v2258_v38  ;;  %v2494_v21 = vmul.f32 1.442695, %v2259_v63  ;;  %v8238_v30 = vpop.f32.mrb[68].mxu0  ;;  %v5698_v20 = vpop.eup %5697  ;;  %v3019_v56 = vadd.f32 %v2955_v4, %v2642_v52  ;;  %v2583_v41 = vpack.c.bf16 %v5696_v57, %v5692_v13  ;;  %v9577_v63 = vld [vmem:[#allocation95_spill] sm:$0xff]  ;;  %3277 = vperm.xlu0 %5387, %v8167_v48  }
 0x41f   : > { %9576 = vst [vmem:[#allocation86_spill] sm:$0xff] %v8238_v30  ;;  %v2496_v2 = vmul.f32 1.442695, %v2260_v58  ;;  %v2498_v6 = vmul.f32 1.442695, %v2261_v3  ;;  %v2110_v35 = vpop.permute.xlu0 %2109  ;;  %v2644_v50 = vpop.f32.mrb[69].mxu1  ;;  %v2956_v62 = vmul.f32 %v8093_v27, %v2892_v14  ;;  %v2957_v57 = vmul.f32 %v8102_v23, %v2893_v26  ;;  %3272 = vperm.xlu1 %5388, %v8164_v17  }
 0x420   : > { %v5700_v38 = vpop.eup %5699  ;;  %5717 = vpow2.f32 %v2492_v40  ;;  %v2262_v8 = vsub.f32 %v9577_v63, %v2110_v35  ;;  %v2263_v11 = vsub.f32 %v9578_v24, %v2110_v35  ;;  %v3734_v36 = vpop.f32.mrb[69].mxu0  ;;  %3084 = vst.msk [vmem:[#allocation3 + $0x10] sm:$0xff] %vm3081_vm1, %v3019_v56  ;;  %v9580_v3 = vld [vmem:[#allocation101_spill] sm:$0xff]  ;;  %2816 = vmatprep.mubr.bf16.mxu1 %v2583_v41  ;;  %3906 = vmatprep.mubr.bf16.mxu0 %v2583_v41  ;;  %v2894_v40 = vld [vmem:[#allocation3 + $0x28] sm:$0xff] }
 0x421   : > { %v2115_v30 = vpop.permute.xlu1 %2114  ;;  %v5702_v18 = vpop.eup %5701  ;;  %5719 = vpow2.f32 %v2494_v21  ;;  %v9581_v23 = vld [vmem:[#allocation103_spill] sm:$0xff] }
 0x422   : > { %v2264_v58 = vsub.f32 %v9579_v31, %v2115_v30  ;;  %v2265_v4 = vsub.f32 %v9580_v3, %v2115_v30  ;;  %v2645_v52 = vpop.f32.mrb[70].mxu1  ;;  %v8249_v13 = vpop.f32.mrb[70].mxu0  ;;  %5721 = vpow2.f32 %v2496_v2  ;;  %v2500_v35 = vmul.f32 1.442695, %v2262_v8  ;;  %3287 = vperm.xlu0 %5387, %v8175_v49  }
 0x423   : > { %v5704_v36 = vpop.eup %5703  ;;  %v2502_v27 = vmul.f32 1.442695, %v2263_v11  ;;  %v3020_v14 = vadd.f32 %v2956_v62, %v2645_v52  ;;  %v2647_v21 = vpop.f32.mrb[71].mxu1  ;;  %5723 = vpow2.f32 %v2498_v6  ;;  %v9582_v11 = vld [vmem:[#allocation105_spill] sm:$0xff]  ;;  %v8257_v62 = vpack.c.bf16 %v5702_v18, %v5698_v20  ;;  %v9583_v6 = vld [vmem:[#allocation107_spill] sm:$0xff]  ;;  %3282 = vperm.xlu1 %5388, %v8170_v12  }
 0x424   : > { %v3737_v56 = vpop.f32.mrb[71].mxu0  ;;  %v5706_v50 = vpop.eup %5705  ;;  %v2504_v30 = vmul.f32 1.442695, %v2264_v58  ;;  %v2506_v63 = vmul.f32 1.442695, %v2265_v4  ;;  %v2585_v41 = vpack.c.bf16 %v5704_v36, %v5700_v38  ;;  %5725 = vpow2.f32 %v2500_v35  ;;  %v9584_v4 = vld [vmem:[#allocation109_spill] sm:$0xff] }
 0x425   : > { %v2120_v24 = vpop.permute.xlu0 %2119  ;;  %v5708_v31 = vpop.eup %5707  ;;  %3085 = vst.msk [vmem:[#allocation3 + $0x18] sm:$0xff] %vm3081_vm1, %v3020_v14  ;;  %5727 = vpow2.f32 %v2502_v27  ;;  %v2958_v21 = vmul.f32 %v8107_v47, %v2894_v40  ;;  %2817 = vmatmul.mubr.bf16.gmra.mrb[156].mxu1 %v8240_v37  ;;  %3907 = vmatmul.mubr.bf16.gmra.mrb[156].mxu0 %v8240_v37  ;;  %v9587_v37 = vld [vmem:[#allocation119_spill] sm:$0xff] }
 0x426   : > { %v2266_v26 = vsub.f32 %v9581_v23, %v2120_v24  ;;  %v2267_v2 = vsub.f32 %v9582_v11, %v2120_v24  ;;  %v2125_v8 = vpop.permute.xlu1 %2124  ;;  %v5710_v3 = vpop.eup %5709  ;;  %5729 = vpow2.f32 %v2504_v30  ;;  %2824 = vmatprep.mubr.bf16.mxu1 %v2585_v41  ;;  %3914 = vmatprep.mubr.bf16.mxu0 %v2585_v41 }
 0x427   : > { %v2268_v58 = vsub.f32 %v9583_v6, %v2125_v8  ;;  %v2269_v52 = vsub.f32 %v9584_v4, %v2125_v8  ;;  %v5712_v38 = vpop.eup %5711  ;;  %v2650_v14 = vpop.f32.mrb[72].mxu1  ;;  %v8266_v20 = vpack.c.bf16 %v5710_v3, %v5706_v50  ;;  %5731 = vpow2.f32 %v2506_v63  ;;  %3297 = vperm.xlu0 %5387, %v8184_v10   ;;  %3292 = vperm.xlu1 %5388, %v8180_v0  }
 0x428   : > { %v2508_v36 = vmul.f32 1.442695, %v2266_v26  ;;  %v2510_v35 = vmul.f32 1.442695, %v2267_v2  ;;  %v8264_v56 = vpop.f32.mrb[72].mxu0  ;;  %v5714_v18 = vpop.eup %5713  ;;  %v3021_v40 = vadd.f32 %v2957_v57, %v2650_v14  ;;  %v9585_v26 = vld [vmem:[#allocation111_spill] sm:$0xff]  ;;  %v2587_v63 = vpack.c.bf16 %v5712_v38, %v5708_v31 }
 0x429   : > { %v2512_v27 = vmul.f32 1.442695, %v2268_v58  ;;  %v2514_v24 = vmul.f32 1.442695, %v2269_v52  ;;  %v2130_v47 = vpop.permute.xlu0 %2129  ;;  %v2652_v30 = vpop.f32.mrb[73].mxu1  ;;  %v9586_v2 = vld [vmem:[#allocation113_spill] sm:$0xff] }
 0x42a   : > { %v5716_v23 = vpop.eup %5715  ;;  %5733 = vpow2.f32 %v2508_v36  ;;  %v2270_v11 = vsub.f32 %v9585_v26, %v2130_v47  ;;  %v2271_v8 = vsub.f32 %v9586_v2, %v2130_v47  ;;  %v3742_v50 = vpop.f32.mrb[73].mxu0  ;;  %3086 = vst.msk [vmem:[#allocation3 + $0x20] sm:$0xff] %vm3081_vm1, %v3021_v40  ;;  %v9588_v57 = vld [vmem:[#allocation121_spill] sm:$0xff]  ;;  %v2895_v36 = vld [vmem:[#allocation3 + $0x30] sm:$0xff] }
 0x42b   : > { %v2135_v3 = vpop.permute.xlu1 %2134  ;;  %5735 = vpow2.f32 %v2510_v35  ;;  %v2653_v4 = vpop.f32.mrb[74].mxu1  ;;  %v2896_v50 = vld [vmem:[#allocation3 + $0x38] sm:$0xff]  ;;  %3307 = vperm.xlu0 %5387, %v8193_v42   ;;  %3302 = vperm.xlu1 %5388, %v8188_v33  }
 0x42c   : > { %v2272_v6 = vsub.f32 %v9587_v37, %v2135_v3  ;;  %v2273_v58 = vsub.f32 %v9588_v57, %v2135_v3  ;;  %v8275_v52 = vpop.f32.mrb[74].mxu0  ;;  %v5718_v14 = vpop.eup %5717  ;;  %5737 = vpow2.f32 %v2512_v27  ;;  %v2516_v30 = vmul.f32 1.442695, %v2270_v11  ;;  %v9589_v27 = vld [vmem:[#allocation123_spill] sm:$0xff]  ;;  %v9590_v11 = vld [vmem:[#allocation125_spill] sm:$0xff] }
 0x42d   : > { %v2518_v47 = vmul.f32 1.442695, %v2271_v8  ;;  %v3022_v26 = vadd.f32 %v2958_v21, %v2653_v4  ;;  %v2655_v41 = vpop.f32.mrb[75].mxu1  ;;  %v3745_v31 = vpop.f32.mrb[75].mxu0  ;;  %5739 = vpow2.f32 %v2514_v24  ;;  %v8279_v3 = vpack.c.bf16 %v5718_v14, %v5714_v18  ;;  %v9591_v24 = vld [vmem:[#allocation127_spill] sm:$0xff]  ;;  %2825 = vmatmul.mubr.bf16.gmra.mrb[160].mxu1 %v8257_v62  ;;  %3915 = vmatmul.mubr.bf16.gmra.mrb[160].mxu0 %v8257_v62 }
 0x42e   : > { %v5720_v38 = vpop.eup %5719  ;;  %v2520_v35 = vmul.f32 1.442695, %v2272_v6  ;;  %v2522_v40 = vmul.f32 1.442695, %v2273_v58  ;;  %v2140_v2 = vpop.permute.xlu0 %2139  ;;  %5741 = vpow2.f32 %v2516_v30  ;;  %v1673_v6 = vsub.f32 %v9591_v24, %v7290_v7  ;;  %2832 = vmatprep.mubr.bf16.mxu1 %v2587_v63  ;;  %3922 = vmatprep.mubr.bf16.mxu0 %v2587_v63 }
 0x42f   : > { %v5722_v37 = vpop.eup %5721  ;;  %3087 = vst.msk [vmem:[#allocation3 + $0x28] sm:$0xff] %vm3081_vm1, %v3022_v26  ;;  %v2274_v21 = vsub.f32 %v9589_v27, %v2140_v2  ;;  %v2275_v8 = vsub.f32 %v9590_v11, %v2140_v2  ;;  %v8284_v57 = vpack.c.bf16 %v5720_v38, %v5716_v23  ;;  %5743 = vpow2.f32 %v2518_v47  ;;  %v2658_v30 = vpop.f32.mrb[76].mxu1  ;;  %v9592_v38 = vld [vmem:[#allocation221_spill] sm:$0xff]  ;;  %3317 = vperm.xlu0 %5387, %v8199_v25  }
 0x430   : > { %v5724_v4 = vpop.eup %5723  ;;  %v2959_v58 = vmul.f32 %v8112_v45, %v2895_v36  ;;  %5745 = vpow2.f32 %v2520_v35  ;;  %v8291_v26 = vpop.f32.mrb[76].mxu0  ;;  %v2960_v23 = vmul.f32 %v8123_v54, %v2896_v50  ;;  %v9593_v7 = vsub.f32 %v9592_v38, %v7779_v28  ;;  %v9595_v11 = vld [vmem:[#allocation129_spill] sm:$0xff]  ;;  %v9596_v54 = vld [vmem:[#allocation218_spill] sm:$0xff]  ;;  %3312 = vperm.xlu1 %5388, %v8196_v43  }
 0x431   : > { %v5726_v41 = vpop.eup %5725  ;;  %v2524_v18 = vmul.f32 1.442695, %v2274_v21  ;;  %v2526_v14 = vmul.f32 1.442695, %v2275_v8  ;;  %5747 = vpow2.f32 %v2522_v40  ;;  %v2660_v36 = vpop.f32.mrb[77].mxu1  ;;  %v9594_v21 = vld [vmem:[#allocation130_spill] sm:$0xff]  ;;  %v9597_v50 = vsub.f32 %v9596_v54, %v7751_v46 }
 0x432   : > { %v5728_v31 = vpop.eup %5727  ;;  %v1758_v47 = vmul.f32 1.442695, %v9593_v7  ;;  %v3023_v45 = vadd.f32 %v2959_v58, %v2658_v30  ;;  %v3750_v35 = vpop.f32.mrb[77].mxu0  ;;  %v8299_v2 = vpack.c.bf16 %v5726_v41, %v5722_v37  ;;  %v1672_v8 = vsub.f32 %v9595_v11, %v9594_v21  ;;  %v9601_v54 = vld [vmem:[#allocation141_spill] sm:$0xff] }
 0x433   : > { %v5730_v27 = vpop.eup %5729  ;;  %v1756_v24 = vmul.f32 1.442695, %v9597_v50  ;;  %5749 = vpow2.f32 %v2524_v18  ;;  %v2661_v28 = vpop.f32.mrb[78].mxu1  ;;  %v8308_v40 = vpack.c.bf16 %v5728_v31, %v5724_v4  ;;  %v1770_v7 = vmul.f32 1.442695, %v1673_v6  ;;  %v9598_v18 = vld [vmem:[#allocation138_spill] sm:$0xff]  ;;  %3327 = vperm.xlu0 %5387, %v8207_v22  }
 0x434   : > { %v8306_v62 = vpop.f32.mrb[78].mxu0  ;;  %v5732_v58 = vpop.eup %5731  ;;  %5751 = vpow2.f32 %v2526_v14  ;;  %3088 = vst.msk [vmem:[#allocation3 + $0x30] sm:$0xff] %vm3081_vm1, %v3023_v45  ;;  %v3024_v37 = vadd.f32 %v2960_v23, %v2661_v28  ;;  %v1675_v63 = vsub.f32 %v9598_v18, %v7354_v53  ;;  %v1768_v31 = vmul.f32 1.442695, %v1672_v8  ;;  %v9599_v23 = vld [vmem:[#allocation135_spill] sm:$0xff]  ;;  %3322 = vperm.xlu1 %5388, %v8202_v55  }
 0x435   : > { %v2663_v41 = vpop.f32.mrb[79].mxu1  ;;  %v3753_v30 = vpop.f32.mrb[79].mxu0  ;;  %5753 = vpow2.f32 %v1758_v47  ;;  %v1674_v45 = vsub.f32 %v9599_v23, %v7333_v44  ;;  %2833 = vmatmul.mubr.bf16.gmra.mrb[164].mxu1 %v8266_v20  ;;  %3923 = vmatmul.mubr.bf16.gmra.mrb[164].mxu0 %v8266_v20  ;;  %v1676_v50 = vsub.f32 %v9601_v54, %v7375_v15  ;;  %v9605_v23 = vld [vmem:[#allocation153_spill] sm:$0xff] }
 0x436   : > { %v5734_v38 = vpop.eup %5733  ;;  %3089 = vst.msk [vmem:[#allocation3 + $0x38] sm:$0xff] %vm3081_vm1, %v3024_v37  ;;  %5755 = vpow2.f32 %v1756_v24  ;;  %v1774_v47 = vmul.f32 1.442695, %v1675_v63  ;;  %2840 = vmatprep.mubr.bf16.mxu1 %v8284_v57  ;;  %3930 = vmatprep.mubr.bf16.mxu0 %v8284_v57  ;;  %v9602_v37 = vld [vmem:[#allocation150_spill] sm:$0xff]  ;;  %v9603_v57 = vld [vmem:[#allocation147_spill] sm:$0xff]  ;;  %v9604_v63 = vld [vmem:[#allocation156_spill] sm:$0xff] }
 0x437   : > { %v5736_v46 = vpop.eup %5735  ;;  %v8316_v4 = vpack.c.bf16 %v5734_v38, %v5730_v27  ;;  %5757 = vpow2.f32 %v1770_v7  ;;  %v9600_v27 = vld [vmem:[#allocation144_spill] sm:$0xff]  ;;  %v1772_v8 = vmul.f32 1.442695, %v1674_v45  ;;  %3337 = vperm.xlu0 %5387, %v8216_v1   ;;  %v1679_v41 = vsub.f32 %v9602_v37, %v7434_v59 }
 0x438   : > { %v5738_v14 = vpop.eup %5737  ;;  %v8320_v36 = vpack.c.bf16 %v5736_v46, %v5732_v58  ;;  %v1677_v21 = vsub.f32 %v9600_v27, %v7396_v51  ;;  %5759 = vpow2.f32 %v1768_v31  ;;  %3332 = vperm.xlu1 %5388, %v8213_v9   ;;  %v1776_v15 = vmul.f32 1.442695, %v1676_v50 }
 0x439   : > { %v5740_v35 = vpop.eup %5739  ;;  %5761 = vpow2.f32 %v1774_v47  ;;  %v1678_v38 = vsub.f32 %v9603_v57, %v7417_v29  ;;  %v1782_v59 = vmul.f32 1.442695, %v1679_v41  ;;  %v2897_v29 = vld [vmem:[#allocation3 + $0x40] sm:$0xff]  ;;  %v1680_v45 = vsub.f32 %v9605_v23, %v7454_v34  ;;  %v2900_v23 = vld [vmem:[#allocation3 + $0x58] sm:$0xff] }
 0x43a   : > { %v5742_v6 = vpop.eup %5741  ;;  %v1778_v58 = vmul.f32 1.442695, %v1677_v21  ;;  %5763 = vpow2.f32 %v1772_v8  ;;  %v2961_v47 = vmul.f32 %v8130_v60, %v2897_v29  ;;  %v9607_v34 = vld [vmem:[#allocation162_spill] sm:$0xff] }
 0x43b   : > { %v5744_v53 = vpop.eup %5743  ;;  %v8328_v44 = vpack.c.bf16 %v5742_v6, %v5738_v14  ;;  %v1681_v14 = vsub.f32 %v9604_v63, %v7471_v16  ;;  %v1780_v31 = vmul.f32 1.442695, %v1678_v38  ;;  %v2898_v6 = vld [vmem:[#allocation3 + $0x48] sm:$0xff]  ;;  %v1683_v21 = vsub.f32 %v9607_v34, %v7504_v19 }
 0x43c   : > { %v5746_v11 = vpop.eup %5745  ;;  %v8334_v24 = vpack.c.bf16 %v5744_v53, %v5740_v35  ;;  %5765 = vpow2.f32 %v1778_v58  ;;  %v9606_v16 = vld [vmem:[#allocation159_spill] sm:$0xff]  ;;  %v1784_v8 = vmul.f32 1.442695, %v1680_v45 }
 0x43d   : > { %v5748_v28 = vpop.eup %5747  ;;  %2841 = vmatmul.mubr.bf16.gmra.mrb[168].mxu1 %v8279_v3  ;;  %3931 = vmatmul.mubr.bf16.gmra.mrb[168].mxu0 %v8279_v3  ;;  %5767 = vpow2.f32 %v1776_v15  ;;  %v1682_v3 = vsub.f32 %v9606_v16, %v7488_v61  ;;  %v1786_v27 = vmul.f32 1.442695, %v1681_v14  ;;  %v2962_v61 = vmul.f32 %v8145_v39, %v2898_v6  ;;  %v9608_v39 = vld [vmem:[#allocation169_spill] sm:$0xff]  ;;  %v9609_v63 = vld [vmem:[#allocation167_spill] sm:$0xff] }
 0x43e   : > { %v5750_v51 = vpop.eup %5749  ;;  %2848 = vmatprep.mubr.bf16.mxu1 %v8308_v40  ;;  %3938 = vmatprep.mubr.bf16.mxu0 %v8308_v40  ;;  %5769 = vpow2.f32 %v1782_v59  ;;  %v1790_v57 = vmul.f32 1.442695, %v1683_v21  ;;  %v1685_v38 = vsub.f32 %v9608_v39, %v9408_v5  ;;  %v2899_v59 = vld [vmem:[#allocation3 + $0x50] sm:$0xff]  ;;  %v9610_v14 = vld [vmem:[#allocation165_spill] sm:$0xff]  ;;  %v9611_v6 = vld [vmem:[#allocation179_spill] sm:$0xff] }
 0x43f   : > { %v5752_v20 = vpop.eup %5751  ;;  %v8340_v30 = vpack.c.bf16 %v5750_v51, %v5746_v11  ;;  %5771 = vpow2.f32 %v1780_v31  ;;  %v1788_v19 = vmul.f32 1.442695, %v1682_v3  ;;  %v1684_v29 = vsub.f32 %v9610_v14, %v9609_v63  ;;  %v9612_v16 = vld [vmem:[#allocation177_spill] sm:$0xff]  ;;  %v9613_v34 = vld [vmem:[#allocation175_spill] sm:$0xff] }
 0x440   : > { %v8344_v46 = vpack.c.bf16 %v5752_v20, %v5748_v28  ;;  %v8346_v7 = vpop.eup %5753  ;;  %v2666_v40 = vpop.f32.mrb[80].mxu1  ;;  %5773 = vpow2.f32 %v1786_v27  ;;  %v2963_v5 = vmul.f32 %v8152_v32, %v2899_v59  ;;  %v1687_v3 = vsub.f32 %v9612_v16, %v9611_v6  ;;  %v9614_v21 = vld [vmem:[#allocation173_spill] sm:$0xff]  ;;  %v9616_v63 = vld [vmem:[#allocation183_spill] sm:$0xff] }
 0x441   : > { %v8348_v18 = vpop.eup %5755  ;;  %3347 = vperm.xlu0 %5387, %v8346_v7   ;;  %v8371_v11 = vpop.f32.mrb[80].mxu0  ;;  %v3025_v54 = vadd.f32 %v2961_v47, %v2666_v40  ;;  %5775 = vpow2.f32 %v1784_v8  ;;  %v1686_v40 = vsub.f32 %v9614_v21, %v9613_v34  ;;  %v9617_v14 = vld [vmem:[#allocation181_spill] sm:$0xff]  ;;  %v9618_v6 = vld [vmem:[#allocation187_spill] sm:$0xff] }
 0x442   : > { %3342 = vperm.xlu1 %5388, %v8348_v18   ;;  %v8360_v35 = vpop.eup %5757  ;;  %v2668_v50 = vpop.f32.mrb[81].mxu1  ;;  %5777 = vpow2.f32 %v1788_v19  ;;  %v1798_v39 = vmul.f32 1.442695, %v1687_v3  ;;  %v9619_v16 = vld [vmem:[#allocation185_spill] sm:$0xff] }
 0x443   : > { %v8362_v53 = vpop.eup %5759  ;;  %v3758_v28 = vpop.f32.mrb[81].mxu0  ;;  %3090 = vst.msk [vmem:[#allocation3 + $0x40] sm:$0xff] %vm3081_vm1, %v3025_v54  ;;  %5779 = vpow2.f32 %v1790_v57  ;;  %v1796_v59 = vmul.f32 1.442695, %v1686_v40  ;;  %v1689_v3 = vsub.f32 %v9619_v16, %v9618_v6 }
 0x444   : > { %v8374_v51 = vpop.eup %5761  ;;  %v2669_v60 = vpop.f32.mrb[82].mxu1  ;;  %v9615_v28 = vld [vmem:[#allocation171_spill] sm:$0xff] }
 0x445   : > { %3377 = vperm.xlu0 %5387, %v8360_v35   ;;  %v8376_v20 = vpop.f32.mrb[82].mxu0  ;;  %v8378_v58 = vpop.eup %5763  ;;  %v3026_v37 = vadd.f32 %v2962_v61, %v2669_v60  ;;  %2849 = vmatmul.mubr.bf16.gmra.mrb[172].mxu1 %v8299_v2  ;;  %v2964_v61 = vmul.f32 %v9615_v28, %v2900_v23 }
 0x446   : > { %3372 = vperm.xlu1 %5388, %v8362_v53   ;;  %v2671_v41 = vpop.f32.mrb[83].mxu1  ;;  %v3761_v15 = vpop.f32.mrb[83].mxu0  ;;  %3939 = vmatmul.mubr.bf16.gmra.mrb[172].mxu0 %v8299_v2  ;;  %v1794_v2 = vmul.f32 1.442695, %v1685_v38  ;;  %v2901_v38 = vld [vmem:[#allocation3 + $0x60] sm:$0xff] }
 0x447   : > { %3091 = vst.msk [vmem:[#allocation3 + $0x48] sm:$0xff] %vm3081_vm1, %v3026_v37  ;;  %2856 = vmatprep.mubr.bf16.mxu1 %v8320_v36  ;;  %3946 = vmatprep.mubr.bf16.mxu0 %v8320_v36  ;;  %v8392_v31 = vpop.eup %5765  ;;  %v1792_v36 = vmul.f32 1.442695, %v1684_v29  ;;  %v1688_v29 = vsub.f32 %v9617_v14, %v9616_v63  ;;  %v9623_v63 = vld [vmem:[#allocation195_spill] sm:$0xff] }
 0x448   : > { %v8394_v45 = vpop.eup %5767  ;;  %v2674_v47 = vpop.f32.mrb[84].mxu1  ;;  %5781 = vpow2.f32 %v1794_v2  ;;  %v9624_v14 = vld [vmem:[#allocation191_spill] sm:$0xff] }
 0x449   : > { %3387 = vperm.xlu0 %5387, %v8374_v51   ;;  %v8401_v27 = vpop.f32.mrb[84].mxu0  ;;  %v3027_v8 = vadd.f32 %v2963_v5, %v2674_v47  ;;  %v2676_v54 = vpop.f32.mrb[85].mxu1  ;;  %5783 = vpow2.f32 %v1792_v36  ;;  %v2902_v5 = vld [vmem:[#allocation3 + $0x68] sm:$0xff]  ;;  %v9620_v47 = vld [vmem:[#allocation224_spill] sm:$0xff]  ;;  %v9621_v36 = vld [vmem:[#allocation225_spill] sm:$0xff] }
 0x44a   : > { %3382 = vperm.xlu1 %5388, %v8378_v58   ;;  %v3766_v50 = vpop.f32.mrb[85].mxu0  ;;  %v8406_v32 = vpop.eup %5769  ;;  %5785 = vpow2.f32 %v1798_v39  ;;  %v9622_v34 = vsub.f32 %v9620_v47, %v9621_v36  ;;  %v1800_v54 = vmul.f32 1.442695, %v1688_v29  ;;  %v1690_v29 = vsub.f32 %v9624_v14, %v9623_v63 }
 0x44b   : > { %v2677_v60 = vpop.f32.mrb[86].mxu1  ;;  %v8408_v19 = vpop.f32.mrb[86].mxu0  ;;  %3092 = vst.msk [vmem:[#allocation3 + $0x50] sm:$0xff] %vm3081_vm1, %v3027_v8  ;;  %5787 = vpow2.f32 %v1796_v59  ;;  %v1802_v59 = vmul.f32 1.442695, %v1689_v3 }
 0x44c   : > { %v8410_v37 = vpop.eup %5771  ;;  %v3028_v41 = vadd.f32 %v2964_v61, %v2677_v60  ;;  %v2679_v15 = vpop.f32.mrb[87].mxu1  ;;  %v1762_v21 = vmul.f32 1.442695, %v9622_v34  ;;  %v2966_v61 = vmul.f32 %v8167_v48, %v2902_v5  ;;  %v2903_v48 = vld [vmem:[#allocation3 + $0x70] sm:$0xff]  ;;  %v9625_v5 = vld [vmem:[#allocation222_spill] sm:$0xff]  ;;  %v9629_v34 = vld [vmem:[#allocation199_spill] sm:$0xff] }
 0x44d   : > { %3397 = vperm.xlu0 %5387, %v8392_v31   ;;  %2857 = vmatmul.mubr.bf16.gmra.mrb[176].mxu1 %v8316_v4  ;;  %v3769_v57 = vpop.f32.mrb[87].mxu0  ;;  %v8422_v23 = vpop.eup %5773  ;;  %v2967_v36 = vmul.f32 %v8170_v12, %v2903_v48 }
 0x44e   : > { %3392 = vperm.xlu1 %5388, %v8394_v45   ;;  %3947 = vmatmul.mubr.bf16.gmra.mrb[176].mxu0 %v8316_v4  ;;  %3093 = vst.msk [vmem:[#allocation3 + $0x58] sm:$0xff] %vm3081_vm1, %v3028_v41  ;;  %v8424_v2 = vpop.eup %5775  ;;  %v2965_v4 = vmul.f32 %v8164_v17, %v2901_v38  ;;  %5789 = vpow2.f32 %v1762_v21  ;;  %v9630_v21 = vld [vmem:[#allocation197_spill] sm:$0xff] }
 0x44f   : > { %2864 = vmatprep.mubr.bf16.mxu1 %v8334_v24  ;;  %3954 = vmatprep.mubr.bf16.mxu0 %v8334_v24  ;;  %v8436_v8 = vpop.eup %5777  ;;  %5791 = vpow2.f32 %v1800_v54  ;;  %v9631_v54 = vld [vmem:[#allocation227_spill] sm:$0xff] }
 0x450   : > { %v2682_v24 = vpop.f32.mrb[88].mxu1  ;;  %v8434_v40 = vpop.f32.mrb[88].mxu0  ;;  %5793 = vpow2.f32 %v1802_v59 }
 0x451   : > { %3407 = vperm.xlu0 %5387, %v8406_v32   ;;  %v3029_v50 = vadd.f32 %v2965_v4, %v2682_v24  ;;  %v2684_v28 = vpop.f32.mrb[89].mxu1  ;;  %v3774_v17 = vpop.f32.mrb[89].mxu0  ;;  %v9626_v4 = vld [vmem:[#allocation223_spill] sm:$0xff]  ;;  %v1691_v24 = vsub.f32 %v9630_v21, %v9629_v34  ;;  %v9639_v21 = vld [vmem:[#allocation202_spill] sm:$0xff] }
 0x452   : > { %3402 = vperm.xlu1 %5388, %v8410_v37   ;;  %v8439_v60 = vpop.eup %5779  ;;  %v2685_v41 = vpop.f32.mrb[90].mxu1  ;;  %v9627_v6 = vsub.f32 %v9625_v5, %v9626_v4  ;;  %v9638_v34 = vld [vmem:[#allocation203_spill] sm:$0xff] }
 0x453   : > { %v8441_v15 = vpop.f32.mrb[90].mxu0  ;;  %3094 = vst.msk [vmem:[#allocation3 + $0x60] sm:$0xff] %vm3081_vm1, %v3029_v50  ;;  %v3030_v57 = vadd.f32 %v2966_v61, %v2685_v41  ;;  %v2687_v39 = vpop.f32.mrb[91].mxu1  ;;  %v9632_v50 = vld [vmem:[#allocation229_spill] sm:$0xff]  ;;  %v1804_v41 = vmul.f32 1.442695, %v1690_v29 }
 0x454   : > { %v3777_v38 = vpop.f32.mrb[91].mxu0  ;;  %v1760_v16 = vmul.f32 1.442695, %v9627_v6  ;;  %v8456_v3 = vpop.eup %5781  ;;  %v9633_v28 = vsub.f32 %v9631_v54, %v9632_v50  ;;  %v1806_v6 = vmul.f32 1.442695, %v1691_v24  ;;  %v1692_v54 = vsub.f32 %v9639_v21, %v9638_v34  ;;  %v9640_v50 = vld [vmem:[#allocation226_spill] sm:$0xff] }
 0x455   : > { %3417 = vperm.xlu0 %5387, %v8422_v23   ;;  %2865 = vmatmul.mubr.bf16.gmra.mrb[180].mxu1 %v8328_v44  ;;  %3095 = vst.msk [vmem:[#allocation3 + $0x68] sm:$0xff] %vm3081_vm1, %v3030_v57  ;;  %9628 = vst [vmem:[#allocation88_spill] sm:$0xff] %v8456_v3  ;;  %v8458_v47 = vpop.eup %5783  ;;  %v2906_v24 = vld [vmem:[#allocation3 + $0x88] sm:$0xff]  ;;  %v9647_v34 = vld [vmem:[#allocation208_spill] sm:$0xff] }
 0x456   : > { %3412 = vperm.xlu1 %5388, %v8424_v2   ;;  %3955 = vmatmul.mubr.bf16.gmra.mrb[180].mxu0 %v8328_v44  ;;  %v2904_v44 = vld [vmem:[#allocation3 + $0x78] sm:$0xff]  ;;  %v1766_v17 = vmul.f32 1.442695, %v9633_v28  ;;  %5795 = vpow2.f32 %v1760_v16  ;;  %v8471_v59 = vpop.eup %5785  ;;  %v9636_v16 = vld [vmem:[#allocation206_spill] sm:$0xff]  ;;  %v9641_v28 = vld [vmem:[#allocation228_spill] sm:$0xff] }
 0x457   : > { %2872 = vmatprep.mubr.bf16.mxu1 %v8344_v46  ;;  %3962 = vmatprep.mubr.bf16.mxu0 %v8344_v46  ;;  %v2968_v12 = vmul.f32 %v8175_v49, %v2904_v44  ;;  %9634 = vst [vmem:[#allocation34_spill] sm:$0xff] %v8471_v59  ;;  %v8475_v14 = vpop.eup %5787  ;;  %v2905_v44 = vld [vmem:[#allocation3 + $0x80] sm:$0xff] }
 0x458   : > { %v2690_v46 = vpop.f32.mrb[92].mxu1  ;;  %v8468_v61 = vpop.f32.mrb[92].mxu0  ;;  %9635 = vst [vmem:[#allocation35_spill] sm:$0xff] %v8475_v14  ;;  %5797 = vpow2.f32 %v1766_v17 }
 0x459   : > { %3427 = vperm.xlu0 %5387, %v8439_v60   ;;  %v3031_v57 = vadd.f32 %v2967_v36, %v2690_v46  ;;  %v2692_v39 = vpop.f32.mrb[93].mxu1  ;;  %v3782_v38 = vpop.f32.mrb[93].mxu0  ;;  %v9637_v36 = vld [vmem:[#allocation204_spill] sm:$0xff]  ;;  %5799 = vpow2.f32 %v1804_v41  ;;  %v9642_v46 = vsub.f32 %v9640_v50, %v9641_v28 }
 0x45a   : > { %3422 = vperm.xlu1 %5388, %v8436_v8   ;;  %v2693_v48 = vpop.f32.mrb[94].mxu1  ;;  %v8473_v63 = vpop.f32.mrb[94].mxu0  ;;  %v1693_v49 = vsub.f32 %v9637_v36, %v9636_v16  ;;  %5801 = vpow2.f32 %v1806_v6  ;;  %v9644_v41 = vld [vmem:[#allocation212_spill] sm:$0xff]  ;;  %v1808_v16 = vmul.f32 1.442695, %v1692_v54  ;;  %v9646_v36 = vld [vmem:[#allocation209_spill] sm:$0xff] }
 0x45b   : > { %3096 = vst.msk [vmem:[#allocation3 + $0x70] sm:$0xff] %vm3081_vm1, %v3031_v57  ;;  %v3032_v5 = vadd.f32 %v2968_v12, %v2693_v48  ;;  %v2695_v29 = vpop.f32.mrb[95].mxu1  ;;  %v3785_v4 = vpop.f32.mrb[95].mxu0  ;;  %v1764_v57 = vmul.f32 1.442695, %v9642_v46  ;;  %v9645_v12 = vld [vmem:[#allocation210_spill] sm:$0xff]  ;;  %v1694_v21 = vsub.f32 %v9647_v34, %v9646_v36 }
 0x45c   : > { %v8490_v39 = vpop.eup %5789  ;;  %v1810_v17 = vmul.f32 1.442695, %v1693_v49  ;;  %v1695_v48 = vsub.f32 %v9645_v12, %v9644_v41  ;;  %v9651_v34 = vld [vmem:[#allocation215_spill] sm:$0xff] }
 0x45d   : > { %3437 = vperm.xlu0 %5387, %v8456_v3   ;;  %2873 = vmatmul.mubr.bf16.gmra.mrb[184].mxu1 %v8340_v30  ;;  %3097 = vst.msk [vmem:[#allocation3 + $0x78] sm:$0xff] %vm3081_vm1, %v3032_v5  ;;  %v8492_v38 = vpop.eup %5791  ;;  %v2970_v5 = vmul.f32 %v8184_v10, %v2906_v24  ;;  %5803 = vpow2.f32 %v1764_v57  ;;  %v9649_v57 = vld [vmem:[#allocation216_spill] sm:$0xff]  ;;  %v1812_v36 = vmul.f32 1.442695, %v1694_v21 }
 0x45e   : > { %3432 = vperm.xlu1 %5388, %v8458_v47   ;;  %3963 = vmatmul.mubr.bf16.gmra.mrb[184].mxu0 %v8340_v30  ;;  %9643 = vst [vmem:[#allocation94_spill] sm:$0xff] %v8492_v38  ;;  %v2969_v30 = vmul.f32 %v8180_v0, %v2905_v44  ;;  %v8504_v6 = vpop.eup %5793  ;;  %5805 = vpow2.f32 %v1810_v17  ;;  %v1814_v41 = vmul.f32 1.442695, %v1695_v48 }
 0x45f   : > { %9648 = vst [vmem:[#allocation96_spill] sm:$0xff] %v8504_v6  ;;  %5807 = vpow2.f32 %v1808_v16 }
 0x460   : > { %v2698_v29 = vpop.f32.mrb[96].mxu1  ;;  %v8499_v4 = vpop.f32.mrb[96].mxu0  ;;  %5809 = vpow2.f32 %v1814_v41 }
 0x461   : > { %3447 = vperm.xlu0 %5387, %v8471_v59   ;;  %v3033_v50 = vadd.f32 %v2969_v30, %v2698_v29  ;;  %v2700_v28 = vpop.f32.mrb[97].mxu1  ;;  %v3790_v0 = vpop.f32.mrb[97].mxu0  ;;  %v9650_v30 = vld [vmem:[#allocation214_spill] sm:$0xff]  ;;  %v2907_v29 = vld [vmem:[#allocation3 + $0x90] sm:$0xff]  ;;  %5811 = vpow2.f32 %v1812_v36 }
 0x462   : > { %3442 = vperm.xlu1 %5388, %v8475_v14   ;;  %v2701_v49 = vpop.f32.mrb[98].mxu1  ;;  %v8506_v44 = vpop.f32.mrb[98].mxu0  ;;  %v1697_v12 = vsub.f32 %v9650_v30, %v9649_v57  ;;  %v9652_v28 = vld [vmem:[#allocation213_spill] sm:$0xff]  ;;  %v2971_v17 = vmul.f32 %v8188_v33, %v2907_v29  ;;  %v9656_v30 = vld [vmem:[#allocation220_spill] sm:$0xff] }
 0x463   : > { %v8508_v46 = vpop.eup %5795  ;;  %3098 = vst.msk [vmem:[#allocation3 + $0x80] sm:$0xff] %vm3081_vm1, %v3033_v50  ;;  %v3034_v10 = vadd.f32 %v2970_v5, %v2701_v49  ;;  %v2703_v54 = vpop.f32.mrb[99].mxu1  ;;  %v1696_v0 = vsub.f32 %v9652_v28, %v9651_v34  ;;  %v2908_v50 = vld [vmem:[#allocation3 + $0x98] sm:$0xff]  ;;  %v9654_v49 = vld [vmem:[#allocation231_spill] sm:$0xff]  ;;  %v3148_v14 = vld [vmem:[#allocation4 + $0x10] sm:$0xff] }
 0x464   : > { %v3793_v24 = vpop.f32.mrb[99].mxu0  ;;  %v1818_v48 = vmul.f32 1.442695, %v1697_v12  ;;  %v9655_v54 = vld [vmem:[#allocation230_spill] sm:$0xff]  ;;  %v9657_v34 = vld [vmem:[#allocation219_spill] sm:$0xff] }
 0x465   : > { %3357 = vperm.xlu0 %5387, %v8490_v39   ;;  %3099 = vst.msk [vmem:[#allocation3 + $0x88] sm:$0xff] %vm3081_vm1, %v3034_v10  ;;  %v1699_v16 = vsub.f32 %v9655_v54, %v9654_v49  ;;  %v2972_v10 = vmul.f32 %v8193_v42, %v2908_v50  ;;  %v1816_v57 = vmul.f32 1.442695, %v1696_v0  ;;  %v1698_v28 = vsub.f32 %v9657_v34, %v9656_v30 }
 0x466   : > { %3452 = vperm.xlu1 %5388, %v8492_v38   ;;  %5813 = vpow2.f32 %v1818_v48  ;;  %v9664_v48 = vld [vmem:[#allocation66_spill] sm:$0xff] }
 0x467   : > { %v1822_v50 = vmul.f32 1.442695, %v1699_v16  ;;  %5815 = vpow2.f32 %v1816_v57  ;;  %v9665_v16 = vld [vmem:[#allocation72_spill] sm:$0xff] }
 0x468   : > { %v2706_v21 = vpop.f32.mrb[100].mxu1  ;;  %v8527_v24 = vpop.f32.mrb[100].mxu0  ;;  %v9666_v57 = vsub.f32 %v9664_v48, %v9665_v16 }
 0x469   : > { %3457 = vperm.xlu0 %5387, %v8504_v6   ;;  %v8518_v6 = vpop.eup %5797  ;;  %v3035_v38 = vadd.f32 %v2971_v17, %v2706_v21  ;;  %v2708_v59 = vpop.f32.mrb[101].mxu1  ;;  %5817 = vpow2.f32 %v1822_v50  ;;  %v9662_v21 = vld [vmem:[#allocation70_spill] sm:$0xff]  ;;  %v9672_v50 = vld [vmem:[#allocation76_spill] sm:$0xff] }
 0x46a   : > { %3352 = vperm.xlu1 %5388, %v8508_v46   ;;  %v8520_v5 = vpop.eup %5799  ;;  %v3798_v33 = vpop.f32.mrb[101].mxu0  ;;  %v1820_v59 = vmul.f32 1.442695, %v1698_v28  ;;  %v1824_v34 = vmul.f32 1.442695, %v9666_v57 }
 0x46b   : > { %9653 = vst [vmem:[#allocation90_spill] sm:$0xff] %v8520_v5  ;;  %v8532_v41 = vpop.eup %5801  ;;  %v2709_v12 = vpop.f32.mrb[102].mxu1  ;;  %3100 = vst.msk [vmem:[#allocation3 + $0x90] sm:$0xff] %vm3081_vm1, %v3035_v38  ;;  %v9661_v38 = vld [vmem:[#allocation64_spill] sm:$0xff] }
 0x46c   : > { %9658 = vst [vmem:[#allocation92_spill] sm:$0xff] %v8532_v41  ;;  %v8534_v29 = vpop.f32.mrb[102].mxu0  ;;  %v8536_v49 = vpop.eup %5803  ;;  %v3036_v42 = vadd.f32 %v2972_v10, %v2709_v12  ;;  %v9663_v10 = vsub.f32 %v9661_v38, %v9662_v21  ;;  %5819 = vpow2.f32 %v1820_v59  ;;  %v9669_v12 = vld [vmem:[#allocation74_spill] sm:$0xff]  ;;  %v9673_v59 = vld [vmem:[#allocation80_spill] sm:$0xff] }
 0x46d   : > { %3367 = vperm.xlu0 %5387, %v8518_v6   ;;  %v2711_v36 = vpop.f32.mrb[103].mxu1  ;;  %v3801_v0 = vpop.f32.mrb[103].mxu0  ;;  %v9674_v38 = vsub.f32 %v9672_v50, %v9673_v59  ;;  %v9683_v50 = vld [vmem:[#allocation196_spill] sm:$0xff] }
 0x46e   : > { %3462 = vperm.xlu1 %5388, %v8520_v5   ;;  %3101 = vst.msk [vmem:[#allocation3 + $0x98] sm:$0xff] %vm3081_vm1, %v3036_v42  ;;  %v8542_v17 = vpop.eup %5805  ;;  %v1826_v30 = vmul.f32 1.442695, %v9663_v10  ;;  %v9670_v42 = vld [vmem:[#allocation78_spill] sm:$0xff]  ;;  %v3149_v5 = vld [vmem:[#allocation4 + $0x18] sm:$0xff] }
 0x46f   : > { %9659 = vst [vmem:[#allocation102_spill] sm:$0xff] %v8542_v17  ;;  %v8544_v54 = vpop.eup %5807  ;;  %v9671_v36 = vsub.f32 %v9669_v12, %v9670_v42  ;;  %v1828_v21 = vmul.f32 1.442695, %v9674_v38 }
 0x470   : > { %9660 = vst [vmem:[#allocation104_spill] sm:$0xff] %v8544_v54  ;;  %v8554_v28 = vpop.eup %5809  ;;  %5821 = vpow2.f32 %v1826_v30 }
 0x471   : > { %3467 = vperm.xlu0 %5387, %v8532_v41   ;;  %9667 = vst [vmem:[#allocation38_spill] sm:$0xff] %v8554_v28  ;;  %v8556_v33 = vpop.eup %5811  ;;  %v1830_v0 = vmul.f32 1.442695, %v9671_v36  ;;  %5823 = vpow2.f32 %v1824_v34  ;;  %v9682_v36 = vld [vmem:[#allocation193_spill] sm:$0xff] }
 0x472   : > { %3362 = vperm.xlu1 %5388, %v8536_v49   ;;  %9668 = vst [vmem:[#allocation39_spill] sm:$0xff] %v8556_v33  ;;  %v8566_v10 = vpop.eup %5813 }
 0x473   : > { %9675 = vst [vmem:[#allocation110_spill] sm:$0xff] %v8566_v10  ;;  %v8568_v48 = vpop.eup %5815  ;;  %5825 = vpow2.f32 %v1830_v0 }
 0x474   : > { %9676 = vst [vmem:[#allocation112_spill] sm:$0xff] %v8568_v48  ;;  %5827 = vpow2.f32 %v1828_v21  ;;  %v8572_v30 = vpop.eup %5817 }
 0x475   : > { %3477 = vperm.xlu0 %5387, %v8542_v17   ;;  %9677 = vst [vmem:[#allocation98_spill] sm:$0xff] %v8572_v30 }
 0x476   : > { %3472 = vperm.xlu1 %5388, %v8544_v54   ;;  %v8574_v16 = vpop.eup %5819 }
 0x477   : > { %9678 = vst [vmem:[#allocation100_spill] sm:$0xff] %v8574_v16 }
 0x479   : > { %3487 = vperm.xlu0 %5387, %v8554_v28   ;;  %v3147_v28 = vld [vmem:[#allocation4 + $0x8] sm:$0xff] }
 0x47a   : > { %3482 = vperm.xlu1 %5388, %v8556_v33   ;;  %v8578_v57 = vpop.eup %5821 }
 0x47b   : > { %9679 = vst [vmem:[#allocation36_spill] sm:$0xff] %v8578_v57  ;;  %v8580_v34 = vpop.eup %5823 }
 0x47c   : > { %9680 = vst [vmem:[#allocation37_spill] sm:$0xff] %v8580_v34 }
 0x47d   : > { %3497 = vperm.xlu0 %5387, %v8566_v10   ;;  %v8584_v42 = vpop.eup %5825  ;;  %v9686_v10 = vld [vmem:[#allocation192_spill] sm:$0xff] }
 0x47e   : > { %3492 = vperm.xlu1 %5388, %v8568_v48   ;;  %9681 = vst [vmem:[#allocation42_spill] sm:$0xff] %v8584_v42  ;;  %v8588_v21 = vpop.eup %5827 }
 0x47f   : > { %9684 = vst [vmem:[#allocation43_spill] sm:$0xff] %v8588_v21 }
 0x481   : > { %3507 = vperm.xlu0 %5387, %v8572_v30   ;;  %v2150_v12 = vpop.permute.xlu0 %2149  ;;  %v9685_v30 = vld [vmem:[#allocation189_spill] sm:$0xff] }
 0x482   : > { %3502 = vperm.xlu1 %5388, %v8574_v16   ;;  %v2278_v0 = vsub.f32 %v9682_v36, %v2150_v12  ;;  %v2279_v59 = vsub.f32 %v9683_v50, %v2150_v12  ;;  %v2145_v38 = vpop.permute.xlu1 %2144 }
 0x483   : > { %v2276_v16 = vsub.f32 %v9685_v30, %v2145_v38  ;;  %v2277_v48 = vsub.f32 %v9686_v10, %v2145_v38  ;;  %v2909_v10 = vld [vmem:[#allocation3 + $0xa0] sm:$0xff] }
 0x484   : > { %v2534_v33 = vmul.f32 1.442695, %v2279_v59 }
 0x485   : > { %3517 = vperm.xlu0 %5387, %v8578_v57   ;;  %v2532_v57 = vmul.f32 1.442695, %v2278_v0  ;;  %v2528_v17 = vmul.f32 1.442695, %v2276_v16  ;;  %v2530_v54 = vmul.f32 1.442695, %v2277_v48  ;;  %v3218_v36 = vpop.permute.xlu0 %3217 }
 0x486   : > { %3512 = vperm.xlu1 %5388, %v8580_v34   ;;  %v3146_v34 = vld [vmem:[#allocation4] sm:$0xff]  ;;  %v3531_v12 = vmul.f32 %v3218_v36, %v3147_v28  ;;  %v3213_v50 = vpop.permute.xlu1 %3212  ;;  %v2910_v48 = vld [vmem:[#allocation3 + $0xa8] sm:$0xff]  ;;  %v2973_v28 = vmul.f32 %v8196_v43, %v2909_v10  ;;  %v3153_v10 = vld [vmem:[#allocation4 + $0x38] sm:$0xff] }
 0x487   : > { %5829 = vpow2.f32 %v2532_v57  ;;  %v3530_v41 = vmul.f32 %v3213_v50, %v3146_v34  ;;  %v9688_v0 = vld [vmem:[#allocation82_spill] sm:$0xff] }
 0x488   : > { %5831 = vpow2.f32 %v2534_v33  ;;  %v3151_v33 = vld [vmem:[#allocation4 + $0x28] sm:$0xff] }
 0x489   : > { %3527 = vperm.xlu0 %5387, %v8584_v42   ;;  %5833 = vpow2.f32 %v2528_v17  ;;  %v9687_v42 = vld [vmem:[#allocation84_spill] sm:$0xff]  ;;  %v3979_v59 = vadd.f32 %v9688_v0, %v3530_v41  ;;  %v3228_v38 = vpop.permute.xlu0 %3227 }
 0x48a   : > { %3522 = vperm.xlu1 %5388, %v8588_v21   ;;  %v3980_v30 = vadd.f32 %v9687_v42, %v3531_v12  ;;  %5835 = vpow2.f32 %v2530_v54  ;;  %v3533_v21 = vmul.f32 %v3228_v38, %v3149_v5  ;;  %v3223_v16 = vpop.permute.xlu1 %3222  ;;  %v9689_v42 = vld [vmem:[#allocation86_spill] sm:$0xff] }
 0x48b   : > { %4043 = vst [vmem:[#allocation4] sm:$0xff] %v3979_v59  ;;  %v3532_v57 = vmul.f32 %v3223_v16, %v3148_v14  ;;  %v3150_v5 = vld [vmem:[#allocation4 + $0x20] sm:$0xff] }
 0x48c   : > { %4044 = vst [vmem:[#allocation4 + $0x8] sm:$0xff] %v3980_v30  ;;  %v3982_v34 = vadd.f32 %v8249_v13, %v3533_v21  ;;  %v2714_v17 = vpop.f32.mrb[104].mxu1  ;;  %v8598_v36 = vpop.f32.mrb[104].mxu0  ;;  %v2974_v30 = vmul.f32 %v8199_v25, %v2910_v48  ;;  %v2911_v25 = vld [vmem:[#allocation3 + $0xb0] sm:$0xff] }
 0x48d   : > { %v3981_v12 = vadd.f32 %v9689_v42, %v3532_v57  ;;  %v3037_v54 = vadd.f32 %v2973_v28, %v2714_v17  ;;  %v3238_v50 = vpop.permute.xlu0 %3237  ;;  %v2716_v41 = vpop.f32.mrb[105].mxu1 }
 0x48e   : > { %4046 = vst [vmem:[#allocation4 + $0x18] sm:$0xff] %v3982_v34  ;;  %v3535_v0 = vmul.f32 %v3238_v50, %v3151_v33  ;;  %v3806_v59 = vpop.f32.mrb[105].mxu0  ;;  %v2717_v14 = vpop.f32.mrb[106].mxu1  ;;  %v3152_v34 = vld [vmem:[#allocation4 + $0x30] sm:$0xff]  ;;  %v2912_v50 = vld [vmem:[#allocation3 + $0xb8] sm:$0xff] }
 0x48f   : > { %4045 = vst [vmem:[#allocation4 + $0x10] sm:$0xff] %v3981_v12  ;;  %3102 = vst.msk [vmem:[#allocation3 + $0xa0] sm:$0xff] %vm3081_vm1, %v3037_v54  ;;  %v3038_v43 = vadd.f32 %v2974_v30, %v2717_v14  ;;  %v8603_v13 = vpop.f32.mrb[106].mxu0  ;;  %v3233_v21 = vpop.permute.xlu1 %3232  ;;  %v2975_v59 = vmul.f32 %v8202_v55, %v2911_v25 }
 0x490   : > { %v3984_v16 = vadd.f32 %v8275_v52, %v3535_v0  ;;  %v3534_v57 = vmul.f32 %v3233_v21, %v3150_v5  ;;  %v2719_v28 = vpop.f32.mrb[107].mxu1  ;;  %v3809_v17 = vpop.f32.mrb[107].mxu0  ;;  %v3155_v52 = vld [vmem:[#allocation4 + $0x48] sm:$0xff] }
 0x491   : > { %v5830_v38 = vpop.eup %5829  ;;  %3103 = vst.msk [vmem:[#allocation3 + $0xa8] sm:$0xff] %vm3081_vm1, %v3038_v43  ;;  %v3248_v33 = vpop.permute.xlu0 %3247 }
 0x492   : > { %v5832_v48 = vpop.eup %5831  ;;  %4048 = vst [vmem:[#allocation4 + $0x28] sm:$0xff] %v3984_v16  ;;  %v3983_v12 = vadd.f32 %v8264_v56, %v3534_v57  ;;  %v3537_v54 = vmul.f32 %v3248_v33, %v3153_v10  ;;  %v2976_v56 = vmul.f32 %v8207_v22, %v2912_v50  ;;  %v3154_v10 = vld [vmem:[#allocation4 + $0x40] sm:$0xff] }
 0x493   : > { %v5834_v42 = vpop.eup %5833  ;;  %v3243_v30 = vpop.permute.xlu1 %3242 }
 0x494   : > { %v5836_v41 = vpop.eup %5835  ;;  %v2598_v5 = vpack.c.bf16 %v5830_v38, %v5834_v42  ;;  %4047 = vst [vmem:[#allocation4 + $0x20] sm:$0xff] %v3983_v12  ;;  %v3986_v0 = vadd.f32 %v8306_v62, %v3537_v54  ;;  %v3536_v14 = vmul.f32 %v3243_v30, %v3152_v34  ;;  %v2722_v21 = vpop.f32.mrb[108].mxu1  ;;  %v2913_v12 = vld [vmem:[#allocation3 + $0xc0] sm:$0xff]  ;;  %v3156_v54 = vld [vmem:[#allocation4 + $0x50] sm:$0xff]  ;;  %v2914_v30 = vld [vmem:[#allocation3 + $0xc8] sm:$0xff] }
 0x495   : > { %v2599_v43 = vpack.c.bf16 %v5832_v48, %v5836_v41  ;;  %v8610_v28 = vpop.f32.mrb[108].mxu0  ;;  %v3039_v17 = vadd.f32 %v2975_v59, %v2722_v21  ;;  %v3258_v16 = vpop.permute.xlu0 %3257  ;;  %v3159_v21 = vld [vmem:[#allocation4 + $0x68] sm:$0xff] }
 0x496   : > { %v2724_v3 = vpop.f32.mrb[109].mxu1  ;;  %4050 = vst [vmem:[#allocation4 + $0x38] sm:$0xff] %v3986_v0  ;;  %v3985_v57 = vadd.f32 %v8291_v26, %v3536_v14  ;;  %v3539_v55 = vmul.f32 %v3258_v16, %v3155_v52  ;;  %v3814_v38 = vpop.f32.mrb[109].mxu0  ;;  %v3157_v26 = vld [vmem:[#allocation4 + $0x58] sm:$0xff] }
 0x497   : > { %2880 = vmatprep.mubr.bf16.mxu1 %v2599_v43  ;;  %3970 = vmatprep.mubr.bf16.mxu0 %v2599_v43  ;;  %v2725_v25 = vpop.f32.mrb[110].mxu1  ;;  %3104 = vst.msk [vmem:[#allocation3 + $0xb0] sm:$0xff] %vm3081_vm1, %v3039_v17  ;;  %v8615_v48 = vpop.f32.mrb[110].mxu0 }
 0x498   : > { %2881 = vmatmul.mubr.bf16.gmra.mrb[188].mxu1 %v2598_v5  ;;  %3971 = vmatmul.mubr.bf16.gmra.mrb[188].mxu0 %v2598_v5  ;;  %v3040_v62 = vadd.f32 %v2976_v56, %v2725_v25  ;;  %v3253_v33 = vpop.permute.xlu1 %3252  ;;  %4049 = vst [vmem:[#allocation4 + $0x30] sm:$0xff] %v3985_v57  ;;  %v3988_v22 = vadd.f32 %v8376_v20, %v3539_v55  ;;  %v2727_v34 = vpop.f32.mrb[111].mxu1 }
 0x499   : > { %v3538_v3 = vmul.f32 %v3253_v33, %v3154_v10  ;;  %v3817_v42 = vpop.f32.mrb[111].mxu0  ;;  %v3268_v41 = vpop.permute.xlu0 %3267  ;;  %v2977_v5 = vmul.f32 %v8213_v9, %v2913_v12  ;;  %v2978_v10 = vmul.f32 %v8216_v1, %v2914_v30  ;;  %v3161_v34 = vld [vmem:[#allocation4 + $0x78] sm:$0xff] }
 0x49a   : > { %3105 = vst.msk [vmem:[#allocation3 + $0xb8] sm:$0xff] %vm3081_vm1, %v3040_v62  ;;  %4052 = vst [vmem:[#allocation4 + $0x48] sm:$0xff] %v3988_v22  ;;  %v3541_v59 = vmul.f32 %v3268_v41, %v3157_v26  ;;  %v2915_v42 = vld [vmem:[#allocation3 + $0xd0] sm:$0xff] }
 0x49b   : > { %v3987_v50 = vadd.f32 %v8371_v11, %v3538_v3  ;;  %v3158_v11 = vld [vmem:[#allocation4 + $0x60] sm:$0xff]  ;;  %v2979_v30 = vmul.f32 %v8348_v18, %v2915_v42 }
 0x49c   : > { %v3263_v52 = vpop.permute.xlu1 %3262  ;;  %v2730_v20 = vpop.f32.mrb[112].mxu1  ;;  %v3990_v43 = vadd.f32 %v8408_v19, %v3541_v59 }
 0x49d   : > { %4051 = vst [vmem:[#allocation4 + $0x40] sm:$0xff] %v3987_v50  ;;  %v3540_v0 = vmul.f32 %v3263_v52, %v3156_v54  ;;  %v8621_v14 = vpop.f32.mrb[112].mxu0  ;;  %v3041_v17 = vadd.f32 %v2977_v5, %v2730_v20  ;;  %v2732_v16 = vpop.f32.mrb[113].mxu1  ;;  %v2916_v54 = vld [vmem:[#allocation3 + $0xd8] sm:$0xff] }
 0x49e   : > { %v3822_v56 = vpop.f32.mrb[113].mxu0  ;;  %v3278_v55 = vpop.permute.xlu0 %3277  ;;  %4054 = vst [vmem:[#allocation4 + $0x58] sm:$0xff] %v3990_v43 }
 0x49f   : > { %v3989_v57 = vadd.f32 %v8401_v27, %v3540_v0  ;;  %v2733_v38 = vpop.f32.mrb[114].mxu1  ;;  %3106 = vst.msk [vmem:[#allocation3 + $0xc0] sm:$0xff] %vm3081_vm1, %v3041_v17  ;;  %v3543_v9 = vmul.f32 %v3278_v55, %v3159_v21  ;;  %v8627_v62 = vpop.f32.mrb[114].mxu0  ;;  %v3160_v27 = vld [vmem:[#allocation4 + $0x70] sm:$0xff]  ;;  %v3163_v0 = vld [vmem:[#allocation4 + $0x88] sm:$0xff]  ;;  %v3162_v17 = vld [vmem:[#allocation4 + $0x80] sm:$0xff] }
 0x4a0   : > { %v3042_v25 = vadd.f32 %v2978_v10, %v2733_v38  ;;  %v3273_v33 = vpop.permute.xlu1 %3272  ;;  %v2735_v22 = vpop.f32.mrb[115].mxu1 }
 0x4a1   : > { %4053 = vst [vmem:[#allocation4 + $0x50] sm:$0xff] %v3989_v57  ;;  %v3542_v19 = vmul.f32 %v3273_v33, %v3158_v11  ;;  %v3825_v3 = vpop.f32.mrb[115].mxu0  ;;  %v3992_v1 = vadd.f32 %v8441_v15, %v3543_v9  ;;  %v2917_v33 = vld [vmem:[#allocation3 + $0xe0] sm:$0xff] }
 0x4a2   : > { %3107 = vst.msk [vmem:[#allocation3 + $0xc8] sm:$0xff] %vm3081_vm1, %v3042_v25  ;;  %v3288_v12 = vpop.permute.xlu0 %3287  ;;  %v3165_v25 = vld [vmem:[#allocation4 + $0x98] sm:$0xff]  ;;  %v2918_v3 = vld [vmem:[#allocation3 + $0xe8] sm:$0xff] }
 0x4a3   : > { %v3991_v26 = vadd.f32 %v8434_v40, %v3542_v19  ;;  %4056 = vst [vmem:[#allocation4 + $0x68] sm:$0xff] %v3992_v1  ;;  %v3545_v50 = vmul.f32 %v3288_v12, %v3161_v34  ;;  %v2980_v40 = vmul.f32 %v8346_v7, %v2916_v54  ;;  %v2981_v1 = vmul.f32 %v8508_v46, %v2917_v33  ;;  %v3167_v54 = vld [vmem:[#allocation4 + $0xa8] sm:$0xff] }
 0x4a4   : > { %v3283_v41 = vpop.permute.xlu1 %3282  ;;  %v2738_v52 = vpop.f32.mrb[116].mxu1 }
 0x4a5   : > { %4055 = vst [vmem:[#allocation4 + $0x60] sm:$0xff] %v3991_v26  ;;  %v3544_v59 = vmul.f32 %v3283_v41, %v3160_v27  ;;  %v8633_v5 = vpop.f32.mrb[116].mxu0  ;;  %v3994_v15 = vadd.f32 %v8473_v63, %v3545_v50  ;;  %v3043_v20 = vadd.f32 %v2979_v30, %v2738_v52  ;;  %v2740_v21 = vpop.f32.mrb[117].mxu1 }
 0x4a6   : > { %v3830_v43 = vpop.f32.mrb[117].mxu0  ;;  %v3298_v56 = vpop.permute.xlu0 %3297 }
 0x4a7   : > { %v3993_v16 = vadd.f32 %v8468_v61, %v3544_v59  ;;  %v2741_v10 = vpop.f32.mrb[118].mxu1  ;;  %4058 = vst [vmem:[#allocation4 + $0x78] sm:$0xff] %v3994_v15  ;;  %3108 = vst.msk [vmem:[#allocation3 + $0xd0] sm:$0xff] %vm3081_vm1, %v3043_v20  ;;  %v3547_v18 = vmul.f32 %v3298_v56, %v3163_v0  ;;  %v8639_v57 = vpop.f32.mrb[118].mxu0  ;;  %v3164_v61 = vld [vmem:[#allocation4 + $0x90] sm:$0xff]  ;;  %v3166_v59 = vld [vmem:[#allocation4 + $0xa0] sm:$0xff] }
 0x4a8   : > { %v3044_v11 = vadd.f32 %v2980_v40, %v2741_v10  ;;  %v3293_v55 = vpop.permute.xlu1 %3292  ;;  %v2743_v38 = vpop.f32.mrb[119].mxu1  ;;  %v2919_v56 = vld [vmem:[#allocation3 + $0xf0] sm:$0xff] }
 0x4a9   : > { %4057 = vst [vmem:[#allocation4 + $0x70] sm:$0xff] %v3993_v16  ;;  %v3546_v63 = vmul.f32 %v3293_v55, %v3162_v17  ;;  %v3833_v9 = vpop.f32.mrb[119].mxu0  ;;  %v3996_v7 = vadd.f32 %v8506_v44, %v3547_v18  ;;  %v3169_v16 = vld [vmem:[#allocation4 + $0xb8] sm:$0xff]  ;;  %v2983_v38 = vmul.f32 %v8536_v49, %v2919_v56 }
 0x4aa   : > { %3109 = vst.msk [vmem:[#allocation3 + $0xd8] sm:$0xff] %vm3081_vm1, %v3044_v11  ;;  %v3308_v22 = vpop.permute.xlu0 %3307  ;;  %v2920_v11 = vld [vmem:[#allocation3 + $0xf8] sm:$0xff] }
 0x4ab   : > { %v3995_v19 = vadd.f32 %v8499_v4, %v3546_v63  ;;  %4060 = vst [vmem:[#allocation4 + $0x88] sm:$0xff] %v3996_v7  ;;  %v3549_v34 = vmul.f32 %v3308_v22, %v3165_v25  ;;  %v2982_v4 = vmul.f32 %v8490_v39, %v2918_v3  ;;  %v3171_v7 = vld [vmem:[#allocation4 + $0xc8] sm:$0xff]  ;;  %v3170_v3 = vld [vmem:[#allocation4 + $0xc0] sm:$0xff] }
 0x4ac   : > { %v3303_v42 = vpop.permute.xlu1 %3302  ;;  %v2746_v26 = vpop.f32.mrb[120].mxu1 }
 0x4ad   : > { %4059 = vst [vmem:[#allocation4 + $0x80] sm:$0xff] %v3995_v19  ;;  %v3548_v27 = vmul.f32 %v3303_v42, %v3164_v61  ;;  %v8645_v12 = vpop.f32.mrb[120].mxu0  ;;  %v3998_v44 = vadd.f32 %v8534_v29, %v3549_v34  ;;  %v3045_v50 = vadd.f32 %v2981_v1, %v2746_v26  ;;  %v2748_v41 = vpop.f32.mrb[121].mxu1 }
 0x4ae   : > { %v3838_v30 = vpop.f32.mrb[121].mxu0  ;;  %v3318_v0 = vpop.permute.xlu0 %3317  ;;  %v3173_v41 = vld [vmem:[#allocation4 + $0xd8] sm:$0xff] }
 0x4af   : > { %v3997_v52 = vadd.f32 %v8527_v24, %v3548_v27  ;;  %v2749_v15 = vpop.f32.mrb[122].mxu1  ;;  %4062 = vst [vmem:[#allocation4 + $0x98] sm:$0xff] %v3998_v44  ;;  %3110 = vst.msk [vmem:[#allocation3 + $0xe0] sm:$0xff] %vm3081_vm1, %v3045_v50  ;;  %v3551_v46 = vmul.f32 %v3318_v0, %v3167_v54  ;;  %v8651_v21 = vpop.f32.mrb[122].mxu0  ;;  %v3168_v24 = vld [vmem:[#allocation4 + $0xb0] sm:$0xff]  ;;  %v2921_v30 = vld [vmem:[#allocation3 + $0x100] sm:$0xff] }
 0x4b0   : > { %v3046_v20 = vadd.f32 %v2982_v4, %v2749_v15  ;;  %v3313_v43 = vpop.permute.xlu1 %3312  ;;  %v2751_v40 = vpop.f32.mrb[123].mxu1 }
 0x4b1   : > { %4061 = vst [vmem:[#allocation4 + $0x90] sm:$0xff] %v3997_v52  ;;  %v3550_v29 = vmul.f32 %v3313_v43, %v3166_v59  ;;  %v3841_v17 = vpop.f32.mrb[123].mxu0  ;;  %v4000_v39 = vadd.f32 %v8603_v13, %v3551_v46  ;;  %v2922_v52 = vld [vmem:[#allocation3 + $0x108] sm:$0xff]  ;;  %v2985_v46 = vmul.f32 %v8362_v53, %v2921_v30 }
 0x4b2   : > { %3111 = vst.msk [vmem:[#allocation3 + $0xe8] sm:$0xff] %vm3081_vm1, %v3046_v20  ;;  %v3328_v18 = vpop.permute.xlu0 %3327  ;;  %v3179_v40 = vld [vmem:[#allocation4 + $0x108] sm:$0xff] }
 0x4b3   : > { %v3999_v10 = vadd.f32 %v8598_v36, %v3550_v29  ;;  %4064 = vst [vmem:[#allocation4 + $0xa8] sm:$0xff] %v4000_v39  ;;  %v3553_v55 = vmul.f32 %v3328_v18, %v3169_v16  ;;  %v2984_v36 = vmul.f32 %v8518_v6, %v2920_v11  ;;  %v2986_v39 = vmul.f32 %v8360_v35, %v2922_v52 }
 0x4b4   : > { %v3323_v63 = vpop.permute.xlu1 %3322  ;;  %v2754_v25 = vpop.f32.mrb[124].mxu1 }
 0x4b5   : > { %4063 = vst [vmem:[#allocation4 + $0xa0] sm:$0xff] %v3999_v10  ;;  %v3552_v9 = vmul.f32 %v3323_v63, %v3168_v24  ;;  %v8657_v33 = vpop.f32.mrb[124].mxu0  ;;  %v4002_v13 = vadd.f32 %v8615_v48, %v3553_v55  ;;  %v3047_v61 = vadd.f32 %v2983_v38, %v2754_v25  ;;  %v2756_v19 = vpop.f32.mrb[125].mxu1  ;;  %v2923_v25 = vld [vmem:[#allocation3 + $0x110] sm:$0xff] }
 0x4b6   : > { %v3846_v22 = vpop.f32.mrb[125].mxu0  ;;  %v3338_v42 = vpop.permute.xlu0 %3337  ;;  %v3181_v19 = vld [vmem:[#allocation4 + $0x118] sm:$0xff] }
 0x4b7   : > { %v4001_v34 = vadd.f32 %v8610_v28, %v3552_v9  ;;  %v2757_v1 = vpop.f32.mrb[126].mxu1  ;;  %4066 = vst [vmem:[#allocation4 + $0xb8] sm:$0xff] %v4002_v13  ;;  %3112 = vst.msk [vmem:[#allocation3 + $0xf0] sm:$0xff] %vm3081_vm1, %v3047_v61  ;;  %v3555_v49 = vmul.f32 %v3338_v42, %v3171_v7  ;;  %v8663_v26 = vpop.f32.mrb[126].mxu0  ;;  %v3172_v28 = vld [vmem:[#allocation4 + $0xd0] sm:$0xff]  ;;  %v2924_v61 = vld [vmem:[#allocation3 + $0x118] sm:$0xff] }
 0x4b8   : > { %v3048_v27 = vadd.f32 %v2984_v36, %v2757_v1  ;;  %v3333_v54 = vpop.permute.xlu1 %3332  ;;  %v2759_v44 = vpop.f32.mrb[127].mxu1  ;;  %v3180_v7 = vld [vmem:[#allocation4 + $0x110] sm:$0xff]  ;;  %v2987_v36 = vmul.f32 %v8378_v58, %v2923_v25 }
 0x4b9   : > { %4065 = vst [vmem:[#allocation4 + $0xb0] sm:$0xff] %v4001_v34  ;;  %v3554_v48 = vmul.f32 %v3333_v54, %v3170_v3  ;;  %v3849_v50 = vpop.f32.mrb[127].mxu0  ;;  %v4004_v6 = vadd.f32 %v8627_v62, %v3555_v49  ;;  %v2988_v54 = vmul.f32 %v8374_v51, %v2924_v61  ;;  %v2926_v51 = vld [vmem:[#allocation3 + $0x128] sm:$0xff] }
 0x4ba   : > { %3113 = vst.msk [vmem:[#allocation3 + $0xf8] sm:$0xff] %vm3081_vm1, %v3048_v27 }
 0x4bb   : > { %v4003_v4 = vadd.f32 %v8621_v14, %v3554_v48  ;;  %4068 = vst [vmem:[#allocation4 + $0xc8] sm:$0xff] %v4004_v6  ;;  %v3178_v14 = vld [vmem:[#allocation4 + $0x100] sm:$0xff] }
 0x4bc   : > { %v2762_v43 = vpop.f32.mrb[128].mxu1  ;;  %v3852_v29 = vpop.f32.mrb[128].mxu0 }
 0x4bd   : > { %4067 = vst [vmem:[#allocation4 + $0xc0] sm:$0xff] %v4003_v4  ;;  %v3049_v62 = vadd.f32 %v2985_v46, %v2762_v43  ;;  %v2764_v16 = vpop.f32.mrb[129].mxu1  ;;  %v3854_v56 = vpop.f32.mrb[129].mxu0  ;;  %v3182_v4 = vld [vmem:[#allocation4 + $0x120] sm:$0xff]  ;;  %v3183_v46 = vld [vmem:[#allocation4 + $0x128] sm:$0xff] }
 0x4be   : > { %v2765_v18 = vpop.f32.mrb[130].mxu1  ;;  %v3855_v55 = vpop.f32.mrb[130].mxu0 }
 0x4bf   : > { %3114 = vst.msk [vmem:[#allocation3 + $0x100] sm:$0xff] %vm3081_vm1, %v3049_v62  ;;  %v3050_v11 = vadd.f32 %v2986_v39, %v2765_v18  ;;  %v3857_v9 = vpop.f32.mrb[131].mxu0 }
 0x4c0   : > { %v3348_v59 = vpop.permute.xlu0 %3347  ;;  %v2927_v9 = vld [vmem:[#allocation3 + $0x130] sm:$0xff] }
 0x4c1   : > { %v3557_v0 = vmul.f32 %v3348_v59, %v3173_v41  ;;  %v3343_v15 = vpop.permute.xlu1 %3342  ;;  %3115 = vst.msk [vmem:[#allocation3 + $0x108] sm:$0xff] %vm3081_vm1, %v3050_v11 }
 0x4c2   : > { %v3556_v20 = vmul.f32 %v3343_v15, %v3172_v28 }
 0x4c3   : > { %v4006_v17 = vadd.f32 %v8639_v57, %v3557_v0  ;;  %v2767_v57 = vpop.f32.mrb[131].mxu1  ;;  %v2925_v0 = vld [vmem:[#allocation3 + $0x120] sm:$0xff] }
 0x4c4   : > { %v4005_v24 = vadd.f32 %v8633_v5, %v3556_v20  ;;  %v3378_v10 = vpop.permute.xlu0 %3377  ;;  %v2770_v34 = vpop.f32.mrb[132].mxu1 }
 0x4c5   : > { %4070 = vst [vmem:[#allocation4 + $0xd8] sm:$0xff] %v4006_v17  ;;  %v3563_v53 = vmul.f32 %v3378_v10, %v3179_v40  ;;  %v3373_v63 = vpop.permute.xlu1 %3372  ;;  %v3860_v42 = vpop.f32.mrb[132].mxu0  ;;  %v3051_v1 = vadd.f32 %v2987_v36, %v2770_v34 }
 0x4c6   : > { %4069 = vst [vmem:[#allocation4 + $0xd0] sm:$0xff] %v4005_v24  ;;  %v3562_v38 = vmul.f32 %v3373_v63, %v3178_v14  ;;  %v2772_v49 = vpop.f32.mrb[133].mxu1  ;;  %v3862_v27 = vpop.f32.mrb[133].mxu0  ;;  %v2990_v14 = vmul.f32 %v8392_v31, %v2926_v51  ;;  %v3184_v63 = vld [vmem:[#allocation4 + $0x130] sm:$0xff]  ;;  %v2928_v31 = vld [vmem:[#allocation3 + $0x138] sm:$0xff]  ;;  %v3175_v51 = vld [vmem:[#allocation4 + $0xe8] sm:$0xff] }
 0x4c7   : > { %v4012_v35 = vadd.f32 %v3855_v55, %v3563_v53  ;;  %v2773_v41 = vpop.f32.mrb[134].mxu1  ;;  %3116 = vst.msk [vmem:[#allocation3 + $0x110] sm:$0xff] %vm3081_vm1, %v3051_v1  ;;  %v3863_v6 = vpop.f32.mrb[134].mxu0 }
 0x4c8   : > { %v4011_v13 = vadd.f32 %v3852_v29, %v3562_v38  ;;  %v3388_v5 = vpop.permute.xlu0 %3387  ;;  %v3052_v30 = vadd.f32 %v2988_v54, %v2773_v41  ;;  %v2775_v59 = vpop.f32.mrb[135].mxu1  ;;  %v2989_v29 = vmul.f32 %v8394_v45, %v2925_v0 }
 0x4c9   : > { %4076 = vst [vmem:[#allocation4 + $0x108] sm:$0xff] %v4012_v35  ;;  %v3383_v22 = vpop.permute.xlu1 %3382  ;;  %v3565_v48 = vmul.f32 %v3388_v5, %v3181_v19  ;;  %v3865_v52 = vpop.f32.mrb[135].mxu0  ;;  %v3185_v35 = vld [vmem:[#allocation4 + $0x138] sm:$0xff]  ;;  %v2991_v5 = vmul.f32 %v8410_v37, %v2927_v9  ;;  %v3186_v37 = vld [vmem:[#allocation4 + $0x140] sm:$0xff] }
 0x4ca   : > { %4075 = vst [vmem:[#allocation4 + $0x100] sm:$0xff] %v4011_v13  ;;  %v3564_v3 = vmul.f32 %v3383_v22, %v3180_v7  ;;  %3117 = vst.msk [vmem:[#allocation3 + $0x118] sm:$0xff] %vm3081_vm1, %v3052_v30 }
 0x4cb   : > { %v4014_v58 = vadd.f32 %v3863_v6, %v3565_v48  ;;  %v2929_v6 = vld [vmem:[#allocation3 + $0x140] sm:$0xff] }
 0x4cc   : > { %v4013_v44 = vadd.f32 %v3860_v42, %v3564_v3  ;;  %v3398_v50 = vpop.permute.xlu0 %3397  ;;  %v2778_v40 = vpop.f32.mrb[136].mxu1  ;;  %v2992_v42 = vmul.f32 %v8406_v32, %v2928_v31  ;;  %v2993_v52 = vmul.f32 %v8424_v2, %v2929_v6  ;;  %v3188_v2 = vld [vmem:[#allocation4 + $0x150] sm:$0xff] }
 0x4cd   : > { %v3393_v28 = vpop.permute.xlu1 %3392  ;;  %4078 = vst [vmem:[#allocation4 + $0x118] sm:$0xff] %v4014_v58  ;;  %v3868_v17 = vpop.f32.mrb[136].mxu0  ;;  %v3053_v62 = vadd.f32 %v2989_v29, %v2778_v40  ;;  %v3567_v24 = vmul.f32 %v3398_v50, %v3183_v46  ;;  %v3187_v58 = vld [vmem:[#allocation4 + $0x148] sm:$0xff] }
 0x4ce   : > { %4077 = vst [vmem:[#allocation4 + $0x110] sm:$0xff] %v4013_v44  ;;  %v3566_v20 = vmul.f32 %v3393_v28, %v3182_v4  ;;  %v2780_v56 = vpop.f32.mrb[137].mxu1  ;;  %v3870_v39 = vpop.f32.mrb[137].mxu0  ;;  %v2930_v28 = vld [vmem:[#allocation3 + $0x148] sm:$0xff] }
 0x4cf   : > { %v2781_v18 = vpop.f32.mrb[138].mxu1  ;;  %3118 = vst.msk [vmem:[#allocation3 + $0x120] sm:$0xff] %vm3081_vm1, %v3053_v62  ;;  %v3871_v11 = vpop.f32.mrb[138].mxu0  ;;  %v2994_v40 = vmul.f32 %v8422_v23, %v2930_v28  ;;  %v3174_v23 = vld [vmem:[#allocation4 + $0xe0] sm:$0xff] }
 0x4d0   : > { %v3408_v15 = vpop.permute.xlu0 %3407  ;;  %v4015_v16 = vadd.f32 %v3868_v17, %v3566_v20  ;;  %v3054_v53 = vadd.f32 %v2990_v14, %v2781_v18  ;;  %v4016_v38 = vadd.f32 %v3871_v11, %v3567_v24  ;;  %v2783_v45 = vpop.f32.mrb[139].mxu1 }
 0x4d1   : > { %v3403_v43 = vpop.permute.xlu1 %3402  ;;  %v3873_v57 = vpop.f32.mrb[139].mxu0  ;;  %v3569_v1 = vmul.f32 %v3408_v15, %v3185_v35  ;;  %v3189_v45 = vld [vmem:[#allocation4 + $0x158] sm:$0xff] }
 0x4d2   : > { %4079 = vst [vmem:[#allocation4 + $0x120] sm:$0xff] %v4015_v16  ;;  %3119 = vst.msk [vmem:[#allocation3 + $0x128] sm:$0xff] %vm3081_vm1, %v3054_v53  ;;  %v3568_v7 = vmul.f32 %v3403_v43, %v3184_v63 }
 0x4d3   : > { %4080 = vst [vmem:[#allocation4 + $0x128] sm:$0xff] %v4016_v38  ;;  %v2932_v38 = vld [vmem:[#allocation3 + $0x158] sm:$0xff] }
 0x4d4   : > { %v3418_v10 = vpop.permute.xlu0 %3417  ;;  %v2786_v61 = vpop.f32.mrb[140].mxu1 }
 0x4d5   : > { %v3413_v55 = vpop.permute.xlu1 %3412  ;;  %v3876_v19 = vpop.f32.mrb[140].mxu0  ;;  %v3055_v22 = vadd.f32 %v2991_v5, %v2786_v61  ;;  %v3571_v17 = vmul.f32 %v3418_v10, %v3187_v58  ;;  %v3177_v61 = vld [vmem:[#allocation4 + $0xf8] sm:$0xff]  ;;  %v3191_v58 = vld [vmem:[#allocation4 + $0x168] sm:$0xff] }
 0x4d6   : > { %v4017_v36 = vadd.f32 %v3876_v19, %v3568_v7  ;;  %v2788_v3 = vpop.f32.mrb[141].mxu1  ;;  %v3878_v34 = vpop.f32.mrb[141].mxu0  ;;  %v3570_v4 = vmul.f32 %v3413_v55, %v3186_v37  ;;  %v2931_v55 = vld [vmem:[#allocation3 + $0x150] sm:$0xff] }
 0x4d7   : > { %v2789_v27 = vpop.f32.mrb[142].mxu1  ;;  %3120 = vst.msk [vmem:[#allocation3 + $0x130] sm:$0xff] %vm3081_vm1, %v3055_v22  ;;  %v3879_v48 = vpop.f32.mrb[142].mxu0  ;;  %v2995_v31 = vmul.f32 %v8436_v8, %v2931_v55  ;;  %v2996_v3 = vmul.f32 %v8439_v60, %v2932_v38 }
 0x4d8   : > { %v8682_v25 = vpop.permute.xlu0 %3427  ;;  %4081 = vst [vmem:[#allocation4 + $0x130] sm:$0xff] %v4017_v36  ;;  %v3056_v54 = vadd.f32 %v2992_v42, %v2789_v27  ;;  %v4018_v50 = vadd.f32 %v3879_v48, %v3569_v1  ;;  %v2791_v41 = vpop.f32.mrb[143].mxu1 }
 0x4d9   : > { %v3423_v13 = vpop.permute.xlu1 %3422  ;;  %v3881_v30 = vpop.f32.mrb[143].mxu0  ;;  %v3573_v34 = vmul.f32 %v8682_v25, %v3189_v45  ;;  %v3176_v25 = vld [vmem:[#allocation4 + $0xf0] sm:$0xff] }
 0x4da   : > { %3121 = vst.msk [vmem:[#allocation3 + $0x138] sm:$0xff] %vm3081_vm1, %v3056_v54  ;;  %4082 = vst [vmem:[#allocation4 + $0x138] sm:$0xff] %v4018_v50  ;;  %v3572_v57 = vmul.f32 %v3423_v13, %v3188_v2  ;;  %v3190_v30 = vld [vmem:[#allocation4 + $0x160] sm:$0xff]  ;;  %v3192_v2 = vld [vmem:[#allocation4 + $0x170] sm:$0xff] }
 0x4dc   : > { %v8686_v49 = vpop.permute.xlu0 %3437  ;;  %v2794_v0 = vpop.f32.mrb[144].mxu1 }
 0x4dd   : > { %v8689_v44 = vpop.permute.xlu1 %3432  ;;  %v3884_v15 = vpop.f32.mrb[144].mxu0  ;;  %v3057_v46 = vadd.f32 %v2993_v52, %v2794_v0  ;;  %v2934_v52 = vld [vmem:[#allocation3 + $0x168] sm:$0xff] }
 0x4de   : > { %v4019_v20 = vadd.f32 %v3884_v15, %v3570_v4  ;;  %v2796_v43 = vpop.f32.mrb[145].mxu1  ;;  %v3886_v29 = vpop.f32.mrb[145].mxu0  ;;  %v3574_v0 = vmul.f32 %v8689_v44, %v3190_v30 }
 0x4df   : > { %v2797_v16 = vpop.f32.mrb[146].mxu1  ;;  %3122 = vst.msk [vmem:[#allocation3 + $0x140] sm:$0xff] %vm3081_vm1, %v3057_v46  ;;  %v3887_v14 = vpop.f32.mrb[146].mxu0  ;;  %v3575_v43 = vmul.f32 %v8686_v49, %v3191_v58  ;;  %v9691_v49 = vld [vmem:[#allocation35_spill] sm:$0xff] }
 0x4e0   : > { %v8692_v32 = vpop.permute.xlu0 %3447  ;;  %4083 = vst [vmem:[#allocation4 + $0x140] sm:$0xff] %v4019_v20  ;;  %v3058_v39 = vadd.f32 %v2994_v40, %v2797_v16  ;;  %v4020_v18 = vadd.f32 %v3887_v14, %v3571_v17  ;;  %v2799_v53 = vpop.f32.mrb[147].mxu1  ;;  %v9690_v17 = vld [vmem:[#allocation88_spill] sm:$0xff] }
 0x4e1   : > { %v8694_v59 = vpop.permute.xlu1 %3442  ;;  %v3889_v11 = vpop.f32.mrb[147].mxu0  ;;  %v2935_v14 = vld [vmem:[#allocation3 + $0x170] sm:$0xff]  ;;  %v2936_v53 = vld [vmem:[#allocation3 + $0x178] sm:$0xff] }
 0x4e2   : > { %3123 = vst.msk [vmem:[#allocation3 + $0x148] sm:$0xff] %vm3081_vm1, %v3058_v39  ;;  %4084 = vst [vmem:[#allocation4 + $0x148] sm:$0xff] %v4020_v18  ;;  %v2999_v18 = vmul.f32 %v9691_v49, %v2935_v14  ;;  %v3193_v11 = vld [vmem:[#allocation4 + $0x178] sm:$0xff]  ;;  %v3576_v55 = vmul.f32 %v8694_v59, %v3192_v2 }
 0x4e4   : > { %v3358_v62 = vpop.permute.xlu0 %3357  ;;  %v2802_v7 = vpop.f32.mrb[148].mxu1 }
 0x4e5   : > { %v3559_v56 = vmul.f32 %v3358_v62, %v3175_v51  ;;  %v8699_v24 = vpop.permute.xlu1 %3452  ;;  %v3892_v5 = vpop.f32.mrb[148].mxu0  ;;  %v3059_v19 = vadd.f32 %v2995_v31, %v2802_v7  ;;  %v2998_v62 = vmul.f32 %v9690_v17, %v2934_v52  ;;  %v9692_v31 = vld [vmem:[#allocation34_spill] sm:$0xff]  ;;  %v3577_v7 = vmul.f32 %v8692_v32, %v3193_v11  ;;  %v3195_v32 = vld [vmem:[#allocation4 + $0x188] sm:$0xff] }
 0x4e6   : > { %v4021_v22 = vadd.f32 %v3892_v5, %v3572_v57  ;;  %v3894_v36 = vpop.f32.mrb[149].mxu0 }
 0x4e7   : > { %v4008_v63 = vadd.f32 %v8651_v21, %v3559_v56  ;;  %v2804_v21 = vpop.f32.mrb[149].mxu1  ;;  %3124 = vst.msk [vmem:[#allocation3 + $0x150] sm:$0xff] %vm3081_vm1, %v3059_v19  ;;  %v3895_v54 = vpop.f32.mrb[150].mxu0  ;;  %v3194_v36 = vld [vmem:[#allocation4 + $0x180] sm:$0xff] }
 0x4e8   : > { %v8703_v10 = vpop.permute.xlu0 %3457  ;;  %v2805_v13 = vpop.f32.mrb[150].mxu1  ;;  %4085 = vst [vmem:[#allocation4 + $0x150] sm:$0xff] %v4021_v22  ;;  %v4022_v37 = vadd.f32 %v3895_v54, %v3573_v34  ;;  %v2937_v21 = vld [vmem:[#allocation3 + $0x180] sm:$0xff] }
 0x4e9   : > { %4072 = vst [vmem:[#allocation4 + $0xe8] sm:$0xff] %v4008_v63  ;;  %v3353_v9 = vpop.permute.xlu1 %3352  ;;  %v3060_v27 = vadd.f32 %v2996_v3, %v2805_v13  ;;  %v2807_v50 = vpop.f32.mrb[151].mxu1  ;;  %v9693_v34 = vld [vmem:[#allocation94_spill] sm:$0xff]  ;;  %v3578_v13 = vmul.f32 %v8699_v24, %v3194_v36  ;;  %v3196_v24 = vld [vmem:[#allocation4 + $0x190] sm:$0xff] }
 0x4ea   : > { %v3558_v35 = vmul.f32 %v3353_v9, %v3174_v23  ;;  %v3897_v41 = vpop.f32.mrb[151].mxu0  ;;  %4086 = vst [vmem:[#allocation4 + $0x158] sm:$0xff] %v4022_v37 }
 0x4eb   : > { %3125 = vst.msk [vmem:[#allocation3 + $0x158] sm:$0xff] %vm3081_vm1, %v3060_v27 }
 0x4ec   : > { %v4007_v42 = vadd.f32 %v8645_v12, %v3558_v35  ;;  %v3368_v1 = vpop.permute.xlu0 %3367  ;;  %v2933_v12 = vld [vmem:[#allocation3 + $0x160] sm:$0xff]  ;;  %v3000_v35 = vmul.f32 %v9692_v31, %v2936_v53 }
 0x4ed   : > { %v3561_v8 = vmul.f32 %v3368_v1, %v3177_v61  ;;  %v8710_v48 = vpop.permute.xlu1 %3462  ;;  %v2997_v4 = vmul.f32 %v8458_v47, %v2933_v12  ;;  %v2938_v1 = vld [vmem:[#allocation3 + $0x188] sm:$0xff]  ;;  %v3579_v12 = vmul.f32 %v8703_v10, %v3195_v32  ;;  %v2941_v53 = vld [vmem:[#allocation3 + $0x1a0] sm:$0xff]  ;;  %v3200_v32 = vld [vmem:[#allocation4 + $0x1b0] sm:$0xff] }
 0x4ee   : > { %4071 = vst [vmem:[#allocation4 + $0xe0] sm:$0xff] %v4007_v42  ;;  %v3001_v42 = vmul.f32 %v9693_v34, %v2937_v21  ;;  %v3580_v10 = vmul.f32 %v8710_v48, %v3196_v24  ;;  %v3198_v48 = vld [vmem:[#allocation4 + $0x1a0] sm:$0xff] }
 0x4ef   : > { %v4010_v60 = vadd.f32 %v8663_v26, %v3561_v8 }
 0x4f0   : > { %v2810_v51 = vpop.f32.mrb[152].mxu1  ;;  %v3900_v26 = vpop.f32.mrb[152].mxu0 }
 0x4f1   : > { %4074 = vst [vmem:[#allocation4 + $0xf8] sm:$0xff] %v4010_v60  ;;  %v3363_v6 = vpop.permute.xlu1 %3362  ;;  %v3061_v46 = vadd.f32 %v2997_v4, %v2810_v51  ;;  %v2812_v20 = vpop.f32.mrb[153].mxu1  ;;  %v4023_v29 = vadd.f32 %v3900_v26, %v3574_v0  ;;  %v9694_v60 = vld [vmem:[#allocation96_spill] sm:$0xff]  ;;  %v3197_v51 = vld [vmem:[#allocation4 + $0x198] sm:$0xff]  ;;  %v9695_v26 = vld [vmem:[#allocation90_spill] sm:$0xff] }
 0x4f2   : > { %v3560_v28 = vmul.f32 %v3363_v6, %v3176_v25  ;;  %v3902_v40 = vpop.f32.mrb[153].mxu0  ;;  %v2813_v16 = vpop.f32.mrb[154].mxu1  ;;  %v3002_v25 = vmul.f32 %v9694_v60, %v2938_v1  ;;  %v2939_v4 = vld [vmem:[#allocation3 + $0x190] sm:$0xff] }
 0x4f3   : > { %3126 = vst.msk [vmem:[#allocation3 + $0x160] sm:$0xff] %vm3081_vm1, %v3061_v46  ;;  %v3903_v47 = vpop.f32.mrb[154].mxu0  ;;  %4087 = vst [vmem:[#allocation4 + $0x160] sm:$0xff] %v4023_v29  ;;  %v3062_v56 = vadd.f32 %v2998_v62, %v2813_v16  ;;  %v2815_v39 = vpop.f32.mrb[155].mxu1  ;;  %v3003_v20 = vmul.f32 %v9695_v26, %v2939_v4  ;;  %v9696_v62 = vld [vmem:[#allocation92_spill] sm:$0xff] }
 0x4f4   : > { %v4009_v15 = vadd.f32 %v8657_v33, %v3560_v28  ;;  %v4024_v44 = vadd.f32 %v3903_v47, %v3575_v43  ;;  %v3905_v33 = vpop.f32.mrb[155].mxu0  ;;  %v3468_v46 = vpop.permute.xlu0 %3467 }
 0x4f5   : > { %3127 = vst.msk [vmem:[#allocation3 + $0x168] sm:$0xff] %vm3081_vm1, %v3062_v56  ;;  %v3581_v47 = vmul.f32 %v3468_v46, %v3197_v51  ;;  %v3473_v11 = vpop.permute.xlu1 %3472 }
 0x4f6   : > { %4073 = vst [vmem:[#allocation4 + $0xf0] sm:$0xff] %v4009_v15  ;;  %4088 = vst [vmem:[#allocation4 + $0x168] sm:$0xff] %v4024_v44  ;;  %v2940_v15 = vld [vmem:[#allocation3 + $0x198] sm:$0xff] }
 0x4f7   : > { %v3004_v16 = vmul.f32 %v9696_v62, %v2940_v15 }
 0x4f8   : > { %v2818_v63 = vpop.f32.mrb[156].mxu1  ;;  %v3908_v38 = vpop.f32.mrb[156].mxu0 }
 0x4f9   : > { %v3063_v23 = vadd.f32 %v2999_v18, %v2818_v63  ;;  %v4025_v45 = vadd.f32 %v3908_v38, %v3576_v55  ;;  %v2820_v57 = vpop.f32.mrb[157].mxu1  ;;  %v3910_v9 = vpop.f32.mrb[157].mxu0  ;;  %v2942_v55 = vld [vmem:[#allocation3 + $0x1a8] sm:$0xff]  ;;  %v9697_v38 = vld [vmem:[#allocation104_spill] sm:$0xff] }
 0x4fa   : > { %v2821_v5 = vpop.f32.mrb[158].mxu1  ;;  %v3911_v19 = vpop.f32.mrb[158].mxu0  ;;  %v3199_v63 = vld [vmem:[#allocation4 + $0x1a8] sm:$0xff]  ;;  %v3582_v57 = vmul.f32 %v3473_v11, %v3198_v48 }
 0x4fb   : > { %3128 = vst.msk [vmem:[#allocation3 + $0x170] sm:$0xff] %vm3081_vm1, %v3063_v23  ;;  %4089 = vst [vmem:[#allocation4 + $0x170] sm:$0xff] %v4025_v45  ;;  %v3064_v61 = vadd.f32 %v3000_v35, %v2821_v5  ;;  %v2823_v22 = vpop.f32.mrb[159].mxu1  ;;  %v4026_v59 = vadd.f32 %v3911_v19, %v3577_v7  ;;  %v3913_v3 = vpop.f32.mrb[159].mxu0  ;;  %v3005_v45 = vmul.f32 %v9697_v38, %v2941_v53  ;;  %v9698_v5 = vld [vmem:[#allocation102_spill] sm:$0xff] }
 0x4fc   : > { %v3478_v23 = vpop.permute.xlu0 %3477 }
 0x4fd   : > { %3129 = vst.msk [vmem:[#allocation3 + $0x178] sm:$0xff] %vm3081_vm1, %v3064_v61  ;;  %4090 = vst [vmem:[#allocation4 + $0x178] sm:$0xff] %v4026_v59  ;;  %v3006_v61 = vmul.f32 %v9698_v5, %v2942_v55  ;;  %v3583_v19 = vmul.f32 %v3478_v23, %v3199_v63 }
 0x500   : > { %v2826_v8 = vpop.f32.mrb[160].mxu1  ;;  %v3916_v54 = vpop.f32.mrb[160].mxu0 }
 0x501   : > { %v3065_v27 = vadd.f32 %v3001_v42, %v2826_v8  ;;  %v4027_v37 = vadd.f32 %v3916_v54, %v3578_v13  ;;  %v2828_v50 = vpop.f32.mrb[161].mxu1  ;;  %v3918_v41 = vpop.f32.mrb[161].mxu0  ;;  %v2943_v13 = vld [vmem:[#allocation3 + $0x1b0] sm:$0xff]  ;;  %v3201_v54 = vld [vmem:[#allocation4 + $0x1b8] sm:$0xff] }
 0x502   : > { %v2829_v30 = vpop.f32.mrb[162].mxu1  ;;  %v3919_v28 = vpop.f32.mrb[162].mxu0  ;;  %v9699_v50 = vld [vmem:[#allocation39_spill] sm:$0xff] }
 0x503   : > { %3130 = vst.msk [vmem:[#allocation3 + $0x180] sm:$0xff] %vm3081_vm1, %v3065_v27  ;;  %4091 = vst [vmem:[#allocation4 + $0x180] sm:$0xff] %v4027_v37  ;;  %v3066_v6 = vadd.f32 %v3002_v25, %v2829_v30  ;;  %v2831_v58 = vpop.f32.mrb[163].mxu1  ;;  %v4028_v52 = vadd.f32 %v3919_v28, %v3579_v12  ;;  %v3921_v0 = vpop.f32.mrb[163].mxu0  ;;  %v2944_v27 = vld [vmem:[#allocation3 + $0x1b8] sm:$0xff]  ;;  %v3007_v41 = vmul.f32 %v9699_v50, %v2943_v13  ;;  %v9700_v28 = vld [vmem:[#allocation38_spill] sm:$0xff] }
 0x504   : > { %v3483_v8 = vpop.permute.xlu1 %3482  ;;  %v3488_v37 = vpop.permute.xlu0 %3487  ;;  %v3008_v58 = vmul.f32 %v9700_v28, %v2944_v27 }
 0x505   : > { %3131 = vst.msk [vmem:[#allocation3 + $0x188] sm:$0xff] %vm3081_vm1, %v3066_v6  ;;  %4092 = vst [vmem:[#allocation4 + $0x188] sm:$0xff] %v4028_v52  ;;  %v3584_v60 = vmul.f32 %v3483_v8, %v3200_v32  ;;  %v3585_v4 = vmul.f32 %v3488_v37, %v3201_v54 }
 0x508   : > { %v2834_v43 = vpop.f32.mrb[164].mxu1  ;;  %v3924_v40 = vpop.f32.mrb[164].mxu0 }
 0x509   : > { %v3067_v29 = vadd.f32 %v3003_v20, %v2834_v43  ;;  %v2836_v17 = vpop.f32.mrb[165].mxu1  ;;  %v4029_v56 = vadd.f32 %v3924_v40, %v3580_v10  ;;  %v3926_v44 = vpop.f32.mrb[165].mxu0  ;;  %v2945_v10 = vld [vmem:[#allocation3 + $0x1c0] sm:$0xff]  ;;  %v2946_v40 = vld [vmem:[#allocation3 + $0x1c8] sm:$0xff] }
 0x50a   : > { %v2837_v39 = vpop.f32.mrb[166].mxu1  ;;  %v3927_v14 = vpop.f32.mrb[166].mxu0  ;;  %v3202_v43 = vld [vmem:[#allocation4 + $0x1c0] sm:$0xff]  ;;  %v3203_v17 = vld [vmem:[#allocation4 + $0x1c8] sm:$0xff] }
 0x50b   : > { %3132 = vst.msk [vmem:[#allocation3 + $0x190] sm:$0xff] %vm3081_vm1, %v3067_v29  ;;  %v3068_v33 = vadd.f32 %v3004_v16, %v2837_v39  ;;  %v2839_v2 = vpop.f32.mrb[167].mxu1  ;;  %4093 = vst [vmem:[#allocation4 + $0x190] sm:$0xff] %v4029_v56  ;;  %v4030_v49 = vadd.f32 %v3927_v14, %v3581_v47  ;;  %v3929_v18 = vpop.f32.mrb[167].mxu0  ;;  %v9701_v16 = vld [vmem:[#allocation112_spill] sm:$0xff] }
 0x50c   : > { %v3493_v29 = vpop.permute.xlu1 %3492  ;;  %v3498_v62 = vpop.permute.xlu0 %3497  ;;  %v3009_v47 = vmul.f32 %v9701_v16, %v2945_v10  ;;  %v9702_v2 = vld [vmem:[#allocation110_spill] sm:$0xff] }
 0x50d   : > { %3133 = vst.msk [vmem:[#allocation3 + $0x198] sm:$0xff] %vm3081_vm1, %v3068_v33  ;;  %4094 = vst [vmem:[#allocation4 + $0x198] sm:$0xff] %v4030_v49  ;;  %v3586_v56 = vmul.f32 %v3493_v29, %v3202_v43  ;;  %v3010_v49 = vmul.f32 %v9702_v2, %v2946_v40  ;;  %v3587_v18 = vmul.f32 %v3498_v62, %v3203_v17  ;;  %v2952_v2 = vld [vmem:[#allocation3 + $0x1f8] sm:$0xff] }
 0x510   : > { %v2842_v9 = vpop.f32.mrb[168].mxu1  ;;  %v3932_v35 = vpop.f32.mrb[168].mxu0 }
 0x511   : > { %v3069_v31 = vadd.f32 %v3005_v45, %v2842_v9  ;;  %v2844_v7 = vpop.f32.mrb[169].mxu1  ;;  %v4031_v22 = vadd.f32 %v3932_v35, %v3582_v57  ;;  %v3934_v21 = vpop.f32.mrb[169].mxu0  ;;  %v2947_v57 = vld [vmem:[#allocation3 + $0x1d0] sm:$0xff]  ;;  %v2948_v35 = vld [vmem:[#allocation3 + $0x1d8] sm:$0xff] }
 0x512   : > { %v2845_v36 = vpop.f32.mrb[170].mxu1  ;;  %v3935_v3 = vpop.f32.mrb[170].mxu0  ;;  %v3204_v9 = vld [vmem:[#allocation4 + $0x1d0] sm:$0xff]  ;;  %v3205_v7 = vld [vmem:[#allocation4 + $0x1d8] sm:$0xff] }
 0x513   : > { %3134 = vst.msk [vmem:[#allocation3 + $0x1a0] sm:$0xff] %vm3081_vm1, %v3069_v31  ;;  %v3070_v59 = vadd.f32 %v3006_v61, %v2845_v36  ;;  %v2847_v34 = vpop.f32.mrb[171].mxu1  ;;  %4095 = vst [vmem:[#allocation4 + $0x1a0] sm:$0xff] %v4031_v22  ;;  %v4032_v42 = vadd.f32 %v3935_v3, %v3583_v19  ;;  %v3937_v1 = vpop.f32.mrb[171].mxu0  ;;  %v9703_v61 = vld [vmem:[#allocation100_spill] sm:$0xff] }
 0x514   : > { %v3503_v31 = vpop.permute.xlu1 %3502  ;;  %v3508_v5 = vpop.permute.xlu0 %3507  ;;  %v3011_v19 = vmul.f32 %v9703_v61, %v2947_v57  ;;  %v9704_v34 = vld [vmem:[#allocation98_spill] sm:$0xff] }
 0x515   : > { %3135 = vst.msk [vmem:[#allocation3 + $0x1a8] sm:$0xff] %vm3081_vm1, %v3070_v59  ;;  %4096 = vst [vmem:[#allocation4 + $0x1a8] sm:$0xff] %v4032_v42  ;;  %v3588_v22 = vmul.f32 %v3503_v31, %v3204_v9  ;;  %v3012_v42 = vmul.f32 %v9704_v34, %v2948_v35  ;;  %v3589_v1 = vmul.f32 %v3508_v5, %v3205_v7  ;;  %v9708_v57 = vld [vmem:[#allocation42_spill] sm:$0xff]  ;;  %v4180_v34 = vld [vmem:[#allocation3 + $0x28] sm:$0xff] (!%p5114_p1) }
 0x516   : > { %v3016_v9 = vmul.f32 %v9708_v57, %v2952_v2  ;;  %v4199_v2 = vld [vmem:[#allocation3 + $0xc0] sm:$0xff] (!%p5114_p1) }
 0x518   : > { %v2850_v25 = vpop.f32.mrb[172].mxu1  ;;  %v3518_v28 = vpop.permute.xlu0 %3517 }
 0x519   : > { %v3071_v12 = vadd.f32 %v3007_v41, %v2850_v25  ;;  %v3940_v30 = vpop.f32.mrb[172].mxu0  ;;  %v2852_v6 = vpop.f32.mrb[173].mxu1  ;;  %v3206_v25 = vld [vmem:[#allocation4 + $0x1e0] sm:$0xff] }
 0x51a   : > { %v4033_v24 = vadd.f32 %v3940_v30, %v3584_v60  ;;  %v3942_v52 = vpop.f32.mrb[173].mxu0  ;;  %v2853_v0 = vpop.f32.mrb[174].mxu1  ;;  %v2949_v60 = vld [vmem:[#allocation3 + $0x1e0] sm:$0xff]  ;;  %v2950_v30 = vld [vmem:[#allocation3 + $0x1e8] sm:$0xff] }
 0x51b   : > { %3136 = vst.msk [vmem:[#allocation3 + $0x1b0] sm:$0xff] %vm3081_vm1, %v3071_v12  ;;  %v3072_v15 = vadd.f32 %v3008_v58, %v2853_v0  ;;  %v3943_v51 = vpop.f32.mrb[174].mxu0  ;;  %v2855_v46 = vpop.f32.mrb[175].mxu1  ;;  %v3207_v6 = vld [vmem:[#allocation4 + $0x1e8] sm:$0xff]  ;;  %v9705_v58 = vld [vmem:[#allocation37_spill] sm:$0xff] }
 0x51c   : > { %4097 = vst [vmem:[#allocation4 + $0x1b0] sm:$0xff] %v4033_v24  ;;  %v4034_v26 = vadd.f32 %v3943_v51, %v3585_v4  ;;  %v3945_v20 = vpop.f32.mrb[175].mxu0  ;;  %v3513_v12 = vpop.permute.xlu1 %3512  ;;  %v3013_v4 = vmul.f32 %v9705_v58, %v2949_v60  ;;  %v9706_v46 = vld [vmem:[#allocation36_spill] sm:$0xff] }
 0x51d   : > { %3137 = vst.msk [vmem:[#allocation3 + $0x1b8] sm:$0xff] %vm3081_vm1, %v3072_v15  ;;  %v3590_v24 = vmul.f32 %v3513_v12, %v3206_v25  ;;  %v3591_v20 = vmul.f32 %v3518_v28, %v3207_v6  ;;  %v4185_v25 = vld [vmem:[#allocation3 + $0x50] sm:$0xff] (!%p5114_p1)  ;;  %v4187_v28 = vld [vmem:[#allocation3 + $0x60] sm:$0xff] (!%p5114_p1) }
 0x51e   : > { %4098 = vst [vmem:[#allocation4 + $0x1b8] sm:$0xff] %v4034_v26  ;;  %v3014_v26 = vmul.f32 %v9706_v46, %v2950_v30  ;;  %v4188_v30 = vld [vmem:[#allocation3 + $0x68] sm:$0xff] (!%p5114_p1)  ;;  %v4191_v46 = vld [vmem:[#allocation3 + $0x80] sm:$0xff] (!%p5114_p1) }
 0x520   : > { %v2858_v44 = vpop.f32.mrb[176].mxu1 }
 0x521   : > { %v3073_v39 = vadd.f32 %v3009_v47, %v2858_v44  ;;  %v3948_v33 = vpop.f32.mrb[176].mxu0  ;;  %v2860_v14 = vpop.f32.mrb[177].mxu1 }
 0x522   : > { %v4035_v53 = vadd.f32 %v3948_v33, %v3586_v56  ;;  %v3950_v48 = vpop.f32.mrb[177].mxu0  ;;  %v2861_v11 = vpop.f32.mrb[178].mxu1  ;;  %v3208_v56 = vld [vmem:[#allocation4 + $0x1f0] sm:$0xff]  ;;  %v3209_v33 = vld [vmem:[#allocation4 + $0x1f8] sm:$0xff] }
 0x523   : > { %3138 = vst.msk [vmem:[#allocation3 + $0x1c0] sm:$0xff] %vm3081_vm1, %v3073_v39  ;;  %v3074_v55 = vadd.f32 %v3010_v49, %v2861_v11  ;;  %v3951_v63 = vpop.f32.mrb[178].mxu0  ;;  %v2863_v23 = vpop.f32.mrb[179].mxu1  ;;  %v2951_v39 = vld [vmem:[#allocation3 + $0x1f0] sm:$0xff] }
 0x524   : > { %4099 = vst [vmem:[#allocation4 + $0x1c0] sm:$0xff] %v4035_v53  ;;  %v4036_v38 = vadd.f32 %v3951_v63, %v3587_v18  ;;  %v3953_v45 = vpop.f32.mrb[179].mxu0  ;;  %v3523_v44 = vpop.permute.xlu1 %3522  ;;  %v9707_v18 = vld [vmem:[#allocation43_spill] sm:$0xff] }
 0x525   : > { %3139 = vst.msk [vmem:[#allocation3 + $0x1c8] sm:$0xff] %vm3081_vm1, %v3074_v55  ;;  %v3528_v14 = vpop.permute.xlu0 %3527  ;;  %v3592_v49 = vmul.f32 %v3523_v44, %v3208_v56  ;;  %v3015_v53 = vmul.f32 %v9707_v18, %v2951_v39  ;;  %v4197_v44 = vld [vmem:[#allocation3 + $0xb0] sm:$0xff] (!%p5114_p1)  ;;  %v4202_v18 = vld [vmem:[#allocation3 + $0xd8] sm:$0xff] (!%p5114_p1) }
 0x526   : > { %4100 = vst [vmem:[#allocation4 + $0x1c8] sm:$0xff] %v4036_v38  ;;  %v3593_v55 = vmul.f32 %v3528_v14, %v3209_v33  ;;  %v4200_v33 = vld [vmem:[#allocation3 + $0xc8] sm:$0xff] (!%p5114_p1) }
 0x528   : > { %v2866_v21 = vpop.f32.mrb[180].mxu1 }
 0x529   : > { %v3075_v36 = vadd.f32 %v3011_v19, %v2866_v21  ;;  %v3956_v59 = vpop.f32.mrb[180].mxu0  ;;  %v2868_v3 = vpop.f32.mrb[181].mxu1  ;;  %v4175_v21 = vld [vmem:[#allocation3] sm:$0xff] (!%p5114_p1) }
 0x52a   : > { %v4037_v13 = vadd.f32 %v3956_v59, %v3588_v22  ;;  %v3958_v32 = vpop.f32.mrb[181].mxu0  ;;  %v2869_v8 = vpop.f32.mrb[182].mxu1  ;;  %v4177_v22 = vld [vmem:[#allocation3 + $0x10] sm:$0xff] (!%p5114_p1)  ;;  %v6169_v59 = vmov (!%p5114_p1), 0   ;;  %v4176_v3 = vld [vmem:[#allocation3 + $0x8] sm:$0xff] (!%p5114_p1) }
 0x52b   : > { %3140 = vst.msk [vmem:[#allocation3 + $0x1d0] sm:$0xff] %vm3081_vm1, %v3075_v36  ;;  %v3076_v27 = vadd.f32 %v3012_v42, %v2869_v8  ;;  %v3959_v54 = vpop.f32.mrb[182].mxu0  ;;  %v2871_v37 = vpop.f32.mrb[183].mxu1  ;;  %v4178_v36 = vld [vmem:[#allocation3 + $0x18] sm:$0xff] (!%p5114_p1)  ;;  %5838 = vset.pattern.permute.xlu1 (!%p5114_p1), %v6169_v59  ;;  %5837 = vset.pattern.permute.xlu0 (!%p5114_p1), %v6169_v59  ;;  %5839 = vrcp.f32 (!%p5114_p1), %v4177_v22  ;;  %v4179_v42 = vld [vmem:[#allocation3 + $0x20] sm:$0xff] (!%p5114_p1)  ;;  %v4212_v59 = vld [vmem:[#allocation3 + $0x128] sm:$0xff] (!%p5114_p1) }
 0x52c   : > { %4101 = vst [vmem:[#allocation4 + $0x1d0] sm:$0xff] %v4037_v13  ;;  %v4038_v50 = vadd.f32 %v3959_v54, %v3589_v1  ;;  %v3961_v41 = vpop.f32.mrb[183].mxu0  ;;  %5841 = vrcp.f32 (!%p5114_p1), %v4175_v21  ;;  %v4182_v1 = vld [vmem:[#allocation3 + $0x38] sm:$0xff] (!%p5114_p1)  ;;  %v4181_v13 = vld [vmem:[#allocation3 + $0x30] sm:$0xff] (!%p5114_p1)  ;;  %v4183_v37 = vld [vmem:[#allocation3 + $0x40] sm:$0xff] (!%p5114_p1) }
 0x52d   : > { %3141 = vst.msk [vmem:[#allocation3 + $0x1d8] sm:$0xff] %vm3081_vm1, %v3076_v27  ;;  %5843 = vrcp.f32 (!%p5114_p1), %v4178_v36  ;;  %v4184_v27 = vld [vmem:[#allocation3 + $0x48] sm:$0xff] (!%p5114_p1)  ;;  %v4186_v41 = vld [vmem:[#allocation3 + $0x58] sm:$0xff] (!%p5114_p1)  ;;  %v4209_v21 = vld [vmem:[#allocation3 + $0x110] sm:$0xff] (!%p5114_p1) }
 0x52e   : > { %4102 = vst [vmem:[#allocation4 + $0x1d8] sm:$0xff] %v4038_v50  ;;  %5845 = vrcp.f32 (!%p5114_p1), %v4176_v3 }
 0x52f   : > { %5847 = vrcp.f32 (!%p5114_p1), %v4180_v34  ;;  %v4211_v34 = vld [vmem:[#allocation3 + $0x120] sm:$0xff] (!%p5114_p1) }
 0x530   : > { %v2874_v52 = vpop.f32.mrb[184].mxu1  ;;  %5849 = vrcp.f32 (!%p5114_p1), %v4179_v42 }
 0x531   : > { %v3077_v0 = vadd.f32 %v3013_v4, %v2874_v52  ;;  %v3964_v15 = vpop.f32.mrb[184].mxu0  ;;  %v2876_v51 = vpop.f32.mrb[185].mxu1  ;;  %5851 = vrcp.f32 (!%p5114_p1), %v4182_v1  ;;  %v4190_v4 = vld [vmem:[#allocation3 + $0x78] sm:$0xff] (!%p5114_p1)  ;;  %v4189_v52 = vld [vmem:[#allocation3 + $0x70] sm:$0xff] (!%p5114_p1) }
 0x532   : > { %v4039_v10 = vadd.f32 %v3964_v15, %v3590_v24  ;;  %v3966_v43 = vpop.f32.mrb[185].mxu0  ;;  %v2877_v29 = vpop.f32.mrb[186].mxu1  ;;  %5853 = vrcp.f32 (!%p5114_p1), %v4181_v13  ;;  %v4192_v15 = vld [vmem:[#allocation3 + $0x88] sm:$0xff] (!%p5114_p1)  ;;  %v4214_v1 = vld [vmem:[#allocation3 + $0x138] sm:$0xff] (!%p5114_p1) }
 0x533   : > { %3142 = vst.msk [vmem:[#allocation3 + $0x1e0] sm:$0xff] %vm3081_vm1, %v3077_v0  ;;  %v3078_v40 = vadd.f32 %v3014_v26, %v2877_v29  ;;  %v3967_v17 = vpop.f32.mrb[186].mxu0  ;;  %v2879_v62 = vpop.f32.mrb[187].mxu1  ;;  %5855 = vrcp.f32 (!%p5114_p1), %v4184_v27  ;;  %v4193_v43 = vld [vmem:[#allocation3 + $0x90] sm:$0xff] (!%p5114_p1)  ;;  %v4216_v27 = vld [vmem:[#allocation3 + $0x148] sm:$0xff] (!%p5114_p1) }
 0x534   : > { %4103 = vst [vmem:[#allocation4 + $0x1e0] sm:$0xff] %v4039_v10  ;;  %v4040_v16 = vadd.f32 %v3967_v17, %v3591_v20  ;;  %v3969_v47 = vpop.f32.mrb[187].mxu0  ;;  %5857 = vrcp.f32 (!%p5114_p1), %v4183_v37  ;;  %v4194_v20 = vld [vmem:[#allocation3 + $0x98] sm:$0xff] (!%p5114_p1)  ;;  %v4195_v62 = vld [vmem:[#allocation3 + $0xa0] sm:$0xff] (!%p5114_p1) }
 0x535   : > { %3143 = vst.msk [vmem:[#allocation3 + $0x1e8] sm:$0xff] %vm3081_vm1, %v3078_v40  ;;  %v5840_v32 = vpop.eup (!%p5114_p1), %5839  ;;  %5859 = vrcp.f32 (!%p5114_p1), %v4186_v41  ;;  %v4196_v40 = vld [vmem:[#allocation3 + $0xa8] sm:$0xff] (!%p5114_p1)  ;;  %v4198_v47 = vld [vmem:[#allocation3 + $0xb8] sm:$0xff] (!%p5114_p1)  ;;  %v4215_v37 = vld [vmem:[#allocation3 + $0x140] sm:$0xff] (!%p5114_p1) }
 0x536   : > { %4104 = vst [vmem:[#allocation4 + $0x1e8] sm:$0xff] %v4040_v16  ;;  %v5842_v8 = vpop.eup (!%p5114_p1), %5841  ;;  %4379 = vperm.xlu1 (!%p5114_p1), %5838, %v5840_v32   ;;  %5861 = vrcp.f32 (!%p5114_p1), %v4185_v25  ;;  %v4213_v32 = vld [vmem:[#allocation3 + $0x130] sm:$0xff] (!%p5114_p1)  ;;  %v4218_v41 = vld [vmem:[#allocation3 + $0x158] sm:$0xff] (!%p5114_p1) }
 0x537   : > { %v5844_v54 = vpop.eup (!%p5114_p1), %5843  ;;  %4369 = vperm.xlu0 (!%p5114_p1), %5837, %v5842_v8   ;;  %5863 = vrcp.f32 (!%p5114_p1), %v4188_v30  ;;  %v4217_v25 = vld [vmem:[#allocation3 + $0x150] sm:$0xff] (!%p5114_p1)  ;;  %v4220_v30 = vld [vmem:[#allocation3 + $0x168] sm:$0xff] (!%p5114_p1) }
 0x538   : > { %v5846_v50 = vpop.eup (!%p5114_p1), %5845  ;;  %5865 = vrcp.f32 (!%p5114_p1), %v4187_v28  ;;  %v4219_v28 = vld [vmem:[#allocation3 + $0x160] sm:$0xff] (!%p5114_p1) }
 0x539   : > { %v5848_v60 = vpop.eup (!%p5114_p1), %5847  ;;  %5867 = vrcp.f32 (!%p5114_p1), %v4190_v4  ;;  %v4222_v4 = vld [vmem:[#allocation3 + $0x178] sm:$0xff] (!%p5114_p1) }
 0x53a   : > { %4384 = vperm.xlu1 (!%p5114_p1), %5838, %v5844_v54   ;;  %v5850_v12 = vpop.eup (!%p5114_p1), %5849  ;;  %5869 = vrcp.f32 (!%p5114_p1), %v4189_v52  ;;  %v4221_v52 = vld [vmem:[#allocation3 + $0x170] sm:$0xff] (!%p5114_p1) }
 0x53b   : > { %4374 = vperm.xlu0 (!%p5114_p1), %5837, %v5846_v50   ;;  %v5852_v6 = vpop.eup (!%p5114_p1), %5851  ;;  %5871 = vrcp.f32 (!%p5114_p1), %v4192_v15  ;;  %v4224_v15 = vld [vmem:[#allocation3 + $0x188] sm:$0xff] (!%p5114_p1) }
 0x53c   : > { %v5854_v58 = vpop.eup (!%p5114_p1), %5853  ;;  %5873 = vrcp.f32 (!%p5114_p1), %v4191_v46  ;;  %v4223_v46 = vld [vmem:[#allocation3 + $0x180] sm:$0xff] (!%p5114_p1) }
 0x53d   : > { %v5856_v24 = vpop.eup (!%p5114_p1), %5855  ;;  %5875 = vrcp.f32 (!%p5114_p1), %v4194_v20  ;;  %v4226_v20 = vld [vmem:[#allocation3 + $0x198] sm:$0xff] (!%p5114_p1) }
 0x53e   : > { %4394 = vperm.xlu1 (!%p5114_p1), %5838, %v5848_v60   ;;  %v5858_v0 = vpop.eup (!%p5114_p1), %5857  ;;  %5877 = vrcp.f32 (!%p5114_p1), %v4193_v43  ;;  %v4225_v43 = vld [vmem:[#allocation3 + $0x190] sm:$0xff] (!%p5114_p1) }
 0x53f   : > { %4389 = vperm.xlu0 (!%p5114_p1), %5837, %v5850_v12   ;;  %v5860_v51 = vpop.eup (!%p5114_p1), %5859  ;;  %5879 = vrcp.f32 (!%p5114_p1), %v4196_v40  ;;  %v4228_v40 = vld [vmem:[#allocation3 + $0x1a8] sm:$0xff] (!%p5114_p1) }
 0x540   : > { %v5862_v26 = vpop.eup (!%p5114_p1), %5861  ;;  %5881 = vrcp.f32 (!%p5114_p1), %v4195_v62  ;;  %v4227_v62 = vld [vmem:[#allocation3 + $0x1a0] sm:$0xff] (!%p5114_p1) }
 0x541   : > { %v5864_v10 = vpop.eup (!%p5114_p1), %5863  ;;  %5883 = vrcp.f32 (!%p5114_p1), %v4198_v47  ;;  %v4230_v47 = vld [vmem:[#allocation3 + $0x1b8] sm:$0xff] (!%p5114_p1) }
 0x542   : > { %4404 = vperm.xlu1 (!%p5114_p1), %5838, %v5852_v6   ;;  %v5866_v29 = vpop.eup (!%p5114_p1), %5865  ;;  %5885 = vrcp.f32 (!%p5114_p1), %v4197_v44  ;;  %v4229_v44 = vld [vmem:[#allocation3 + $0x1b0] sm:$0xff] (!%p5114_p1) }
 0x543   : > { %4399 = vperm.xlu0 (!%p5114_p1), %5837, %v5854_v58   ;;  %v5868_v17 = vpop.eup (!%p5114_p1), %5867  ;;  %5887 = vrcp.f32 (!%p5114_p1), %v4200_v33  ;;  %v4232_v33 = vld [vmem:[#allocation3 + $0x1c8] sm:$0xff] (!%p5114_p1) }
 0x544   : > { %v5870_v16 = vpop.eup (!%p5114_p1), %5869  ;;  %5889 = vrcp.f32 (!%p5114_p1), %v4199_v2  ;;  %v4231_v2 = vld [vmem:[#allocation3 + $0x1c0] sm:$0xff] (!%p5114_p1) }
 0x545   : > { %v5872_v56 = vpop.eup (!%p5114_p1), %5871  ;;  %5891 = vrcp.f32 (!%p5114_p1), %v4202_v18  ;;  %v4234_v18 = vld [vmem:[#allocation3 + $0x1d8] sm:$0xff] (!%p5114_p1) }
 0x546   : > { %4414 = vperm.xlu1 (!%p5114_p1), %5838, %v5856_v24   ;;  %v5874_v39 = vpop.eup (!%p5114_p1), %5873 }
 0x547   : > { %4409 = vperm.xlu0 (!%p5114_p1), %5837, %v5858_v0   ;;  %v5876_v14 = vpop.eup (!%p5114_p1), %5875 }
 0x54a   : > { %4424 = vperm.xlu1 (!%p5114_p1), %5838, %v5860_v51  }
 0x54b   : > { %4419 = vperm.xlu0 (!%p5114_p1), %5837, %v5862_v26  }
 0x54e   : > { %4434 = vperm.xlu1 (!%p5114_p1), %5838, %v5864_v10  }
 0x54f   : > { %4429 = vperm.xlu0 (!%p5114_p1), %5837, %v5866_v29  }
 0x552   : > { %4444 = vperm.xlu1 (!%p5114_p1), %5838, %v5868_v17  }
 0x553   : > { %4439 = vperm.xlu0 (!%p5114_p1), %5837, %v5870_v16  }
 0x556   : > { %4454 = vperm.xlu1 (!%p5114_p1), %5838, %v5872_v56  }
 0x557   : > { %4449 = vperm.xlu0 (!%p5114_p1), %5837, %v5874_v39  }
 0x55a   : > { %4464 = vperm.xlu1 (!%p5114_p1), %5838, %v5876_v14  }
 0x56a   : > { %4174 = sbr.rel (%p5114_p1) target bundleno = 1611 (0x64b), region = 52 }
 0x56b   : > { %v2882_v48 = vpop.f32.mrb[188].mxu1  ;;  %v3972_v11 = vpop.f32.mrb[188].mxu0 }
 0x56c   : > { %v3079_v63 = vadd.f32 %v3015_v53, %v2882_v48  ;;  %v4041_v23 = vadd.f32 %v3972_v11, %v3592_v49  ;;  %v2884_v38 = vpop.f32.mrb[189].mxu1  ;;  %v3974_v45 = vpop.f32.mrb[189].mxu0  ;;  %v4201_v48 = vld [vmem:[#allocation3 + $0xd0] sm:$0xff] (!%p5114_p1) }
 0x56d   : > { %v2885_v31 = vpop.f32.mrb[190].mxu1  ;;  %v3975_v35 = vpop.f32.mrb[190].mxu0  ;;  %5893 = vrcp.f32 (!%p5114_p1), %v4201_v48  ;;  %v4206_v45 = vld [vmem:[#allocation3 + $0xf8] sm:$0xff] (!%p5114_p1)  ;;  %v4233_v48 = vld [vmem:[#allocation3 + $0x1d0] sm:$0xff] (!%p5114_p1) }
 0x56e   : > { %3144 = vst.msk [vmem:[#allocation3 + $0x1f0] sm:$0xff] %vm3081_vm1, %v3079_v63  ;;  %4105 = vst [vmem:[#allocation4 + $0x1f0] sm:$0xff] %v4041_v23  ;;  %v3080_v7 = vadd.f32 %v3016_v9, %v2885_v31  ;;  %v4042_v5 = vadd.f32 %v3975_v35, %v3593_v55  ;;  %v2887_v61 = vpop.f32.mrb[191].mxu1  ;;  %v3977_v19 = vpop.f32.mrb[191].mxu0  ;;  %v4204_v55 = vld [vmem:[#allocation3 + $0xe8] sm:$0xff] (!%p5114_p1)  ;;  %v4203_v23 = vld [vmem:[#allocation3 + $0xe0] sm:$0xff] (!%p5114_p1) }
 0x56f   : > { %v5878_v49 = vpop.eup (!%p5114_p1), %5877  ;;  %5895 = vrcp.f32 (!%p5114_p1), %v4204_v55  ;;  %v4205_v9 = vld [vmem:[#allocation3 + $0xf0] sm:$0xff] (!%p5114_p1)  ;;  %v4208_v35 = vld [vmem:[#allocation3 + $0x108] sm:$0xff] (!%p5114_p1)  ;;  %v4210_v19 = vld [vmem:[#allocation3 + $0x118] sm:$0xff] (!%p5114_p1) }
 0x570   : > { %3145 = vst.msk [vmem:[#allocation3 + $0x1f8] sm:$0xff] %vm3081_vm1, %v3080_v7  ;;  %4106 = vst [vmem:[#allocation4 + $0x1f8] sm:$0xff] %v4042_v5  ;;  %v5880_v53 = vpop.eup (!%p5114_p1), %5879  ;;  %4459 = vperm.xlu0 (!%p5114_p1), %5837, %v5878_v49   ;;  %5897 = vrcp.f32 (!%p5114_p1), %v4203_v23  ;;  %v4207_v5 = vld [vmem:[#allocation3 + $0x100] sm:$0xff] (!%p5114_p1)  ;;  %v4236_v55 = vld [vmem:[#allocation3 + $0x1e8] sm:$0xff] (!%p5114_p1) }
 0x571   : > { %v5882_v11 = vpop.eup %5881  ;;  %4474 = vperm.xlu1 %5838, %v5880_v53   ;;  %5899 = vrcp.f32 %v4206_v45  ;;  %v4235_v23 = vld [vmem:[#allocation3 + $0x1e0] sm:$0xff] }
 0x572   : > { %v5884_v63 = vpop.eup %5883  ;;  %5901 = vrcp.f32 %v4205_v9 }
 0x573   : > { %v5886_v38 = vpop.eup %5885  ;;  %5903 = vrcp.f32 %v4208_v35 }
 0x574   : > { %4469 = vperm.xlu0 %5837, %v5882_v11   ;;  %v5888_v57 = vpop.eup %5887  ;;  %5905 = vrcp.f32 %v4207_v5 }
 0x575   : > { %4484 = vperm.xlu1 %5838, %v5884_v63   ;;  %v5890_v31 = vpop.eup %5889  ;;  %5907 = vrcp.f32 %v4210_v19  ;;  %v4237_v9 = vld [vmem:[#allocation3 + $0x1f0] sm:$0xff] }
 0x576   : > { %v5892_v7 = vpop.eup %5891  ;;  %5909 = vrcp.f32 %v4209_v21  ;;  %v4305_v21 = vld [vmem:[#allocation4 + $0x10] sm:$0xff] }
 0x577   : > { %v5894_v61 = vpop.eup %5893  ;;  %5911 = vrcp.f32 %v4212_v59  ;;  %v4238_v45 = vld [vmem:[#allocation3 + $0x1f8] sm:$0xff] }
 0x578   : > { %4479 = vperm.xlu0 %5837, %v5886_v38   ;;  %5913 = vrcp.f32 %v4211_v34 }
 0x579   : > { %4494 = vperm.xlu1 %5838, %v5888_v57   ;;  %v5896_v22 = vpop.eup %5895  ;;  %5915 = vrcp.f32 %v4214_v1  ;;  %v4306_v1 = vld [vmem:[#allocation4 + $0x18] sm:$0xff] }
 0x57a   : > { %v5898_v36 = vpop.eup %5897  ;;  %5917 = vrcp.f32 %v4213_v32 }
 0x57b   : > { %v5900_v3 = vpop.eup %5899  ;;  %5919 = vrcp.f32 %v4216_v27 }
 0x57c   : > { %4489 = vperm.xlu0 %5837, %v5890_v31   ;;  %v5902_v42 = vpop.eup %5901  ;;  %5921 = vrcp.f32 %v4215_v37  ;;  %v4308_v37 = vld [vmem:[#allocation4 + $0x28] sm:$0xff] }
 0x57d   : > { %4504 = vperm.xlu1 %5838, %v5892_v7   ;;  %v5904_v13 = vpop.eup %5903  ;;  %5923 = vrcp.f32 %v4218_v41 }
 0x57e   : > { %v5906_v8 = vpop.eup %5905  ;;  %5925 = vrcp.f32 %v4217_v25 }
 0x57f   : > { %v5908_v54 = vpop.eup %5907  ;;  %5927 = vrcp.f32 %v4220_v30  ;;  %v4310_v30 = vld [vmem:[#allocation4 + $0x38] sm:$0xff] }
 0x580   : > { %4499 = vperm.xlu0 %5837, %v5894_v61   ;;  %v5910_v50 = vpop.eup %5909  ;;  %5929 = vrcp.f32 %v4219_v28 }
 0x581   : > { %4514 = vperm.xlu1 %5838, %v5896_v22   ;;  %v5912_v60 = vpop.eup %5911  ;;  %5931 = vrcp.f32 %v4222_v4 }
 0x582   : > { %v5914_v12 = vpop.eup %5913  ;;  %5933 = vrcp.f32 %v4221_v52  ;;  %v4312_v52 = vld [vmem:[#allocation4 + $0x48] sm:$0xff] }
 0x583   : > { %v5916_v6 = vpop.eup %5915  ;;  %5935 = vrcp.f32 %v4224_v15 }
 0x584   : > { %4509 = vperm.xlu0 %5837, %v5898_v36   ;;  %v5918_v58 = vpop.eup %5917  ;;  %5937 = vrcp.f32 %v4223_v46  ;;  %v4303_v36 = vld [vmem:[#allocation4] sm:$0xff] }
 0x585   : > { %4524 = vperm.xlu1 %5838, %v5900_v3   ;;  %v5920_v24 = vpop.eup %5919  ;;  %5939 = vrcp.f32 %v4226_v20  ;;  %v4314_v20 = vld [vmem:[#allocation4 + $0x58] sm:$0xff] }
 0x586   : > { %v5922_v0 = vpop.eup %5921  ;;  %5941 = vrcp.f32 %v4225_v43 }
 0x587   : > { %v5924_v51 = vpop.eup %5923  ;;  %5943 = vrcp.f32 %v4228_v40 }
 0x588   : > { %4519 = vperm.xlu0 %5837, %v5902_v42   ;;  %v5926_v26 = vpop.eup %5925  ;;  %5945 = vrcp.f32 %v4227_v62  ;;  %v4316_v62 = vld [vmem:[#allocation4 + $0x68] sm:$0xff] }
 0x589   : > { %4534 = vperm.xlu1 %5838, %v5904_v13   ;;  %v5928_v10 = vpop.eup %5927  ;;  %5947 = vrcp.f32 %v4230_v47  ;;  %v4304_v13 = vld [vmem:[#allocation4 + $0x8] sm:$0xff] }
 0x58a   : > { %v5930_v29 = vpop.eup %5929  ;;  %5949 = vrcp.f32 %v4229_v44 }
 0x58b   : > { %v5932_v17 = vpop.eup %5931  ;;  %5951 = vrcp.f32 %v4232_v33  ;;  %v4318_v33 = vld [vmem:[#allocation4 + $0x78] sm:$0xff] }
 0x58c   : > { %4529 = vperm.xlu0 %5837, %v5906_v8   ;;  %v5934_v16 = vpop.eup %5933  ;;  %5953 = vrcp.f32 %v4231_v2 }
 0x58d   : > { %4544 = vperm.xlu1 %5838, %v5908_v54   ;;  %v5936_v56 = vpop.eup %5935  ;;  %5955 = vrcp.f32 %v4234_v18 }
 0x58e   : > { %v5938_v39 = vpop.eup %5937  ;;  %5957 = vrcp.f32 %v4233_v48  ;;  %v4320_v48 = vld [vmem:[#allocation4 + $0x88] sm:$0xff] }
 0x58f   : > { %v5940_v14 = vpop.eup %5939  ;;  %5959 = vrcp.f32 %v4236_v55 }
 0x590   : > { %4539 = vperm.xlu0 %5837, %v5910_v50   ;;  %v5942_v49 = vpop.eup %5941  ;;  %5961 = vrcp.f32 %v4235_v23  ;;  %v4307_v50 = vld [vmem:[#allocation4 + $0x20] sm:$0xff] }
 0x591   : > { %4554 = vperm.xlu1 %5838, %v5912_v60   ;;  %v5944_v53 = vpop.eup %5943  ;;  %5963 = vrcp.f32 %v4238_v45  ;;  %v4322_v45 = vld [vmem:[#allocation4 + $0x98] sm:$0xff] }
 0x592   : > { %v5946_v11 = vpop.eup %5945  ;;  %5965 = vrcp.f32 %v4237_v9 }
 0x593   : > { %v5948_v63 = vpop.eup %5947 }
 0x594   : > { %4549 = vperm.xlu0 %5837, %v5914_v12   ;;  %v5950_v38 = vpop.eup %5949 }
 0x595   : > { %4564 = vperm.xlu1 %5838, %v5916_v6   ;;  %v5952_v57 = vpop.eup %5951  ;;  %v4309_v6 = vld [vmem:[#allocation4 + $0x30] sm:$0xff] }
 0x596   : > { %v5954_v31 = vpop.eup %5953 }
 0x597   : > { %v5956_v35 = vpop.eup %5955 }
 0x598   : > { %4559 = vperm.xlu0 %5837, %v5918_v58   ;;  %v5958_v7 = vpop.eup %5957 }
 0x599   : > { %4574 = vperm.xlu1 %5838, %v5920_v24   ;;  %v5960_v5 = vpop.eup %5959 }
 0x59a   : > { %v5962_v61 = vpop.eup %5961 }
 0x59b   : > { %v5964_v19 = vpop.eup %5963 }
 0x59c   : > { %4569 = vperm.xlu0 %5837, %v5922_v0   ;;  %v5966_v22 = vpop.eup %5965  ;;  %v4311_v0 = vld [vmem:[#allocation4 + $0x40] sm:$0xff] }
 0x59d   : > { %4584 = vperm.xlu1 %5838, %v5924_v51  }
 0x5a0   : > { %4579 = vperm.xlu0 %5837, %v5926_v26  }
 0x5a1   : > { %4594 = vperm.xlu1 %5838, %v5928_v10   ;;  %v4313_v10 = vld [vmem:[#allocation4 + $0x50] sm:$0xff] }
 0x5a4   : > { %4589 = vperm.xlu0 %5837, %v5930_v29  }
 0x5a5   : > { %4604 = vperm.xlu1 %5838, %v5932_v17  }
 0x5a8   : > { %4599 = vperm.xlu0 %5837, %v5934_v16   ;;  %v4315_v16 = vld [vmem:[#allocation4 + $0x60] sm:$0xff] }
 0x5a9   : > { %4614 = vperm.xlu1 %5838, %v5936_v56  }
 0x5ac   : > { %4609 = vperm.xlu0 %5837, %v5938_v39  }
 0x5ad   : > { %4624 = vperm.xlu1 %5838, %v5940_v14   ;;  %v4317_v14 = vld [vmem:[#allocation4 + $0x70] sm:$0xff] }
 0x5b0   : > { %4619 = vperm.xlu0 %5837, %v5942_v49  }
 0x5b1   : > { %4634 = vperm.xlu1 %5838, %v5944_v53  }
 0x5b4   : > { %4629 = vperm.xlu0 %5837, %v5946_v11   ;;  %v4319_v11 = vld [vmem:[#allocation4 + $0x80] sm:$0xff] }
 0x5b5   : > { %4644 = vperm.xlu1 %5838, %v5948_v63   ;;  %v4380_v59 = vpop.permute.xlu1 %4379 }
 0x5b6   : > { %v4689_v3 = vmul.f32 %v4380_v59, %v4305_v21  ;;  %v4370_v34 = vpop.permute.xlu0 %4369  ;;  %v4326_v59 = vld [vmem:[#allocation4 + $0xb8] sm:$0xff] }
 0x5b7   : > { %v4687_v42 = vmul.f32 %v4370_v34, %v4303_v36 }
 0x5b8   : > { %4639 = vperm.xlu0 %5837, %v5950_v38   ;;  %4753 = vst [vmem:[%s6492_s8 + $0x10] sm:$0xff] %v4689_v3  ;;  %v4325_v3 = vld [vmem:[#allocation4 + $0xb0] sm:$0xff] }
 0x5b9   : > { %4654 = vperm.xlu1 %5838, %v5952_v57   ;;  %4751 = vst [vmem:[%s6492_s8] sm:$0xff] %v4687_v42  ;;  %v4385_v32 = vpop.permute.xlu1 %4384  ;;  %v4321_v57 = vld [vmem:[#allocation4 + $0x90] sm:$0xff] }
 0x5ba   : > { %v4690_v8 = vmul.f32 %v4385_v32, %v4306_v1  ;;  %v4375_v27 = vpop.permute.xlu0 %4374  ;;  %v4328_v32 = vld [vmem:[#allocation4 + $0xc8] sm:$0xff] }
 0x5bb   : > { %v4688_v54 = vmul.f32 %v4375_v27, %v4304_v13 }
 0x5bc   : > { %4649 = vperm.xlu0 %5837, %v5954_v31   ;;  %4754 = vst [vmem:[%s6492_s8 + $0x18] sm:$0xff] %v4690_v8  ;;  %v4327_v8 = vld [vmem:[#allocation4 + $0xc0] sm:$0xff] }
 0x5bd   : > { %4664 = vperm.xlu1 %5838, %v5956_v35   ;;  %4752 = vst [vmem:[%s6492_s8 + $0x8] sm:$0xff] %v4688_v54  ;;  %v4395_v41 = vpop.permute.xlu1 %4394 }
 0x5be   : > { %v4692_v60 = vmul.f32 %v4395_v41, %v4308_v37  ;;  %v4390_v25 = vpop.permute.xlu0 %4389  ;;  %v4330_v41 = vld [vmem:[#allocation4 + $0xd8] sm:$0xff] }
 0x5bf   : > { %v4691_v12 = vmul.f32 %v4390_v25, %v4307_v50 }
 0x5c0   : > { %4659 = vperm.xlu0 %5837, %v5958_v7   ;;  %4756 = vst [vmem:[%s6492_s8 + $0x28] sm:$0xff] %v4692_v60  ;;  %v4329_v60 = vld [vmem:[#allocation4 + $0xd0] sm:$0xff] }
 0x5c1   : > { %4674 = vperm.xlu1 %5838, %v5960_v5   ;;  %4755 = vst [vmem:[%s6492_s8 + $0x20] sm:$0xff] %v4691_v12  ;;  %v4405_v28 = vpop.permute.xlu1 %4404  ;;  %v4324_v5 = vld [vmem:[#allocation4 + $0xa8] sm:$0xff] }
 0x5c2   : > { %v4694_v58 = vmul.f32 %v4405_v28, %v4310_v30  ;;  %v4400_v4 = vpop.permute.xlu0 %4399  ;;  %v4332_v28 = vld [vmem:[#allocation4 + $0xe8] sm:$0xff] }
 0x5c3   : > { %v4693_v24 = vmul.f32 %v4400_v4, %v4309_v6 }
 0x5c4   : > { %4669 = vperm.xlu0 %5837, %v5962_v61   ;;  %4758 = vst [vmem:[%s6492_s8 + $0x38] sm:$0xff] %v4694_v58  ;;  %v4323_v61 = vld [vmem:[#allocation4 + $0xa0] sm:$0xff] }
 0x5c5   : > { %4684 = vperm.xlu1 %5838, %v5964_v19   ;;  %4757 = vst [vmem:[%s6492_s8 + $0x30] sm:$0xff] %v4693_v24  ;;  %v4415_v15 = vpop.permute.xlu1 %4414  ;;  %v4331_v58 = vld [vmem:[#allocation4 + $0xe0] sm:$0xff] }
 0x5c6   : > { %v4696_v51 = vmul.f32 %v4415_v15, %v4312_v52  ;;  %v4410_v46 = vpop.permute.xlu0 %4409  ;;  %v4334_v15 = vld [vmem:[#allocation4 + $0xf8] sm:$0xff] }
 0x5c7   : > { %v4695_v26 = vmul.f32 %v4410_v46, %v4311_v0 }
 0x5c8   : > { %4679 = vperm.xlu0 %5837, %v5966_v22   ;;  %4760 = vst [vmem:[%s6492_s8 + $0x48] sm:$0xff] %v4696_v51  ;;  %v4333_v51 = vld [vmem:[#allocation4 + $0xf0] sm:$0xff] }
 0x5c9   : > { %4759 = vst [vmem:[%s6492_s8 + $0x40] sm:$0xff] %v4695_v26  ;;  %v4425_v43 = vpop.permute.xlu1 %4424 }
 0x5ca   : > { %v4698_v29 = vmul.f32 %v4425_v43, %v4314_v20  ;;  %v4420_v40 = vpop.permute.xlu0 %4419  ;;  %v4336_v43 = vld [vmem:[#allocation4 + $0x108] sm:$0xff] }
 0x5cb   : > { %v4697_v17 = vmul.f32 %v4420_v40, %v4313_v10 }
 0x5cc   : > { %4762 = vst [vmem:[%s6492_s8 + $0x58] sm:$0xff] %v4698_v29  ;;  %v4335_v29 = vld [vmem:[#allocation4 + $0x100] sm:$0xff] }
 0x5cd   : > { %4761 = vst [vmem:[%s6492_s8 + $0x50] sm:$0xff] %v4697_v17  ;;  %v4435_v47 = vpop.permute.xlu1 %4434 }
 0x5ce   : > { %v4700_v56 = vmul.f32 %v4435_v47, %v4316_v62  ;;  %v4430_v44 = vpop.permute.xlu0 %4429  ;;  %v4338_v47 = vld [vmem:[#allocation4 + $0x118] sm:$0xff] }
 0x5cf   : > { %v4699_v39 = vmul.f32 %v4430_v44, %v4315_v16 }
 0x5d0   : > { %4764 = vst [vmem:[%s6492_s8 + $0x68] sm:$0xff] %v4700_v56  ;;  %v4337_v56 = vld [vmem:[#allocation4 + $0x110] sm:$0xff] }
 0x5d1   : > { %4763 = vst [vmem:[%s6492_s8 + $0x60] sm:$0xff] %v4699_v39  ;;  %v4445_v2 = vpop.permute.xlu1 %4444 }
 0x5d2   : > { %v4702_v49 = vmul.f32 %v4445_v2, %v4318_v33  ;;  %v4440_v18 = vpop.permute.xlu0 %4439  ;;  %v4340_v2 = vld [vmem:[#allocation4 + $0x128] sm:$0xff] }
 0x5d3   : > { %v4701_v53 = vmul.f32 %v4440_v18, %v4317_v14 }
 0x5d4   : > { %4766 = vst [vmem:[%s6492_s8 + $0x78] sm:$0xff] %v4702_v49  ;;  %v4339_v49 = vld [vmem:[#allocation4 + $0x120] sm:$0xff] }
 0x5d5   : > { %4765 = vst [vmem:[%s6492_s8 + $0x70] sm:$0xff] %v4701_v53  ;;  %v4455_v55 = vpop.permute.xlu1 %4454 }
 0x5d6   : > { %v4704_v63 = vmul.f32 %v4455_v55, %v4320_v48  ;;  %v4450_v23 = vpop.permute.xlu0 %4449  ;;  %v4342_v55 = vld [vmem:[#allocation4 + $0x138] sm:$0xff] }
 0x5d7   : > { %v4703_v38 = vmul.f32 %v4450_v23, %v4319_v11 }
 0x5d8   : > { %4768 = vst [vmem:[%s6492_s8 + $0x88] sm:$0xff] %v4704_v63  ;;  %v4341_v63 = vld [vmem:[#allocation4 + $0x130] sm:$0xff] }
 0x5d9   : > { %4767 = vst [vmem:[%s6492_s8 + $0x80] sm:$0xff] %v4703_v38  ;;  %v4465_v9 = vpop.permute.xlu1 %4464 }
 0x5da   : > { %v4706_v31 = vmul.f32 %v4465_v9, %v4322_v45  ;;  %v4344_v9 = vld [vmem:[#allocation4 + $0x148] sm:$0xff] }
 0x5dc   : > { %4770 = vst [vmem:[%s6492_s8 + $0x98] sm:$0xff] %v4706_v31  ;;  %v4343_v31 = vld [vmem:[#allocation4 + $0x140] sm:$0xff] }
 0x5ef   : > { %v4460_v35 = vpop.permute.xlu0 %4459 }
 0x5f0   : > { %v4705_v7 = vmul.f32 %v4460_v35, %v4321_v57  ;;  %v4475_v19 = vpop.permute.xlu1 %4474 }
 0x5f1   : > { %v4708_v22 = vmul.f32 %v4475_v19, %v4324_v5  ;;  %v4346_v19 = vld [vmem:[#allocation4 + $0x158] sm:$0xff] }
 0x5f2   : > { %4769 = vst [vmem:[%s6492_s8 + $0x90] sm:$0xff] %v4705_v7 }
 0x5f3   : > { %v4470_v21 = vpop.permute.xlu0 %4469  ;;  %4772 = vst [vmem:[%s6492_s8 + $0xa8] sm:$0xff] %v4708_v22  ;;  %v4345_v22 = vld [vmem:[#allocation4 + $0x150] sm:$0xff] }
 0x5f4   : > { %v4707_v36 = vmul.f32 %v4470_v21, %v4323_v61  ;;  %v4485_v34 = vpop.permute.xlu1 %4484 }
 0x5f5   : > { %v4710_v42 = vmul.f32 %v4485_v34, %v4326_v59  ;;  %v4348_v34 = vld [vmem:[#allocation4 + $0x168] sm:$0xff] }
 0x5f6   : > { %4771 = vst [vmem:[%s6492_s8 + $0xa0] sm:$0xff] %v4707_v36 }
 0x5f7   : > { %v4480_v1 = vpop.permute.xlu0 %4479  ;;  %4774 = vst [vmem:[%s6492_s8 + $0xb8] sm:$0xff] %v4710_v42  ;;  %v4347_v42 = vld [vmem:[#allocation4 + $0x160] sm:$0xff] }
 0x5f8   : > { %v4709_v13 = vmul.f32 %v4480_v1, %v4325_v3  ;;  %v4495_v27 = vpop.permute.xlu1 %4494 }
 0x5f9   : > { %v4712_v54 = vmul.f32 %v4495_v27, %v4328_v32  ;;  %v4350_v27 = vld [vmem:[#allocation4 + $0x178] sm:$0xff] }
 0x5fa   : > { %4773 = vst [vmem:[%s6492_s8 + $0xb0] sm:$0xff] %v4709_v13 }
 0x5fb   : > { %v4490_v37 = vpop.permute.xlu0 %4489  ;;  %4776 = vst [vmem:[%s6492_s8 + $0xc8] sm:$0xff] %v4712_v54  ;;  %v4349_v54 = vld [vmem:[#allocation4 + $0x170] sm:$0xff] }
 0x5fc   : > { %v4711_v50 = vmul.f32 %v4490_v37, %v4327_v8  ;;  %v4505_v25 = vpop.permute.xlu1 %4504 }
 0x5fd   : > { %v4714_v12 = vmul.f32 %v4505_v25, %v4330_v41  ;;  %v4352_v25 = vld [vmem:[#allocation4 + $0x188] sm:$0xff] }
 0x5fe   : > { %4775 = vst [vmem:[%s6492_s8 + $0xc0] sm:$0xff] %v4711_v50 }
 0x5ff   : > { %v4500_v30 = vpop.permute.xlu0 %4499  ;;  %4778 = vst [vmem:[%s6492_s8 + $0xd8] sm:$0xff] %v4714_v12  ;;  %v4351_v12 = vld [vmem:[#allocation4 + $0x180] sm:$0xff] }
 0x600   : > { %v4713_v6 = vmul.f32 %v4500_v30, %v4329_v60  ;;  %v4515_v4 = vpop.permute.xlu1 %4514 }
 0x601   : > { %v4716_v24 = vmul.f32 %v4515_v4, %v4332_v28  ;;  %v4354_v4 = vld [vmem:[#allocation4 + $0x198] sm:$0xff] }
 0x602   : > { %4777 = vst [vmem:[%s6492_s8 + $0xd0] sm:$0xff] %v4713_v6 }
 0x603   : > { %v4510_v52 = vpop.permute.xlu0 %4509  ;;  %4780 = vst [vmem:[%s6492_s8 + $0xe8] sm:$0xff] %v4716_v24  ;;  %v4353_v24 = vld [vmem:[#allocation4 + $0x190] sm:$0xff] }
 0x604   : > { %v4715_v0 = vmul.f32 %v4510_v52, %v4331_v58  ;;  %v4525_v46 = vpop.permute.xlu1 %4524 }
 0x605   : > { %v4718_v26 = vmul.f32 %v4525_v46, %v4334_v15  ;;  %v4356_v46 = vld [vmem:[#allocation4 + $0x1a8] sm:$0xff] }
 0x606   : > { %4779 = vst [vmem:[%s6492_s8 + $0xe0] sm:$0xff] %v4715_v0 }
 0x607   : > { %v4520_v20 = vpop.permute.xlu0 %4519  ;;  %4782 = vst [vmem:[%s6492_s8 + $0xf8] sm:$0xff] %v4718_v26  ;;  %v4355_v26 = vld [vmem:[#allocation4 + $0x1a0] sm:$0xff] }
 0x608   : > { %v4717_v10 = vmul.f32 %v4520_v20, %v4333_v51  ;;  %v4535_v40 = vpop.permute.xlu1 %4534 }
 0x609   : > { %v4720_v17 = vmul.f32 %v4535_v40, %v4336_v43  ;;  %v4358_v40 = vld [vmem:[#allocation4 + $0x1b8] sm:$0xff] }
 0x60a   : > { %4781 = vst [vmem:[%s6492_s8 + $0xf0] sm:$0xff] %v4717_v10 }
 0x60b   : > { %v4530_v62 = vpop.permute.xlu0 %4529  ;;  %4784 = vst [vmem:[%s6492_s8 + $0x108] sm:$0xff] %v4720_v17  ;;  %v4357_v17 = vld [vmem:[#allocation4 + $0x1b0] sm:$0xff] }
 0x60c   : > { %v4719_v16 = vmul.f32 %v4530_v62, %v4335_v29  ;;  %v4545_v44 = vpop.permute.xlu1 %4544 }
 0x60d   : > { %v4722_v39 = vmul.f32 %v4545_v44, %v4338_v47  ;;  %v4360_v44 = vld [vmem:[#allocation4 + $0x1c8] sm:$0xff] }
 0x60e   : > { %4783 = vst [vmem:[%s6492_s8 + $0x100] sm:$0xff] %v4719_v16 }
 0x60f   : > { %v4540_v33 = vpop.permute.xlu0 %4539  ;;  %4786 = vst [vmem:[%s6492_s8 + $0x118] sm:$0xff] %v4722_v39  ;;  %v4359_v39 = vld [vmem:[#allocation4 + $0x1c0] sm:$0xff] }
 0x610   : > { %v4721_v14 = vmul.f32 %v4540_v33, %v4337_v56  ;;  %v4555_v18 = vpop.permute.xlu1 %4554 }
 0x611   : > { %v4724_v53 = vmul.f32 %v4555_v18, %v4340_v2  ;;  %v4362_v18 = vld [vmem:[#allocation4 + $0x1d8] sm:$0xff] }
 0x612   : > { %4785 = vst [vmem:[%s6492_s8 + $0x110] sm:$0xff] %v4721_v14 }
 0x613   : > { %v4550_v48 = vpop.permute.xlu0 %4549  ;;  %4788 = vst [vmem:[%s6492_s8 + $0x128] sm:$0xff] %v4724_v53  ;;  %v4361_v53 = vld [vmem:[#allocation4 + $0x1d0] sm:$0xff] }
 0x614   : > { %v4723_v11 = vmul.f32 %v4550_v48, %v4339_v49  ;;  %v4565_v23 = vpop.permute.xlu1 %4564 }
 0x615   : > { %v4726_v38 = vmul.f32 %v4565_v23, %v4342_v55  ;;  %v4364_v23 = vld [vmem:[#allocation4 + $0x1e8] sm:$0xff] }
 0x616   : > { %4787 = vst [vmem:[%s6492_s8 + $0x120] sm:$0xff] %v4723_v11 }
 0x617   : > { %v4560_v45 = vpop.permute.xlu0 %4559  ;;  %4790 = vst [vmem:[%s6492_s8 + $0x138] sm:$0xff] %v4726_v38  ;;  %v4363_v38 = vld [vmem:[#allocation4 + $0x1e0] sm:$0xff] }
 0x618   : > { %v4725_v57 = vmul.f32 %v4560_v45, %v4341_v63  ;;  %v4575_v35 = vpop.permute.xlu1 %4574 }
 0x619   : > { %v4728_v7 = vmul.f32 %v4575_v35, %v4344_v9  ;;  %v4366_v35 = vld [vmem:[#allocation4 + $0x1f8] sm:$0xff] }
 0x61a   : > { %4789 = vst [vmem:[%s6492_s8 + $0x130] sm:$0xff] %v4725_v57 }
 0x61b   : > { %v4570_v5 = vpop.permute.xlu0 %4569  ;;  %4792 = vst [vmem:[%s6492_s8 + $0x148] sm:$0xff] %v4728_v7  ;;  %v4365_v7 = vld [vmem:[#allocation4 + $0x1f0] sm:$0xff] }
 0x61c   : > { %v4727_v61 = vmul.f32 %v4570_v5, %v4343_v31  ;;  %v4585_v21 = vpop.permute.xlu1 %4584 }
 0x61d   : > { %v4730_v36 = vmul.f32 %v4585_v21, %v4346_v19 }
 0x61e   : > { %4791 = vst [vmem:[%s6492_s8 + $0x140] sm:$0xff] %v4727_v61 }
 0x61f   : > { %v4580_v59 = vpop.permute.xlu0 %4579  ;;  %4794 = vst [vmem:[%s6492_s8 + $0x158] sm:$0xff] %v4730_v36 }
 0x620   : > { %v4729_v3 = vmul.f32 %v4580_v59, %v4345_v22  ;;  %v4595_v1 = vpop.permute.xlu1 %4594 }
 0x621   : > { %v4732_v13 = vmul.f32 %v4595_v1, %v4348_v34 }
 0x622   : > { %4793 = vst [vmem:[%s6492_s8 + $0x150] sm:$0xff] %v4729_v3 }
 0x623   : > { %v4590_v32 = vpop.permute.xlu0 %4589  ;;  %4796 = vst [vmem:[%s6492_s8 + $0x168] sm:$0xff] %v4732_v13 }
 0x624   : > { %v4731_v8 = vmul.f32 %v4590_v32, %v4347_v42  ;;  %v4605_v37 = vpop.permute.xlu1 %4604 }
 0x625   : > { %v4734_v50 = vmul.f32 %v4605_v37, %v4350_v27 }
 0x626   : > { %4795 = vst [vmem:[%s6492_s8 + $0x160] sm:$0xff] %v4731_v8 }
 0x627   : > { %v4600_v41 = vpop.permute.xlu0 %4599  ;;  %4798 = vst [vmem:[%s6492_s8 + $0x178] sm:$0xff] %v4734_v50 }
 0x628   : > { %v4733_v60 = vmul.f32 %v4600_v41, %v4349_v54  ;;  %v4615_v30 = vpop.permute.xlu1 %4614 }
 0x629   : > { %v4736_v6 = vmul.f32 %v4615_v30, %v4352_v25 }
 0x62a   : > { %4797 = vst [vmem:[%s6492_s8 + $0x170] sm:$0xff] %v4733_v60 }
 0x62b   : > { %v4610_v28 = vpop.permute.xlu0 %4609  ;;  %4800 = vst [vmem:[%s6492_s8 + $0x188] sm:$0xff] %v4736_v6 }
 0x62c   : > { %v4735_v58 = vmul.f32 %v4610_v28, %v4351_v12  ;;  %v4625_v52 = vpop.permute.xlu1 %4624 }
 0x62d   : > { %v4738_v0 = vmul.f32 %v4625_v52, %v4354_v4 }
 0x62e   : > { %4799 = vst [vmem:[%s6492_s8 + $0x180] sm:$0xff] %v4735_v58 }
 0x62f   : > { %v4620_v15 = vpop.permute.xlu0 %4619  ;;  %4802 = vst [vmem:[%s6492_s8 + $0x198] sm:$0xff] %v4738_v0 }
 0x630   : > { %v4737_v51 = vmul.f32 %v4620_v15, %v4353_v24  ;;  %v4635_v20 = vpop.permute.xlu1 %4634 }
 0x631   : > { %v4740_v10 = vmul.f32 %v4635_v20, %v4356_v46 }
 0x632   : > { %4801 = vst [vmem:[%s6492_s8 + $0x190] sm:$0xff] %v4737_v51 }
 0x633   : > { %v4630_v43 = vpop.permute.xlu0 %4629  ;;  %4804 = vst [vmem:[%s6492_s8 + $0x1a8] sm:$0xff] %v4740_v10 }
 0x634   : > { %v4739_v29 = vmul.f32 %v4630_v43, %v4355_v26  ;;  %v4645_v62 = vpop.permute.xlu1 %4644 }
 0x635   : > { %v4742_v16 = vmul.f32 %v4645_v62, %v4358_v40 }
 0x636   : > { %4803 = vst [vmem:[%s6492_s8 + $0x1a0] sm:$0xff] %v4739_v29 }
 0x637   : > { %v4640_v47 = vpop.permute.xlu0 %4639  ;;  %4806 = vst [vmem:[%s6492_s8 + $0x1b8] sm:$0xff] %v4742_v16 }
 0x638   : > { %v4741_v56 = vmul.f32 %v4640_v47, %v4357_v17  ;;  %v4655_v33 = vpop.permute.xlu1 %4654 }
 0x639   : > { %v4744_v14 = vmul.f32 %v4655_v33, %v4360_v44 }
 0x63a   : > { %4805 = vst [vmem:[%s6492_s8 + $0x1b0] sm:$0xff] %v4741_v56 }
 0x63b   : > { %v4650_v2 = vpop.permute.xlu0 %4649  ;;  %4808 = vst [vmem:[%s6492_s8 + $0x1c8] sm:$0xff] %v4744_v14 }
 0x63c   : > { %v4743_v49 = vmul.f32 %v4650_v2, %v4359_v39  ;;  %v4665_v48 = vpop.permute.xlu1 %4664 }
 0x63d   : > { %v4746_v11 = vmul.f32 %v4665_v48, %v4362_v18 }
 0x63e   : > { %4807 = vst [vmem:[%s6492_s8 + $0x1c0] sm:$0xff] %v4743_v49 }
 0x63f   : > { %v4660_v55 = vpop.permute.xlu0 %4659  ;;  %4810 = vst [vmem:[%s6492_s8 + $0x1d8] sm:$0xff] %v4746_v11 }
 0x640   : > { %v4745_v63 = vmul.f32 %v4660_v55, %v4361_v53  ;;  %v4675_v45 = vpop.permute.xlu1 %4674 }
 0x641   : > { %v4748_v57 = vmul.f32 %v4675_v45, %v4364_v23 }
 0x642   : > { %4809 = vst [vmem:[%s6492_s8 + $0x1d0] sm:$0xff] %v4745_v63 }
 0x643   : > { %v4670_v9 = vpop.permute.xlu0 %4669  ;;  %4812 = vst [vmem:[%s6492_s8 + $0x1e8] sm:$0xff] %v4748_v57 }
 0x644   : > { %v4747_v31 = vmul.f32 %v4670_v9, %v4363_v38  ;;  %v4685_v5 = vpop.permute.xlu1 %4684 }
 0x645   : > { %v4750_v61 = vmul.f32 %v4685_v5, %v4366_v35 }
 0x646   : > { %4811 = vst [vmem:[%s6492_s8 + $0x1e0] sm:$0xff] %v4747_v31 }
 0x647   : > { %v4680_v19 = vpop.permute.xlu0 %4679  ;;  %4814 = vst [vmem:[%s6492_s8 + $0x1f8] sm:$0xff] %v4750_v61 }
 0x648   : > { %v4749_v22 = vmul.f32 %v4680_v19, %v4365_v7 }
 0x64a   : > { %4813 = vst [vmem:[%s6492_s8 + $0x1f0] sm:$0xff] %v4749_v22 }
 0x64b PF: > { %s4816_s5 = scalar_lea.sflag [#allocation7], %s6471_s21 }
 0x64c   : > { %s9710_s19 = sld [smem:[#allocation22_spill]]  ;;  %s9711_s11 = sld [smem:[#allocation23_spill]] }
 0x64d   : > { %s9712_s9 = sld [smem:[#allocation24_spill]]  ;;  %s4850_s12 = sshll.u32 %s6492_s8, 4  ;;  %s4851_s12 = int_to_ptr.vmem [resolvable:$true] %s4850_s12 }
 0x64e   : > { %s9713_s18 = sld [smem:[#allocation232_spill]]  ;;  %s6170_s28 = smov 4096  }
 0x64f   : > { %p9714_p4 = scmp.ne.s32.totalorder %s9183_s4, 0  ;;  %s6171_s6 = smov 8192  }
 0x650   : > { %s6172_s27 = smov 32   ;;  %s6174_s8 = smov 8  }
 0x651   : > { %5234 = sst [smem:[#allocation15]] (%p9714_p4), %s6170_s28 }
 0x652   : > { %s5117_s3 = sshll.u32 %s9710_s19, 5  ;;  %s5124_s7 = sshll.u32 %s9711_s11, 7 }
 0x653   : > { %s4829_s29 = sadd.s32 %s5124_s7, %s5117_s3  ;;  %s5119_s10 = sshll.u32 %s9712_s9, 8 }
 0x654   : > { %s4831_s23 = sadd.s32 %s5119_s10, %s4829_s29  ;;  %5235 = sst [smem:[#allocation15 + $0x1]] (%p9714_p4), %s6171_s6 }
 0x655   : > { %s5120_s20 = sshll.u32 %s4831_s23, 7  ;;  %5236 = sst [smem:[#allocation15 + $0x2]] (%p9714_p4), %s6172_s27 }
 0x656   : > { %s4833_s30 = scalar_lea.hbm %s9713_s18, %s5120_s20  ;;  %s6173_s19 = smov 128  }
 0x657   : > { %5237 = sst [smem:[#allocation15 + $0x3]] (%p9714_p4), %s6173_s19  ;;  %s6175_s11 = smov [#allocation14]  }
 0x658   : > { %5238 = sst [smem:[#allocation15 + $0x4]] (%p9714_p4), %s6173_s19  ;;  %s6176_s9 = smov 0  }
 0x659   : > { %5239 = sst [smem:[#allocation15 + $0x5]] (%p9714_p4), %s6174_s8 }
 0x65a   : > { %5240 = dma.general (%p9714_p4), %s4851_s12, 8192, %s4833_s30, %s4816_s5, %s6175_s11, [#allocation15], %s6176_s9, 0  }
 0x65b PF: > { %s9715_s3 = sld [smem:[#allocation31_spill]]  ;;  %p5246_p5 = scmp.ge.s32.totalorder %s6153_s26, 2 }
 0x65c   : > { %s4878_s7 = sand.u32 1, %s6109_s15  }
 0x65d   : > { %s4879_s29 = scalar_lea.sflag [#allocation7], %s4878_s7 }
 0x661   : > { %p9716_p12 = scmp.ne.s32.totalorder %s9715_s3, 0 }
 0x663   : > { %p5243_p13 = pnand %p5246_p5, %p9716_p12 }
 0x665   : > { %6092 = dma.done.wait (!%p5243_p13), %s4879_s29, 8192  }
 0x666   : > { %6094 = vsyncadd (!%p5243_p13), %s4879_s29, 4294959104  ;;  %s22_s26 = sadd.s32 1, %s6153_s26   ;;  %s9718_s4 = sld [smem:[#allocation33_spill]] }
 0x667   : > { %p8854_p3 = scmp.ge.s32.totalorder %s22_s26, 18   ;;  %s9719_s5 = sld [smem:[#allocation20_spill]] }
 0x668   : > { %s9720_s17 = sld [smem:[#allocation32_spill]]  ;;  %s9721_s19 = sld [smem:[#allocation25_spill]] }
 0x669   : > { %s9722_s23 = sld [smem:[#allocation26_spill]]  ;;  %s9723_s30 = sld [smem:[#allocation27_spill]] }
 0x66a   : > { %s9724_s28 = sld [smem:[#allocation28_spill]]  ;;  %s9725_s6 = sld [smem:[#allocation29_spill]] }
 0x66b   : > { %s9726_s12 = smov %s6101_s13  ;;  %s9727_s13 = smov %s6105_s14 }
 0x66c   : > { %s9728_s14 = smov %s9718_s4  ;;  %s9729_s15 = smov %s6113_s16 }
 0x66d   : > { %s9730_s16 = smov %s9719_s5  ;;  %s9731_s18 = smov %s6137_s22 }
 0x66e   : > { %s9732_s20 = smov %s6145_s24  ;;  %s9733_s21 = smov %s6149_s25 }
 0x66f   : > { %s9734_s22 = smov %s9722_s23  ;;  %s9735_s23 = smov %s9723_s30 }
 0x670   : > { %s9736_s24 = smov %s9724_s28  ;;  %s9737_s25 = smov %s9725_s6 }
 0x671   :  { %21 = sbr.rel (!%p8854_p3) target bundleno = 15 (0xf), region = 119 }
 0x678   :  { %4884 = vsyncpa [#allocation6], 1 }
 0x679   :  { %4886 = vsyncpa [#allocation6 + $0x1], 1 }
 0x67a   :  { %4887 = vsyncpa [#allocation9], 1 }
 0x67b   :  { %4889 = vsyncpa [#allocation9 + $0x1], 1 }
 0x67c   :  { %4890 = vsyncpa [#allocation7], 1 }
 0x67d   :  { %4892 = vsyncpa [#allocation7 + $0x1], 1 }

</bundles_post_ra>
